<compile_context>
chip_gen: v7x
topology: tpu7x:2x2x1
jax: 0.10.0
libtpu: 0.0.40
codegen_flags: <defaults>
</compile_context>

<pallas_src>
import math

import numpy as np

import jax
import jax.numpy as jnp
from jax.experimental import pallas as pl
from jax.experimental.pallas import tpu as pltpu


# --------------------------- in-kernel building blocks ----------------------
def _conv3x3(pad_ref, h_out, wt_ref, bt_ref):
    """3x3 'same' conv + bias + ReLU as three banded-Toeplitz MXU matmuls.

    pad_ref: (bn, h_out+2, (w+2)*cin) bf16 halo buffer (interior filled,
             1-pixel borders zero), lanes ordered q*cin + ci (q = padded x).
    wt_ref : (3, (w+2)*cin, n_cols) bf16 banded weights, one slab per kernel
             row dh; columns ordered per the layer's output layout.
    bt_ref : (1, n_cols) f32 bias tiled across x (order-independent).
    returns: (bn*h_out, n_cols) f32, rows in (b, y) order, post-ReLU.
    """
    bn, _, kdim = pad_ref.shape
    rows = bn * h_out
    acc = jnp.dot(pad_ref[:, 0:h_out, :].reshape(rows, kdim), wt_ref[0],
                  preferred_element_type=jnp.float32)
    acc = acc + jnp.dot(pad_ref[:, 1:h_out + 1, :].reshape(rows, kdim),
                        wt_ref[1], preferred_element_type=jnp.float32)
    acc = acc + jnp.dot(pad_ref[:, 2:h_out + 2, :].reshape(rows, kdim),
                        wt_ref[2], preferred_element_type=jnp.float32)
    return jnp.maximum(acc + bt_ref[...], 0.0)


def _maxpool_2x2(y, bn, h_out):
    """Fused 2x2/2 max pool on a conv output whose columns were permuted at
    init to (x%2, x//2, c): W-pairs are the two lane-aligned 256-wide column
    halves, H-pairs are adjacent (b, y) rows.  Output lanes: x_half*cout + c.
    """
    half = y.shape[1] // 2
    xw = jnp.maximum(y[:, :half], y[:, half:])        # reduce W pairs (aligned)
    a = xw.reshape(bn * h_out // 2, 2, half)          # row-pair split (free)
    return jnp.maximum(a[:, 0], a[:, 1])              # reduce H pairs


# ------------------------------- fused kernel -------------------------------
def _net_kernel(x_ref,
                wt1, bt1, wt2, bt2, wt3, bt3, wt4, bt4, wt5, bt5,
                w6, b6, w7, b7,
                o_ref,
                pad_a, pad_b, pad_c):
    bn = x_ref.shape[0]

    # Zero the halo buffers.  With the merged (x*c) bf16 layout this is only
    # ~12*bn full-width unmasked vector stores per grid step (hidden under the
    # MXU work).  Doing it every step is megacore-safe (each TensorCore owns
    # its scratch and there is no reliable "first step on this core" signal)
    # and avoids depending on stale/NaN VMEM contents; interiors are fully
    # overwritten below, so the borders provide the conv zero padding.
    pad_a[...] = jnp.zeros(pad_a.shape, pad_a.dtype)
    pad_b[...] = jnp.zeros(pad_b.shape, pad_b.dtype)
    pad_c[...] = jnp.zeros(pad_c.shape, pad_c.dtype)

    # conv1 (3 -> 16) + 2x2 max pool:  (bn,32,96) -> (bn*16, 256), lanes x*16+c
    pad_a[:, 1:33, 3:99] = x_ref[...]
    y = _conv3x3(pad_a, 32, wt1, bt1)                  # (bn*32, 512)
    p = _maxpool_2x2(y, bn, 32)                        # (bn*16, 256)

    # conv2 (16 -> 16): (bn*16, 256), lanes x*16+c
    pad_b[:, 1:17, 16:272] = p.reshape(bn, 16, 256).astype(pad_b.dtype)
    y = _conv3x3(pad_b, 16, wt2, bt2)                  # (bn*16, 256)

    # conv3 (16 -> 32) + 2x2 max pool: -> (bn*8, 256), lanes x*32+c
    pad_b[:, 1:17, 16:272] = y.reshape(bn, 16, 256).astype(pad_b.dtype)
    y = _conv3x3(pad_b, 16, wt3, bt3)                  # (bn*16, 512)
    p = _maxpool_2x2(y, bn, 16)                        # (bn*8, 256)

    # conv4, conv5 (32 -> 32): (bn*8, 256), lanes x*32+c
    pad_c[:, 1:9, 32:288] = p.reshape(bn, 8, 256).astype(pad_c.dtype)
    y = _conv3x3(pad_c, 8, wt4, bt4)
    pad_c[:, 1:9, 32:288] = y.reshape(bn, 8, 256).astype(pad_c.dtype)
    y = _conv3x3(pad_c, 8, wt5, bt5)                   # (bn*8, 256)

    # fc1 (2048 -> 128) + ReLU.  The NHWC flatten j = (y*8 + x)*32 + c is
    # already the natural (row, lane) order of y, so the flatten is contracted
    # as 8 aligned per-image-row matmuls -- no (bn, 2048) relayout and no
    # flatten stores.  torch's NCHW x.view(-1, 2048) order was folded into
    # w6's row permutation at init.
    x5 = y.astype(jnp.bfloat16).reshape(bn, 8, 256)
    h1 = jnp.dot(x5[:, 0, :], w6[0], preferred_element_type=jnp.float32)
    for r in range(1, 8):
        h1 = h1 + jnp.dot(x5[:, r, :], w6[r],
                          preferred_element_type=jnp.float32)
    h1 = jnp.maximum(h1 + b6[...], 0.0).astype(jnp.bfloat16)

    # fc2 (128 -> 10)
    o_ref[...] = jnp.dot(h1, w7[...], preferred_element_type=jnp.float32) + b7[...]


# --------------------------------- wrapper ----------------------------------
_PARAM_KEYS = ("wt1", "bt1", "wt2", "bt2", "wt3", "bt3", "wt4", "bt4",
               "wt5", "bt5", "w6", "b6", "w7", "b7")


def _pick_batch_block(n, target=32):
    """Largest divisor of n that is <= target.

    target=32 keeps the per-step footprint well inside v7x's 64 MiB VMEM while
    filling the fc1 MXU rows far better than bn=8 on v5e/v6e; batches >= 2*target
    automatically get >= 2 grid steps so the 'parallel' batch axis can shard
    across megacore TensorCores."""
    if n <= target:
        return n
    best = 1
    for d in range(1, target + 1):
        if n % d == 0:
            best = d
    return best


def _const2(i):
    return (0, 0)


def _const3(i):
    return (0, 0, 0)


def net_forward(x_nchw, params, *, batch_block=None):
    n = x_nchw.shape[0]
    bn = _pick_batch_block(n) if batch_block is None else batch_block
    assert n % bn == 0, "batch must be divisible by the batch block"

    # Tiny XLA glue on the network input only: NCHW -> (N, H, W*C) bf16.
    # Merging W*C into the lane dim keeps the input block lane-dense (96 real
    # lanes instead of a 3-wide channel dim padding to 128) and the HBM->VMEM
    # DMA contiguous.
    x = jnp.transpose(x_nchw, (0, 2, 3, 1)).reshape(n, 32, 96).astype(jnp.bfloat16)

    weights = [params[k] for k in _PARAM_KEYS]

    in_specs = [pl.BlockSpec((bn, 32, 96), lambda i: (i, 0, 0))]
    for wgt in weights:
        in_specs.append(
            pl.BlockSpec(wgt.shape, _const3 if wgt.ndim == 3 else _const2))

    return pl.pallas_call(
        _net_kernel,
        grid=(n // bn,),
        out_shape=jax.ShapeDtypeStruct((n, 10), jnp.float32),
        in_specs=in_specs,
        out_specs=pl.BlockSpec((bn, 10), lambda i: (i, 0)),
        scratch_shapes=[
            pltpu.VMEM((bn, 34, 102), jnp.bfloat16),   # conv1 halo: 34 x (32+2)*3
            pltpu.VMEM((bn, 18, 288), jnp.bfloat16),   # conv2/3 halo: 18 x (16+2)*16
            pltpu.VMEM((bn, 10, 320), jnp.bfloat16),   # conv4/5 halo: 10 x (8+2)*32
        ],
        compiler_params=pltpu.CompilerParams(
            dimension_semantics=("parallel",),
            # v5e's scoped-VMEM default is 16 MiB; the bn=32 footprint
            # (weights x2 buffers + halos + f32 matmul temps) is ~15-17 MiB,
            # so raise the limit explicitly.  48 MiB is safe on all of
            # v5e/v6e (128 MiB physical) and v7x (64 MiB physical).
            vmem_limit_bytes=48 * 1024 * 1024),
    )(x, *weights)


# ------------------------------- parameters ---------------------------------
def _toeplitz_rows(w_hwio, width):
    """(3,3,cin,cout) HWIO conv weight -> (3, (width+2)*cin, width*cout) banded
    (block-Toeplitz) matrices, one per kernel row dh.  Row k = q*cin+ci with q
    the zero-padded x coordinate; column j = x*cout+co."""
    cin, cout = w_hwio.shape[2], w_hwio.shape[3]
    w = np.asarray(w_hwio, np.float32)
    wt = np.zeros((3, (width + 2) * cin, width * cout), np.float32)
    for dh in range(3):
        for dw in range(3):
            for x in range(width):
                q = x + dw
                wt[dh, q * cin:(q + 1) * cin, x * cout:(x + 1) * cout] = w[dh, dw]
    return wt


def _pool_col_permute(wt, width, cout):
    """Reorder output columns from (x, c) to (x%2, x//2, c) so the fused 2x2
    pool can reduce W-pairs as a max of two lane-aligned column halves."""
    k = wt.shape[1]
    return (wt.reshape(3, k, width // 2, 2, cout)
              .transpose(0, 1, 3, 2, 4)
              .reshape(3, k, width * cout))


def _conv_params(key, cin, cout, width, pooled):
    kw, kb = jax.random.split(key)
    bound = 1.0 / math.sqrt(cin * 9)
    w = jax.random.uniform(kw, (3, 3, cin, cout), jnp.float32, -bound, bound)
    b = jax.random.uniform(kb, (cout,), jnp.float32, -bound, bound)
    wt = _toeplitz_rows(np.asarray(w), width)
    if pooled:
        wt = _pool_col_permute(wt, width, cout)
    bt = np.tile(np.asarray(b), width).reshape(1, width * cout)  # order-free
    return jnp.asarray(wt, jnp.bfloat16), jnp.asarray(bt, jnp.float32)


def _linear_params(key, din, dout):
    kw, kb = jax.random.split(key)
    bound = 1.0 / math.sqrt(din)
    w = jax.random.uniform(kw, (din, dout), jnp.float32, -bound, bound)
    b = jax.random.uniform(kb, (dout,), jnp.float32, -bound, bound)
    return w, b.reshape(1, dout)


def init_params(key):
    ks = jax.random.split(key, 7)
    p = {}
    p["wt1"], p["bt1"] = _conv_params(ks[0], 3, 16, 32, pooled=True)
    p["wt2"], p["bt2"] = _conv_params(ks[1], 16, 16, 16, pooled=False)
    p["wt3"], p["bt3"] = _conv_params(ks[2], 16, 32, 16, pooled=True)
    p["wt4"], p["bt4"] = _conv_params(ks[3], 32, 32, 8, pooled=False)
    p["wt5"], p["bt5"] = _conv_params(ks[4], 32, 32, 8, pooled=False)

    # fc1: generated in torch's (in=2048, out=128) layout with torch-flatten
    # (c, h, w) row order, then its rows are permuted ONCE so the kernel can
    # contract the natural NHWC flatten j = (h*8+w)*32 + c directly, and
    # reshaped to (8, 256, 128) for the 8 per-image-row matmuls.
    w6, p["b6"] = _linear_params(ks[5], 2048, 128)
    j = jnp.arange(2048)
    src = (j % 32) * 64 + (j // 32)          # NHWC index -> torch NCHW row
    p["w6"] = w6[src, :].reshape(8, 256, 128).astype(jnp.bfloat16)

    w7, p["b7"] = _linear_params(ks[6], 128, 10)
    p["w7"] = w7.astype(jnp.bfloat16)
    return p


if __name__ == "__main__":
    key = jax.random.PRNGKey(0)
    kx, kp = jax.random.split(key)
    params = init_params(kp)
    # CIFAR-10 shaped input (32x32x3 is required by the 2048-wide flatten).
    x = jax.random.normal(kx, (2, 3, 32, 32), jnp.float32)

    fwd = jax.jit(lambda inp: net_forward(inp, params))
    out = jax.block_until_ready(fwd(x))

    assert out.shape == (2, 10), out.shape
    assert out.dtype == jnp.float32
    assert bool(jnp.all(jnp.isfinite(out)))
    print("KERNEL_OK")
</pallas_src>

<mosaic_0001>
module attributes {stable_mosaic.version = 11 : i64} {
  func.func @_net_kernel(%arg0: i32, %arg1: memref<2x32x96xbf16, #tpu.memory_space<vmem>>, %arg2: memref<3x102x512xbf16, #tpu.memory_space<vmem>>, %arg3: memref<1x512xf32, #tpu.memory_space<vmem>>, %arg4: memref<3x288x256xbf16, #tpu.memory_space<vmem>>, %arg5: memref<1x256xf32, #tpu.memory_space<vmem>>, %arg6: memref<3x288x512xbf16, #tpu.memory_space<vmem>>, %arg7: memref<1x512xf32, #tpu.memory_space<vmem>>, %arg8: memref<3x320x256xbf16, #tpu.memory_space<vmem>>, %arg9: memref<1x256xf32, #tpu.memory_space<vmem>>, %arg10: memref<3x320x256xbf16, #tpu.memory_space<vmem>>, %arg11: memref<1x256xf32, #tpu.memory_space<vmem>>, %arg12: memref<8x256x128xbf16, #tpu.memory_space<vmem>>, %arg13: memref<1x128xf32, #tpu.memory_space<vmem>>, %arg14: memref<128x10xbf16, #tpu.memory_space<vmem>>, %arg15: memref<1x10xf32, #tpu.memory_space<vmem>>, %arg16: memref<2x10xf32, #tpu.memory_space<vmem>>, %arg17: memref<2x34x102xbf16, #tpu.memory_space<vmem>>, %arg18: memref<2x18x288xbf16, #tpu.memory_space<vmem>>, %arg19: memref<2x10x320xbf16, #tpu.memory_space<vmem>>) attributes {dimension_semantics = [#tpu.dimension_semantics<parallel>], iteration_bounds = array<i64: 1>, scalar_prefetch = 0 : i64, scratch_operands = 3 : i64, tpu.core_type = #tpu.core_type<tc>, window_params = [{transform_indices = @transform_0, window_bounds = array<i64: 2, 32, 96>}, {pipeline_mode = #tpu.pipeline_mode<synchronous>, transform_indices = @transform_1, window_bounds = array<i64: 3, 102, 512>}, {pipeline_mode = #tpu.pipeline_mode<synchronous>, transform_indices = @transform_2, window_bounds = array<i64: 1, 512>}, {pipeline_mode = #tpu.pipeline_mode<synchronous>, transform_indices = @transform_3, window_bounds = array<i64: 3, 288, 256>}, {pipeline_mode = #tpu.pipeline_mode<synchronous>, transform_indices = @transform_4, window_bounds = array<i64: 1, 256>}, {pipeline_mode = #tpu.pipeline_mode<synchronous>, transform_indices = @transform_5, window_bounds = array<i64: 3, 288, 512>}, {pipeline_mode = #tpu.pipeline_mode<synchronous>, transform_indices = @transform_6, window_bounds = array<i64: 1, 512>}, {pipeline_mode = #tpu.pipeline_mode<synchronous>, transform_indices = @transform_7, window_bounds = array<i64: 3, 320, 256>}, {pipeline_mode = #tpu.pipeline_mode<synchronous>, transform_indices = @transform_8, window_bounds = array<i64: 1, 256>}, {pipeline_mode = #tpu.pipeline_mode<synchronous>, transform_indices = @transform_9, window_bounds = array<i64: 3, 320, 256>}, {pipeline_mode = #tpu.pipeline_mode<synchronous>, transform_indices = @transform_10, window_bounds = array<i64: 1, 256>}, {pipeline_mode = #tpu.pipeline_mode<synchronous>, transform_indices = @transform_11, window_bounds = array<i64: 8, 256, 128>}, {pipeline_mode = #tpu.pipeline_mode<synchronous>, transform_indices = @transform_12, window_bounds = array<i64: 1, 128>}, {pipeline_mode = #tpu.pipeline_mode<synchronous>, transform_indices = @transform_13, window_bounds = array<i64: 128, 10>}, {pipeline_mode = #tpu.pipeline_mode<synchronous>, transform_indices = @transform_14, window_bounds = array<i64: 1, 10>}, {transform_indices = @transform_15, window_bounds = array<i64: 2, 10>}]} {
    %cst = arith.constant 0.000000e+00 : bf16
    %0 = vector.broadcast %cst : bf16 to vector<2x34x102xbf16>
    %c0 = arith.constant 0 : index
    %c0_0 = arith.constant 0 : index
    %c0_1 = arith.constant 0 : index
    %1 = vector.load %arg17[%c0, %c0_0, %c0_1] : memref<2x34x102xbf16, #tpu.memory_space<vmem>>, vector<2x34x102xbf16>
    tpu.vector_store %arg17[%c0, %c0_0, %c0_1], %0 {strides = array<i32>} : memref<2x34x102xbf16, #tpu.memory_space<vmem>>, vector<2x34x102xbf16>,
    %cst_2 = arith.constant 0.000000e+00 : bf16
    %2 = vector.broadcast %cst_2 : bf16 to vector<2x18x288xbf16>
    %c0_3 = arith.constant 0 : index
    %c0_4 = arith.constant 0 : index
    %c0_5 = arith.constant 0 : index
    %3 = vector.load %arg18[%c0_3, %c0_4, %c0_5] : memref<2x18x288xbf16, #tpu.memory_space<vmem>>, vector<2x18x288xbf16>
    tpu.vector_store %arg18[%c0_3, %c0_4, %c0_5], %2 {strides = array<i32>} : memref<2x18x288xbf16, #tpu.memory_space<vmem>>, vector<2x18x288xbf16>,
    %cst_6 = arith.constant 0.000000e+00 : bf16
    %4 = vector.broadcast %cst_6 : bf16 to vector<2x10x320xbf16>
    %c0_7 = arith.constant 0 : index
    %c0_8 = arith.constant 0 : index
    %c0_9 = arith.constant 0 : index
    %5 = vector.load %arg19[%c0_7, %c0_8, %c0_9] : memref<2x10x320xbf16, #tpu.memory_space<vmem>>, vector<2x10x320xbf16>
    tpu.vector_store %arg19[%c0_7, %c0_8, %c0_9], %4 {strides = array<i32>} : memref<2x10x320xbf16, #tpu.memory_space<vmem>>, vector<2x10x320xbf16>,
    %c0_10 = arith.constant 0 : index
    %c0_11 = arith.constant 0 : index
    %c0_12 = arith.constant 0 : index
    %6 = vector.load %arg1[%c0_10, %c0_11, %c0_12] : memref<2x32x96xbf16, #tpu.memory_space<vmem>>, vector<2x32x96xbf16>
    %c0_13 = arith.constant 0 : index
    %c1 = arith.constant 1 : index
    %c3 = arith.constant 3 : index
    %7 = vector.load %arg17[%c0_13, %c1, %c3] : memref<2x34x102xbf16, #tpu.memory_space<vmem>>, vector<2x32x96xbf16>
    tpu.vector_store %arg17[%c0_13, %c1, %c3], %6 {strides = array<i32>} : memref<2x34x102xbf16, #tpu.memory_space<vmem>>, vector<2x32x96xbf16>,
    %c0_14 = arith.constant 0 : index
    %c0_15 = arith.constant 0 : index
    %c0_16 = arith.constant 0 : index
    %8 = vector.load %arg17[%c0_14, %c0_15, %c0_16] : memref<2x34x102xbf16, #tpu.memory_space<vmem>>, vector<2x32x102xbf16>
    %9 = vector.shape_cast %8 : vector<2x32x102xbf16> to vector<64x102xbf16>
    %c0_17 = arith.constant 0 : index
    %c0_18 = arith.constant 0 : index
    %c0_19 = arith.constant 0 : index
    %10 = vector.load %arg2[%c0_17, %c0_18, %c0_19] : memref<3x102x512xbf16, #tpu.memory_space<vmem>>, vector<1x102x512xbf16>
    %11 = vector.shape_cast %10 : vector<1x102x512xbf16> to vector<102x512xbf16>
    %cst_20 = arith.constant dense<0.000000e+00> : vector<64x512xf32>
    %12 = tpu.matmul %9, %11, %cst_20 {dimension_numbers = #tpu.dot_dimension_numbers<[1], [0], [0], [1], [0, 0, 1, 1], [], []>} : vector<64x102xbf16>, vector<102x512xbf16>, vector<64x512xf32> -> vector<64x512xf32>
    %c0_21 = arith.constant 0 : index
    %c1_22 = arith.constant 1 : index
    %c0_23 = arith.constant 0 : index
    %13 = vector.load %arg17[%c0_21, %c1_22, %c0_23] : memref<2x34x102xbf16, #tpu.memory_space<vmem>>, vector<2x32x102xbf16>
    %14 = vector.shape_cast %13 : vector<2x32x102xbf16> to vector<64x102xbf16>
    %c1_24 = arith.constant 1 : index
    %c0_25 = arith.constant 0 : index
    %c0_26 = arith.constant 0 : index
    %15 = vector.load %arg2[%c1_24, %c0_25, %c0_26] : memref<3x102x512xbf16, #tpu.memory_space<vmem>>, vector<1x102x512xbf16>
    %16 = vector.shape_cast %15 : vector<1x102x512xbf16> to vector<102x512xbf16>
    %cst_27 = arith.constant dense<0.000000e+00> : vector<64x512xf32>
    %17 = tpu.matmul %14, %16, %cst_27 {dimension_numbers = #tpu.dot_dimension_numbers<[1], [0], [0], [1], [0, 0, 1, 1], [], []>} : vector<64x102xbf16>, vector<102x512xbf16>, vector<64x512xf32> -> vector<64x512xf32>
    %18 = arith.addf %12, %17 : vector<64x512xf32>
    %c0_28 = arith.constant 0 : index
    %c2 = arith.constant 2 : index
    %c0_29 = arith.constant 0 : index
    %19 = vector.load %arg17[%c0_28, %c2, %c0_29] : memref<2x34x102xbf16, #tpu.memory_space<vmem>>, vector<2x32x102xbf16>
    %20 = vector.shape_cast %19 : vector<2x32x102xbf16> to vector<64x102xbf16>
    %c2_30 = arith.constant 2 : index
    %c0_31 = arith.constant 0 : index
    %c0_32 = arith.constant 0 : index
    %21 = vector.load %arg2[%c2_30, %c0_31, %c0_32] : memref<3x102x512xbf16, #tpu.memory_space<vmem>>, vector<1x102x512xbf16>
    %22 = vector.shape_cast %21 : vector<1x102x512xbf16> to vector<102x512xbf16>
    %cst_33 = arith.constant dense<0.000000e+00> : vector<64x512xf32>
    %23 = tpu.matmul %20, %22, %cst_33 {dimension_numbers = #tpu.dot_dimension_numbers<[1], [0], [0], [1], [0, 0, 1, 1], [], []>} : vector<64x102xbf16>, vector<102x512xbf16>, vector<64x512xf32> -> vector<64x512xf32>
    %24 = arith.addf %18, %23 : vector<64x512xf32>
    %c0_34 = arith.constant 0 : index
    %c0_35 = arith.constant 0 : index
    %25 = vector.load %arg3[%c0_34, %c0_35] : memref<1x512xf32, #tpu.memory_space<vmem>>, vector<1x512xf32>
    %26 = vector.broadcast %25 : vector<1x512xf32> to vector<64x512xf32>
    %27 = arith.addf %24, %26 : vector<64x512xf32>
    %cst_36 = arith.constant 0.000000e+00 : f32
    %28 = vector.broadcast %cst_36 : f32 to vector<64x512xf32>
    %29 = arith.maximumf %27, %28 : vector<64x512xf32>
    %30 = vector.extract_strided_slice %29 {offsets = [0, 0], sizes = [64, 256], strides = [1, 1]} : vector<64x512xf32> to vector<64x256xf32>
    %31 = vector.extract_strided_slice %29 {offsets = [0, 256], sizes = [64, 256], strides = [1, 1]} : vector<64x512xf32> to vector<64x256xf32>
    %32 = arith.maximumf %30, %31 : vector<64x256xf32>
    %33 = vector.shape_cast %32 : vector<64x256xf32> to vector<32x2x256xf32>
    %34 = vector.extract_strided_slice %33 {offsets = [0, 0, 0], sizes = [32, 1, 256], strides = [1, 1, 1]} : vector<32x2x256xf32> to vector<32x1x256xf32>
    %35 = vector.shape_cast %34 : vector<32x1x256xf32> to vector<32x256xf32>
    %36 = vector.extract_strided_slice %33 {offsets = [0, 1, 0], sizes = [32, 1, 256], strides = [1, 1, 1]} : vector<32x2x256xf32> to vector<32x1x256xf32>
    %37 = vector.shape_cast %36 : vector<32x1x256xf32> to vector<32x256xf32>
    %38 = arith.maximumf %35, %37 : vector<32x256xf32>
    %39 = vector.shape_cast %38 : vector<32x256xf32> to vector<2x16x256xf32>
    %40 = arith.truncf %39 : vector<2x16x256xf32> to vector<2x16x256xbf16>
    %c0_37 = arith.constant 0 : index
    %c1_38 = arith.constant 1 : index
    %c16 = arith.constant 16 : index
    %41 = vector.load %arg18[%c0_37, %c1_38, %c16] : memref<2x18x288xbf16, #tpu.memory_space<vmem>>, vector<2x16x256xbf16>
    tpu.vector_store %arg18[%c0_37, %c1_38, %c16], %40 {strides = array<i32>} : memref<2x18x288xbf16, #tpu.memory_space<vmem>>, vector<2x16x256xbf16>,
    %c0_39 = arith.constant 0 : index
    %c0_40 = arith.constant 0 : index
    %c0_41 = arith.constant 0 : index
    %42 = vector.load %arg18[%c0_39, %c0_40, %c0_41] : memref<2x18x288xbf16, #tpu.memory_space<vmem>>, vector<2x16x288xbf16>
    %43 = vector.shape_cast %42 : vector<2x16x288xbf16> to vector<32x288xbf16>
    %c0_42 = arith.constant 0 : index
    %c0_43 = arith.constant 0 : index
    %c0_44 = arith.constant 0 : index
    %44 = vector.load %arg4[%c0_42, %c0_43, %c0_44] : memref<3x288x256xbf16, #tpu.memory_space<vmem>>, vector<1x288x256xbf16>
    %45 = vector.shape_cast %44 : vector<1x288x256xbf16> to vector<288x256xbf16>
    %cst_45 = arith.constant dense<0.000000e+00> : vector<32x256xf32>
    %46 = tpu.matmul %43, %45, %cst_45 {dimension_numbers = #tpu.dot_dimension_numbers<[1], [0], [0], [1], [0, 0, 1, 1], [], []>} : vector<32x288xbf16>, vector<288x256xbf16>, vector<32x256xf32> -> vector<32x256xf32>
    %c0_46 = arith.constant 0 : index
    %c1_47 = arith.constant 1 : index
    %c0_48 = arith.constant 0 : index
    %47 = vector.load %arg18[%c0_46, %c1_47, %c0_48] : memref<2x18x288xbf16, #tpu.memory_space<vmem>>, vector<2x16x288xbf16>
    %48 = vector.shape_cast %47 : vector<2x16x288xbf16> to vector<32x288xbf16>
    %c1_49 = arith.constant 1 : index
    %c0_50 = arith.constant 0 : index
    %c0_51 = arith.constant 0 : index
    %49 = vector.load %arg4[%c1_49, %c0_50, %c0_51] : memref<3x288x256xbf16, #tpu.memory_space<vmem>>, vector<1x288x256xbf16>
    %50 = vector.shape_cast %49 : vector<1x288x256xbf16> to vector<288x256xbf16>
    %cst_52 = arith.constant dense<0.000000e+00> : vector<32x256xf32>
    %51 = tpu.matmul %48, %50, %cst_52 {dimension_numbers = #tpu.dot_dimension_numbers<[1], [0], [0], [1], [0, 0, 1, 1], [], []>} : vector<32x288xbf16>, vector<288x256xbf16>, vector<32x256xf32> -> vector<32x256xf32>
    %52 = arith.addf %46, %51 : vector<32x256xf32>
    %c0_53 = arith.constant 0 : index
    %c2_54 = arith.constant 2 : index
    %c0_55 = arith.constant 0 : index
    %53 = vector.load %arg18[%c0_53, %c2_54, %c0_55] : memref<2x18x288xbf16, #tpu.memory_space<vmem>>, vector<2x16x288xbf16>
    %54 = vector.shape_cast %53 : vector<2x16x288xbf16> to vector<32x288xbf16>
    %c2_56 = arith.constant 2 : index
    %c0_57 = arith.constant 0 : index
    %c0_58 = arith.constant 0 : index
    %55 = vector.load %arg4[%c2_56, %c0_57, %c0_58] : memref<3x288x256xbf16, #tpu.memory_space<vmem>>, vector<1x288x256xbf16>
    %56 = vector.shape_cast %55 : vector<1x288x256xbf16> to vector<288x256xbf16>
    %cst_59 = arith.constant dense<0.000000e+00> : vector<32x256xf32>
    %57 = tpu.matmul %54, %56, %cst_59 {dimension_numbers = #tpu.dot_dimension_numbers<[1], [0], [0], [1], [0, 0, 1, 1], [], []>} : vector<32x288xbf16>, vector<288x256xbf16>, vector<32x256xf32> -> vector<32x256xf32>
    %58 = arith.addf %52, %57 : vector<32x256xf32>
    %c0_60 = arith.constant 0 : index
    %c0_61 = arith.constant 0 : index
    %59 = vector.load %arg5[%c0_60, %c0_61] : memref<1x256xf32, #tpu.memory_space<vmem>>, vector<1x256xf32>
    %60 = vector.broadcast %59 : vector<1x256xf32> to vector<32x256xf32>
    %61 = arith.addf %58, %60 : vector<32x256xf32>
    %cst_62 = arith.constant 0.000000e+00 : f32
    %62 = vector.broadcast %cst_62 : f32 to vector<32x256xf32>
    %63 = arith.maximumf %61, %62 : vector<32x256xf32>
    %64 = vector.shape_cast %63 : vector<32x256xf32> to vector<2x16x256xf32>
    %65 = arith.truncf %64 : vector<2x16x256xf32> to vector<2x16x256xbf16>
    %c0_63 = arith.constant 0 : index
    %c1_64 = arith.constant 1 : index
    %c16_65 = arith.constant 16 : index
    %66 = vector.load %arg18[%c0_63, %c1_64, %c16_65] : memref<2x18x288xbf16, #tpu.memory_space<vmem>>, vector<2x16x256xbf16>
    tpu.vector_store %arg18[%c0_63, %c1_64, %c16_65], %65 {strides = array<i32>} : memref<2x18x288xbf16, #tpu.memory_space<vmem>>, vector<2x16x256xbf16>,
    %c0_66 = arith.constant 0 : index
    %c0_67 = arith.constant 0 : index
    %c0_68 = arith.constant 0 : index
    %67 = vector.load %arg18[%c0_66, %c0_67, %c0_68] : memref<2x18x288xbf16, #tpu.memory_space<vmem>>, vector<2x16x288xbf16>
    %68 = vector.shape_cast %67 : vector<2x16x288xbf16> to vector<32x288xbf16>
    %c0_69 = arith.constant 0 : index
    %c0_70 = arith.constant 0 : index
    %c0_71 = arith.constant 0 : index
    %69 = vector.load %arg6[%c0_69, %c0_70, %c0_71] : memref<3x288x512xbf16, #tpu.memory_space<vmem>>, vector<1x288x512xbf16>
    %70 = vector.shape_cast %69 : vector<1x288x512xbf16> to vector<288x512xbf16>
    %cst_72 = arith.constant dense<0.000000e+00> : vector<32x512xf32>
    %71 = tpu.matmul %68, %70, %cst_72 {dimension_numbers = #tpu.dot_dimension_numbers<[1], [0], [0], [1], [0, 0, 1, 1], [], []>} : vector<32x288xbf16>, vector<288x512xbf16>, vector<32x512xf32> -> vector<32x512xf32>
    %c0_73 = arith.constant 0 : index
    %c1_74 = arith.constant 1 : index
    %c0_75 = arith.constant 0 : index
    %72 = vector.load %arg18[%c0_73, %c1_74, %c0_75] : memref<2x18x288xbf16, #tpu.memory_space<vmem>>, vector<2x16x288xbf16>
    %73 = vector.shape_cast %72 : vector<2x16x288xbf16> to vector<32x288xbf16>
    %c1_76 = arith.constant 1 : index
    %c0_77 = arith.constant 0 : index
    %c0_78 = arith.constant 0 : index
    %74 = vector.load %arg6[%c1_76, %c0_77, %c0_78] : memref<3x288x512xbf16, #tpu.memory_space<vmem>>, vector<1x288x512xbf16>
    %75 = vector.shape_cast %74 : vector<1x288x512xbf16> to vector<288x512xbf16>
    %cst_79 = arith.constant dense<0.000000e+00> : vector<32x512xf32>
    %76 = tpu.matmul %73, %75, %cst_79 {dimension_numbers = #tpu.dot_dimension_numbers<[1], [0], [0], [1], [0, 0, 1, 1], [], []>} : vector<32x288xbf16>, vector<288x512xbf16>, vector<32x512xf32> -> vector<32x512xf32>
    %77 = arith.addf %71, %76 : vector<32x512xf32>
    %c0_80 = arith.constant 0 : index
    %c2_81 = arith.constant 2 : index
    %c0_82 = arith.constant 0 : index
    %78 = vector.load %arg18[%c0_80, %c2_81, %c0_82] : memref<2x18x288xbf16, #tpu.memory_space<vmem>>, vector<2x16x288xbf16>
    %79 = vector.shape_cast %78 : vector<2x16x288xbf16> to vector<32x288xbf16>
    %c2_83 = arith.constant 2 : index
    %c0_84 = arith.constant 0 : index
    %c0_85 = arith.constant 0 : index
    %80 = vector.load %arg6[%c2_83, %c0_84, %c0_85] : memref<3x288x512xbf16, #tpu.memory_space<vmem>>, vector<1x288x512xbf16>
    %81 = vector.shape_cast %80 : vector<1x288x512xbf16> to vector<288x512xbf16>
    %cst_86 = arith.constant dense<0.000000e+00> : vector<32x512xf32>
    %82 = tpu.matmul %79, %81, %cst_86 {dimension_numbers = #tpu.dot_dimension_numbers<[1], [0], [0], [1], [0, 0, 1, 1], [], []>} : vector<32x288xbf16>, vector<288x512xbf16>, vector<32x512xf32> -> vector<32x512xf32>
    %83 = arith.addf %77, %82 : vector<32x512xf32>
    %c0_87 = arith.constant 0 : index
    %c0_88 = arith.constant 0 : index
    %84 = vector.load %arg7[%c0_87, %c0_88] : memref<1x512xf32, #tpu.memory_space<vmem>>, vector<1x512xf32>
    %85 = vector.broadcast %84 : vector<1x512xf32> to vector<32x512xf32>
    %86 = arith.addf %83, %85 : vector<32x512xf32>
    %cst_89 = arith.constant 0.000000e+00 : f32
    %87 = vector.broadcast %cst_89 : f32 to vector<32x512xf32>
    %88 = arith.maximumf %86, %87 : vector<32x512xf32>
    %89 = vector.extract_strided_slice %88 {offsets = [0, 0], sizes = [32, 256], strides = [1, 1]} : vector<32x512xf32> to vector<32x256xf32>
    %90 = vector.extract_strided_slice %88 {offsets = [0, 256], sizes = [32, 256], strides = [1, 1]} : vector<32x512xf32> to vector<32x256xf32>
    %91 = arith.maximumf %89, %90 : vector<32x256xf32>
    %92 = vector.shape_cast %91 : vector<32x256xf32> to vector<16x2x256xf32>
    %93 = vector.extract_strided_slice %92 {offsets = [0, 0, 0], sizes = [16, 1, 256], strides = [1, 1, 1]} : vector<16x2x256xf32> to vector<16x1x256xf32>
    %94 = vector.shape_cast %93 : vector<16x1x256xf32> to vector<16x256xf32>
    %95 = vector.extract_strided_slice %92 {offsets = [0, 1, 0], sizes = [16, 1, 256], strides = [1, 1, 1]} : vector<16x2x256xf32> to vector<16x1x256xf32>
    %96 = vector.shape_cast %95 : vector<16x1x256xf32> to vector<16x256xf32>
    %97 = arith.maximumf %94, %96 : vector<16x256xf32>
    %98 = vector.shape_cast %97 : vector<16x256xf32> to vector<2x8x256xf32>
    %99 = arith.truncf %98 : vector<2x8x256xf32> to vector<2x8x256xbf16>
    %c0_90 = arith.constant 0 : index
    %c1_91 = arith.constant 1 : index
    %c32 = arith.constant 32 : index
    %100 = vector.load %arg19[%c0_90, %c1_91, %c32] : memref<2x10x320xbf16, #tpu.memory_space<vmem>>, vector<2x8x256xbf16>
    tpu.vector_store %arg19[%c0_90, %c1_91, %c32], %99 {strides = array<i32>} : memref<2x10x320xbf16, #tpu.memory_space<vmem>>, vector<2x8x256xbf16>,
    %c0_92 = arith.constant 0 : index
    %c0_93 = arith.constant 0 : index
    %c0_94 = arith.constant 0 : index
    %101 = vector.load %arg19[%c0_92, %c0_93, %c0_94] : memref<2x10x320xbf16, #tpu.memory_space<vmem>>, vector<2x8x320xbf16>
    %102 = vector.shape_cast %101 : vector<2x8x320xbf16> to vector<16x320xbf16>
    %c0_95 = arith.constant 0 : index
    %c0_96 = arith.constant 0 : index
    %c0_97 = arith.constant 0 : index
    %103 = vector.load %arg8[%c0_95, %c0_96, %c0_97] : memref<3x320x256xbf16, #tpu.memory_space<vmem>>, vector<1x320x256xbf16>
    %104 = vector.shape_cast %103 : vector<1x320x256xbf16> to vector<320x256xbf16>
    %cst_98 = arith.constant dense<0.000000e+00> : vector<16x256xf32>
    %105 = tpu.matmul %102, %104, %cst_98 {dimension_numbers = #tpu.dot_dimension_numbers<[1], [0], [0], [1], [0, 0, 1, 1], [], []>} : vector<16x320xbf16>, vector<320x256xbf16>, vector<16x256xf32> -> vector<16x256xf32>
    %c0_99 = arith.constant 0 : index
    %c1_100 = arith.constant 1 : index
    %c0_101 = arith.constant 0 : index
    %106 = vector.load %arg19[%c0_99, %c1_100, %c0_101] : memref<2x10x320xbf16, #tpu.memory_space<vmem>>, vector<2x8x320xbf16>
    %107 = vector.shape_cast %106 : vector<2x8x320xbf16> to vector<16x320xbf16>
    %c1_102 = arith.constant 1 : index
    %c0_103 = arith.constant 0 : index
    %c0_104 = arith.constant 0 : index
    %108 = vector.load %arg8[%c1_102, %c0_103, %c0_104] : memref<3x320x256xbf16, #tpu.memory_space<vmem>>, vector<1x320x256xbf16>
    %109 = vector.shape_cast %108 : vector<1x320x256xbf16> to vector<320x256xbf16>
    %cst_105 = arith.constant dense<0.000000e+00> : vector<16x256xf32>
    %110 = tpu.matmul %107, %109, %cst_105 {dimension_numbers = #tpu.dot_dimension_numbers<[1], [0], [0], [1], [0, 0, 1, 1], [], []>} : vector<16x320xbf16>, vector<320x256xbf16>, vector<16x256xf32> -> vector<16x256xf32>
    %111 = arith.addf %105, %110 : vector<16x256xf32>
    %c0_106 = arith.constant 0 : index
    %c2_107 = arith.constant 2 : index
    %c0_108 = arith.constant 0 : index
    %112 = vector.load %arg19[%c0_106, %c2_107, %c0_108] : memref<2x10x320xbf16, #tpu.memory_space<vmem>>, vector<2x8x320xbf16>
    %113 = vector.shape_cast %112 : vector<2x8x320xbf16> to vector<16x320xbf16>
    %c2_109 = arith.constant 2 : index
    %c0_110 = arith.constant 0 : index
    %c0_111 = arith.constant 0 : index
    %114 = vector.load %arg8[%c2_109, %c0_110, %c0_111] : memref<3x320x256xbf16, #tpu.memory_space<vmem>>, vector<1x320x256xbf16>
    %115 = vector.shape_cast %114 : vector<1x320x256xbf16> to vector<320x256xbf16>
    %cst_112 = arith.constant dense<0.000000e+00> : vector<16x256xf32>
    %116 = tpu.matmul %113, %115, %cst_112 {dimension_numbers = #tpu.dot_dimension_numbers<[1], [0], [0], [1], [0, 0, 1, 1], [], []>} : vector<16x320xbf16>, vector<320x256xbf16>, vector<16x256xf32> -> vector<16x256xf32>
    %117 = arith.addf %111, %116 : vector<16x256xf32>
    %c0_113 = arith.constant 0 : index
    %c0_114 = arith.constant 0 : index
    %118 = vector.load %arg9[%c0_113, %c0_114] : memref<1x256xf32, #tpu.memory_space<vmem>>, vector<1x256xf32>
    %119 = vector.broadcast %118 : vector<1x256xf32> to vector<16x256xf32>
    %120 = arith.addf %117, %119 : vector<16x256xf32>
    %cst_115 = arith.constant 0.000000e+00 : f32
    %121 = vector.broadcast %cst_115 : f32 to vector<16x256xf32>
    %122 = arith.maximumf %120, %121 : vector<16x256xf32>
    %123 = vector.shape_cast %122 : vector<16x256xf32> to vector<2x8x256xf32>
    %124 = arith.truncf %123 : vector<2x8x256xf32> to vector<2x8x256xbf16>
    %c0_116 = arith.constant 0 : index
    %c1_117 = arith.constant 1 : index
    %c32_118 = arith.constant 32 : index
    %125 = vector.load %arg19[%c0_116, %c1_117, %c32_118] : memref<2x10x320xbf16, #tpu.memory_space<vmem>>, vector<2x8x256xbf16>
    tpu.vector_store %arg19[%c0_116, %c1_117, %c32_118], %124 {strides = array<i32>} : memref<2x10x320xbf16, #tpu.memory_space<vmem>>, vector<2x8x256xbf16>,
    %c0_119 = arith.constant 0 : index
    %c0_120 = arith.constant 0 : index
    %c0_121 = arith.constant 0 : index
    %126 = vector.load %arg19[%c0_119, %c0_120, %c0_121] : memref<2x10x320xbf16, #tpu.memory_space<vmem>>, vector<2x8x320xbf16>
    %127 = vector.shape_cast %126 : vector<2x8x320xbf16> to vector<16x320xbf16>
    %c0_122 = arith.constant 0 : index
    %c0_123 = arith.constant 0 : index
    %c0_124 = arith.constant 0 : index
    %128 = vector.load %arg10[%c0_122, %c0_123, %c0_124] : memref<3x320x256xbf16, #tpu.memory_space<vmem>>, vector<1x320x256xbf16>
    %129 = vector.shape_cast %128 : vector<1x320x256xbf16> to vector<320x256xbf16>
    %cst_125 = arith.constant dense<0.000000e+00> : vector<16x256xf32>
    %130 = tpu.matmul %127, %129, %cst_125 {dimension_numbers = #tpu.dot_dimension_numbers<[1], [0], [0], [1], [0, 0, 1, 1], [], []>} : vector<16x320xbf16>, vector<320x256xbf16>, vector<16x256xf32> -> vector<16x256xf32>
    %c0_126 = arith.constant 0 : index
    %c1_127 = arith.constant 1 : index
    %c0_128 = arith.constant 0 : index
    %131 = vector.load %arg19[%c0_126, %c1_127, %c0_128] : memref<2x10x320xbf16, #tpu.memory_space<vmem>>, vector<2x8x320xbf16>
    %132 = vector.shape_cast %131 : vector<2x8x320xbf16> to vector<16x320xbf16>
    %c1_129 = arith.constant 1 : index
    %c0_130 = arith.constant 0 : index
    %c0_131 = arith.constant 0 : index
    %133 = vector.load %arg10[%c1_129, %c0_130, %c0_131] : memref<3x320x256xbf16, #tpu.memory_space<vmem>>, vector<1x320x256xbf16>
    %134 = vector.shape_cast %133 : vector<1x320x256xbf16> to vector<320x256xbf16>
    %cst_132 = arith.constant dense<0.000000e+00> : vector<16x256xf32>
    %135 = tpu.matmul %132, %134, %cst_132 {dimension_numbers = #tpu.dot_dimension_numbers<[1], [0], [0], [1], [0, 0, 1, 1], [], []>} : vector<16x320xbf16>, vector<320x256xbf16>, vector<16x256xf32> -> vector<16x256xf32>
    %136 = arith.addf %130, %135 : vector<16x256xf32>
    %c0_133 = arith.constant 0 : index
    %c2_134 = arith.constant 2 : index
    %c0_135 = arith.constant 0 : index
    %137 = vector.load %arg19[%c0_133, %c2_134, %c0_135] : memref<2x10x320xbf16, #tpu.memory_space<vmem>>, vector<2x8x320xbf16>
    %138 = vector.shape_cast %137 : vector<2x8x320xbf16> to vector<16x320xbf16>
    %c2_136 = arith.constant 2 : index
    %c0_137 = arith.constant 0 : index
    %c0_138 = arith.constant 0 : index
    %139 = vector.load %arg10[%c2_136, %c0_137, %c0_138] : memref<3x320x256xbf16, #tpu.memory_space<vmem>>, vector<1x320x256xbf16>
    %140 = vector.shape_cast %139 : vector<1x320x256xbf16> to vector<320x256xbf16>
    %cst_139 = arith.constant dense<0.000000e+00> : vector<16x256xf32>
    %141 = tpu.matmul %138, %140, %cst_139 {dimension_numbers = #tpu.dot_dimension_numbers<[1], [0], [0], [1], [0, 0, 1, 1], [], []>} : vector<16x320xbf16>, vector<320x256xbf16>, vector<16x256xf32> -> vector<16x256xf32>
    %142 = arith.addf %136, %141 : vector<16x256xf32>
    %c0_140 = arith.constant 0 : index
    %c0_141 = arith.constant 0 : index
    %143 = vector.load %arg11[%c0_140, %c0_141] : memref<1x256xf32, #tpu.memory_space<vmem>>, vector<1x256xf32>
    %144 = vector.broadcast %143 : vector<1x256xf32> to vector<16x256xf32>
    %145 = arith.addf %142, %144 : vector<16x256xf32>
    %cst_142 = arith.constant 0.000000e+00 : f32
    %146 = vector.broadcast %cst_142 : f32 to vector<16x256xf32>
    %147 = arith.maximumf %145, %146 : vector<16x256xf32>
    %148 = arith.truncf %147 : vector<16x256xf32> to vector<16x256xbf16>
    %149 = vector.shape_cast %148 : vector<16x256xbf16> to vector<2x8x256xbf16>
    %150 = vector.extract_strided_slice %149 {offsets = [0, 0, 0], sizes = [2, 1, 256], strides = [1, 1, 1]} : vector<2x8x256xbf16> to vector<2x1x256xbf16>
    %151 = vector.shape_cast %150 : vector<2x1x256xbf16> to vector<2x256xbf16>
    %c0_143 = arith.constant 0 : index
    %c0_144 = arith.constant 0 : index
    %c0_145 = arith.constant 0 : index
    %152 = vector.load %arg12[%c0_143, %c0_144, %c0_145] : memref<8x256x128xbf16, #tpu.memory_space<vmem>>, vector<1x256x128xbf16>
    %153 = vector.shape_cast %152 : vector<1x256x128xbf16> to vector<256x128xbf16>
    %cst_146 = arith.constant dense<0.000000e+00> : vector<2x128xf32>
    %154 = tpu.matmul %151, %153, %cst_146 {dimension_numbers = #tpu.dot_dimension_numbers<[1], [0], [0], [1], [0, 0, 1, 1], [], []>} : vector<2x256xbf16>, vector<256x128xbf16>, vector<2x128xf32> -> vector<2x128xf32>
    %155 = vector.extract_strided_slice %149 {offsets = [0, 1, 0], sizes = [2, 1, 256], strides = [1, 1, 1]} : vector<2x8x256xbf16> to vector<2x1x256xbf16>
    %156 = vector.shape_cast %155 : vector<2x1x256xbf16> to vector<2x256xbf16>
    %c1_147 = arith.constant 1 : index
    %c0_148 = arith.constant 0 : index
    %c0_149 = arith.constant 0 : index
    %157 = vector.load %arg12[%c1_147, %c0_148, %c0_149] : memref<8x256x128xbf16, #tpu.memory_space<vmem>>, vector<1x256x128xbf16>
    %158 = vector.shape_cast %157 : vector<1x256x128xbf16> to vector<256x128xbf16>
    %cst_150 = arith.constant dense<0.000000e+00> : vector<2x128xf32>
    %159 = tpu.matmul %156, %158, %cst_150 {dimension_numbers = #tpu.dot_dimension_numbers<[1], [0], [0], [1], [0, 0, 1, 1], [], []>} : vector<2x256xbf16>, vector<256x128xbf16>, vector<2x128xf32> -> vector<2x128xf32>
    %160 = arith.addf %154, %159 : vector<2x128xf32>
    %161 = vector.extract_strided_slice %149 {offsets = [0, 2, 0], sizes = [2, 1, 256], strides = [1, 1, 1]} : vector<2x8x256xbf16> to vector<2x1x256xbf16>
    %162 = vector.shape_cast %161 : vector<2x1x256xbf16> to vector<2x256xbf16>
    %c2_151 = arith.constant 2 : index
    %c0_152 = arith.constant 0 : index
    %c0_153 = arith.constant 0 : index
    %163 = vector.load %arg12[%c2_151, %c0_152, %c0_153] : memref<8x256x128xbf16, #tpu.memory_space<vmem>>, vector<1x256x128xbf16>
    %164 = vector.shape_cast %163 : vector<1x256x128xbf16> to vector<256x128xbf16>
    %cst_154 = arith.constant dense<0.000000e+00> : vector<2x128xf32>
    %165 = tpu.matmul %162, %164, %cst_154 {dimension_numbers = #tpu.dot_dimension_numbers<[1], [0], [0], [1], [0, 0, 1, 1], [], []>} : vector<2x256xbf16>, vector<256x128xbf16>, vector<2x128xf32> -> vector<2x128xf32>
    %166 = arith.addf %160, %165 : vector<2x128xf32>
    %167 = vector.extract_strided_slice %149 {offsets = [0, 3, 0], sizes = [2, 1, 256], strides = [1, 1, 1]} : vector<2x8x256xbf16> to vector<2x1x256xbf16>
    %168 = vector.shape_cast %167 : vector<2x1x256xbf16> to vector<2x256xbf16>
    %c3_155 = arith.constant 3 : index
    %c0_156 = arith.constant 0 : index
    %c0_157 = arith.constant 0 : index
    %169 = vector.load %arg12[%c3_155, %c0_156, %c0_157] : memref<8x256x128xbf16, #tpu.memory_space<vmem>>, vector<1x256x128xbf16>
    %170 = vector.shape_cast %169 : vector<1x256x128xbf16> to vector<256x128xbf16>
    %cst_158 = arith.constant dense<0.000000e+00> : vector<2x128xf32>
    %171 = tpu.matmul %168, %170, %cst_158 {dimension_numbers = #tpu.dot_dimension_numbers<[1], [0], [0], [1], [0, 0, 1, 1], [], []>} : vector<2x256xbf16>, vector<256x128xbf16>, vector<2x128xf32> -> vector<2x128xf32>
    %172 = arith.addf %166, %171 : vector<2x128xf32>
    %173 = vector.extract_strided_slice %149 {offsets = [0, 4, 0], sizes = [2, 1, 256], strides = [1, 1, 1]} : vector<2x8x256xbf16> to vector<2x1x256xbf16>
    %174 = vector.shape_cast %173 : vector<2x1x256xbf16> to vector<2x256xbf16>
    %c4 = arith.constant 4 : index
    %c0_159 = arith.constant 0 : index
    %c0_160 = arith.constant 0 : index
    %175 = vector.load %arg12[%c4, %c0_159, %c0_160] : memref<8x256x128xbf16, #tpu.memory_space<vmem>>, vector<1x256x128xbf16>
    %176 = vector.shape_cast %175 : vector<1x256x128xbf16> to vector<256x128xbf16>
    %cst_161 = arith.constant dense<0.000000e+00> : vector<2x128xf32>
    %177 = tpu.matmul %174, %176, %cst_161 {dimension_numbers = #tpu.dot_dimension_numbers<[1], [0], [0], [1], [0, 0, 1, 1], [], []>} : vector<2x256xbf16>, vector<256x128xbf16>, vector<2x128xf32> -> vector<2x128xf32>
    %178 = arith.addf %172, %177 : vector<2x128xf32>
    %179 = vector.extract_strided_slice %149 {offsets = [0, 5, 0], sizes = [2, 1, 256], strides = [1, 1, 1]} : vector<2x8x256xbf16> to vector<2x1x256xbf16>
    %180 = vector.shape_cast %179 : vector<2x1x256xbf16> to vector<2x256xbf16>
    %c5 = arith.constant 5 : index
    %c0_162 = arith.constant 0 : index
    %c0_163 = arith.constant 0 : index
    %181 = vector.load %arg12[%c5, %c0_162, %c0_163] : memref<8x256x128xbf16, #tpu.memory_space<vmem>>, vector<1x256x128xbf16>
    %182 = vector.shape_cast %181 : vector<1x256x128xbf16> to vector<256x128xbf16>
    %cst_164 = arith.constant dense<0.000000e+00> : vector<2x128xf32>
    %183 = tpu.matmul %180, %182, %cst_164 {dimension_numbers = #tpu.dot_dimension_numbers<[1], [0], [0], [1], [0, 0, 1, 1], [], []>} : vector<2x256xbf16>, vector<256x128xbf16>, vector<2x128xf32> -> vector<2x128xf32>
    %184 = arith.addf %178, %183 : vector<2x128xf32>
    %185 = vector.extract_strided_slice %149 {offsets = [0, 6, 0], sizes = [2, 1, 256], strides = [1, 1, 1]} : vector<2x8x256xbf16> to vector<2x1x256xbf16>
    %186 = vector.shape_cast %185 : vector<2x1x256xbf16> to vector<2x256xbf16>
    %c6 = arith.constant 6 : index
    %c0_165 = arith.constant 0 : index
    %c0_166 = arith.constant 0 : index
    %187 = vector.load %arg12[%c6, %c0_165, %c0_166] : memref<8x256x128xbf16, #tpu.memory_space<vmem>>, vector<1x256x128xbf16>
    %188 = vector.shape_cast %187 : vector<1x256x128xbf16> to vector<256x128xbf16>
    %cst_167 = arith.constant dense<0.000000e+00> : vector<2x128xf32>
    %189 = tpu.matmul %186, %188, %cst_167 {dimension_numbers = #tpu.dot_dimension_numbers<[1], [0], [0], [1], [0, 0, 1, 1], [], []>} : vector<2x256xbf16>, vector<256x128xbf16>, vector<2x128xf32> -> vector<2x128xf32>
    %190 = arith.addf %184, %189 : vector<2x128xf32>
    %191 = vector.extract_strided_slice %149 {offsets = [0, 7, 0], sizes = [2, 1, 256], strides = [1, 1, 1]} : vector<2x8x256xbf16> to vector<2x1x256xbf16>
    %192 = vector.shape_cast %191 : vector<2x1x256xbf16> to vector<2x256xbf16>
    %c7 = arith.constant 7 : index
    %c0_168 = arith.constant 0 : index
    %c0_169 = arith.constant 0 : index
    %193 = vector.load %arg12[%c7, %c0_168, %c0_169] : memref<8x256x128xbf16, #tpu.memory_space<vmem>>, vector<1x256x128xbf16>
    %194 = vector.shape_cast %193 : vector<1x256x128xbf16> to vector<256x128xbf16>
    %cst_170 = arith.constant dense<0.000000e+00> : vector<2x128xf32>
    %195 = tpu.matmul %192, %194, %cst_170 {dimension_numbers = #tpu.dot_dimension_numbers<[1], [0], [0], [1], [0, 0, 1, 1], [], []>} : vector<2x256xbf16>, vector<256x128xbf16>, vector<2x128xf32> -> vector<2x128xf32>
    %196 = arith.addf %190, %195 : vector<2x128xf32>
    %c0_171 = arith.constant 0 : index
    %c0_172 = arith.constant 0 : index
    %197 = vector.load %arg13[%c0_171, %c0_172] : memref<1x128xf32, #tpu.memory_space<vmem>>, vector<1x128xf32>
    %198 = vector.broadcast %197 : vector<1x128xf32> to vector<2x128xf32>
    %199 = arith.addf %196, %198 : vector<2x128xf32>
    %cst_173 = arith.constant 0.000000e+00 : f32
    %200 = vector.broadcast %cst_173 : f32 to vector<2x128xf32>
    %201 = arith.maximumf %199, %200 : vector<2x128xf32>
    %202 = arith.truncf %201 : vector<2x128xf32> to vector<2x128xbf16>
    %c0_174 = arith.constant 0 : index
    %c0_175 = arith.constant 0 : index
    %203 = vector.load %arg14[%c0_174, %c0_175] : memref<128x10xbf16, #tpu.memory_space<vmem>>, vector<128x10xbf16>
    %cst_176 = arith.constant dense<0.000000e+00> : vector<2x10xf32>
    %204 = tpu.matmul %202, %203, %cst_176 {dimension_numbers = #tpu.dot_dimension_numbers<[1], [0], [0], [1], [0, 0, 1, 1], [], []>} : vector<2x128xbf16>, vector<128x10xbf16>, vector<2x10xf32> -> vector<2x10xf32>
    %c0_177 = arith.constant 0 : index
    %c0_178 = arith.constant 0 : index
    %205 = vector.load %arg15[%c0_177, %c0_178] : memref<1x10xf32, #tpu.memory_space<vmem>>, vector<1x10xf32>
    %206 = vector.broadcast %205 : vector<1x10xf32> to vector<2x10xf32>
    %207 = arith.addf %204, %206 : vector<2x10xf32>
    %c0_179 = arith.constant 0 : index
    %c0_180 = arith.constant 0 : index
    %208 = vector.load %arg16[%c0_179, %c0_180] : memref<2x10xf32, #tpu.memory_space<vmem>>, vector<2x10xf32>
    tpu.vector_store %arg16[%c0_179, %c0_180], %207 {strides = array<i32>} : memref<2x10xf32, #tpu.memory_space<vmem>>, vector<2x10xf32>,
    return
  }
  func.func @transform_0(%arg0: i32) -> (i32, i32, i32) {
    %c0_i32 = arith.constant 0 : i32
    %c0_i32_0 = arith.constant 0 : i32
    %c0_i32_1 = arith.constant 0 : i32
    return %arg0, %c0_i32, %c0_i32_0 : i32, i32, i32
  }
  func.func @transform_1(%arg0: i32) -> (i32, i32, i32) {
    %c0_i32 = arith.constant 0 : i32
    %c0_i32_0 = arith.constant 0 : i32
    %c0_i32_1 = arith.constant 0 : i32
    %c0_i32_2 = arith.constant 0 : i32
    return %c0_i32, %c0_i32_0, %c0_i32_1 : i32, i32, i32
  }
  func.func @transform_2(%arg0: i32) -> (i32, i32) {
    %c0_i32 = arith.constant 0 : i32
    %c0_i32_0 = arith.constant 0 : i32
    %c0_i32_1 = arith.constant 0 : i32
    return %c0_i32, %c0_i32_0 : i32, i32
  }
  func.func @transform_3(%arg0: i32) -> (i32, i32, i32) {
    %c0_i32 = arith.constant 0 : i32
    %c0_i32_0 = arith.constant 0 : i32
    %c0_i32_1 = arith.constant 0 : i32
    %c0_i32_2 = arith.constant 0 : i32
    return %c0_i32, %c0_i32_0, %c0_i32_1 : i32, i32, i32
  }
  func.func @transform_4(%arg0: i32) -> (i32, i32) {
    %c0_i32 = arith.constant 0 : i32
    %c0_i32_0 = arith.constant 0 : i32
    %c0_i32_1 = arith.constant 0 : i32
    return %c0_i32, %c0_i32_0 : i32, i32
  }
  func.func @transform_5(%arg0: i32) -> (i32, i32, i32) {
    %c0_i32 = arith.constant 0 : i32
    %c0_i32_0 = arith.constant 0 : i32
    %c0_i32_1 = arith.constant 0 : i32
    %c0_i32_2 = arith.constant 0 : i32
    return %c0_i32, %c0_i32_0, %c0_i32_1 : i32, i32, i32
  }
  func.func @transform_6(%arg0: i32) -> (i32, i32) {
    %c0_i32 = arith.constant 0 : i32
    %c0_i32_0 = arith.constant 0 : i32
    %c0_i32_1 = arith.constant 0 : i32
    return %c0_i32, %c0_i32_0 : i32, i32
  }
  func.func @transform_7(%arg0: i32) -> (i32, i32, i32) {
    %c0_i32 = arith.constant 0 : i32
    %c0_i32_0 = arith.constant 0 : i32
    %c0_i32_1 = arith.constant 0 : i32
    %c0_i32_2 = arith.constant 0 : i32
    return %c0_i32, %c0_i32_0, %c0_i32_1 : i32, i32, i32
  }
  func.func @transform_8(%arg0: i32) -> (i32, i32) {
    %c0_i32 = arith.constant 0 : i32
    %c0_i32_0 = arith.constant 0 : i32
    %c0_i32_1 = arith.constant 0 : i32
    return %c0_i32, %c0_i32_0 : i32, i32
  }
  func.func @transform_9(%arg0: i32) -> (i32, i32, i32) {
    %c0_i32 = arith.constant 0 : i32
    %c0_i32_0 = arith.constant 0 : i32
    %c0_i32_1 = arith.constant 0 : i32
    %c0_i32_2 = arith.constant 0 : i32
    return %c0_i32, %c0_i32_0, %c0_i32_1 : i32, i32, i32
  }
  func.func @transform_10(%arg0: i32) -> (i32, i32) {
    %c0_i32 = arith.constant 0 : i32
    %c0_i32_0 = arith.constant 0 : i32
    %c0_i32_1 = arith.constant 0 : i32
    return %c0_i32, %c0_i32_0 : i32, i32
  }
  func.func @transform_11(%arg0: i32) -> (i32, i32, i32) {
    %c0_i32 = arith.constant 0 : i32
    %c0_i32_0 = arith.constant 0 : i32
    %c0_i32_1 = arith.constant 0 : i32
    %c0_i32_2 = arith.constant 0 : i32
    return %c0_i32, %c0_i32_0, %c0_i32_1 : i32, i32, i32
  }
  func.func @transform_12(%arg0: i32) -> (i32, i32) {
    %c0_i32 = arith.constant 0 : i32
    %c0_i32_0 = arith.constant 0 : i32
    %c0_i32_1 = arith.constant 0 : i32
    return %c0_i32, %c0_i32_0 : i32, i32
  }
  func.func @transform_13(%arg0: i32) -> (i32, i32) {
    %c0_i32 = arith.constant 0 : i32
    %c0_i32_0 = arith.constant 0 : i32
    %c0_i32_1 = arith.constant 0 : i32
    return %c0_i32, %c0_i32_0 : i32, i32
  }
  func.func @transform_14(%arg0: i32) -> (i32, i32) {
    %c0_i32 = arith.constant 0 : i32
    %c0_i32_0 = arith.constant 0 : i32
    %c0_i32_1 = arith.constant 0 : i32
    return %c0_i32, %c0_i32_0 : i32, i32
  }
  func.func @transform_15(%arg0: i32) -> (i32, i32) {
    %c0_i32 = arith.constant 0 : i32
    %c0_i32_0 = arith.constant 0 : i32
    return %arg0, %c0_i32 : i32, i32
  }
}

</mosaic_0001>

<bundles_post_ra>
// kernel: _lambda_.1
= control target key start
LH: loop header
LB: loop body
LE: loop exit
PB: predicated region body
PF: predicated region fallthrough
CT: control target
= control target key end

     0   :  { %vm96_vm0 = vsmask.f32 256  ;;  %vm97_vm1 = vsmask.f32 4368  ;;  %v18400_v19 = vmov 0  ;;  %s14148_s21 = smov 3   ;;  %s18361_s0 = inlined_call_operand.vmem [shape: bf16[2,32,96], index: 0, kind: input, shape index: {}]   ;;  %s18362_s1 = inlined_call_operand.vmem [shape: bf16[3,102,512], index: 1, kind: input, shape index: {}]   ;;  %s18363_s2 = inlined_call_operand.vmem [shape: f32[1,512], index: 2, kind: input, shape index: {}]   ;;  %s18364_s3 = inlined_call_operand.vmem [shape: bf16[3,288,256], index: 3, kind: input, shape index: {}]   ;;  %s18365_s4 = inlined_call_operand.vmem [shape: f32[1,256], index: 4, kind: input, shape index: {}]   ;;  %s18366_s5 = inlined_call_operand.vmem [shape: bf16[3,288,512], index: 5, kind: input, shape index: {}]   ;;  %s18367_s6 = inlined_call_operand.vmem [shape: f32[1,512], index: 6, kind: input, shape index: {}]   ;;  %s18368_s7 = inlined_call_operand.vmem [shape: bf16[3,320,256], index: 7, kind: input, shape index: {}]   ;;  %s18369_s8 = inlined_call_operand.vmem [shape: f32[1,256], index: 8, kind: input, shape index: {}]   ;;  %s18370_s9 = inlined_call_operand.vmem [shape: bf16[3,320,256], index: 9, kind: input, shape index: {}]   ;;  %s18371_s10 = inlined_call_operand.vmem [shape: f32[1,256], index: 10, kind: input, shape index: {}]   ;;  %s18372_s11 = inlined_call_operand.vmem [shape: bf16[8,256,128], index: 11, kind: input, shape index: {}]   ;;  %s18373_s12 = inlined_call_operand.vmem [shape: f32[1,128], index: 12, kind: input, shape index: {}]   ;;  %s18374_s13 = inlined_call_operand.vmem [shape: bf16[128,10], index: 13, kind: input, shape index: {}]   ;;  %s18375_s14 = inlined_call_operand.vmem [shape: f32[1,10], index: 14, kind: input, shape index: {}]   ;;  %s18376_s15 = inlined_call_operand.hbm [shape: f32[2,10], index: 15, kind: output, shape index: {}]  }
   0x1   :  { %v88_v0 = vld [vmem:[%s18361_s0] sm:$0xf]  ;;  %v89_v1 = vld [vmem:[%s18361_s0 + $0x4] sm:$0xf]  ;;  %v90_v4 = vld [vmem:[%s18361_s0 + $0x8] sm:$0xf] }
   0x2   :  { %v100_v2 = vshrl.u32 %v88_v0, 16  ;;  %v103_v3 = vshll.u32 %v88_v0, 16  ;;  %v108_v5 = vshrl.u32 %v89_v1, 16  ;;  %v117_v6 = vshrl.u32 %v90_v4, 16  ;;  %v91_v10 = vld [vmem:[%s18361_s0 + $0xc] sm:$0xf]  ;;  %vm14256_vm2 = vmor %vm96_vm0, %vm97_vm1 }
   0x3   :  { %v120_v7 = vshll.u32 %v90_v4, 16  ;;  %v111_v9 = vshll.u32 %v89_v1, 16  ;;  %v92_v11 = vld [vmem:[%s18361_s0 + $0x10] sm:$0xf]  ;;  %v126_v14 = vshrl.u32 %v91_v10, 16  ;;  %v129_v15 = vshll.u32 %v91_v10, 16 }
   0x4   :  { %v102_v8 = vrot.slane %v100_v2, 7  ;;  %v110_v12 = vrot.slane %v108_v5, 7  ;;  %v119_v13 = vrot.slane %v117_v6, 7  ;;  %v93_v16 = vld [vmem:[%s18361_s0 + $0x14] sm:$0xf]  ;;  %v18401_v19 = vsel %vm14256_vm2, 4294967295, %v18400_v19 }
   0x5   :  { %18402 = vst [vmem:[#allocation8_spill] sm:$0xff] %v18401_v19  ;;  %v135_v20 = vshrl.u32 %v92_v11, 16  ;;  %v138_v21 = vshll.u32 %v92_v11, 16  ;;  %v94_v22 = vld [vmem:[%s18361_s0 + $0x18] sm:$0xf]  ;;  %v14272_v29 = vrot.slane %v126_v14, 7 }
   0x6   :  { %v105_v17 = vor.u32 %v103_v3, %v102_v8  ;;  %v106_v18 = vrot.slane %v102_v8, 4  ;;  %v115_v23 = vrot.slane %v110_v12, 4  ;;  %v122_v24 = vor.u32 %v120_v7, %v119_v13  ;;  %v14266_v27 = vld [vmem:[%s18361_s0 + $0x1c] sm:$0xf]  ;;  %v13019_v28 = vld [vmem:[%s18362_s1 + $0xd4] ss:$16 sps:$4 sm:$0xff]  }
   0x7   :  { %v113_v25 = vor.u32 %v111_v9, %v110_v12  ;;  %v124_v26 = vrot.slane %v119_v13, 4  ;;  %v14274_v30 = vrot.slane %v135_v20, 7  ;;  %v143_v31 = vshrl.u32 %v93_v16, 16  ;;  %545 = vmatprep.subr.bf16.mxu0 %v13019_v28  ;;  %v13021_v36 = vld [vmem:[%s18362_s1 + $0xdc] ss:$16 sps:$4 sm:$0xff]   ;;  %v10846_v38 = vld [vmem:[%s18362_s1 + $0xf0] sm:$0xff] }
   0x8   :  { %169 = vrot.lane.b32.xlu0 %v105_v17, %s14148_s21  ;;  %v146_v32 = vshll.u32 %v93_v16, 16  ;;  %v123_v33 = vsel %vm14256_vm2, %v115_v23, %v122_v24  ;;  %v152_v35 = vshrl.u32 %v94_v22, 16  ;;  %v13023_v37 = vld [vmem:[%s18362_s1 + $0xd0] ss:$16 sps:$4 sm:$0xff]   ;;  %v131_v39 = vor.u32 %v129_v15, %v14272_v29  ;;  %v13024_v41 = vld [vmem:[%s18362_s1 + $0xd8] ss:$16 sps:$4 sm:$0xff]   ;;  %618 = vmatprep.subr.bf16.mxu1 %v13021_v36 }
   0x9   :  { %v114_v34 = vsel %vm14256_vm2, %v106_v18, %v113_v25  ;;  %173 = vrot.lane.b32.xlu1 %v123_v33, %s14148_s21  ;;  %v155_v40 = vshll.u32 %v94_v22, 16  ;;  %v10848_v42 = vld [vmem:[%s18362_s1 + $0x100] sm:$0xff]  ;;  %v14297_v43 = vrot.slane %v143_v31, 7  ;;  %v161_v45 = vshrl.u32 %v14266_v27, 16  ;;  %546 = vmatpush1.bf16.msra.mxu0 %v13023_v37  ;;  %v10847_v47 = vld [vmem:[%s18362_s1 + $0xf8] sm:$0xff]  ;;  %v10849_v50 = vld [vmem:[%s18362_s1 + $0x108] sm:$0xff] }
   0xa   :  { %v14299_v44 = vrot.slane %v152_v35, 7  ;;  %v13025_v46 = vld [vmem:[%s18362_s1 + $0xf4] ss:$16 sps:$4 sm:$0xff]   ;;  %v132_v48 = vsel %vm14256_vm2, %v124_v26, %v131_v39  ;;  %v133_v49 = vrot.slane %v14272_v29, 4  ;;  %619 = vmatpush1.bf16.msra.mxu1 %v13024_v41  ;;  %v13027_v51 = vld [vmem:[%s18362_s1 + $0xfc] ss:$16 sps:$4 sm:$0xff]   ;;  %v10876_v52 = vcombine.low %v10846_v38, %v10848_v42 }
   0xb   :  { %v140_v53 = vor.u32 %v138_v21, %v14274_v30  ;;  %v141_v54 = vrot.slane %v14274_v30, 4  ;;  %v148_v55 = vor.u32 %v146_v32, %v14297_v43  ;;  %v164_v56 = vshll.u32 %v14266_v27, 16  ;;  %547 = vmatprep.subr.bf16.mxu0 %v13025_v46  ;;  %v10850_v57 = vld [vmem:[%s18362_s1 + $0x110] sm:$0xff]  ;;  %v10852_v58 = vld [vmem:[%s18362_s1 + $0x120] sm:$0xff]  ;;  %620 = vmatprep.subr.bf16.mxu1 %v13027_v51  ;;  %v10851_v62 = vld [vmem:[%s18362_s1 + $0x118] sm:$0xff] }
   0xc   :  { %171 = vrot.lane.b32.xlu0 %v114_v34, %s14148_s21  ;;  %v14329_v59 = vrot.slane %v161_v45, 7  ;;  %vm52_vm3 = vcmask 830464   ;;  %v10878_v60 = vcombine.low %v10847_v47, %v10849_v50  ;;  %v13029_v61 = vld [vmem:[%s18362_s1 + $0x114] ss:$16 sps:$4 sm:$0xff]   ;;  %v150_v63 = vrot.slane %v14297_v43, 4  ;;  %v10853_v2 = vld [vmem:[%s18362_s1 + $0x128] sm:$0xff] }
   0xd   :  { %175 = vrot.lane.b32.xlu1 %v132_v48, %s14148_s21  ;;  %v157_v0 = vor.u32 %v155_v40, %v14299_v44  ;;  %v14149_v1 = vmov 0   ;;  %548 = vmatpush1.bf16.msra.mxu0 %v10876_v52  ;;  %v13031_v3 = vld [vmem:[%s18362_s1 + $0x11c] ss:$16 sps:$4 sm:$0xff]   ;;  %v10880_v4 = vcombine.low %v10850_v57, %v10852_v58  ;;  %v10882_v5 = vcombine.low %v10851_v62, %v10853_v2  ;;  %v10854_v6 = vld [vmem:[%s18362_s1 + $0x130] sm:$0xff]  ;;  %v10856_v7 = vld [vmem:[%s18362_s1 + $0x140] sm:$0xff] }
   0xe   :  { %53 = vst.msk [vmem:[#allocation2] sm:$0xf] %vm52_vm3, %v14149_v1  ;;  %54 = vst.msk [vmem:[#allocation2 + $0x4] sm:$0xf] %vm52_vm3, %v14149_v1  ;;  %577 = vmatprep.mubr.bf16.mxu0 %v14149_v1  ;;  %621 = vmatpush1.bf16.msra.mxu1 %v10878_v60  ;;  %v13033_v8 = vld [vmem:[%s18362_s1 + $0x134] ss:$16 sps:$4 sm:$0xff]   ;;  %v149_v9 = vsel %vm14256_vm2, %v141_v54, %v148_v55  ;;  %v166_v11 = vor.u32 %v164_v56, %v14329_v59 }
   0xf   :  { %55 = vst.msk [vmem:[#allocation2 + $0x8] sm:$0xf] %vm52_vm3, %v14149_v1  ;;  %56 = vst.msk [vmem:[#allocation2 + $0xc] sm:$0xf] %vm52_vm3, %v14149_v1  ;;  %vm57_vm4 = vcmask 827392   ;;  %v159_v10 = vrot.slane %v14299_v44, 4  ;;  %549 = vmatprep.subr.bf16.mxu0 %v13029_v61  ;;  %622 = vmatprep.subr.bf16.mxu1 %v13031_v3  ;;  %v158_v15 = vsel %vm14256_vm2, %v150_v63, %v157_v0  ;;  %v10884_v16 = vcombine.low %v10854_v6, %v10856_v7 }
  0x10   :  { %59 = vst.msk [vmem:[#allocation2 + $0x14] sm:$0xf] %vm52_vm3, %v14149_v1  ;;  %60 = vst.msk [vmem:[#allocation2 + $0x18] sm:$0xf] %vm52_vm3, %v14149_v1  ;;  %177 = vrot.lane.b32.xlu0 %v133_v49, %s14148_s21  ;;  %v10855_v12 = vld [vmem:[%s18362_s1 + $0x138] sm:$0xff]  ;;  %v10857_v13 = vld [vmem:[%s18362_s1 + $0x148] sm:$0xff]  ;;  %650 = vmatprep.mubr.bf16.mxu1 %v14149_v1 }
  0x11   :  { %61 = vst.msk [vmem:[#allocation2 + $0x1c] sm:$0xf] %vm52_vm3, %v14149_v1  ;;  %62 = vst.msk [vmem:[#allocation2 + $0x20] sm:$0xf] %vm52_vm3, %v14149_v1  ;;  %v13035_v14 = vld [vmem:[%s18362_s1 + $0x13c] ss:$16 sps:$4 sm:$0xff]   ;;  %179 = vrot.lane.b32.xlu1 %v140_v53, %s14148_s21  ;;  %550 = vmatpush1.bf16.msra.mxu0 %v10880_v4  ;;  %v10886_v17 = vcombine.low %v10855_v12, %v10857_v13  ;;  %v167_v18 = vsel %vm14256_vm2, %v159_v10, %v166_v11 }
  0x12   :  { %67 = vst [vmem:[#allocation3 + $0xc] sm:$0xff] %v14149_v1  ;;  %69 = vst [vmem:[#allocation3 + $0x18] sm:$0x11] %v14149_v1  ;;  %623 = vmatpush1.bf16.msra.mxu1 %v10882_v5  ;;  %551 = vmatprep.subr.bf16.mxu0 %v13033_v8  ;;  %v13037_v20 = vld [vmem:[%s18362_s1 + $0x154] ss:$16 sps:$4 sm:$0xff]   ;;  %v168_v22 = vrot.slane %v14329_v59, 4 }
  0x13   :  { %74 = vst [vmem:[#allocation3 + $0x30] sm:$0xff] %v14149_v1  ;;  %76 = vst [vmem:[#allocation3 + $0x3c] sm:$0x11] %v14149_v1  ;;  %624 = vmatprep.subr.bf16.mxu1 %v13035_v14  ;;  %v13039_v21 = vld [vmem:[%s18362_s1 + $0x15c] ss:$16 sps:$4 sm:$0xff]   ;;  %v10862_v25 = vld [vmem:[%s18362_s1 + $0x170] sm:$0xff] }
  0x14   :  { %81 = vst [vmem:[#allocation4 + $0xc] sm:$0x11] %v14149_v1  ;;  %86 = vst [vmem:[#allocation4 + $0x24] sm:$0x11] %v14149_v1  ;;  %181 = vrot.lane.b32.xlu0 %v149_v9, %s14148_s21  ;;  %v13041_v23 = vld [vmem:[%s18362_s1 + $0x150] ss:$16 sps:$4 sm:$0xff]  }
  0x15   :  { %58 = vst.msk [vmem:[#allocation2 + $0x10] sm:$0x1] %vm57_vm4, %v14149_v1  ;;  %63 = vst.msk [vmem:[#allocation2 + $0x24] sm:$0x1] %vm57_vm4, %v14149_v1  ;;  %183 = vrot.lane.b32.xlu1 %v158_v15, %s14148_s21  ;;  %v13042_v24 = vld [vmem:[%s18362_s1 + $0x158] ss:$16 sps:$4 sm:$0xff]   ;;  %552 = vmatpush1.bf16.msra.mxu0 %v10884_v16 }
  0x16   :  { %v10864_v26 = vld [vmem:[%s18362_s1 + $0x180] sm:$0xff]  ;;  %625 = vmatpush1.bf16.msra.mxu1 %v10886_v17  ;;  %v10863_v28 = vld [vmem:[%s18362_s1 + $0x178] sm:$0xff]  ;;  %v10865_v29 = vld [vmem:[%s18362_s1 + $0x188] sm:$0xff]  ;;  %553 = vmatprep.subr.bf16.mxu0 %v13037_v20  ;;  %vm532_vm5 = vcmask 1042432   ;;  %vm199_vm6 = vcmask 805912   ;;  %vm209_vm9 = vcmask 802840  }
  0x17   :  { %v13043_v27 = vld [vmem:[%s18362_s1 + $0x174] ss:$16 sps:$4 sm:$0xff]   ;;  %626 = vmatprep.subr.bf16.mxu1 %v13039_v21  ;;  %v13045_v30 = vld [vmem:[%s18362_s1 + $0x17c] ss:$16 sps:$4 sm:$0xff]   ;;  %v10892_v33 = vcombine.low %v10862_v25, %v10864_v26  ;;  %v10894_v34 = vcombine.low %v10863_v28, %v10865_v29  ;;  %vm200_vm7 = vsmask.f32 7938  ;;  %vm14449_vm10 = vmand %vm209_vm9, %vm96_vm0 }
  0x18   :  { %185 = vrot.lane.b32.xlu0 %v167_v18, %s14148_s21  ;;  %v10866_v31 = vld [vmem:[%s18362_s1 + $0x190] sm:$0x77]  ;;  %v10867_v32 = vld [vmem:[%s18362_s1 + $0x198] sm:$0x77]  ;;  %vm14444_vm8 = vmand %vm199_vm6, %vm200_vm7  ;;  %vm259_vm11 = vsmask.f32 3328 }
  0x19   :  { %187 = vrot.lane.b32.xlu1 %v168_v22, %s14148_s21  ;;  %554 = vmatpush1.bf16.msra.mxu0 %v13041_v23  ;;  %v10897_v35 = vcombine.high %v10866_v31, %v10866_v31  ;;  %v10896_v36 = vcombine.low %v10866_v31, %v10866_v31  ;;  %v10899_v37 = vcombine.high %v10867_v32, %v10867_v32  ;;  %v13051_v40 = vld [vmem:[%s18362_s1 + $0x4] ss:$16 sps:$4 sm:$0xff]   ;;  %v13054_v42 = vld [vmem:[%s18362_s1 + $0xc] ss:$16 sps:$4 sm:$0xff]   ;;  %v202_v44 = vld [vmem:[#allocation2] sm:$0xf] }
  0x1a   :  { %627 = vmatpush1.bf16.msra.mxu1 %v13042_v24  ;;  %555 = vmatprep.subr.bf16.mxu0 %v13043_v27  ;;  %v10898_v38 = vcombine.low %v10867_v32, %v10867_v32  ;;  %v214_v52 = vld [vmem:[#allocation2 + $0x14] sm:$0xf]  ;;  %vm260_vm12 = vsmask.f32 7440  ;;  %vm1018_vm13 = vcmask 1046532   ;;  %v18407_v15 = vmov 0 }
  0x1b   :  { %628 = vmatprep.subr.bf16.mxu1 %v13045_v30  ;;  %v534_v39 = vsel %vm532_vm5, %v10896_v36, 0  ;;  %vm14483_vm14 = vmor %vm532_vm5, %vm1018_vm13  ;;  %vm519_vm15 = vcmask 834560   ;;  %v18410_v25 = vmov 0  ;;  %v13052_v36 = vld [vmem:[%s18362_s1 + $0x8] ss:$16 sps:$4 sm:$0xff]  }
  0x1c   :  { %v540_v41 = vsel %vm532_vm5, %v10898_v38, 0  ;;  %v211_v50 = vld [vmem:[#allocation2 + $0x10] sm:$0x1]  ;;  %v220_v12 = vld [vmem:[#allocation2 + $0x24] sm:$0x1]  ;;  %v18408_v15 = vsel %vm14483_vm14, 4294967295, %v18407_v15  ;;  %vm14494_vm1 = vmor %vm259_vm11, %vm260_vm12 }
  0x1d   :  { %556 = vmatpush1.bf16.msra.mxu0 %v10892_v33  ;;  %18409 = vst [vmem:[#allocation9_spill] sm:$0xff] %v18408_v15  ;;  %v18411_v25 = vsel %vm14494_vm1, 4294967295, %v18410_v25  ;;  %v13057_v43 = vld [vmem:[%s18362_s1 + $0x24] ss:$16 sps:$4 sm:$0xff]  }
  0x1e   :  { %629 = vmatpush1.bf16.msra.mxu1 %v10894_v34  ;;  %10900 = vmatprep.subr.msk.bf16.mxu0 %vm532_vm5, %v10897_v35  ;;  %18412 = vst [vmem:[#allocation10_spill] sm:$0xff] %v18411_v25  ;;  %v13049_v35 = vld [vmem:[%s18362_s1] ss:$16 sps:$4 sm:$0xff]  }
  0x1f   :  { %10905 = vmatprep.subr.msk.bf16.mxu1 %vm532_vm5, %v10899_v37 }
  0x21   :  { %558 = vmatpush1.bf16.msra.mxu0 %v534_v39 }
  0x22   :  { %631 = vmatpush1.bf16.msra.mxu1 %v540_v41  ;;  %865 = vmatprep.subr.bf16.mxu0 %v13051_v40 }
  0x23   :  { %938 = vmatprep.subr.bf16.mxu1 %v13054_v42 }
  0x7a   :  { %v170_v46 = vpop.permute.xlu0 %169 }
  0x7b   :  { %v203_v47 = vsel %vm14444_vm8, %v170_v46, %v202_v44  ;;  %v174_v48 = vpop.permute.xlu1 %173  ;;  %v13060_v44 = vld [vmem:[%s18362_s1 + $0x2c] ss:$16 sps:$4 sm:$0xff]  }
  0x7c   :  { %204 = vst [vmem:[#allocation2] sm:$0xf] %v203_v47  ;;  %207 = vst.msk [vmem:[#allocation2 + $0x8] sm:$0xf] %vm199_vm6, %v174_v48 }
  0x7e   :  { %v172_v49 = vpop.permute.xlu0 %171 }
  0x7f   :  { %206 = vst.msk [vmem:[#allocation2 + $0x4] sm:$0xf] %vm199_vm6, %v172_v49  ;;  %v176_v51 = vpop.permute.xlu1 %175 }
  0x80   :  { %208 = vst.msk [vmem:[#allocation2 + $0xc] sm:$0xf] %vm199_vm6, %v176_v51 }
  0x82   :  { %v178_v53 = vpop.permute.xlu0 %177 }
  0x83   :  { %v212_v54 = vsel %vm14449_vm10, %v178_v53, %v211_v50  ;;  %v14460_v55 = vld [vmem:[#allocation2] sm:$0xf]  ;;  %v180_v56 = vpop.permute.xlu1 %179  ;;  %v14462_v57 = vld [vmem:[#allocation2 + $0x8] sm:$0xf] }
  0x84   :  { %213 = vst [vmem:[#allocation2 + $0x10] sm:$0x1] %v212_v54  ;;  %v263_v58 = vshrl.u32 %v14460_v55, 16  ;;  %v266_v59 = vshll.u32 %v14460_v55, 16  ;;  %v215_v60 = vsel %vm14444_vm8, %v180_v56, %v214_v52  ;;  %v282_v61 = vshll.u32 %v14462_v57, 16 }
  0x85   :  { %v286_v62 = vshrl.u32 %v14462_v57, 16  ;;  %v14470_v63 = vld [vmem:[#allocation2] sm:$0xe]  ;;  %216 = vst [vmem:[#allocation2 + $0x14] sm:$0xf] %v215_v60  ;;  %v1025_v11 = vrot.slane %v14462_v57, 5 }
  0x86   :  { %v182_v0 = vpop.permute.xlu0 %181  ;;  %v14472_v2 = vld [vmem:[#allocation2 + $0x4] sm:$0xf]  ;;  %v265_v3 = vrot.slane %v263_v58, 4  ;;  %v268_v4 = vrot.slane %v266_v59, 5  ;;  %v284_v7 = vrot.slane %v282_v61, 5  ;;  %v10952_v24 = vrot.slane %v14470_v63, 9 }
  0x87   :  { %217 = vst.msk [vmem:[#allocation2 + $0x18] sm:$0xf] %vm199_vm6, %v182_v0  ;;  %v272_v5 = vshll.u32 %v14472_v2, 16  ;;  %v276_v6 = vshrl.u32 %v14472_v2, 16  ;;  %v1022_v8 = vrot.slane %v14472_v2, 5  ;;  %v184_v9 = vpop.permute.xlu1 %183  ;;  %v288_v14 = vrot.slane %v286_v62, 4 }
  0x88   :  { %v269_v10 = vor.u32 %v268_v4, %v265_v3  ;;  %v14479_v13 = vld [vmem:[#allocation2 + $0xc] sm:$0xf]  ;;  %218 = vst.msk [vmem:[#allocation2 + $0x1c] sm:$0xf] %vm199_vm6, %v184_v9  ;;  %v1027_v34 = vrot.slane %v1025_v11, 4 }
  0x89   :  { %v274_v16 = vrot.slane %v272_v5, 5  ;;  %v278_v17 = vrot.slane %v276_v6, 4  ;;  %v292_v18 = vshll.u32 %v14479_v13, 16  ;;  %v296_v20 = vshrl.u32 %v14479_v13, 16  ;;  %v13055_v59 = vld [vmem:[%s18362_s1 + $0x20] ss:$16 sps:$4 sm:$0xff]  }
  0x8a   :  { %v186_v21 = vpop.permute.xlu0 %185  ;;  %v270_v22 = vrot.slane %v269_v10, 4  ;;  %v289_v23 = vor.u32 %v288_v14, %v284_v7  ;;  %v1024_v30 = vrot.slane %v1022_v8, 4  ;;  %v13058_v60 = vld [vmem:[%s18362_s1 + $0x28] ss:$16 sps:$4 sm:$0xff]   ;;  %v1023_v63 = vsel %vm14483_vm14, %v10952_v24, %v1022_v8  ;;  %v13063_v3 = vld [vmem:[%s18362_s1 + $0x44] ss:$16 sps:$4 sm:$0xff]  }
  0x8b   :  { %219 = vst.msk [vmem:[#allocation2 + $0x20] sm:$0xf] %vm199_vm6, %v186_v21  ;;  %v279_v26 = vor.u32 %v278_v17, %v274_v16  ;;  %v14498_v27 = vld [vmem:[#allocation2 + $0x10] sm:$0x1]  ;;  %v14500_v28 = vrot.slane %v292_v18, 5  ;;  %v298_v29 = vrot.slane %v296_v20, 4  ;;  %v188_v31 = vpop.permute.xlu1 %187 }
  0x8c   :  { %v14502_v32 = vrot.slane %v289_v23, 4  ;;  %v302_v33 = vshll.u32 %v14498_v27, 16  ;;  %v221_v38 = vsel %vm14449_vm10, %v188_v31, %v220_v12  ;;  %v14514_v40 = vld [vmem:[#allocation2 + $0x14] sm:$0xf]  ;;  %v1026_v41 = vsel %vm14483_vm14, %v1024_v30, %v1025_v11  ;;  %v13066_v4 = vld [vmem:[%s18362_s1 + $0x4c] ss:$16 sps:$4 sm:$0xff]  }
  0x8d   :  { %v280_v37 = vrot.slane %v279_v26, 4  ;;  %v299_v39 = vor.u32 %v298_v29, %v14500_v28  ;;  %v275_v42 = vsel %vm14494_vm1, %v270_v22, %v274_v16  ;;  %222 = vst [vmem:[#allocation2 + $0x24] sm:$0x1] %v221_v38  ;;  %v307_v47 = vshrl.u32 %v14514_v40, 16  ;;  %v13061_v17 = vld [vmem:[%s18362_s1 + $0x40] ss:$16 sps:$4 sm:$0xff]  }
  0x8e   :  { %v304_v45 = vrot.slane %v302_v33, 5  ;;  %v14526_v46 = vld [vmem:[#allocation2 + $0x18] sm:$0xf]  ;;  %v310_v48 = vshll.u32 %v14514_v40, 16  ;;  %v1028_v0 = vrot.slane %v14479_v13, 5  ;;  %v14557_v6 = vcombine.low %v1023_v63, %v1026_v41 }
  0x8f   :  { %v285_v49 = vsel %vm14494_vm1, %v280_v37, %v284_v7  ;;  %v300_v50 = vrot.slane %v299_v39, 4  ;;  %v316_v51 = vshll.u32 %v14526_v46, 16  ;;  %v320_v52 = vshrl.u32 %v14526_v46, 16  ;;  %v14534_v54 = vld [vmem:[#allocation2 + $0x1c] sm:$0xf] }
  0x90   :  { %v10868_v53 = vcombine.low %v275_v42, %v285_v49  ;;  %v309_v56 = vrot.slane %v307_v47, 4  ;;  %v312_v58 = vrot.slane %v310_v48, 5  ;;  %v1012_v7 = vld [vmem:[#allocation2 + $0x14] sm:$0xe]  ;;  %v295_v8 = vsel %vm14494_vm1, %v14502_v32, %v14500_v28  ;;  %v13064_v18 = vld [vmem:[%s18362_s1 + $0x48] ss:$16 sps:$4 sm:$0xff]  }
  0x91   :  { %v14542_v61 = vrot.slane %v316_v51, 5  ;;  %v322_v62 = vrot.slane %v320_v52, 4  ;;  %v305_v9 = vsel %vm14494_vm1, %v300_v50, %v304_v45  ;;  %v326_v12 = vshll.u32 %v14534_v54, 16  ;;  %v13069_v24 = vld [vmem:[%s18362_s1 + $0x64] ss:$16 sps:$4 sm:$0xff]  }
  0x92   :  { %10901 = vmatmul.mubr.msk.bf16.vlgmr.msra.gmra.mrb[0].mxu0 %vm519_vm15, %v10868_v53  ;;  %10906 = vmatmul.mubr.msk.bf16.vlgmr.msra.gmra.mrb[0].mxu1 %vm519_vm15, %v10868_v53  ;;  %v14555_v5 = vld [vmem:[#allocation2 + $0x20] sm:$0xf]  ;;  %v313_v10 = vor.u32 %v312_v58, %v309_v56  ;;  %v330_v14 = vshrl.u32 %v14534_v54, 16  ;;  %v1029_v16 = vsel %vm14483_vm14, %v1027_v34, %v1028_v0  ;;  %v1030_v23 = vrot.slane %v1028_v0, 4  ;;  %v13075_v42 = vld [vmem:[%s18362_s1 + $0x84] ss:$16 sps:$4 sm:$0xff]  }
  0x93   :  { %866 = vmatpush1.bf16.msra.mxu0 %v13049_v35  ;;  %939 = vmatpush1.bf16.msra.mxu1 %v13052_v36  ;;  %v323_v11 = vor.u32 %v322_v62, %v14542_v61  ;;  %v336_v21 = vshll.u32 %v14555_v5, 16  ;;  %v340_v22 = vshrl.u32 %v14555_v5, 16  ;;  %v1031_v26 = vrot.slane %v14498_v27, 5  ;;  %v13067_v36 = vld [vmem:[%s18362_s1 + $0x60] ss:$16 sps:$4 sm:$0xff]   ;;  %v14620_v56 = vld [vmem:[#allocation3 + $0xc] sm:$0xff] }
  0x94   :  { %867 = vmatprep.subr.bf16.mxu0 %v13057_v43  ;;  %940 = vmatprep.subr.bf16.mxu1 %v13060_v44  ;;  %v14578_v20 = vld [vmem:[#allocation2 + $0x24] sm:$0x1]  ;;  %v10869_v28 = vcombine.low %v295_v8, %v305_v9  ;;  %v314_v29 = vrot.slane %v313_v10, 4  ;;  %v10953_v30 = vrot.slane %v1012_v7, 9  ;;  %v1035_v31 = vrot.slane %v14526_v46, 5 }
  0x95   :  { %587 = vmatprep.mubr.bf16.mxu0 %v14149_v1  ;;  %660 = vmatprep.mubr.bf16.mxu1 %v14149_v1  ;;  %v13072_v1 = vld [vmem:[%s18362_s1 + $0x6c] ss:$16 sps:$4 sm:$0xff]   ;;  %v324_v32 = vrot.slane %v323_v11, 4  ;;  %v328_v33 = vrot.slane %v326_v12, 5  ;;  %v332_v34 = vrot.slane %v330_v14, 4  ;;  %v1032_v35 = vsel %vm14483_vm14, %v1030_v23, %v1031_v26 }
  0x96   :  { %v13070_v27 = vld [vmem:[%s18362_s1 + $0x68] ss:$16 sps:$4 sm:$0xff]   ;;  %v14598_v37 = vrot.slane %v336_v21, 5  ;;  %v342_v38 = vrot.slane %v340_v22, 4  ;;  %v14600_v39 = vcombine.low %v1029_v16, %v1032_v35  ;;  %v1037_v41 = vrot.slane %v1035_v31, 4 }
  0x97   :  { %868 = vmatpush1.bf16.msra.mxu0 %v13055_v59  ;;  %941 = vmatpush1.bf16.msra.mxu1 %v13058_v60  ;;  %v13078_v43 = vld [vmem:[%s18362_s1 + $0x8c] ss:$16 sps:$4 sm:$0xff]   ;;  %v1036_v44 = vsel %vm14483_vm14, %v10953_v30, %v1035_v31  ;;  %v1038_v45 = vrot.slane %v14534_v54, 5  ;;  %v1041_v47 = vrot.slane %v14555_v5, 5  ;;  %v1044_v48 = vrot.slane %v14578_v20, 5 }
  0x98   :  { %869 = vmatprep.subr.bf16.mxu0 %v13063_v3  ;;  %942 = vmatprep.subr.bf16.mxu1 %v13066_v4  ;;  %v319_v49 = vsel %vm14494_vm1, %v314_v29, %v14542_v61  ;;  %v333_v50 = vor.u32 %v332_v34, %v328_v33  ;;  %v329_v58 = vsel %vm14494_vm1, %v324_v32, %v328_v33  ;;  %v13073_v59 = vld [vmem:[%s18362_s1 + $0x80] ss:$16 sps:$4 sm:$0xff]   ;;  %v13076_v60 = vld [vmem:[%s18362_s1 + $0x88] ss:$16 sps:$4 sm:$0xff]   ;;  %v346_v62 = vshll.u32 %v14578_v20, 16 }
  0x99   :  { %v1039_v51 = vsel %vm14483_vm14, %v1037_v41, %v1038_v45  ;;  %v1040_v52 = vrot.slane %v1038_v45, 4  ;;  %v1043_v53 = vrot.slane %v1041_v47, 4  ;;  %v343_v61 = vor.u32 %v342_v38, %v14598_v37  ;;  %v255_v0 = vld [vmem:[%s18362_s1 + $0xc0] sm:$0x77]  ;;  %v13084_v8 = vld [vmem:[%s18362_s1 + $0xac] ss:$16 sps:$4 sm:$0xff]  }
  0x9a   :  { %10902 = vmatmul.mubr.msk.bf16.gmra.mrb[4].mxu0 %vm519_vm15, %v10869_v28  ;;  %10907 = vmatmul.mubr.msk.bf16.gmra.mrb[4].mxu1 %vm519_vm15, %v10869_v28  ;;  %v14634_v63 = vcombine.low %v1036_v44, %v1039_v51  ;;  %v13081_v7 = vld [vmem:[%s18362_s1 + $0xa4] ss:$16 sps:$4 sm:$0xff]   ;;  %v256_v9 = vld [vmem:[%s18362_s1 + $0xc8] sm:$0x77]  ;;  %v10870_v11 = vcombine.low %v319_v49, %v329_v58  ;;  %v13079_v12 = vld [vmem:[%s18362_s1 + $0xa0] ss:$16 sps:$4 sm:$0xff]   ;;  %v10939_v20 = vcombine.high %v255_v0, %v255_v0 }
  0x9b   :  { %870 = vmatpush1.bf16.msra.mxu0 %v13061_v17  ;;  %943 = vmatpush1.bf16.msra.mxu1 %v13064_v18  ;;  %v1042_v3 = vsel %vm14483_vm14, %v1040_v52, %v1041_v47  ;;  %v1045_v4 = vsel %vm14483_vm14, %v1043_v53, %v1044_v48  ;;  %v13082_v14 = vld [vmem:[%s18362_s1 + $0xa8] ss:$16 sps:$4 sm:$0xff]   ;;  %v334_v16 = vrot.slane %v333_v50, 4  ;;  %v344_v17 = vrot.slane %v343_v61, 4  ;;  %v13092_v26 = vld [vmem:[%s18362_s1 + $0x1a4] ss:$16 sps:$4 sm:$0xff]  }
  0x9c   :  { %871 = vmatprep.subr.bf16.mxu0 %v13069_v24  ;;  %944 = vmatprep.subr.bf16.mxu1 %v13072_v1  ;;  %v14652_v10 = vcombine.low %v1042_v3, %v1045_v4  ;;  %v348_v18 = vrot.slane %v346_v62, 5  ;;  %v10941_v21 = vcombine.high %v256_v9, %v256_v9  ;;  %v10938_v22 = vcombine.low %v255_v0, %v255_v0  ;;  %v13095_v28 = vld [vmem:[%s18362_s1 + $0x1ac] ss:$16 sps:$4 sm:$0xff]   ;;  %v13090_v32 = vld [vmem:[%s18362_s1 + $0x1a0] ss:$16 sps:$4 sm:$0xff]  }
  0x9d   :  { %597 = vmatprep.mubr.bf16.mxu0 %v14620_v56  ;;  %670 = vmatprep.mubr.bf16.mxu1 %v14620_v56  ;;  %v10940_v23 = vcombine.low %v256_v9, %v256_v9  ;;  %v339_v24 = vsel %vm14494_vm1, %v334_v16, %v14598_v37  ;;  %v13093_v33 = vld [vmem:[%s18362_s1 + $0x1a8] ss:$16 sps:$4 sm:$0xff]   ;;  %v13098_v34 = vld [vmem:[%s18362_s1 + $0x1c4] ss:$16 sps:$4 sm:$0xff]   ;;  %v13101_v35 = vld [vmem:[%s18362_s1 + $0x1cc] ss:$16 sps:$4 sm:$0xff]   ;;  %v10911_v44 = vcombine.low %v14462_v57, %v14479_v13 }
  0x9e   :  { %v349_v1 = vsel %vm14494_vm1, %v344_v17, %v348_v18  ;;  %v854_v30 = vsel %vm532_vm5, %v10938_v22, 0  ;;  %v13099_v37 = vld [vmem:[%s18362_s1 + $0x1c8] ss:$16 sps:$4 sm:$0xff]   ;;  %v13105_v38 = vld [vmem:[%s18362_s1 + $0x1e4] ss:$16 sps:$4 sm:$0xff]   ;;  %v10912_v58 = vcombine.low %v14514_v40, %v14526_v46  ;;  %v10913_v0 = vcombine.low %v14534_v54, %v14555_v5 }
  0x9f   :  { %872 = vmatpush1.bf16.msra.mxu0 %v13067_v36  ;;  %945 = vmatpush1.bf16.msra.mxu1 %v13070_v27  ;;  %v10871_v29 = vcombine.low %v339_v24, %v349_v1  ;;  %v860_v31 = vsel %vm532_vm5, %v10940_v23, 0  ;;  %v10910_v36 = vcombine.low %v14460_v55, %v14472_v2  ;;  %v13096_v27 = vld [vmem:[%s18362_s1 + $0x1c0] ss:$16 sps:$4 sm:$0xff]   ;;  %v13108_v55 = vld [vmem:[%s18362_s1 + $0x1ec] ss:$16 sps:$4 sm:$0xff]  }
  0xa0   :  { %873 = vmatprep.subr.bf16.mxu0 %v13075_v42  ;;  %946 = vmatprep.subr.bf16.mxu1 %v13078_v43  ;;  %v13103_v2 = vld [vmem:[%s18362_s1 + $0x1e0] ss:$16 sps:$4 sm:$0xff]   ;;  %v13106_v41 = vld [vmem:[%s18362_s1 + $0x1e8] ss:$16 sps:$4 sm:$0xff]   ;;  %v13111_v42 = vld [vmem:[%s18362_s1 + $0x204] ss:$16 sps:$4 sm:$0xff]  }
  0xa1   :  { %v13114_v43 = vld [vmem:[%s18362_s1 + $0x20c] ss:$16 sps:$4 sm:$0xff]   ;;  %v13109_v45 = vld [vmem:[%s18362_s1 + $0x200] ss:$16 sps:$4 sm:$0xff]   ;;  %v13112_v47 = vld [vmem:[%s18362_s1 + $0x208] ss:$16 sps:$4 sm:$0xff]  }
  0xa2   :  { %10903 = vmatmul.mubr.msk.bf16.gmra.mrb[8].mxu0 %vm519_vm15, %v10870_v11  ;;  %10908 = vmatmul.mubr.msk.bf16.gmra.mrb[8].mxu1 %vm519_vm15, %v10870_v11  ;;  %v13118_v48 = vld [vmem:[%s18362_s1 + $0x224] ss:$16 sps:$4 sm:$0xff]   ;;  %v13121_v57 = vld [vmem:[%s18362_s1 + $0x22c] ss:$16 sps:$4 sm:$0xff]   ;;  %v13116_v13 = vld [vmem:[%s18362_s1 + $0x220] ss:$16 sps:$4 sm:$0xff]  }
  0xa3   :  { %874 = vmatpush1.bf16.msra.mxu0 %v13073_v59  ;;  %947 = vmatpush1.bf16.msra.mxu1 %v13076_v60  ;;  %v13119_v49 = vld [vmem:[%s18362_s1 + $0x228] ss:$16 sps:$4 sm:$0xff]   ;;  %v10978_v50 = vld [vmem:[%s18362_s1 + $0x260] sm:$0x77]  ;;  %v13127_v52 = vld [vmem:[%s18362_s1 + $0x24c] ss:$16 sps:$4 sm:$0xff]  }
  0xa4   :  { %607 = vmatprep.mubr.bf16.mxu0 %v14620_v56  ;;  %680 = vmatprep.mubr.bf16.mxu1 %v14620_v56  ;;  %v13124_v51 = vld [vmem:[%s18362_s1 + $0x244] ss:$16 sps:$4 sm:$0xff]   ;;  %v10979_v53 = vld [vmem:[%s18362_s1 + $0x268] sm:$0x77]  ;;  %v13122_v59 = vld [vmem:[%s18362_s1 + $0x240] ss:$16 sps:$4 sm:$0xff]   ;;  %v11009_v61 = vcombine.high %v10978_v50, %v10978_v50  ;;  %v11008_v46 = vcombine.low %v10978_v50, %v10978_v50 }
  0xa5   :  { %875 = vmatprep.subr.bf16.mxu0 %v13081_v7  ;;  %948 = vmatprep.subr.bf16.mxu1 %v13084_v8  ;;  %v13125_v60 = vld [vmem:[%s18362_s1 + $0x248] ss:$16 sps:$4 sm:$0xff]   ;;  %v11011_v40 = vcombine.high %v10979_v53, %v10979_v53  ;;  %v11010_v62 = vcombine.low %v10979_v53, %v10979_v53 }
  0xa6   :  { %v1228_v3 = vsel %vm532_vm5, %v11008_v46, 0 }
  0xa7   :  { %876 = vmatpush1.bf16.msra.mxu0 %v13079_v12  ;;  %949 = vmatpush1.bf16.msra.mxu1 %v13082_v14  ;;  %v1234_v4 = vsel %vm532_vm5, %v11010_v62, 0 }
  0xa8   :  { %10942 = vmatprep.subr.msk.bf16.mxu0 %vm532_vm5, %v10939_v20  ;;  %10947 = vmatprep.subr.msk.bf16.mxu1 %vm532_vm5, %v10941_v21 }
  0xaa   :  { %10904 = vmatmul.mubr.msk.bf16.gmra.mrb[12].mxu0 %vm519_vm15, %v10871_v29  ;;  %10909 = vmatmul.mubr.msk.bf16.gmra.mrb[12].mxu1 %vm519_vm15, %v10871_v29 }
  0xab   :  { %878 = vmatpush1.bf16.msra.mxu0 %v854_v30  ;;  %951 = vmatpush1.bf16.msra.mxu1 %v860_v31 }
  0xac   :  { %897 = vmatprep.mubr.bf16.mxu0 %v14620_v56  ;;  %970 = vmatprep.mubr.bf16.mxu1 %v14620_v56 }
  0xad   :  { %1239 = vmatprep.subr.bf16.mxu0 %v13092_v26  ;;  %1312 = vmatprep.subr.bf16.mxu1 %v13095_v28 }
  0xb2   :  { %10943 = vmatmul.mubr.msk.bf16.vlgmr.msra.gmra.mrb[0].mxu0 %vm519_vm15, %v10910_v36  ;;  %10948 = vmatmul.mubr.msk.bf16.vlgmr.msra.gmra.mrb[0].mxu1 %vm519_vm15, %v10910_v36 }
  0xb3   :  { %1240 = vmatpush1.bf16.msra.mxu0 %v13090_v32  ;;  %1313 = vmatpush1.bf16.msra.mxu1 %v13093_v33 }
  0xb4   :  { %1241 = vmatprep.subr.bf16.mxu0 %v13098_v34  ;;  %1314 = vmatprep.subr.bf16.mxu1 %v13101_v35 }
  0xb5   :  { %907 = vmatprep.mubr.bf16.mxu0 %v14620_v56  ;;  %980 = vmatprep.mubr.bf16.mxu1 %v14620_v56 }
  0xb7   :  { %1242 = vmatpush1.bf16.msra.mxu0 %v13096_v27  ;;  %1315 = vmatpush1.bf16.msra.mxu1 %v13099_v37 }
  0xb8   :  { %1243 = vmatprep.subr.bf16.mxu0 %v13105_v38  ;;  %1316 = vmatprep.subr.bf16.mxu1 %v13108_v55 }
  0xba   :  { %10944 = vmatmul.mubr.msk.bf16.gmra.mrb[4].mxu0 %vm519_vm15, %v10911_v44  ;;  %10949 = vmatmul.mubr.msk.bf16.gmra.mrb[4].mxu1 %vm519_vm15, %v10911_v44 }
  0xbb   :  { %1244 = vmatpush1.bf16.msra.mxu0 %v13103_v2  ;;  %1317 = vmatpush1.bf16.msra.mxu1 %v13106_v41 }
  0xbc   :  { %1245 = vmatprep.subr.bf16.mxu0 %v13111_v42  ;;  %1318 = vmatprep.subr.bf16.mxu1 %v13114_v43 }
  0xbd   :  { %917 = vmatprep.mubr.bf16.mxu0 %v14620_v56  ;;  %990 = vmatprep.mubr.bf16.mxu1 %v14620_v56 }
  0xbf   :  { %1246 = vmatpush1.bf16.msra.mxu0 %v13109_v45  ;;  %1319 = vmatpush1.bf16.msra.mxu1 %v13112_v47 }
  0xc0   :  { %1247 = vmatprep.subr.bf16.mxu0 %v13118_v48  ;;  %1320 = vmatprep.subr.bf16.mxu1 %v13121_v57 }
  0xc2   :  { %10945 = vmatmul.mubr.msk.bf16.gmra.mrb[8].mxu0 %vm519_vm15, %v10912_v58  ;;  %10950 = vmatmul.mubr.msk.bf16.gmra.mrb[8].mxu1 %vm519_vm15, %v10912_v58 }
  0xc3   :  { %1248 = vmatpush1.bf16.msra.mxu0 %v13116_v13  ;;  %1321 = vmatpush1.bf16.msra.mxu1 %v13119_v49 }
  0xc4   :  { %927 = vmatprep.mubr.bf16.mxu0 %v14620_v56  ;;  %1000 = vmatprep.mubr.bf16.mxu1 %v14620_v56 }
  0xc5   :  { %1249 = vmatprep.subr.bf16.mxu0 %v13124_v51  ;;  %1322 = vmatprep.subr.bf16.mxu1 %v13127_v52 }
  0xc7   :  { %1250 = vmatpush1.bf16.msra.mxu0 %v13122_v59  ;;  %1323 = vmatpush1.bf16.msra.mxu1 %v13125_v60 }
  0xc8   :  { %11012 = vmatprep.subr.msk.bf16.mxu0 %vm532_vm5, %v11009_v61  ;;  %11017 = vmatprep.subr.msk.bf16.mxu1 %vm532_vm5, %v11011_v40 }
  0xca   :  { %10946 = vmatmul.mubr.msk.bf16.gmra.mrb[12].mxu0 %vm519_vm15, %v10913_v0  ;;  %10951 = vmatmul.mubr.msk.bf16.gmra.mrb[12].mxu1 %vm519_vm15, %v10913_v0 }
  0xcb   :  { %1252 = vmatpush1.bf16.msra.mxu0 %v1228_v3  ;;  %1325 = vmatpush1.bf16.msra.mxu1 %v1234_v4 }
  0xcc   :  { %1271 = vmatprep.mubr.bf16.mxu0 %v14620_v56  ;;  %1344 = vmatprep.mubr.bf16.mxu1 %v14620_v56 }
  0xd2   :  { %11013 = vmatmul.mubr.msk.bf16.vlgmr.msra.gmra.mrb[0].mxu0 %vm519_vm15, %v14557_v6  ;;  %11018 = vmatmul.mubr.msk.bf16.vlgmr.msra.gmra.mrb[0].mxu1 %vm519_vm15, %v14557_v6 }
  0xd3   :  { %1281 = vmatprep.mubr.bf16.mxu0 %v14620_v56  ;;  %1354 = vmatprep.mubr.bf16.mxu1 %v14620_v56 }
  0xda   :  { %11014 = vmatmul.mubr.msk.bf16.gmra.mrb[4].mxu0 %vm519_vm15, %v14600_v39  ;;  %11019 = vmatmul.mubr.msk.bf16.gmra.mrb[4].mxu1 %vm519_vm15, %v14600_v39 }
  0xdb   :  { %1291 = vmatprep.mubr.bf16.mxu0 %v14620_v56  ;;  %1364 = vmatprep.mubr.bf16.mxu1 %v14620_v56 }
  0xe2   :  { %11015 = vmatmul.mubr.msk.bf16.gmra.mrb[8].mxu0 %vm519_vm15, %v14634_v63  ;;  %11020 = vmatmul.mubr.msk.bf16.gmra.mrb[8].mxu1 %vm519_vm15, %v14634_v63 }
  0xe3   :  { %1301 = vmatprep.mubr.bf16.mxu0 %v14620_v56  ;;  %1374 = vmatprep.mubr.bf16.mxu1 %v14620_v56 }
  0xea   :  { %11016 = vmatmul.mubr.msk.bf16.gmra.mrb[12].mxu0 %vm519_vm15, %v14652_v10  ;;  %11021 = vmatmul.mubr.msk.bf16.gmra.mrb[12].mxu1 %vm519_vm15, %v14652_v10 }
  0xeb   :  { %20 = vsyncpa [#allocation6], 0  ;;  %v1419_v54 = vlaneseq  ;;  %v1417_v56 = vld [vmem:[%s18363_s2] sm:$0xf]  ;;  %v13135_v9 = vld [vmem:[%s18364_s3 + $0x124] ss:$8 sps:$4 sm:$0xff]  }
  0xec   :  { %v13133_v8 = vld [vmem:[%s18364_s3 + $0x120] ss:$8 sps:$4 sm:$0xff]   ;;  %v13138_v10 = vld [vmem:[%s18364_s3 + $0x134] ss:$8 sps:$4 sm:$0xff]   ;;  %3075 = vmatprep.subr.bf16.mxu0 %v13135_v9  ;;  %v14150_v16 = vmov 1983009808  }
  0xed   :  { %v14805_v5 = vshrl.u32 %v1419_v54, 7  ;;  %v1538_v17 = vunpack.c.l.s4 %v14150_v16  ;;  %3076 = vmatpush1.bf16.msra.mxu0 %v13133_v8  ;;  %v13136_v20 = vld [vmem:[%s18364_s3 + $0x130] ss:$8 sps:$4 sm:$0xff]   ;;  %v13141_v21 = vld [vmem:[%s18364_s3 + $0x144] ss:$8 sps:$4 sm:$0xff]   ;;  %vm18388_vm3 = vcmask 257024  }
  0xee   :  { %3077 = vmatprep.subr.bf16.mxu0 %v13138_v10  ;;  %v13139_v34 = vld [vmem:[%s18364_s3 + $0x140] ss:$8 sps:$4 sm:$0xff]   ;;  %v14122_v35 = vld [vmem:[#allocation3 + $0xc] sm:$0xff]  ;;  %v13147_v58 = vld [vmem:[%s18364_s3 + $0x164] ss:$8 sps:$4 sm:$0xff]   ;;  %vm18394_vm4 = vcmask 1042434  }
  0xef   :  { %18413 = vst [vmem:[#allocation11_spill] sm:$0xff] %v14805_v5  ;;  %v14808_v6 = vsub.s32 0, %v14805_v5  ;;  %v14811_v39 = vsub.s32 2, %v14805_v5  ;;  %v14817_v63 = vsub.s32 1, %v14805_v5  ;;  %v18377_v7 = vsub.s32 3, %v14805_v5  ;;  %s14151_s21 = smov 16  }
  0xf0   :  { %v1539_v30 = vunpack.c.0.s8 %v1538_v17  ;;  %66 = vst.msk [vmem:[#allocation3 + $0x8] sm:$0xf] %vm18388_vm3, %v14122_v35  ;;  %68 = vst.msk [vmem:[#allocation3 + $0x14] sm:$0xf] %vm18388_vm3, %v14122_v35  ;;  %v13144_v41 = vld [vmem:[%s18364_s3 + $0x154] ss:$8 sps:$4 sm:$0xff]  }
  0xf1   :  { %18414 = vst [vmem:[#allocation12_spill] sm:$0xff] %v14817_v63  ;;  %v14830_v11 = vrot.slane %v1417_v56, %v14808_v6  ;;  %v14833_v12 = vrot.slane %v1417_v56, %v14811_v39  ;;  %v14836_v14 = vrot.slane %v1417_v56, %v14817_v63  ;;  %v14840_v18 = vrot.slane %v1417_v56, %v18377_v7  ;;  %v13142_v52 = vld [vmem:[%s18364_s3 + $0x150] ss:$8 sps:$4 sm:$0xff]   ;;  %v13145_v17 = vld [vmem:[%s18364_s3 + $0x160] ss:$8 sps:$4 sm:$0xff]   ;;  %s14152_s29 = smov 32  }
  0xf2   :  { %3078 = vmatpush1.bf16.msra.mxu0 %v13136_v20  ;;  %73 = vst.msk [vmem:[#allocation3 + $0x2c] sm:$0xf] %vm18388_vm3, %v14122_v35  ;;  %75 = vst.msk [vmem:[#allocation3 + $0x38] sm:$0xf] %vm18388_vm3, %v14122_v35  ;;  %v14867_v13 = vsub.s32 %v1539_v30, %v14805_v5  ;;  %vm18391_vm5 = vcmask 1043459   ;;  %vm18395_vm6 = vcmask 1044484  }
  0xf3   :  { %3079 = vmatprep.subr.bf16.mxu0 %v13141_v21  ;;  %vm18389_vm8 = vcmask 1045509   ;;  %vm18392_vm9 = vcmask 1046534   ;;  %vm18393_vm10 = vcmask 1047559   ;;  %vm18387_vm11 = vcmask 1041409  }
  0xf4   :  { %vm18390_vm12 = vcmask 253952   ;;  %vm18397_vm13 = vcmask 1043584   ;;  %vm18396_vm15 = vcmask 1047556  }
  0xf5   :  { %vm2638_vm3 = vmand %vm18397_vm13, %vm200_vm7  ;;  %vm18439_vm13 = vcmask 1044484  }
  0xf6   :  { %3080 = vmatpush1.bf16.msra.mxu0 %v13139_v34 }
  0xf7   :  { %3081 = vmatprep.subr.bf16.mxu0 %v13144_v41 }
  0xfa   :  { %3082 = vmatpush1.bf16.msra.mxu0 %v13142_v52 }
  0xfb   :  { %3083 = vmatprep.subr.bf16.mxu0 %v13147_v58 }
  0xfe   :  { %3084 = vmatpush1.bf16.msra.mxu0 %v13145_v17 }
 0x1a5   :  { %v1273_v22 = vpop.f32.mrb[0].mxu0  ;;  %v1346_v23 = vpop.f32.mrb[0].mxu1 }
 0x1a6   :  { %v1439_v24 = vadd.f32 %v14830_v11, %v1273_v22  ;;  %v1441_v1 = vadd.f32 %v14833_v12, %v1346_v23  ;;  %v1275_v26 = vpop.f32.mrb[1].mxu0  ;;  %v1348_v28 = vpop.f32.mrb[1].mxu1 }
 0x1a7   :  { %v1440_v29 = vadd.f32 %v14836_v14, %v1275_v26  ;;  %v1442_v31 = vadd.f32 %v14840_v18, %v1348_v28  ;;  %v1277_v32 = vpop.f32.mrb[2].mxu0  ;;  %v1350_v33 = vpop.f32.mrb[2].mxu1 }
 0x1a8   :  { %v1471_v36 = vmax.f32 %v1439_v24, 0.0  ;;  %v1473_v27 = vmax.f32 %v1441_v1, 0.0  ;;  %v1443_v37 = vadd.f32 %v14830_v11, %v1277_v32  ;;  %v1445_v38 = vadd.f32 %v14833_v12, %v1350_v33  ;;  %v1279_v55 = vpop.f32.mrb[3].mxu0  ;;  %v1352_v2 = vpop.f32.mrb[3].mxu1  ;;  %v13150_v1 = vld [vmem:[%s18364_s3 + $0x174] ss:$8 sps:$4 sm:$0xff]  }
 0x1a9   :  { %v1472_v42 = vmax.f32 %v1440_v29, 0.0  ;;  %v1474_v43 = vmax.f32 %v1442_v31, 0.0  ;;  %v1444_v44 = vadd.f32 %v14836_v14, %v1279_v55  ;;  %v1446_v45 = vadd.f32 %v14840_v18, %v1352_v2  ;;  %3085 = vmatprep.subr.bf16.mxu0 %v13150_v1 }
 0x1aa   :  { %v1503_v47 = vmax.f32 %v1471_v36, %v1473_v27  ;;  %v1475_v48 = vmax.f32 %v1443_v37, 0.0  ;;  %v1477_v57 = vmax.f32 %v1445_v38, 0.0  ;;  %v13148_v38 = vld [vmem:[%s18364_s3 + $0x170] ss:$8 sps:$4 sm:$0xff]  }
 0x1ab   :  { %v1504_v49 = vmax.f32 %v1472_v42, %v1474_v43  ;;  %v1476_v50 = vmax.f32 %v1444_v44, 0.0  ;;  %v1478_v51 = vmax.f32 %v1446_v45, 0.0  ;;  %v13153_v43 = vld [vmem:[%s18364_s3 + $0x184] ss:$8 sps:$4 sm:$0xff]   ;;  %3086 = vmatpush1.bf16.msra.mxu0 %v13148_v38  ;;  %v13154_v38 = vld [vmem:[%s18364_s3 + $0x190] ss:$8 sps:$4 sm:$0xff]  }
 0x1ac   :  { %v1505_v53 = vmax.f32 %v1475_v48, %v1477_v57  ;;  %3087 = vmatprep.subr.bf16.mxu0 %v13153_v43 }
 0x1ad   :  { %v1535_v59 = vcombine.low %v1503_v47, %v1504_v49  ;;  %v1536_v60 = vcombine.high %v1503_v47, %v1504_v49  ;;  %v1506_v61 = vmax.f32 %v1476_v50, %v1478_v51  ;;  %v1283_v40 = vpop.f32.mrb[4].mxu0  ;;  %v1356_v46 = vpop.f32.mrb[4].mxu1 }
 0x1ae   :  { %v1447_v62 = vadd.f32 %v14830_v11, %v1283_v40  ;;  %v1449_v0 = vadd.f32 %v14833_v12, %v1356_v46  ;;  %v1285_v3 = vpop.f32.mrb[5].mxu0  ;;  %v1358_v4 = vpop.f32.mrb[5].mxu1 }
 0x1af   :  { %v1543_v54 = vrot.slane %v1535_v59, %v14867_v13  ;;  %v1550_v56 = vrot.slane %v1536_v60, %v14867_v13  ;;  %v1553_v8 = vcombine.low %v1505_v53, %v1506_v61  ;;  %v1554_v9 = vcombine.high %v1505_v53, %v1506_v61  ;;  %v14879_v10 = vpop.f32.mrb[6].mxu0  ;;  %v14881_v16 = vpop.f32.mrb[6].mxu1 }
 0x1b0   :  { %v1479_v20 = vmax.f32 %v1447_v62, 0.0  ;;  %v1481_v21 = vmax.f32 %v1449_v0, 0.0  ;;  %v14887_v22 = vadd.f32 %v14836_v14, %v1285_v3  ;;  %v14889_v23 = vpop.f32.mrb[7].mxu0  ;;  %v14891_v24 = vpop.f32.mrb[7].mxu1  ;;  %v14901_v34 = vadd.f32 %v14840_v18, %v1358_v4  ;;  %v13151_v3 = vld [vmem:[%s18364_s3 + $0x180] ss:$8 sps:$4 sm:$0xff]  }
 0x1b1   :  { %v1551_v26 = vcombine.high %v1543_v54, %v1543_v54  ;;  %v1552_v28 = vcombine.high %v1550_v56, %v1550_v56  ;;  %v11022_v29 = vrot.slane %v1543_v54, 9  ;;  %v11024_v30 = vrot.slane %v1550_v56, 9  ;;  %3088 = vmatpush1.bf16.msra.mxu0 %v13151_v3 }
 0x1b2   :  { %v1561_v31 = vrot.slane %v1553_v8, %v14867_v13  ;;  %v1568_v32 = vrot.slane %v1554_v9, %v14867_v13  ;;  %v14898_v33 = vmax.f32 %v1479_v20, %v1481_v21  ;;  %v1480_v8 = vmax.f32 %v14887_v22, 0.0  ;;  %v13156_v20 = vld [vmem:[%s18364_s3 + $0x194] ss:$8 sps:$4 sm:$0xff]  }
 0x1b3   :  { %v11023_v35 = vrot.slane %v1551_v26, 9  ;;  %v11025_v36 = vrot.slane %v1552_v28, 9  ;;  %v1807_v27 = vmax.f32 %v1543_v54, %v11022_v29  ;;  %v1809_v37 = vmax.f32 %v1550_v56, %v11024_v30  ;;  %3089 = vmatprep.subr.bf16.mxu0 %v13156_v20 }
 0x1b4   :  { %v1569_v55 = vcombine.high %v1561_v31, %v1561_v31  ;;  %v1570_v2 = vcombine.high %v1568_v32, %v1568_v32  ;;  %v11026_v41 = vrot.slane %v1561_v31, 9  ;;  %v11028_v42 = vrot.slane %v1568_v32, 9 }
 0x1b5   :  { %v1808_v44 = vmax.f32 %v1551_v26, %v11023_v35  ;;  %v1810_v45 = vmax.f32 %v1552_v28, %v11025_v36  ;;  %v1874_v47 = vrot.slane %v1807_v27, %v14808_v6  ;;  %v1878_v48 = vrot.slane %v1807_v27, %v14811_v39  ;;  %v14911_v57 = vpop.f32.mrb[8].mxu0  ;;  %v14913_v49 = vpop.f32.mrb[8].mxu1  ;;  %3090 = vmatpush1.bf16.msra.mxu0 %v13154_v38 }
 0x1b6   :  { %v1890_v50 = vrot.slane %v1809_v37, %v14808_v6  ;;  %v1894_v51 = vrot.slane %v1809_v37, %v14811_v39  ;;  %v11027_v52 = vrot.slane %v1569_v55, 9  ;;  %v11029_v53 = vrot.slane %v1570_v2, 9  ;;  %v14917_v58 = vpop.f32.mrb[9].mxu0  ;;  %v14919_v59 = vpop.f32.mrb[9].mxu1 }
 0x1b7   :  { %v1882_v60 = vrot.slane %v1808_v44, %v14808_v6  ;;  %v1886_v61 = vrot.slane %v1808_v44, %v14811_v39  ;;  %v1898_v40 = vrot.slane %v1810_v45, %v14808_v6  ;;  %v1902_v46 = vrot.slane %v1810_v45, %v14811_v39  ;;  %v14925_v62 = vpop.f32.mrb[10].mxu0  ;;  %v14927_v0 = vpop.f32.mrb[10].mxu1 }
 0x1b8   :  { %v12524_v4 = vpack.c.bf16 %v1878_v48, %v1874_v47  ;;  %v12526_v54 = vpack.c.bf16 %v1894_v51, %v1890_v50  ;;  %v1811_v56 = vmax.f32 %v1561_v31, %v11026_v41  ;;  %v14933_v9 = vpop.f32.mrb[11].mxu0  ;;  %v14935_v17 = vpop.f32.mrb[11].mxu1  ;;  %v14940_v1 = vmax.f32 %v1569_v55, %v11027_v52 }
 0x1b9   :  { %v12525_v21 = vpack.c.bf16 %v1886_v61, %v1882_v60  ;;  %v14942_v26 = vmax.f32 %v1568_v32, %v11028_v42  ;;  %v1814_v28 = vmax.f32 %v1570_v2, %v11029_v53  ;;  %v14944_v22 = vpack.c.bf16 %v1902_v46, %v1898_v40  ;;  %v13159_v42 = vld [vmem:[%s18364_s3 + $0x1a4] ss:$8 sps:$4 sm:$0xff]  }
 0x1ba   :  { %v2415_v29 = vunpack.c.l.b16 %v12524_v4  ;;  %v2416_v30 = vunpack.c.h.b16 %v12524_v4  ;;  %v2419_v31 = vunpack.c.l.b16 %v12526_v54  ;;  %v2420_v35 = vunpack.c.h.b16 %v12526_v54  ;;  %3091 = vmatprep.subr.bf16.mxu0 %v13159_v42 }
 0x1bb   :  { %v2417_v36 = vunpack.c.l.b16 %v12525_v21  ;;  %v2418_v27 = vunpack.c.h.b16 %v12525_v21  ;;  %v1906_v37 = vrot.slane %v1811_v56, %v14808_v6  ;;  %v1910_v41 = vrot.slane %v1811_v56, %v14811_v39  ;;  %v13157_v21 = vld [vmem:[%s18364_s3 + $0x1a0] ss:$8 sps:$4 sm:$0xff]  }
 0x1bc   :  { %v14950_v55 = vrot.slane %v2415_v29, 7  ;;  %v14952_v32 = vrot.slane %v2419_v31, 5  ;;  %v14954_v2 = vrot.slane %v2416_v30, 7  ;;  %v14964_v45 = vrot.slane %v2420_v35, 5  ;;  %3092 = vmatpush1.bf16.msra.mxu0 %v13157_v21 }
 0x1bd   :  { %v14960_v43 = vrot.slane %v2417_v36, 6  ;;  %v14962_v44 = vrot.slane %v2418_v27, 6  ;;  %v14968_v48 = vpop.f32.mrb[12].mxu0  ;;  %v14970_v50 = vpop.f32.mrb[12].mxu1  ;;  %v1930_v53 = vrot.slane %v1814_v28, %v14808_v6  ;;  %v1934_v60 = vrot.slane %v1814_v28, %v14811_v39 }
 0x1be   :  { %v14978_v61 = vpop.f32.mrb[13].mxu0  ;;  %v14980_v40 = vpop.f32.mrb[13].mxu1  ;;  %v1482_v3 = vmax.f32 %v14901_v34, 0.0  ;;  %v1451_v4 = vadd.f32 %v14830_v11, %v14879_v10  ;;  %v1453_v54 = vadd.f32 %v14833_v12, %v14881_v16  ;;  %v1452_v34 = vadd.f32 %v14836_v14, %v14889_v23 }
 0x1bf   :  { %v14989_v56 = vpop.f32.mrb[14].mxu0  ;;  %v14991_v20 = vpop.f32.mrb[14].mxu1  ;;  %v14996_v28 = vpack.c.bf16 %v1934_v60, %v1930_v53  ;;  %v1454_v10 = vadd.f32 %v14840_v18, %v14891_v24  ;;  %v1455_v16 = vadd.f32 %v14830_v11, %v14911_v57  ;;  %v1457_v27 = vadd.f32 %v14833_v12, %v14913_v49 }
 0x1c0   :  { %v15004_v29 = vpop.f32.mrb[15].mxu0  ;;  %v15006_v30 = vpop.f32.mrb[15].mxu1  ;;  %v1508_v31 = vmax.f32 %v1480_v8, %v1482_v3  ;;  %v1483_v35 = vmax.f32 %v1451_v4, 0.0  ;;  %v1485_v36 = vmax.f32 %v1453_v54, 0.0  ;;  %v15010_v38 = vpack.c.bf16 %v1910_v41, %v1906_v37 }
 0x1c1   :  { %v1484_v53 = vmax.f32 %v1452_v34, 0.0  ;;  %v1486_v24 = vmax.f32 %v1454_v10, 0.0  ;;  %v1487_v46 = vmax.f32 %v1455_v16, 0.0  ;;  %v1489_v8 = vmax.f32 %v1457_v27, 0.0 }
 0x1c2   :  { %v1571_v60 = vcombine.low %v14898_v33, %v1508_v31  ;;  %v1572_v57 = vcombine.high %v14898_v33, %v1508_v31  ;;  %v1509_v7 = vmax.f32 %v1483_v35, %v1485_v36  ;;  %v1456_v3 = vadd.f32 %v14836_v14, %v14917_v58 }
 0x1c3   :  { %v1510_v42 = vmax.f32 %v1484_v53, %v1486_v24  ;;  %v1458_v49 = vadd.f32 %v14840_v18, %v14919_v59  ;;  %v15024_v33 = vadd.f32 %v14830_v11, %v14925_v62  ;;  %v15026_v34 = vmax.f32 %v1487_v46, %v1489_v8 }
 0x1c4   :  { %v1579_v41 = vrot.slane %v1571_v60, %v14867_v13  ;;  %v1586_v4 = vrot.slane %v1572_v57, %v14867_v13  ;;  %v1488_v10 = vmax.f32 %v1456_v3, 0.0  ;;  %v1461_v53 = vadd.f32 %v14833_v12, %v14927_v0 }
 0x1c5   :  { %v1589_v54 = vcombine.low %v1509_v7, %v1510_v42  ;;  %v1590_v21 = vcombine.high %v1509_v7, %v1510_v42  ;;  %v1490_v27 = vmax.f32 %v1458_v49, 0.0 }
 0x1c6   :  { %v1587_v16 = vcombine.high %v1579_v41, %v1579_v41  ;;  %v1588_v58 = vcombine.high %v1586_v4, %v1586_v4  ;;  %v11030_v31 = vrot.slane %v1579_v41, 9  ;;  %v11032_v35 = vrot.slane %v1586_v4, 9 }
 0x1c7   :  { %v1597_v59 = vrot.slane %v1589_v54, %v14867_v13  ;;  %v15030_v36 = vrot.slane %v1590_v21, %v14867_v13  ;;  %v1512_v8 = vmax.f32 %v1488_v10, %v1490_v27  ;;  %v1491_v27 = vmax.f32 %v15024_v33, 0.0 }
 0x1c8   :  { %v11031_v62 = vrot.slane %v1587_v16, 9  ;;  %v11033_v24 = vrot.slane %v1588_v58, 9  ;;  %v1815_v60 = vmax.f32 %v1579_v41, %v11030_v31  ;;  %v1817_v7 = vmax.f32 %v1586_v4, %v11032_v35 }
 0x1c9   :  { %v1605_v46 = vcombine.high %v1597_v59, %v1597_v59  ;;  %v11034_v57 = vrot.slane %v1597_v59, 9  ;;  %v11036_v42 = vrot.slane %v15030_v36, 9 }
 0x1ca   :  { %v1816_v3 = vmax.f32 %v1587_v16, %v11031_v62  ;;  %v1818_v37 = vmax.f32 %v1588_v58, %v11033_v24  ;;  %v1938_v54 = vrot.slane %v1815_v60, %v14808_v6  ;;  %v1942_v21 = vrot.slane %v1815_v60, %v14811_v39 }
 0x1cb   :  { %v1954_v49 = vrot.slane %v1817_v7, %v14808_v6  ;;  %v1958_v23 = vrot.slane %v1817_v7, %v14811_v39  ;;  %v11035_v0 = vrot.slane %v1605_v46, 9  ;;  %v1819_v52 = vmax.f32 %v1597_v59, %v11034_v57 }
 0x1cc   :  { %v1946_v41 = vrot.slane %v1816_v3, %v14808_v6  ;;  %v1950_v4 = vrot.slane %v1816_v3, %v14811_v39  ;;  %v1962_v31 = vrot.slane %v1818_v37, %v14808_v6  ;;  %v1966_v10 = vrot.slane %v1818_v37, %v14811_v39 }
 0x1cd   :  { %v12532_v16 = vpack.c.bf16 %v1942_v21, %v1938_v54  ;;  %v12534_v58 = vpack.c.bf16 %v1958_v23, %v1954_v49  ;;  %v15043_v35 = vmax.f32 %v1605_v46, %v11035_v0  ;;  %v15049_v60 = vmax.f32 %v15030_v36, %v11036_v42 }
 0x1ce   :  { %v12533_v62 = vpack.c.bf16 %v1950_v4, %v1946_v41  ;;  %v15046_v24 = vpack.c.bf16 %v1966_v10, %v1962_v31  ;;  %v1970_v59 = vrot.slane %v1819_v52, %v14808_v6  ;;  %v1974_v23 = vrot.slane %v1819_v52, %v14811_v39 }
 0x1cf   :  { %v2431_v7 = vunpack.c.l.b16 %v12532_v16  ;;  %v2432_v57 = vunpack.c.h.b16 %v12532_v16  ;;  %v2435_v3 = vunpack.c.l.b16 %v12534_v58  ;;  %v2436_v51 = vunpack.c.h.b16 %v12534_v58 }
 0x1d0   :  { %v2433_v47 = vunpack.c.l.b16 %v12533_v62  ;;  %v2434_v37 = vunpack.c.h.b16 %v12533_v62  ;;  %v1607_v31 = vcombine.low %v15026_v34, %v1512_v8  ;;  %v1608_v10 = vcombine.high %v15026_v34, %v1512_v8 }
 0x1d1   :  { %v15055_v33 = vrot.slane %v2431_v7, 7  ;;  %v15057_v54 = vrot.slane %v2435_v3, 5  ;;  %v15059_v21 = vrot.slane %v2432_v57, 7  ;;  %v15067_v41 = vrot.slane %v2436_v51, 5 }
 0x1d2   :  { %v15063_v49 = vrot.slane %v2433_v47, 6  ;;  %v15065_v0 = vrot.slane %v2434_v37, 6  ;;  %v1493_v16 = vmax.f32 %v1461_v53, 0.0  ;;  %v1460_v58 = vadd.f32 %v14836_v14, %v14933_v9 }
 0x1d3   :  { %v1462_v47 = vadd.f32 %v14840_v18, %v14935_v17  ;;  %v1463_v51 = vadd.f32 %v14830_v11, %v14968_v48  ;;  %v1465_v62 = vadd.f32 %v14833_v12, %v14970_v50  ;;  %v1615_v7 = vrot.slane %v1607_v31, %v14867_v13 }
 0x1d4   :  { %v1622_v57 = vrot.slane %v1608_v10, %v14867_v13  ;;  %v1513_v3 = vmax.f32 %v1491_v27, %v1493_v16  ;;  %v1464_v34 = vadd.f32 %v14836_v14, %v14978_v61  ;;  %v1492_v53 = vmax.f32 %v1460_v58, 0.0 }
 0x1d5   :  { %v1494_v8 = vmax.f32 %v1462_v47, 0.0  ;;  %v1495_v9 = vmax.f32 %v1463_v51, 0.0  ;;  %v1497_v37 = vmax.f32 %v1465_v62, 0.0  ;;  %v1623_v4 = vcombine.high %v1615_v7, %v1615_v7 }
 0x1d6   :  { %v1624_v17 = vcombine.high %v1622_v57, %v1622_v57  ;;  %v11038_v52 = vrot.slane %v1615_v7, 9  ;;  %v11040_v42 = vrot.slane %v1622_v57, 9  ;;  %v15087_v48 = vpack.c.bf16 %v1974_v23, %v1970_v59 }
 0x1d7   :  { %v1514_v46 = vmax.f32 %v1492_v53, %v1494_v8  ;;  %v15089_v50 = vmax.f32 %v1495_v9, %v1497_v37  ;;  %v1466_v31 = vadd.f32 %v14840_v18, %v14980_v40  ;;  %v11039_v27 = vrot.slane %v1623_v4, 9 }
 0x1d8   :  { %v11041_v10 = vrot.slane %v1624_v17, 9  ;;  %v1823_v16 = vmax.f32 %v1615_v7, %v11038_v52  ;;  %v1825_v61 = vmax.f32 %v1622_v57, %v11040_v42  ;;  %v1496_v51 = vmax.f32 %v1464_v34, 0.0 }
 0x1d9   :  { %v1625_v58 = vcombine.low %v1513_v3, %v1514_v46  ;;  %v1626_v47 = vcombine.high %v1513_v3, %v1514_v46  ;;  %v1498_v62 = vmax.f32 %v1466_v31, 0.0  ;;  %v1824_v5 = vmax.f32 %v1623_v4, %v11039_v27 }
 0x1da   :  { %v1826_v19 = vmax.f32 %v1624_v17, %v11041_v10  ;;  %v2002_v63 = vrot.slane %v1823_v16, %v14808_v6  ;;  %v2006_v59 = vrot.slane %v1823_v16, %v14811_v39  ;;  %v2018_v23 = vrot.slane %v1825_v61, %v14808_v6 }
 0x1db   :  { %v2022_v53 = vrot.slane %v1825_v61, %v14811_v39  ;;  %v1633_v40 = vrot.slane %v1625_v58, %v14867_v13  ;;  %v1640_v8 = vrot.slane %v1626_v47, %v14867_v13  ;;  %v2010_v42 = vrot.slane %v1824_v5, %v14808_v6 }
 0x1dc   :  { %v2014_v46 = vrot.slane %v1824_v5, %v14811_v39  ;;  %v2026_v52 = vrot.slane %v1826_v19, %v14808_v6  ;;  %v2030_v4 = vrot.slane %v1826_v19, %v14811_v39  ;;  %v12540_v7 = vpack.c.bf16 %v2006_v59, %v2002_v63 }
 0x1dd   :  { %v12542_v57 = vpack.c.bf16 %v2022_v53, %v2018_v23  ;;  %v1641_v3 = vcombine.high %v1633_v40, %v1633_v40  ;;  %v1642_v34 = vcombine.high %v1640_v8, %v1640_v8  ;;  %v11042_v37 = vrot.slane %v1633_v40, 9 }
 0x1de   :  { %v12541_v9 = vpack.c.bf16 %v2014_v46, %v2010_v42  ;;  %v11044_v17 = vrot.slane %v1640_v8, 9  ;;  %v1467_v31 = vadd.f32 %v14830_v11, %v14989_v56  ;;  %v2447_v27 = vunpack.c.l.b16 %v12540_v7 }
 0x1df   :  { %v2448_v10 = vunpack.c.h.b16 %v12540_v7  ;;  %v2451_v16 = vunpack.c.l.b16 %v12542_v57  ;;  %v2452_v61 = vunpack.c.h.b16 %v12542_v57  ;;  %v11043_v47 = vrot.slane %v1641_v3, 9 }
 0x1e0   :  { %v2449_v58 = vunpack.c.l.b16 %v12541_v9  ;;  %v2450_v5 = vunpack.c.h.b16 %v12541_v9  ;;  %v11045_v15 = vrot.slane %v1642_v34, 9  ;;  %v15105_v25 = vpack.c.bf16 %v2030_v4, %v2026_v52 }
 0x1e1   :  { %v15107_v19 = vrot.slane %v2447_v27, 7  ;;  %v15109_v63 = vrot.slane %v2451_v16, 5  ;;  %v15111_v59 = vrot.slane %v2448_v10, 7  ;;  %v15115_v53 = vrot.slane %v2452_v61, 5 }
 0x1e2   :  { %v15113_v23 = vrot.slane %v2449_v58, 6  ;;  %v1827_v11 = vmax.f32 %v1633_v40, %v11042_v37  ;;  %v15117_v56 = vmax.f32 %v1641_v3, %v11043_v47  ;;  %v15119_v42 = vrot.slane %v2450_v5, 6 }
 0x1e3   :  { %v15121_v46 = vmax.f32 %v1640_v8, %v11044_v17  ;;  %v1830_v7 = vmax.f32 %v1642_v34, %v11045_v15  ;;  %v1516_v52 = vmax.f32 %v1496_v51, %v1498_v62  ;;  %v1499_v27 = vmax.f32 %v1467_v31, 0.0 }
 0x1e4   :  { %v2034_v4 = vrot.slane %v1827_v11, %v14808_v6  ;;  %v2038_v57 = vrot.slane %v1827_v11, %v14811_v39  ;;  %v2042_v9 = vrot.slane %v15117_v56, %v14808_v6  ;;  %v2046_v10 = vrot.slane %v15117_v56, %v14811_v39 }
 0x1e5   :  { %v2058_v3 = vrot.slane %v1830_v7, %v14808_v6  ;;  %v2062_v8 = vrot.slane %v1830_v7, %v14811_v39  ;;  %v1643_v51 = vcombine.low %v15089_v50, %v1516_v52  ;;  %v1644_v62 = vcombine.high %v15089_v50, %v1516_v52 }
 0x1e6   :  { %v1469_v34 = vadd.f32 %v14833_v12, %v14991_v20  ;;  %v15139_v37 = vpack.c.bf16 %v2038_v57, %v2034_v4  ;;  %v1468_v31 = vadd.f32 %v14836_v14, %v15004_v29  ;;  %v1470_v16 = vadd.f32 %v14840_v18, %v15006_v30 }
 0x1e7   :  { %v15141_v17 = vpack.c.bf16 %v2062_v8, %v2058_v3  ;;  %v1651_v61 = vrot.slane %v1643_v51, %v14867_v13  ;;  %v1658_v58 = vrot.slane %v1644_v62, %v14867_v13  ;;  %v18415_v50 = vrot.slane %v14940_v1, %v14808_v6 }
 0x1e8   :  { %v1501_v5 = vmax.f32 %v1469_v34, 0.0  ;;  %v18416_v12 = vrot.slane %v14940_v1, %v14811_v39  ;;  %v1500_v11 = vmax.f32 %v1468_v31, 0.0  ;;  %v1502_v14 = vmax.f32 %v1470_v16, 0.0 }
 0x1e9   :  { %v18417_v18 = vrot.slane %v14942_v26, %v14808_v6  ;;  %v18418_v29 = vrot.slane %v14942_v26, %v14811_v39  ;;  %v1659_v7 = vcombine.high %v1651_v61, %v1651_v61  ;;  %v1660_v52 = vcombine.high %v1658_v58, %v1658_v58 }
 0x1ea   :  { %v15155_v20 = vpack.c.bf16 %v18416_v12, %v18415_v50  ;;  %v11046_v4 = vrot.slane %v1651_v61, 9  ;;  %v11048_v57 = vrot.slane %v1658_v58, 9  ;;  %v1517_v3 = vmax.f32 %v1499_v27, %v1501_v5 }
 0x1eb   :  { %v15164_v30 = vpack.c.bf16 %v18418_v29, %v18417_v18  ;;  %v1518_v8 = vmax.f32 %v1500_v11, %v1502_v14  ;;  %v2421_v51 = vunpack.c.l.b16 %v14944_v22  ;;  %v11047_v62 = vrot.slane %v1659_v7, 9 }
 0x1ec   :  { %v11049_v34 = vrot.slane %v1660_v52, 9  ;;  %v1831_v31 = vmax.f32 %v1651_v61, %v11046_v4  ;;  %v1833_v16 = vmax.f32 %v1658_v58, %v11048_v57  ;;  %v2422_v26 = vunpack.c.h.b16 %v14944_v22 }
 0x1ed   :  { %v1661_v50 = vcombine.low %v1517_v3, %v1518_v8  ;;  %v1662_v12 = vcombine.high %v1517_v3, %v1518_v8  ;;  %v2423_v18 = vunpack.c.l.b16 %v15010_v38  ;;  %v1832_v29 = vmax.f32 %v1659_v7, %v11047_v62 }
 0x1ee   :  { %v1834_v47 = vmax.f32 %v1660_v52, %v11049_v34  ;;  %v2066_v15 = vrot.slane %v1831_v31, %v14808_v6  ;;  %v2070_v1 = vrot.slane %v1831_v31, %v14811_v39  ;;  %v2082_v27 = vrot.slane %v1833_v16, %v14808_v6 }
 0x1ef   :  { %v2086_v5 = vrot.slane %v1833_v16, %v14811_v39  ;;  %v1669_v61 = vrot.slane %v1661_v50, %v14867_v13  ;;  %v15176_v58 = vrot.slane %v1662_v12, %v14867_v13  ;;  %v2074_v11 = vrot.slane %v1832_v29, %v14808_v6 }
 0x1f0   :  { %v2078_v14 = vrot.slane %v1832_v29, %v14811_v39  ;;  %v2090_v7 = vrot.slane %v1834_v47, %v14808_v6  ;;  %v2094_v52 = vrot.slane %v1834_v47, %v14811_v39  ;;  %v12548_v4 = vpack.c.bf16 %v2070_v1, %v2066_v15 }
 0x1f1   :  { %v12550_v57 = vpack.c.bf16 %v2086_v5, %v2082_v27  ;;  %v1677_v3 = vcombine.high %v1669_v61, %v1669_v61  ;;  %v11050_v8 = vrot.slane %v1669_v61, 9  ;;  %v11052_v31 = vrot.slane %v15176_v58, 9 }
 0x1f2   :  { %v15182_v62 = vpack.c.bf16 %v2078_v14, %v2074_v11  ;;  %v15184_v34 = vpack.c.bf16 %v2094_v52, %v2090_v7  ;;  %v2424_v16 = vunpack.c.h.b16 %v15010_v38  ;;  %v2463_v50 = vunpack.c.l.b16 %v12548_v4 }
 0x1f3   :  { %v2464_v12 = vunpack.c.h.b16 %v12548_v4  ;;  %v2467_v29 = vunpack.c.l.b16 %v12550_v57  ;;  %v2468_v40 = vunpack.c.h.b16 %v12550_v57  ;;  %v11051_v47 = vrot.slane %v1677_v3, 9 }
 0x1f4   :  { %v2465_v15 = vunpack.c.l.b16 %v15182_v62  ;;  %v1835_v1 = vmax.f32 %v1669_v61, %v11050_v8  ;;  %v2425_v27 = vunpack.c.l.b16 %v15155_v20  ;;  %v15191_v11 = vrot.slane %v2463_v50, 7 }
 0x1f5   :  { %v15193_v14 = vrot.slane %v2467_v29, 5  ;;  %v15195_v7 = vrot.slane %v2464_v12, 7  ;;  %v15199_v52 = vrot.slane %v2468_v40, 5  ;;  %v15201_v4 = vmax.f32 %v1677_v3, %v11051_v47 }
 0x1f6   :  { %v15197_v38 = vrot.slane %v2465_v15, 6  ;;  %v15204_v57 = vmax.f32 %v15176_v58, %v11052_v31  ;;  %v2098_v61 = vrot.slane %v1835_v1, %v14808_v6  ;;  %v2102_v8 = vrot.slane %v1835_v1, %v14811_v39 }
 0x1f7   :  { %v2426_v50 = vunpack.c.h.b16 %v15155_v20  ;;  %v2427_v29 = vunpack.c.l.b16 %v15164_v30  ;;  %v2428_v47 = vunpack.c.h.b16 %v15164_v30  ;;  %v2482_v20 = vsel %vm18394_vm4, %v14960_v43, %v14950_v55 }
 0x1f8   :  { %v2118_v31 = vrot.slane %v15204_v57, %v14811_v39  ;;  %v15218_v15 = vpack.c.bf16 %v2102_v8, %v2098_v61  ;;  %v2486_v1 = vrot.slane %v2421_v51, 4  ;;  %v2485_v5 = vsel %vm18391_vm5, %v14952_v32, %v2482_v20  ;;  %v13160_v61 = vld [vmem:[%s18364_s3 + $0x1b0] ss:$8 sps:$4 sm:$0xff]   ;;  %v13162_v32 = vld [vmem:[%s18364_s3 + $0x1b4] ss:$8 sps:$4 sm:$0xff]  }
 0x1f9   :  { %v2489_v40 = vrot.slane %v2423_v18, 3  ;;  %v2492_v12 = vrot.slane %v2425_v27, 2  ;;  %v2495_v3 = vrot.slane %v2427_v29, 1  ;;  %v2500_v30 = vsel %vm18394_vm4, %v14962_v44, %v14954_v2  ;;  %3093 = vmatprep.subr.bf16.mxu0 %v13162_v32 }
 0x1fa   :  { %v2488_v8 = vsel %vm18395_vm6, %v2486_v1, %v2485_v5  ;;  %v2503_v55 = vrot.slane %v2422_v26, 4  ;;  %v2505_v43 = vrot.slane %v2424_v16, 3  ;;  %v2502_v18 = vsel %vm18391_vm5, %v14964_v45, %v2500_v30  ;;  %3094 = vmatpush1.bf16.msra.mxu0 %v13160_v61 }
 0x1fb   :  { %v2491_v51 = vsel %vm18389_vm8, %v2489_v40, %v2488_v8  ;;  %v2507_v27 = vrot.slane %v2426_v50, 2  ;;  %v2509_v29 = vrot.slane %v2428_v47, 1  ;;  %v1606_v22 = vcombine.high %v15030_v36, %v15030_v36 }
 0x1fc   :  { %v2494_v5 = vsel %vm18392_vm9, %v2492_v12, %v2491_v51  ;;  %v2504_v20 = vsel %vm18395_vm6, %v2503_v55, %v2502_v18  ;;  %v18419_v2 = vrot.slane %v15043_v35, %v14808_v6  ;;  %v18420_v44 = vrot.slane %v15043_v35, %v14811_v39  ;;  %v13163_v35 = vld [vmem:[%s18364_s3 + $0x1c0] ss:$8 sps:$4 sm:$0xff]  }
 0x1fd   :  { %v2497_v16 = vsel %vm18393_vm10, %v2495_v3, %v2494_v5  ;;  %v2506_v45 = vsel %vm18389_vm8, %v2505_v43, %v2504_v20  ;;  %v18421_v50 = vrot.slane %v15049_v60, %v14808_v6  ;;  %v18422_v12 = vrot.slane %v15049_v60, %v14811_v39  ;;  %v13165_v3 = vld [vmem:[%s18364_s3 + $0x1c4] ss:$8 sps:$4 sm:$0xff]  }
 0x1fe   :  { %v12537_v26 = vpack.c.bf16 %v18420_v44, %v18419_v2  ;;  %v2437_v36 = vunpack.c.l.b16 %v15046_v24  ;;  %v2508_v47 = vsel %vm18392_vm9, %v2507_v27, %v2506_v45  ;;  %v11037_v1 = vrot.slane %v1606_v22, 9  ;;  %3095 = vmatprep.subr.bf16.mxu0 %v13165_v3 }
 0x1ff   :  { %v12538_v40 = vpack.c.bf16 %v18422_v12, %v18421_v50  ;;  %v2438_v8 = vunpack.c.h.b16 %v15046_v24  ;;  %v2439_v30 = vunpack.c.l.b16 %v15087_v48  ;;  %v2510_v60 = vsel %vm18393_vm10, %v2509_v29, %v2508_v47  ;;  %3096 = vmatpush1.bf16.msra.mxu0 %v13163_v35 }
 0x200   :  { %v2440_v55 = vunpack.c.h.b16 %v15087_v48  ;;  %v2441_v61 = vunpack.c.l.b16 %v12537_v26  ;;  %v2442_v43 = vunpack.c.h.b16 %v12537_v26  ;;  %v2594_v32 = vpack.c.b16 %v2510_v60, %v2497_v16  ;;  %v13166_v16 = vld [vmem:[%s18364_s3 + $0x1d0] ss:$8 sps:$4 sm:$0xff]  }
 0x201   :  { %v1822_v51 = vmax.f32 %v1606_v22, %v11037_v1  ;;  %v2443_v18 = vunpack.c.l.b16 %v12538_v40  ;;  %v2444_v5 = vunpack.c.h.b16 %v12538_v40  ;;  %v18423_v20 = vunpack.c.l.b16 %v14996_v28 }
 0x202   :  { %v2518_v2 = vrot.slane %v2437_v36, 4  ;;  %v2520_v24 = vrot.slane %v2439_v30, 3  ;;  %v2522_v44 = vrot.slane %v2441_v61, 2  ;;  %2600 = vrot.lane.b32.xlu0 %v2594_v32, %s14151_s21  ;;  %v18424_v50 = vunpack.c.h.b16 %v14996_v28 }
 0x203   :  { %v2513_v27 = vsel %vm18387_vm11, %v15055_v33, %v18423_v20  ;;  %v1994_v48 = vrot.slane %v1822_v51, %v14808_v6  ;;  %v1998_v29 = vrot.slane %v1822_v51, %v14811_v39  ;;  %v2524_v26 = vrot.slane %v2443_v18, 1  ;;  %v13168_v33 = vld [vmem:[%s18364_s3 + $0x1d4] ss:$8 sps:$4 sm:$0xff]  }
 0x204   :  { %v2515_v22 = vsel %vm18394_vm4, %v15063_v49, %v2513_v27  ;;  %v2527_v12 = vsel %vm18387_vm11, %v15059_v21, %v18424_v50  ;;  %v2532_v40 = vrot.slane %v2438_v8, 4  ;;  %v2534_v36 = vrot.slane %v2440_v55, 3  ;;  %v13171_v49 = vld [vmem:[%s18364_s3 + $0x1e4] ss:$8 sps:$4 sm:$0xff]   ;;  %3097 = vmatprep.subr.bf16.mxu0 %v13168_v33 }
 0x205   :  { %v2517_v45 = vsel %vm18391_vm5, %v15057_v54, %v2515_v22  ;;  %v12539_v35 = vpack.c.bf16 %v1998_v29, %v1994_v48  ;;  %v2529_v47 = vsel %vm18394_vm4, %v15065_v0, %v2527_v12  ;;  %v2536_v1 = vrot.slane %v2442_v43, 2  ;;  %3098 = vmatpush1.bf16.msra.mxu0 %v13166_v16  ;;  %v13169_v0 = vld [vmem:[%s18364_s3 + $0x1e0] ss:$8 sps:$4 sm:$0xff]   ;;  %v13174_v22 = vld [vmem:[%s18364_s3 + $0x1f4] ss:$8 sps:$4 sm:$0xff]  }
 0x206   :  { %v2519_v3 = vsel %vm18395_vm6, %v2518_v2, %v2517_v45  ;;  %v2531_v28 = vsel %vm18391_vm5, %v15067_v41, %v2529_v47  ;;  %v2538_v21 = vrot.slane %v2444_v5, 1  ;;  %v12545_v8 = vpack.c.bf16 %v2046_v10, %v2042_v9  ;;  %3099 = vmatprep.subr.bf16.mxu0 %v13171_v49 }
 0x207   :  { %v2521_v54 = vsel %vm18389_vm8, %v2520_v24, %v2519_v3  ;;  %2604 = vrot.lane.b32.xlu0 %v12539_v35, %s14151_s21  ;;  %v2533_v60 = vsel %vm18395_vm6, %v2532_v40, %v2531_v28  ;;  %v18425_v41 = vrot.slane %v15121_v46, %v14808_v6  ;;  %v18426_v55 = vrot.slane %v15121_v46, %v14811_v39 }
 0x208   :  { %v2523_v30 = vsel %vm18392_vm9, %v2522_v44, %v2521_v54  ;;  %v2453_v56 = vunpack.c.l.b16 %v15105_v25  ;;  %v2535_v10 = vsel %vm18389_vm8, %v2534_v36, %v2533_v60  ;;  %v2454_v43 = vunpack.c.h.b16 %v15105_v25  ;;  %v13177_v54 = vld [vmem:[%s18364_s3 + $0x204] ss:$8 sps:$4 sm:$0xff]  }
 0x209   :  { %v12546_v61 = vpack.c.bf16 %v18426_v55, %v18425_v41  ;;  %v2525_v9 = vsel %vm18393_vm10, %v2524_v26, %v2523_v30  ;;  %v2455_v32 = vunpack.c.l.b16 %v15139_v37  ;;  %v2537_v51 = vsel %vm18392_vm9, %v2536_v1, %v2535_v10  ;;  %3100 = vmatpush1.bf16.msra.mxu0 %v13169_v0 }
 0x20a   :  { %v2456_v18 = vunpack.c.h.b16 %v15139_v37  ;;  %v2457_v5 = vunpack.c.l.b16 %v12545_v8  ;;  %v2458_v20 = vunpack.c.h.b16 %v12545_v8  ;;  %v2539_v46 = vsel %vm18393_vm10, %v2538_v21, %v2537_v51  ;;  %v13172_v37 = vld [vmem:[%s18364_s3 + $0x1f0] ss:$8 sps:$4 sm:$0xff]   ;;  %3101 = vmatprep.subr.bf16.mxu0 %v13174_v22 }
 0x20b   :  { %v2459_v27 = vunpack.c.l.b16 %v12546_v61  ;;  %v2460_v2 = vunpack.c.h.b16 %v12546_v61  ;;  %v2542_v24 = vsel %vm18394_vm4, %v15113_v23, %v15107_v19  ;;  %v2595_v44 = vpack.c.b16 %v2539_v46, %v2525_v9 }
 0x20c   :  { %v2544_v25 = vsel %vm18391_vm5, %v15109_v63, %v2542_v24  ;;  %v2545_v48 = vrot.slane %v2453_v56, 4  ;;  %v2547_v29 = vrot.slane %v2455_v32, 3  ;;  %v2549_v26 = vrot.slane %v2457_v5, 2  ;;  %v13178_v5 = vld [vmem:[%s18364_s3 + $0x210] ss:$8 sps:$4 sm:$0xff]  }
 0x20d   :  { %v2551_v16 = vrot.slane %v2459_v27, 1  ;;  %v2555_v19 = vsel %vm18394_vm4, %v15119_v42, %v15111_v59  ;;  %v2558_v23 = vrot.slane %v2454_v43, 4  ;;  %2602 = vrot.lane.b32.xlu1 %v2595_v44, %s14151_s21  ;;  %v2560_v45 = vrot.slane %v2456_v18, 3  ;;  %3102 = vmatpush1.bf16.msra.mxu0 %v13172_v37 }
 0x20e   :  { %v2546_v63 = vsel %vm18395_vm6, %v2545_v48, %v2544_v25  ;;  %v2557_v33 = vsel %vm18391_vm5, %v15115_v53, %v2555_v19  ;;  %v2562_v50 = vrot.slane %v2458_v20, 2  ;;  %v2564_v36 = vrot.slane %v2460_v2, 1  ;;  %3103 = vmatprep.subr.bf16.mxu0 %v13177_v54  ;;  %v13180_v20 = vld [vmem:[%s18364_s3 + $0x214] ss:$8 sps:$4 sm:$0xff]  }
 0x20f   :  { %v2548_v12 = vsel %vm18389_vm8, %v2547_v29, %v2546_v63  ;;  %v2559_v40 = vsel %vm18395_vm6, %v2558_v23, %v2557_v33  ;;  %v1678_v49 = vcombine.high %v15176_v58, %v15176_v58  ;;  %v18427_v35 = vrot.slane %v15201_v4, %v14808_v6  ;;  %v13175_v58 = vld [vmem:[%s18364_s3 + $0x200] ss:$8 sps:$4 sm:$0xff]  }
 0x210   :  { %v2550_v59 = vsel %vm18392_vm9, %v2549_v26, %v2548_v12  ;;  %v2561_v42 = vsel %vm18389_vm8, %v2560_v45, %v2559_v40  ;;  %v18428_v53 = vrot.slane %v15201_v4, %v14811_v39  ;;  %v18429_v47 = vrot.slane %v15204_v57, %v14808_v6 }
 0x211   :  { %v2552_v28 = vsel %vm18393_vm10, %v2551_v16, %v2550_v59  ;;  %v2563_v4 = vsel %vm18392_vm9, %v2562_v50, %v2561_v42  ;;  %v11053_v21 = vrot.slane %v1678_v49, 9  ;;  %v2469_v8 = vunpack.c.l.b16 %v15184_v34  ;;  %3104 = vmatpush1.bf16.msra.mxu0 %v13175_v58 }
 0x212   :  { %v12553_v3 = vpack.c.bf16 %v18428_v53, %v18427_v35  ;;  %v12554_v1 = vpack.c.bf16 %v2118_v31, %v18429_v47  ;;  %v18430_v0 = vunpack.c.h.b16 %v15182_v62  ;;  %v2565_v57 = vsel %vm18393_vm10, %v2564_v36, %v2563_v4  ;;  %3105 = vmatprep.subr.bf16.mxu0 %v13180_v20  ;;  %v2663_v4 = vld [vmem:[#allocation3 + $0x18] sm:$0x11] }
 0x213   :  { %v2470_v31 = vunpack.c.h.b16 %v15184_v34  ;;  %v2471_v60 = vunpack.c.l.b16 %v15218_v15  ;;  %v2597_v41 = vpack.c.b16 %v2565_v57, %v2552_v28  ;;  %v1838_v55 = vmax.f32 %v1678_v49, %v11053_v21  ;;  %v2648_v49 = vld [vmem:[#allocation3 + $0x8] sm:$0xf] }
 0x214   :  { %v2582_v30 = vrot.slane %v18430_v0, 6  ;;  %v2472_v61 = vunpack.c.h.b16 %v15218_v15  ;;  %v2473_v56 = vunpack.c.l.b16 %v12553_v3  ;;  %v2474_v9 = vunpack.c.h.b16 %v12553_v3 }
 0x215   :  { %v2475_v10 = vunpack.c.l.b16 %v12554_v1  ;;  %v2476_v43 = vunpack.c.h.b16 %v12554_v1  ;;  %v18431_v32 = vunpack.c.l.b16 %v15141_v17  ;;  %2606 = vrot.lane.b32.xlu1 %v2597_v41, %s14151_s21  ;;  %v2122_v34 = vrot.slane %v1838_v55, %v14808_v6  ;;  %3106 = vmatpush1.bf16.msra.mxu0 %v13178_v5 }
 0x216   :  { %v2126_v51 = vrot.slane %v1838_v55, %v14811_v39  ;;  %v2572_v15 = vrot.slane %v2469_v8, 4  ;;  %v2574_v46 = vrot.slane %v2471_v60, 3  ;;  %v2576_v27 = vrot.slane %v2473_v56, 2  ;;  %v2674_v56 = vld [vmem:[#allocation3 + $0x2c] sm:$0xf] }
 0x217   :  { %v2567_v62 = vsel %vm18387_vm11, %v15191_v11, %v18431_v32  ;;  %v18432_v2 = vunpack.c.h.b16 %v15141_v17  ;;  %v2586_v48 = vrot.slane %v2470_v31, 4  ;;  %v2578_v37 = vrot.slane %v2475_v10, 1  ;;  %v13183_v17 = vld [vmem:[%s18364_s3 + $0x224] ss:$8 sps:$4 sm:$0xff]  }
 0x218   :  { %v2569_v18 = vsel %vm18394_vm4, %v15197_v38, %v2567_v62  ;;  %v12555_v38 = vpack.c.bf16 %v2126_v51, %v2122_v34  ;;  %v2588_v22 = vrot.slane %v2472_v61, 3  ;;  %v2590_v16 = vrot.slane %v2474_v9, 2  ;;  %3128 = vmatprep.subr.bf16.mxu0 %v13183_v17 }
 0x219   :  { %v2571_v11 = vsel %vm18391_vm5, %v15193_v14, %v2569_v18  ;;  %v2581_v24 = vsel %vm18387_vm11, %v15195_v7, %v18432_v2  ;;  %v2592_v63 = vrot.slane %v2476_v43, 1  ;;  %vm2640_vm11 = vsmask.f32 7954 }
 0x21a   :  { %v2573_v44 = vsel %vm18395_vm6, %v2572_v15, %v2571_v11  ;;  %v2583_v25 = vsel %vm18394_vm4, %v2582_v30, %v2581_v24  ;;  %2610 = vrot.lane.b32.xlu1 %v12555_v38, %s14151_s21  ;;  %vm2618_vm4 = vcmask 130048   ;;  %v2679_v11 = vld [vmem:[#allocation3 + $0x3c] sm:$0x11] }
 0x21b   :  { %v2575_v29 = vsel %vm18389_vm8, %v2574_v46, %v2573_v44  ;;  %v2585_v14 = vsel %vm18391_vm5, %v15199_v52, %v2583_v25  ;;  %v15414_v52 = vld [vmem:[#allocation3 + $0xc] sm:$0xff]  ;;  %vm2657_vm5 = vcmask 1040512  }
 0x21c   :  { %v2577_v7 = vsel %vm18392_vm9, %v2576_v27, %v2575_v29  ;;  %v2587_v26 = vsel %vm18395_vm6, %v2586_v48, %v2585_v14  ;;  %71 = vst.msk [vmem:[#allocation3 + $0x20] sm:$0x1] %vm18390_vm12, %v15414_v52  ;;  %77 = vst.msk [vmem:[#allocation3 + $0x44] sm:$0x1] %vm18390_vm12, %v15414_v52  ;;  %vm2646_vm12 = vcmask 125952  }
 0x21d   :  { %v2579_v19 = vsel %vm18393_vm10, %v2578_v37, %v2577_v7  ;;  %v2589_v23 = vsel %vm18389_vm8, %v2588_v22, %v2587_v26  ;;  %vm15426_vm8 = vmand %vm18396_vm15, %vm2640_vm11  ;;  %vm2666_vm15 = vcmask 122880  }
 0x21e   :  { %v2591_v33 = vsel %vm18392_vm9, %v2590_v16, %v2589_v23  ;;  %vm15432_vm9 = vmor %vm15426_vm8, %vm2638_vm3  ;;  %v13867_v23 = vld [vmem:[%s18370_s9 + $0x10] ss:$8 sps:$4 sm:$0xff]  }
 0x21f   :  { %v2593_v45 = vsel %vm18393_vm10, %v2592_v63, %v2591_v33  ;;  %vm2660_vm10 = vsmask.f32 4352  ;;  %vm15438_vm6 = vmand %vm2646_vm12, %vm200_vm7 }
 0x220   :  { %v2598_v50 = vpack.c.b16 %v2593_v45, %v2579_v19  ;;  %vm2658_vm11 = vmand %vm2657_vm5, %vm96_vm0 }
 0x221   :  { %vm15444_vm2 = vmand %vm18439_vm13, %vm2660_vm10  ;;  %vm18446_vm10 = vcmask 1043584   ;;  %vm18447_vm13 = vcmask 1047556  }
 0x222   :  { %2608 = vrot.lane.b32.xlu0 %v2598_v50, %s14151_s21  ;;  %vm15457_vm3 = vmand %vm2666_vm15, %vm96_vm0 }
 0x223   :  { %v2668_v58 = vld [vmem:[#allocation3 + $0x20] sm:$0x1]  ;;  %vm15464_vm5 = vmor %vm15444_vm2, %vm2658_vm11  ;;  %v2682_v15 = vld [vmem:[#allocation3 + $0x44] sm:$0x1]  ;;  %vm3068_vm11 = vcmask 261120  }
 0x224   :  { %vm15475_vm15 = vmor %vm18447_vm13, %vm18446_vm10  ;;  %vm18462_vm13 = vcmask 1046534  }
 0x274   :  { %v2601_v59 = vpop.permute.xlu0 %2600 }
 0x275   :  { %v2612_v42 = vrot.slane %v2601_v59, 4 }
 0x277   :  { %v2619_v53 = vsel %vm2618_vm4, %v2612_v42, %v2601_v59  ;;  %v2649_v3 = vsel %vm15438_vm6, %v2612_v42, %v2648_v49  ;;  %v13181_v49 = vld [vmem:[%s18364_s3 + $0x220] ss:$8 sps:$4 sm:$0xff]   ;;  %v13186_v59 = vld [vmem:[%s18364_s3 + $0x234] ss:$8 sps:$4 sm:$0xff]  }
 0x278   :  { %v15454_v47 = vsel %vm15432_vm9, %v2619_v53, %v15414_v52  ;;  %2650 = vst [vmem:[#allocation3 + $0x8] sm:$0xf] %v2649_v3 }
 0x279   :  { %v2605_v54 = vpop.permute.xlu0 %2604  ;;  %2645 = vst [vmem:[#allocation3] sm:$0xff] %v15454_v47  ;;  %v2734_v55 = vshrl.u32 %v15454_v47, 16  ;;  %v2737_v61 = vshll.u32 %v15454_v47, 16 }
 0x27a   :  { %v2614_v21 = vrot.slane %v2605_v54, 4 }
 0x27b   :  { %v2736_v43 = vrot.slane %v2734_v55, 4  ;;  %v2739_v32 = vrot.slane %v2737_v61, 5 }
 0x27c   :  { %v2621_v8 = vsel %vm2618_vm4, %v2614_v21, %v2605_v54  ;;  %v2669_v0 = vsel %vm15457_vm3, %v2614_v21, %v2668_v58  ;;  %v13184_v58 = vld [vmem:[%s18364_s3 + $0x230] ss:$8 sps:$4 sm:$0xff]   ;;  %v13189_v54 = vld [vmem:[%s18364_s3 + $0x4] ss:$8 sps:$4 sm:$0xff]  }
 0x27d   :  { %v2664_v30 = vsel %vm15464_vm5, %v2621_v8, %v2663_v4  ;;  %2670 = vst [vmem:[#allocation3 + $0x20] sm:$0x1] %v2669_v0  ;;  %v2740_v24 = vor.u32 %v2739_v32, %v2736_v43 }
 0x27e   :  { %2665 = vst [vmem:[#allocation3 + $0x18] sm:$0x11] %v2664_v30 }
 0x27f   :  { %v2603_v57 = vpop.permute.xlu1 %2602  ;;  %v2741_v7 = vrot.slane %v2740_v24, 4  ;;  %v15532_v30 = vld [vmem:[#allocation3 + $0x8] sm:$0xf] }
 0x280   :  { %v2613_v60 = vrot.slane %v2603_v57, 4  ;;  %v2748_v61 = vshrl.u32 %v15532_v30, 16 }
 0x282   :  { %v2620_v41 = vsel %vm2618_vm4, %v2613_v60, %v2603_v57  ;;  %2656 = vst.msk [vmem:[#allocation3 + $0x14] sm:$0xf] %vm2646_vm12, %v2613_v60 }
 0x283   :  { %2654 = vst.msk [vmem:[#allocation3 + $0xc] sm:$0xff] %vm15475_vm15, %v2620_v41 }
 0x285   :  { %v15488_v51 = vld [vmem:[#allocation3 + $0x18] sm:$0x11] }
 0x286   :  { %v2767_v38 = vshll.u32 %v15488_v51, 16 }
 0x287   :  { %v2607_v9 = vpop.permute.xlu1 %2606 }
 0x288   :  { %v2615_v10 = vrot.slane %v2607_v9, 4  ;;  %v2769_v16 = vrot.slane %v2767_v38, 5  ;;  %v15545_v38 = vld [vmem:[#allocation3 + $0x20] sm:$0x1] }
 0x289   :  { %v15522_v3 = vld [vmem:[#allocation3 + $0x14] sm:$0xf] }
 0x28a   :  { %v2622_v62 = vsel %vm2618_vm4, %v2615_v10, %v2607_v9  ;;  %v2675_v34 = vsel %vm15438_vm6, %v2615_v10, %v2674_v56  ;;  %v15495_v20 = vld [vmem:[#allocation3 + $0xc] sm:$0xff]  ;;  %v2757_v4 = vshll.u32 %v15522_v3, 16  ;;  %v2771_v21 = vshrl.u32 %v15522_v3, 16 }
 0x28b   :  { %v15493_v18 = vsel %vm15432_vm9, %v2622_v62, %v15414_v52  ;;  %2676 = vst [vmem:[#allocation3 + $0x2c] sm:$0xf] %v2675_v34  ;;  %v2743_v27 = vshll.u32 %v15495_v20, 16  ;;  %v2761_v2 = vshrl.u32 %v15495_v20, 16  ;;  %v2751_v56 = vshll.u32 %v15532_v30, 16 }
 0x28c   :  { %v2611_v5 = vpop.permute.xlu1 %2610  ;;  %2673 = vst [vmem:[#allocation3 + $0x24] sm:$0xff] %v15493_v18  ;;  %v2782_v42 = vshrl.u32 %v15493_v18, 16  ;;  %v2785_v53 = vshll.u32 %v15493_v18, 16  ;;  %v2759_v9 = vrot.slane %v2757_v4, 5  ;;  %v2773_v10 = vrot.slane %v2771_v21, 4 }
 0x28d   :  { %v2617_v46 = vrot.slane %v2611_v5, 4  ;;  %v2745_v48 = vrot.slane %v2743_v27, 5  ;;  %v2763_v29 = vrot.slane %v2761_v2, 4  ;;  %v13187_v4 = vld [vmem:[%s18364_s3] ss:$8 sps:$4 sm:$0xff]  }
 0x28e   :  { %v2784_v8 = vrot.slane %v2782_v42, 4  ;;  %v2787_v0 = vrot.slane %v2785_v53, 5 }
 0x28f   :  { %v2624_v44 = vsel %vm2618_vm4, %v2617_v46, %v2611_v5  ;;  %v2683_v25 = vsel %vm15457_vm3, %v2617_v46, %v2682_v15  ;;  %v2764_v14 = vor.u32 %v2763_v29, %v2745_v48  ;;  %v2746_v63 = vsel %vm14494_vm1, %v2741_v7, %v2745_v48 }
 0x290   :  { %v2680_v37 = vsel %vm15464_vm5, %v2624_v44, %v2679_v11  ;;  %2684 = vst [vmem:[#allocation3 + $0x44] sm:$0x1] %v2683_v25  ;;  %v2788_v43 = vor.u32 %v2787_v0, %v2784_v8  ;;  %v2750_v11 = vrot.slane %v2748_v61, 4  ;;  %v2753_v46 = vrot.slane %v2751_v56, 5  ;;  %v13190_v56 = vld [vmem:[%s18364_s3 + $0x10] ss:$8 sps:$4 sm:$0xff]  }
 0x291   :  { %2681 = vst [vmem:[#allocation3 + $0x3c] sm:$0x11] %v2680_v37  ;;  %v2765_v26 = vrot.slane %v2764_v14, 4  ;;  %v2774_v44 = vor.u32 %v2773_v10, %v2759_v9  ;;  %v2777_v7 = vshll.u32 %v15545_v38, 16  ;;  %v13195_v10 = vld [vmem:[%s18364_s3 + $0x24] ss:$8 sps:$4 sm:$0xff]  }
 0x292   :  { %v2789_v27 = vrot.slane %v2788_v43, 4  ;;  %v15553_v14 = vld [vmem:[#allocation3 + $0x2c] sm:$0xf] }
 0x293   :  { %v2770_v33 = vsel %vm14494_vm1, %v2765_v26, %v2769_v16  ;;  %v2754_v26 = vor.u32 %v2753_v46, %v2750_v11  ;;  %v2775_v16 = vrot.slane %v2774_v44, 4  ;;  %v13198_v11 = vld [vmem:[%s18364_s3 + $0x34] ss:$8 sps:$4 sm:$0xff]   ;;  %v11167_v46 = vcombine.high %v15454_v47, %v15495_v20 }
 0x294   :  { %v2609_v22 = vpop.permute.xlu0 %2608  ;;  %v11122_v45 = vcombine.low %v2746_v63, %v2770_v33  ;;  %v11123_v50 = vcombine.high %v2746_v63, %v2770_v33  ;;  %v2799_v63 = vshll.u32 %v15553_v14, 16  ;;  %v13204_v44 = vld [vmem:[%s18364_s3 + $0x54] ss:$8 sps:$4 sm:$0xff]  }
 0x295   :  { %v2616_v17 = vrot.slane %v2609_v22, 4 }
 0x296   :  { %3107 = vmatprep.mubr.bf16.mxu0 %v11123_v50  ;;  %v2779_v50 = vrot.slane %v2777_v7, 5  ;;  %v13211_v7 = vld [vmem:[%s18364_s3 + $0x80] ss:$8 sps:$4 sm:$0xff]  }
 0x297   :  { %v2623_v19 = vsel %vm2618_vm4, %v2616_v17, %v2609_v22  ;;  %2678 = vst.msk [vmem:[#allocation3 + $0x38] sm:$0xf] %vm2646_vm12, %v2616_v17  ;;  %3108 = vmatmul.mubr.bf16.vlgmr.msra.gmra.mrb[16].mxu0 %v11122_v45 }
 0x298   :  { %2677 = vst.msk [vmem:[#allocation3 + $0x30] sm:$0xff] %vm15475_vm15, %v2623_v19  ;;  %3129 = vmatpush1.bf16.msra.mxu0 %v13181_v49  ;;  %v15536_v60 = vld [vmem:[#allocation3 + $0x3c] sm:$0x11]  ;;  %v2796_v19 = vshrl.u32 %v15553_v14, 16  ;;  %v2755_v49 = vrot.slane %v2754_v26, 4  ;;  %v2780_v42 = vsel %vm14494_vm1, %v2775_v16, %v2779_v50 }
 0x299   :  { %3130 = vmatprep.subr.bf16.mxu0 %v13186_v59  ;;  %v2815_v34 = vshll.u32 %v15536_v60, 16  ;;  %v15559_v59 = vld [vmem:[#allocation3 + $0x44] sm:$0x1]  ;;  %v13216_v26 = vld [vmem:[%s18364_s3 + $0x94] ss:$8 sps:$4 sm:$0xff]  }
 0x29a   :  { %v2798_v53 = vrot.slane %v2796_v19, 4  ;;  %v2760_v21 = vsel %vm14494_vm1, %v2755_v49, %v2759_v9  ;;  %v2825_v8 = vshll.u32 %v15559_v59, 16  ;;  %v13214_v16 = vld [vmem:[%s18364_s3 + $0x90] ss:$8 sps:$4 sm:$0xff]   ;;  %v13219_v19 = vld [vmem:[%s18364_s3 + $0xa4] ss:$8 sps:$4 sm:$0xff]  }
 0x29b   :  { %v2817_v24 = vrot.slane %v2815_v34, 5  ;;  %v11124_v0 = vcombine.low %v2760_v21, %v2780_v42  ;;  %v13225_v50 = vld [vmem:[%s18364_s3 + $0xc4] ss:$8 sps:$4 sm:$0xff]   ;;  %v13223_v49 = vld [vmem:[%s18364_s3 + $0xc0] ss:$8 sps:$4 sm:$0xff]  }
 0x29c   :  { %3131 = vmatpush1.bf16.msra.mxu0 %v13184_v58  ;;  %v2801_v58 = vrot.slane %v2799_v63, 5  ;;  %v2827_v9 = vrot.slane %v2825_v8, 5  ;;  %v13217_v63 = vld [vmem:[%s18364_s3 + $0xa0] ss:$8 sps:$4 sm:$0xff]   ;;  %v13228_v42 = vld [vmem:[%s18364_s3 + $0xd4] ss:$8 sps:$4 sm:$0xff]  }
 0x29d   :  { %3397 = vmatprep.subr.bf16.mxu0 %v13189_v54  ;;  %v13232_v21 = vld [vmem:[%s18364_s3 + $0xf0] ss:$8 sps:$4 sm:$0xff]   ;;  %v13237_v8 = vld [vmem:[%s18364_s3 + $0x104] ss:$8 sps:$4 sm:$0xff]  }
 0x29e   :  { %v15543_v5 = vld [vmem:[#allocation3 + $0x38] sm:$0xf] }
 0x29f   :  { %v15534_v57 = vld [vmem:[#allocation3 + $0x30] sm:$0xff]  ;;  %v2805_v25 = vshll.u32 %v15543_v5, 16  ;;  %v2819_v48 = vshrl.u32 %v15543_v5, 16 }
 0x2a0   :  { %v2791_v41 = vshll.u32 %v15534_v57, 16  ;;  %v2809_v55 = vshrl.u32 %v15534_v57, 16 }
 0x2a1   :  { %v2807_v33 = vrot.slane %v2805_v25, 5  ;;  %v2821_v45 = vrot.slane %v2819_v48, 4  ;;  %v13202_v25 = vld [vmem:[%s18364_s3 + $0x50] ss:$8 sps:$4 sm:$0xff]   ;;  %v13207_v48 = vld [vmem:[%s18364_s3 + $0x64] ss:$8 sps:$4 sm:$0xff]  }
 0x2a2   :  { %v2793_v32 = vrot.slane %v2791_v41, 5  ;;  %v2811_v62 = vrot.slane %v2809_v55, 4  ;;  %v13192_v41 = vld [vmem:[%s18364_s3 + $0x14] ss:$8 sps:$4 sm:$0xff]   ;;  %v2802_v55 = vor.u32 %v2801_v58, %v2798_v53  ;;  %v13226_v53 = vld [vmem:[%s18364_s3 + $0xd0] ss:$8 sps:$4 sm:$0xff]  }
 0x2a3   :  { %v2822_v54 = vor.u32 %v2821_v45, %v2807_v33  ;;  %v13220_v45 = vld [vmem:[%s18364_s3 + $0xb0] ss:$8 sps:$4 sm:$0xff]   ;;  %v13231_v58 = vld [vmem:[%s18364_s3 + $0xe4] ss:$8 sps:$4 sm:$0xff]  }
 0x2a4   :  { %v2812_v15 = vor.u32 %v2811_v62, %v2793_v32  ;;  %v2794_v29 = vsel %vm14494_vm1, %v2789_v27, %v2793_v32  ;;  %v2803_v43 = vrot.slane %v2802_v55, 4  ;;  %v13193_v62 = vld [vmem:[%s18364_s3 + $0x20] ss:$8 sps:$4 sm:$0xff]   ;;  %v13196_v27 = vld [vmem:[%s18364_s3 + $0x30] ss:$8 sps:$4 sm:$0xff]  }
 0x2a5   :  { %v2823_v61 = vrot.slane %v2822_v54, 4  ;;  %v13229_v54 = vld [vmem:[%s18364_s3 + $0xe0] ss:$8 sps:$4 sm:$0xff]   ;;  %v13240_v55 = vld [vmem:[%s18364_s3 + $0x114] ss:$8 sps:$4 sm:$0xff]  }
 0x2a6   :  { %v2813_v2 = vrot.slane %v2812_v15, 4  ;;  %v2808_v34 = vsel %vm14494_vm1, %v2803_v43, %v2807_v33  ;;  %v13222_v33 = vld [vmem:[%s18364_s3 + $0xb4] ss:$8 sps:$4 sm:$0xff]   ;;  %v3517_v43 = vrot.slane %v15495_v20, 5 }
 0x2a7   :  { %v2828_v32 = vsel %vm14494_vm1, %v2823_v61, %v2827_v9  ;;  %v11170_v61 = vcombine.high %v15493_v18, %v15534_v57  ;;  %v13243_v9 = vld [vmem:[%s18364_s3 + $0x244] ss:$8 sps:$4 sm:$0xff]  }
 0x2a8   :  { %v2818_v37 = vsel %vm14494_vm1, %v2813_v2, %v2817_v24  ;;  %v11127_v15 = vcombine.low %v2808_v34, %v2828_v32  ;;  %v13201_v2 = vld [vmem:[%s18364_s3 + $0x44] ss:$8 sps:$4 sm:$0xff]   ;;  %v13199_v24 = vld [vmem:[%s18364_s3 + $0x40] ss:$8 sps:$4 sm:$0xff]   ;;  %v13247_v34 = vld [vmem:[%s18364_s3 + $0x254] ss:$8 sps:$4 sm:$0xff]  }
 0x2a9   :  { %v11126_v22 = vcombine.high %v2794_v29, %v2818_v37  ;;  %v11125_v17 = vcombine.low %v2794_v29, %v2818_v37  ;;  %v13205_v29 = vld [vmem:[%s18364_s3 + $0x60] ss:$8 sps:$4 sm:$0xff]   ;;  %v13210_v37 = vld [vmem:[%s18364_s3 + $0x74] ss:$8 sps:$4 sm:$0xff]  }
 0x2aa   :  { %v13241_v32 = vld [vmem:[%s18364_s3 + $0x240] ss:$8 sps:$4 sm:$0xff]  }
 0x2ab   :  { %3117 = vmatprep.mubr.bf16.mxu0 %v11126_v22  ;;  %v13208_v22 = vld [vmem:[%s18364_s3 + $0x70] ss:$8 sps:$4 sm:$0xff]  }
 0x2ac   :  { %3118 = vmatmul.mubr.bf16.gmra.mrb[20].mxu0 %v11125_v17  ;;  %v13213_v17 = vld [vmem:[%s18364_s3 + $0x84] ss:$8 sps:$4 sm:$0xff]  }
 0x2ad   :  { %3160 = vmatprep.mubr.bf16.mxu0 %v15414_v52 }
 0x2b4   :  { %11164 = vmatmul.mubr.msk.bf16.vlgmr.msra.gmra.mrb[16].mxu0 %vm3068_vm11, %v11124_v0  ;;  %v13235_v0 = vld [vmem:[%s18364_s3 + $0x100] ss:$8 sps:$4 sm:$0xff]  }
 0x2b5   :  { %3398 = vmatpush1.bf16.msra.mxu0 %v13187_v4  ;;  %3170 = vmatprep.mubr.bf16.mxu0 %v15414_v52  ;;  %v13234_v4 = vld [vmem:[%s18364_s3 + $0xf4] ss:$8 sps:$4 sm:$0xff]  }
 0x2b6   :  { %3399 = vmatprep.subr.bf16.mxu0 %v13192_v41  ;;  %v11166_v41 = vcombine.low %v15454_v47, %v15495_v20  ;;  %v3503_v20 = vld [vmem:[#allocation3] sm:$0xee] }
 0x2b9   :  { %3400 = vmatpush1.bf16.msra.mxu0 %v13190_v56  ;;  %v13238_v56 = vld [vmem:[%s18364_s3 + $0x110] ss:$8 sps:$4 sm:$0xff]  }
 0x2ba   :  { %3401 = vmatprep.subr.bf16.mxu0 %v13195_v10  ;;  %v11169_v10 = vcombine.low %v15493_v18, %v15534_v57  ;;  %v3523_v18 = vrot.slane %v3517_v43, 4 }
 0x2bc   :  { %11165 = vmatmul.mubr.msk.bf16.gmra.mrb[20].mxu0 %vm3068_vm11, %v11127_v15  ;;  %v13245_v15 = vld [vmem:[%s18364_s3 + $0x250] ss:$8 sps:$4 sm:$0xff]  }
 0x2bd   :  { %3402 = vmatpush1.bf16.msra.mxu0 %v13193_v62  ;;  %3429 = vmatprep.mubr.bf16.mxu0 %v11167_v46  ;;  %v11168_v62 = vcombine.low %v15532_v30, %v15522_v3  ;;  %v13250_v30 = vld [vmem:[%s18364_s3 + $0x264] ss:$8 sps:$4 sm:$0xff]   ;;  %v11210_v46 = vrot.slane %v3503_v20, 9 }
 0x2be   :  { %3403 = vmatprep.subr.bf16.mxu0 %v13198_v11  ;;  %v3524_v11 = vrot.slane %v15488_v51, 5  ;;  %v13254_v51 = vld [vmem:[%s18364_s3 + $0x274] ss:$8 sps:$4 sm:$0xff]  }
 0x2c1   :  { %3404 = vmatpush1.bf16.msra.mxu0 %v13196_v27 }
 0x2c2   :  { %3405 = vmatprep.subr.bf16.mxu0 %v13201_v2  ;;  %v15710_v2 = vsel %vm14483_vm14, %v3523_v18, %v3524_v11  ;;  %v3521_v11 = vrot.slane %v15522_v3, 5 }
 0x2c5   :  { %3406 = vmatpush1.bf16.msra.mxu0 %v13199_v24  ;;  %v13248_v24 = vld [vmem:[%s18364_s3 + $0x260] ss:$8 sps:$4 sm:$0xff]  }
 0x2c6   :  { %3407 = vmatprep.subr.bf16.mxu0 %v13204_v44  ;;  %v11171_v44 = vcombine.low %v15553_v14, %v15543_v5  ;;  %v13257_v14 = vld [vmem:[%s18364_s3 + $0x284] ss:$8 sps:$4 sm:$0xff]  }
 0x2c9   :  { %3408 = vmatpush1.bf16.msra.mxu0 %v13202_v25  ;;  %v15719_v25 = vsel %vm14483_vm14, %v11210_v46, %v3517_v43  ;;  %v3538_v43 = vrot.slane %v15536_v60, 5  ;;  %v13296_v60 = vld [vmem:[%s18364_s3 + $0x354] ss:$8 sps:$4 sm:$0xff]  }
 0x2ca   :  { %3409 = vmatprep.subr.bf16.mxu0 %v13207_v48  ;;  %v11251_v48 = vcombine.high %v15719_v25, %v15710_v2  ;;  %v11250_v18 = vcombine.low %v15719_v25, %v15710_v2  ;;  %v3526_v2 = vrot.slane %v3521_v11, 4 }
 0x2cd   :  { %3410 = vmatpush1.bf16.msra.mxu0 %v13205_v29  ;;  %v13252_v29 = vld [vmem:[%s18364_s3 + $0x270] ss:$8 sps:$4 sm:$0xff]  }
 0x2ce   :  { %3411 = vmatprep.subr.bf16.mxu0 %v13210_v37  ;;  %v13255_v37 = vld [vmem:[%s18364_s3 + $0x280] ss:$8 sps:$4 sm:$0xff]  }
 0x2d1   :  { %3412 = vmatpush1.bf16.msra.mxu0 %v13208_v22  ;;  %v13260_v22 = vld [vmem:[%s18364_s3 + $0x294] ss:$8 sps:$4 sm:$0xff]  }
 0x2d2   :  { %3413 = vmatprep.subr.bf16.mxu0 %v13213_v17  ;;  %v13258_v17 = vld [vmem:[%s18364_s3 + $0x290] ss:$8 sps:$4 sm:$0xff]  }
 0x2d5   :  { %3414 = vmatpush1.bf16.msra.mxu0 %v13211_v7  ;;  %v13263_v7 = vld [vmem:[%s18364_s3 + $0x2a4] ss:$8 sps:$4 sm:$0xff]  }
 0x2d6   :  { %3415 = vmatprep.subr.bf16.mxu0 %v13216_v26  ;;  %v13261_v26 = vld [vmem:[%s18364_s3 + $0x2a0] ss:$8 sps:$4 sm:$0xff]  }
 0x2d9   :  { %3416 = vmatpush1.bf16.msra.mxu0 %v13214_v16  ;;  %v13266_v16 = vld [vmem:[%s18364_s3 + $0x2b4] ss:$8 sps:$4 sm:$0xff]  }
 0x2da   :  { %3417 = vmatprep.subr.bf16.mxu0 %v13219_v19  ;;  %v13264_v19 = vld [vmem:[%s18364_s3 + $0x2b0] ss:$8 sps:$4 sm:$0xff]  }
 0x2dd   :  { %3418 = vmatpush1.bf16.msra.mxu0 %v13217_v63  ;;  %v13269_v63 = vld [vmem:[%s18364_s3 + $0x2c4] ss:$8 sps:$4 sm:$0xff]  }
 0x2de   :  { %3419 = vmatprep.subr.bf16.mxu0 %v13222_v33  ;;  %v13267_v33 = vld [vmem:[%s18364_s3 + $0x2c0] ss:$8 sps:$4 sm:$0xff]  }
 0x2e1   :  { %3420 = vmatpush1.bf16.msra.mxu0 %v13220_v45  ;;  %v13272_v45 = vld [vmem:[%s18364_s3 + $0x2d4] ss:$8 sps:$4 sm:$0xff]  }
 0x2e2   :  { %3421 = vmatprep.subr.bf16.mxu0 %v13225_v50  ;;  %v13270_v50 = vld [vmem:[%s18364_s3 + $0x2d0] ss:$8 sps:$4 sm:$0xff]  }
 0x2e5   :  { %3422 = vmatpush1.bf16.msra.mxu0 %v13223_v49  ;;  %v13275_v49 = vld [vmem:[%s18364_s3 + $0x2e4] ss:$8 sps:$4 sm:$0xff]  }
 0x2e6   :  { %3423 = vmatprep.subr.bf16.mxu0 %v13228_v42  ;;  %v13273_v42 = vld [vmem:[%s18364_s3 + $0x2e0] ss:$8 sps:$4 sm:$0xff]  }
 0x2e9   :  { %3424 = vmatpush1.bf16.msra.mxu0 %v13226_v53  ;;  %v13278_v53 = vld [vmem:[%s18364_s3 + $0x2f4] ss:$8 sps:$4 sm:$0xff]  }
 0x2ea   :  { %3425 = vmatprep.subr.bf16.mxu0 %v13231_v58  ;;  %v13276_v58 = vld [vmem:[%s18364_s3 + $0x2f0] ss:$8 sps:$4 sm:$0xff]  }
 0x2ed   :  { %3426 = vmatpush1.bf16.msra.mxu0 %v13229_v54  ;;  %v13281_v54 = vld [vmem:[%s18364_s3 + $0x304] ss:$8 sps:$4 sm:$0xff]  }
 0x2ee   :  { %3427 = vmatprep.subr.bf16.mxu0 %v13234_v4  ;;  %v13279_v4 = vld [vmem:[%s18364_s3 + $0x300] ss:$8 sps:$4 sm:$0xff]  }
 0x2f1   :  { %3428 = vmatpush1.bf16.msra.mxu0 %v13232_v21  ;;  %v13284_v21 = vld [vmem:[%s18364_s3 + $0x314] ss:$8 sps:$4 sm:$0xff]  }
 0x2f2   :  { %3450 = vmatprep.subr.bf16.mxu0 %v13237_v8  ;;  %v13282_v8 = vld [vmem:[%s18364_s3 + $0x310] ss:$8 sps:$4 sm:$0xff]  }
 0x2f4   :  { %3430 = vmatmul.mubr.bf16.vlgmr.msra.gmra.mrb[16].mxu0 %v11166_v41  ;;  %v3531_v41 = vrot.slane %v15534_v57, 5  ;;  %v13293_v57 = vld [vmem:[%s18364_s3 + $0x344] ss:$8 sps:$4 sm:$0xff]  }
 0x2f5   :  { %3439 = vmatprep.mubr.bf16.mxu0 %v11170_v61  ;;  %3451 = vmatpush1.bf16.msra.mxu0 %v13235_v0  ;;  %v13287_v0 = vld [vmem:[%s18364_s3 + $0x324] ss:$8 sps:$4 sm:$0xff]   ;;  %v13290_v61 = vld [vmem:[%s18364_s3 + $0x334] ss:$8 sps:$4 sm:$0xff]  }
 0x2f6   :  { %3452 = vmatprep.subr.bf16.mxu0 %v13240_v55  ;;  %v13285_v55 = vld [vmem:[%s18364_s3 + $0x320] ss:$8 sps:$4 sm:$0xff]  }
 0x2f9   :  { %3453 = vmatpush1.bf16.msra.mxu0 %v13238_v56  ;;  %v3537_v56 = vrot.slane %v3531_v41, 4 }
 0x2fa   :  { %3788 = vmatprep.subr.bf16.mxu0 %v13243_v9  ;;  %v13288_v9 = vld [vmem:[%s18364_s3 + $0x330] ss:$8 sps:$4 sm:$0xff]  }
 0x2fc   :  { %3440 = vmatmul.mubr.bf16.gmra.mrb[20].mxu0 %v11169_v10  ;;  %v3505_v10 = vld [vmem:[#allocation3 + $0x24] sm:$0xee] }
 0x2fd   :  { %3482 = vmatprep.mubr.bf16.mxu0 %v15414_v52 }
 0x304   :  { %11208 = vmatmul.mubr.msk.bf16.vlgmr.msra.gmra.mrb[16].mxu0 %vm3068_vm11, %v11168_v62  ;;  %v3539_v62 = vsel %vm14483_vm14, %v3537_v56, %v3538_v43  ;;  %v3902_v56 = vld [vmem:[%s18365_s4] sm:$0x3]  ;;  %s14155_s4 = smov [#allocation5]  }
 0x305   :  { %3789 = vmatpush1.bf16.msra.mxu0 %v13241_v32  ;;  %3492 = vmatprep.mubr.bf16.mxu0 %v15414_v52  ;;  %v11212_v32 = vrot.slane %v3505_v10, 9  ;;  %v18452_v10 = vld [vmem:[#allocation12_spill] sm:$0xff] }
 0x306   :  { %3790 = vmatprep.subr.bf16.mxu0 %v13247_v34  ;;  %v13291_v34 = vld [vmem:[%s18364_s3 + $0x340] ss:$8 sps:$4 sm:$0xff]  }
 0x309   :  { %3791 = vmatpush1.bf16.msra.mxu0 %v13245_v15  ;;  %v3532_v15 = vsel %vm14483_vm14, %v11212_v32, %v3531_v41  ;;  %v13321_v41 = vld [vmem:[%s18366_s5 + $0x340] ss:$16 sps:$4 sm:$0xff]  }
 0x30a   :  { %3792 = vmatprep.subr.bf16.mxu0 %v13250_v30  ;;  %v11254_v20 = vcombine.high %v3532_v15, %v3539_v62  ;;  %v13294_v30 = vld [vmem:[%s18364_s3 + $0x350] ss:$8 sps:$4 sm:$0xff]   ;;  %v11253_v46 = vcombine.low %v3532_v15, %v3539_v62 }
 0x30c   :  { %11209 = vmatmul.mubr.msk.bf16.gmra.mrb[20].mxu0 %vm3068_vm11, %v11171_v44  ;;  %v3527_v44 = vrot.slane %v15545_v38, 5 }
 0x30d   :  { %3793 = vmatpush1.bf16.msra.mxu0 %v13248_v24  ;;  %3820 = vmatprep.mubr.bf16.mxu0 %v11251_v48  ;;  %v3504_v24 = vld [vmem:[#allocation3 + $0x8] sm:$0xe]  ;;  %v3535_v48 = vrot.slane %v15543_v5, 5 }
 0x30e   :  { %3794 = vmatprep.subr.bf16.mxu0 %v13254_v51  ;;  %v11211_v25 = vrot.slane %v3504_v24, 9  ;;  %v3528_v51 = vsel %vm14483_vm14, %v3526_v2, %v3527_v44  ;;  %v13327_v2 = vld [vmem:[%s18366_s5 + $0x380] ss:$16 sps:$4 sm:$0xff]   ;;  %v13329_v24 = vld [vmem:[%s18366_s5 + $0x384] ss:$16 sps:$4 sm:$0xff]  }
 0x30f   :  { %v3540_v3 = vrot.slane %v3535_v48, 4 }
 0x311   :  { %3795 = vmatpush1.bf16.msra.mxu0 %v13252_v29  ;;  %v3522_v29 = vsel %vm14483_vm14, %v11211_v25, %v3521_v11 }
 0x312   :  { %3796 = vmatprep.subr.bf16.mxu0 %v13257_v14  ;;  %v11252_v14 = vcombine.low %v3522_v29, %v3528_v51 }
 0x315   :  { %3797 = vmatpush1.bf16.msra.mxu0 %v13255_v37  ;;  %v3506_v37 = vld [vmem:[#allocation3 + $0x2c] sm:$0xe] }
 0x316   :  { %3798 = vmatprep.subr.bf16.mxu0 %v13260_v22  ;;  %v3541_v22 = vrot.slane %v15559_v59, 5  ;;  %v13302_v59 = vld [vmem:[%s18366_s5 + $0x264] ss:$16 sps:$4 sm:$0xff]  }
 0x318   :  { %v3542_v38 = vsel %vm14483_vm14, %v3540_v3, %v3541_v22  ;;  %v13332_v22 = vld [vmem:[%s18366_s5 + $0x3a4] ss:$16 sps:$4 sm:$0xff]  }
 0x319   :  { %3799 = vmatpush1.bf16.msra.mxu0 %v13258_v17  ;;  %v11213_v17 = vrot.slane %v3506_v37, 9  ;;  %v13330_v37 = vld [vmem:[%s18366_s5 + $0x3a0] ss:$16 sps:$4 sm:$0xff]  }
 0x31a   :  { %3800 = vmatprep.subr.bf16.mxu0 %v13263_v7 }
 0x31b   :  { %v3536_v7 = vsel %vm14483_vm14, %v11213_v17, %v3535_v48 }
 0x31c   :  { %v11255_v5 = vcombine.low %v3536_v7, %v3542_v38 }
 0x31d   :  { %3801 = vmatpush1.bf16.msra.mxu0 %v13261_v26  ;;  %v13297_v26 = vld [vmem:[%s18366_s5 + $0x240] ss:$16 sps:$4 sm:$0xff]  }
 0x31e   :  { %3802 = vmatprep.subr.bf16.mxu0 %v13266_v16  ;;  %v13299_v16 = vld [vmem:[%s18366_s5 + $0x244] ss:$16 sps:$4 sm:$0xff]  }
 0x31f   :  { %4688 = vmatprep.subr.bf16.mxu1 %v13299_v16 }
 0x320   :  { %4689 = vmatpush1.bf16.msra.mxu1 %v13297_v26 }
 0x321   :  { %3803 = vmatpush1.bf16.msra.mxu0 %v13264_v19  ;;  %v13300_v19 = vld [vmem:[%s18366_s5 + $0x260] ss:$16 sps:$4 sm:$0xff]   ;;  %4690 = vmatprep.subr.bf16.mxu1 %v13302_v59 }
 0x322   :  { %3804 = vmatprep.subr.bf16.mxu0 %v13269_v63  ;;  %v13305_v63 = vld [vmem:[%s18366_s5 + $0x284] ss:$16 sps:$4 sm:$0xff]  }
 0x324   :  { %4691 = vmatpush1.bf16.msra.mxu1 %v13300_v19 }
 0x325   :  { %3805 = vmatpush1.bf16.msra.mxu0 %v13267_v33  ;;  %v13303_v33 = vld [vmem:[%s18366_s5 + $0x280] ss:$16 sps:$4 sm:$0xff]   ;;  %4692 = vmatprep.subr.bf16.mxu1 %v13305_v63 }
 0x326   :  { %3806 = vmatprep.subr.bf16.mxu0 %v13272_v45  ;;  %v13308_v45 = vld [vmem:[%s18366_s5 + $0x2a4] ss:$16 sps:$4 sm:$0xff]  }
 0x328   :  { %4693 = vmatpush1.bf16.msra.mxu1 %v13303_v33 }
 0x329   :  { %3807 = vmatpush1.bf16.msra.mxu0 %v13270_v50  ;;  %v13306_v50 = vld [vmem:[%s18366_s5 + $0x2a0] ss:$16 sps:$4 sm:$0xff]   ;;  %4694 = vmatprep.subr.bf16.mxu1 %v13308_v45 }
 0x32a   :  { %3808 = vmatprep.subr.bf16.mxu0 %v13275_v49  ;;  %v13311_v49 = vld [vmem:[%s18366_s5 + $0x2c4] ss:$16 sps:$4 sm:$0xff]  }
 0x32c   :  { %4695 = vmatpush1.bf16.msra.mxu1 %v13306_v50 }
 0x32d   :  { %3809 = vmatpush1.bf16.msra.mxu0 %v13273_v42  ;;  %v13309_v42 = vld [vmem:[%s18366_s5 + $0x2c0] ss:$16 sps:$4 sm:$0xff]   ;;  %4696 = vmatprep.subr.bf16.mxu1 %v13311_v49 }
 0x32e   :  { %3810 = vmatprep.subr.bf16.mxu0 %v13278_v53  ;;  %v13314_v53 = vld [vmem:[%s18366_s5 + $0x2e4] ss:$16 sps:$4 sm:$0xff]  }
 0x330   :  { %4697 = vmatpush1.bf16.msra.mxu1 %v13309_v42 }
 0x331   :  { %3811 = vmatpush1.bf16.msra.mxu0 %v13276_v58  ;;  %v13312_v58 = vld [vmem:[%s18366_s5 + $0x2e0] ss:$16 sps:$4 sm:$0xff]   ;;  %4698 = vmatprep.subr.bf16.mxu1 %v13314_v53 }
 0x332   :  { %3812 = vmatprep.subr.bf16.mxu0 %v13281_v54  ;;  %v13317_v54 = vld [vmem:[%s18366_s5 + $0x304] ss:$16 sps:$4 sm:$0xff]   ;;  %v13333_v53 = vld [vmem:[%s18366_s5 + $0x3c0] ss:$16 sps:$4 sm:$0xff]  }
 0x334   :  { %4699 = vmatpush1.bf16.msra.mxu1 %v13312_v58  ;;  %v13335_v58 = vld [vmem:[%s18366_s5 + $0x3c4] ss:$16 sps:$4 sm:$0xff]  }
 0x335   :  { %3813 = vmatpush1.bf16.msra.mxu0 %v13279_v4  ;;  %v13315_v4 = vld [vmem:[%s18366_s5 + $0x300] ss:$16 sps:$4 sm:$0xff]   ;;  %4700 = vmatprep.subr.bf16.mxu1 %v13317_v54 }
 0x336   :  { %3814 = vmatprep.subr.bf16.mxu0 %v13284_v21  ;;  %v13320_v21 = vld [vmem:[%s18366_s5 + $0x324] ss:$16 sps:$4 sm:$0xff]  }
 0x338   :  { %4701 = vmatpush1.bf16.msra.mxu1 %v13315_v4 }
 0x339   :  { %3815 = vmatpush1.bf16.msra.mxu0 %v13282_v8  ;;  %v13318_v8 = vld [vmem:[%s18366_s5 + $0x320] ss:$16 sps:$4 sm:$0xff]   ;;  %4702 = vmatprep.subr.bf16.mxu1 %v13320_v21 }
 0x33a   :  { %3816 = vmatprep.subr.bf16.mxu0 %v13287_v0  ;;  %v13323_v0 = vld [vmem:[%s18366_s5 + $0x344] ss:$16 sps:$4 sm:$0xff]  }
 0x33c   :  { %4703 = vmatpush1.bf16.msra.mxu1 %v13318_v8 }
 0x33d   :  { %3817 = vmatpush1.bf16.msra.mxu0 %v13285_v55  ;;  %4704 = vmatprep.subr.bf16.mxu1 %v13323_v0  ;;  %v13326_v55 = vld [vmem:[%s18366_s5 + $0x364] ss:$16 sps:$4 sm:$0xff]  }
 0x33e   :  { %3818 = vmatprep.subr.bf16.mxu0 %v13290_v61  ;;  %v13324_v61 = vld [vmem:[%s18366_s5 + $0x360] ss:$16 sps:$4 sm:$0xff]  }
 0x340   :  { %4705 = vmatpush1.bf16.msra.mxu1 %v13321_v41 }
 0x341   :  { %3819 = vmatpush1.bf16.msra.mxu0 %v13288_v9  ;;  %4706 = vmatprep.subr.bf16.mxu1 %v13326_v55  ;;  %v3907_v9 = vrot.slane %v3902_v56, %v14808_v6  ;;  %v18453_v55 = vld [vmem:[#allocation8_spill] sm:$0xff] }
 0x342   :  { %3841 = vmatprep.subr.bf16.mxu0 %v13293_v57  ;;  %v3911_v57 = vrot.slane %v3902_v56, %v18452_v10  ;;  %vm18454_vm10 = vnez %v18453_v55 }
 0x344   :  { %3821 = vmatmul.mubr.bf16.vlgmr.msra.gmra.mrb[16].mxu0 %v11250_v18  ;;  %4707 = vmatpush1.bf16.msra.mxu1 %v13324_v61 }
 0x345   :  { %3830 = vmatprep.mubr.bf16.mxu0 %v11254_v20  ;;  %3842 = vmatpush1.bf16.msra.mxu0 %v13291_v34 }
 0x346   :  { %3843 = vmatprep.subr.bf16.mxu0 %v13296_v60  ;;  %4708 = vmatprep.subr.bf16.mxu1 %v13329_v24 }
 0x348   :  { %4709 = vmatpush1.bf16.msra.mxu1 %v13327_v2 }
 0x349   :  { %3844 = vmatpush1.bf16.msra.mxu0 %v13294_v30  ;;  %4710 = vmatprep.subr.bf16.mxu1 %v13332_v22 }
 0x34c   :  { %3831 = vmatmul.mubr.bf16.gmra.mrb[20].mxu0 %v11253_v46  ;;  %4711 = vmatpush1.bf16.msra.mxu1 %v13330_v37 }
 0x34d   :  { %3873 = vmatprep.mubr.bf16.mxu0 %v15414_v52  ;;  %4712 = vmatprep.subr.bf16.mxu1 %v13335_v58 }
 0x350   :  { %4713 = vmatpush1.bf16.msra.mxu1 %v13333_v53 }
 0x354   :  { %11292 = vmatmul.mubr.msk.bf16.vlgmr.msra.gmra.mrb[16].mxu0 %vm3068_vm11, %v11252_v14 }
 0x355   :  { %3883 = vmatprep.mubr.bf16.mxu0 %v15414_v52 }
 0x35c   :  { %11293 = vmatmul.mubr.msk.bf16.gmra.mrb[20].mxu0 %vm3068_vm11, %v11255_v5 }
 0x427   :  { %v3875_v43 = vpop.f32.mrb[16].mxu0 }
 0x428   :  { %v3914_v32 = vadd.f32 %v3907_v9, %v3875_v43  ;;  %v3877_v62 = vpop.f32.mrb[17].mxu0 }
 0x429   :  { %v3915_v34 = vadd.f32 %v3911_v57, %v3877_v62  ;;  %v3879_v18 = vpop.f32.mrb[18].mxu0 }
 0x42a   :  { %v3922_v15 = vmax.f32 %v3914_v32, 0.0  ;;  %v3916_v60 = vadd.f32 %v3907_v9, %v3879_v18  ;;  %v3881_v20 = vpop.f32.mrb[19].mxu0 }
 0x42b   :  { %v3923_v30 = vmax.f32 %v3915_v34, 0.0  ;;  %v3917_v11 = vadd.f32 %v3911_v57, %v3881_v20  ;;  %v13341_v34 = vld [vmem:[%s18366_s5 + $0x404] ss:$16 sps:$4 sm:$0xff]   ;;  %v13339_v20 = vld [vmem:[%s18366_s5 + $0x400] ss:$16 sps:$4 sm:$0xff]  }
 0x42c   :  { %v3924_v46 = vmax.f32 %v3916_v60, 0.0 }
 0x42d   :  { %v12556_v44 = vpack.c.bf16 %v3923_v30, %v3922_v15  ;;  %v3925_v25 = vmax.f32 %v3917_v11, 0.0  ;;  %v13344_v30 = vld [vmem:[%s18366_s5 + $0x424] ss:$16 sps:$4 sm:$0xff]  }
 0x42f   :  { %v3951_v51 = vshrl.u32 %v12556_v44, 16  ;;  %v12557_v48 = vpack.c.bf16 %v3925_v25, %v3924_v46  ;;  %v3885_v29 = vpop.f32.mrb[20].mxu0  ;;  %v3954_v38 = vshll.u32 %v12556_v44, 16  ;;  %v13342_v44 = vld [vmem:[%s18366_s5 + $0x420] ss:$16 sps:$4 sm:$0xff]  }
 0x430   :  { %v3918_v14 = vadd.f32 %v3907_v9, %v3885_v29  ;;  %v3887_v3 = vpop.f32.mrb[21].mxu0  ;;  %v13347_v25 = vld [vmem:[%s18366_s5 + $0x444] ss:$16 sps:$4 sm:$0xff]   ;;  %v4022_v29 = vld [vmem:[#allocation3 + $0x8] sm:$0xf] }
 0x431   :  { %v3953_v17 = vrot.slane %v3951_v51, 7  ;;  %v3959_v7 = vshrl.u32 %v12557_v48, 16  ;;  %v3919_v5 = vadd.f32 %v3911_v57, %v3887_v3  ;;  %v3889_v26 = vpop.f32.mrb[22].mxu0  ;;  %v3962_v16 = vshll.u32 %v12557_v48, 16 }
 0x432   :  { %v3926_v59 = vmax.f32 %v3918_v14, 0.0  ;;  %v3920_v19 = vadd.f32 %v3907_v9, %v3889_v26  ;;  %v3891_v63 = vpop.f32.mrb[23].mxu0  ;;  %v13336_v9 = vld [vmem:[%s18366_s5 + $0x3e0] ss:$16 sps:$4 sm:$0xff]   ;;  %v4030_v26 = vld [vmem:[#allocation3 + $0x20] sm:$0x1] }
 0x433   :  { %v3961_v33 = vrot.slane %v3959_v7, 7  ;;  %v3927_v45 = vmax.f32 %v3919_v5, 0.0  ;;  %v3921_v50 = vadd.f32 %v3911_v57, %v3891_v63  ;;  %v3956_v49 = vor.u32 %v3954_v38, %v3953_v17  ;;  %v13338_v57 = vld [vmem:[%s18366_s5 + $0x3e4] ss:$16 sps:$4 sm:$0xff]  }
 0x434   :  { %v3928_v42 = vmax.f32 %v3920_v19, 0.0  ;;  %v3957_v21 = vrot.slane %v3953_v17, 4  ;;  %4714 = vmatprep.subr.bf16.mxu1 %v13338_v57 }
 0x435   :  { %v12558_v54 = vpack.c.bf16 %v3927_v45, %v3926_v59  ;;  %v3929_v4 = vmax.f32 %v3921_v50, 0.0  ;;  %3984 = vrot.lane.b32.xlu0 %v3956_v49, %s14151_s21  ;;  %v3964_v8 = vor.u32 %v3962_v16, %v3961_v33  ;;  %v3966_v56 = vrot.slane %v3961_v33, 4  ;;  %4715 = vmatpush1.bf16.msra.mxu1 %v13336_v9  ;;  %v4027_v16 = vld [vmem:[#allocation3 + $0x18] sm:$0x11]  ;;  %v4036_v49 = vld [vmem:[#allocation3 + $0x2c] sm:$0xf] }
 0x436   :  { %4716 = vmatprep.subr.bf16.mxu1 %v13341_v34  ;;  %v4044_v9 = vld [vmem:[#allocation3 + $0x44] sm:$0x1]  ;;  %v4041_v34 = vld [vmem:[#allocation3 + $0x3c] sm:$0x11] }
 0x437   :  { %v3968_v0 = vshrl.u32 %v12558_v54, 16  ;;  %v12559_v41 = vpack.c.bf16 %v3929_v4, %v3928_v42  ;;  %v3965_v61 = vsel %vm18454_vm10, %v3957_v21, %v3964_v8  ;;  %v3971_v32 = vshll.u32 %v12558_v54, 16  ;;  %v4033_v42 = vld [vmem:[#allocation3 + $0x24] sm:$0xff] }
 0x438   :  { %3986 = vrot.lane.b32.xlu1 %v3965_v61, %s14151_s21 }
 0x439   :  { %v3970_v43 = vrot.slane %v3968_v0, 7  ;;  %v3976_v62 = vshrl.u32 %v12559_v41, 16  ;;  %3988 = vrot.lane.b32.xlu0 %v3966_v56, %s14151_s21  ;;  %v3979_v15 = vshll.u32 %v12559_v41, 16  ;;  %4717 = vmatpush1.bf16.msra.mxu1 %v13339_v20 }
 0x43a   :  { %4718 = vmatprep.subr.bf16.mxu1 %v13344_v30 }
 0x43b   :  { %v3978_v18 = vrot.slane %v3976_v62, 7  ;;  %v3973_v60 = vor.u32 %v3971_v32, %v3970_v43  ;;  %v3974_v11 = vrot.slane %v3970_v43, 4 }
 0x43d   :  { %3990 = vrot.lane.b32.xlu1 %v3973_v60, %s14151_s21  ;;  %v3981_v46 = vor.u32 %v3979_v15, %v3978_v18  ;;  %v3983_v24 = vrot.slane %v3978_v18, 4  ;;  %4719 = vmatpush1.bf16.msra.mxu1 %v13342_v44 }
 0x43e   :  { %4741 = vmatprep.subr.bf16.mxu1 %v13347_v25 }
 0x43f   :  { %v3982_v2 = vsel %vm18454_vm10, %v3974_v11, %v3981_v46  ;;  %vm18464_vm10 = vcmask 1047559  }
 0x440   :  { %3992 = vrot.lane.b32.xlu0 %v3982_v2, %s14151_s21 }
 0x441   :  { %3994 = vrot.lane.b32.xlu1 %v3983_v24, %s14151_s21 }
 0x4a7   :  { %v3985_v51 = vpop.permute.xlu0 %3984 }
 0x4a8   :  { %v3996_v48 = vrot.slane %v3985_v51, 4 }
 0x4aa   :  { %v4002_v14 = vsel %vm2618_vm4, %v3996_v48, %v3985_v51  ;;  %v4023_v3 = vsel %vm15438_vm6, %v3996_v48, %v4022_v29  ;;  %v3987_v37 = vpop.permute.xlu1 %3986 }
 0x4ab   :  { %v15958_v22 = vsel %vm15432_vm9, %v4002_v14, %v15454_v47  ;;  %4024 = vst [vmem:[#allocation3 + $0x8] sm:$0xf] %v4023_v3  ;;  %v3997_v17 = vrot.slane %v3987_v37, 4  ;;  %v3989_v38 = vpop.permute.xlu0 %3988 }
 0x4ac   :  { %4021 = vst [vmem:[#allocation3] sm:$0xff] %v15958_v22  ;;  %v3998_v7 = vrot.slane %v3989_v38, 4  ;;  %v4132_v19 = vshrl.u32 %v15958_v22, 16  ;;  %v4135_v63 = vshll.u32 %v15958_v22, 16 }
 0x4ad   :  { %v4003_v5 = vsel %vm2618_vm4, %v3997_v17, %v3987_v37  ;;  %4026 = vst.msk [vmem:[#allocation3 + $0x14] sm:$0xf] %vm2646_vm12, %v3997_v17 }
 0x4ae   :  { %4025 = vst.msk [vmem:[#allocation3 + $0xc] sm:$0xff] %vm15475_vm15, %v4003_v5  ;;  %v4004_v59 = vsel %vm2618_vm4, %v3998_v7, %v3989_v38  ;;  %v4031_v47 = vsel %vm15457_vm3, %v3998_v7, %v4030_v26  ;;  %v4134_v4 = vrot.slane %v4132_v19, 4  ;;  %v4137_v21 = vrot.slane %v4135_v63, 5 }
 0x4af   :  { %v4028_v33 = vsel %vm15464_vm5, %v4004_v59, %v4027_v16  ;;  %4032 = vst [vmem:[#allocation3 + $0x20] sm:$0x1] %v4031_v47  ;;  %v3991_v45 = vpop.permute.xlu1 %3990 }
 0x4b0   :  { %4029 = vst [vmem:[#allocation3 + $0x18] sm:$0x11] %v4028_v33  ;;  %v3999_v50 = vrot.slane %v3991_v45, 4  ;;  %v4138_v46 = vor.u32 %v4137_v21, %v4134_v4  ;;  %v13350_v4 = vld [vmem:[%s18366_s5 + $0x464] ss:$16 sps:$4 sm:$0xff]  }
 0x4b2   :  { %v4005_v53 = vsel %vm2618_vm4, %v3999_v50, %v3991_v45  ;;  %v4037_v58 = vsel %vm15438_vm6, %v3999_v50, %v4036_v49  ;;  %v3993_v54 = vpop.permute.xlu0 %3992  ;;  %v4048_v8 = vld [vmem:[#allocation3 + $0x8] sm:$0xf]  ;;  %v4139_v37 = vrot.slane %v4138_v46, 4  ;;  %vm18457_vm6 = vcmask 1042434  }
 0x4b3   :  { %v15977_v0 = vsel %vm15432_vm9, %v4005_v53, %v4033_v42  ;;  %4038 = vst [vmem:[#allocation3 + $0x2c] sm:$0xf] %v4037_v58  ;;  %v4000_v41 = vrot.slane %v3993_v54, 4  ;;  %v3995_v55 = vpop.permute.xlu1 %3994  ;;  %v4146_v61 = vshrl.u32 %v4048_v8, 16  ;;  %v4149_v56 = vshll.u32 %v4048_v8, 16 }
 0x4b4   :  { %4035 = vst [vmem:[#allocation3 + $0x24] sm:$0xff] %v15977_v0  ;;  %v4001_v57 = vrot.slane %v3995_v55, 4  ;;  %v4180_v32 = vshrl.u32 %v15977_v0, 16  ;;  %v4183_v40 = vshll.u32 %v15977_v0, 16  ;;  %v15986_v62 = vld [vmem:[#allocation3 + $0x14] sm:$0xf] }
 0x4b5   :  { %v4006_v36 = vsel %vm2618_vm4, %v4000_v41, %v3993_v54  ;;  %4040 = vst.msk [vmem:[#allocation3 + $0x38] sm:$0xf] %vm2646_vm12, %v4000_v41  ;;  %v15982_v43 = vld [vmem:[#allocation3 + $0xc] sm:$0xff]  ;;  %v4148_v2 = vrot.slane %v4146_v61, 4  ;;  %v4151_v31 = vrot.slane %v4149_v56, 5  ;;  %v4155_v1 = vshll.u32 %v15986_v62, 16 }
 0x4b6   :  { %4039 = vst.msk [vmem:[#allocation3 + $0x30] sm:$0xff] %vm15475_vm15, %v4006_v36  ;;  %v4007_v18 = vsel %vm2618_vm4, %v4001_v57, %v3995_v55  ;;  %v4045_v15 = vsel %vm15457_vm3, %v4001_v57, %v4044_v9  ;;  %v4141_v60 = vshll.u32 %v15982_v43, 16  ;;  %v4159_v20 = vshrl.u32 %v15982_v43, 16  ;;  %v16002_v28 = vld [vmem:[#allocation3 + $0x20] sm:$0x1] }
 0x4b7   :  { %v4042_v30 = vsel %vm15464_vm5, %v4007_v18, %v4041_v34  ;;  %4046 = vst [vmem:[#allocation3 + $0x44] sm:$0x1] %v4045_v15  ;;  %v15997_v11 = vld [vmem:[#allocation3 + $0x18] sm:$0x11]  ;;  %v4182_v51 = vrot.slane %v4180_v32, 4  ;;  %v4185_v48 = vrot.slane %v4183_v40, 5  ;;  %v16006_v3 = vcombine.high %v15958_v22, %v15982_v43  ;;  %vm18461_vm5 = vmmov %vm18457_vm6 }
 0x4b8   :  { %4043 = vst [vmem:[#allocation3 + $0x3c] sm:$0x11] %v4042_v30  ;;  %v4143_v24 = vrot.slane %v4141_v60, 5  ;;  %v4161_v44 = vrot.slane %v4159_v20, 4  ;;  %v4165_v25 = vshll.u32 %v15997_v11, 16  ;;  %v4169_v29 = vshrl.u32 %v15986_v62, 16 }
 0x4b9   :  { %v4152_v17 = vor.u32 %v4151_v31, %v4148_v2  ;;  %v16008_v5 = vrot.slane %v4155_v1, 5  ;;  %v16012_v16 = vcombine.low %v15958_v22, %v15982_v43  ;;  %v4186_v47 = vor.u32 %v4185_v48, %v4182_v51  ;;  %v13345_v22 = vld [vmem:[%s18366_s5 + $0x440] ss:$16 sps:$4 sm:$0xff]   ;;  %v13353_v18 = vld [vmem:[%s18366_s5 + $0x24c] ss:$16 sps:$4 sm:$0xff]  }
 0x4ba   :  { %v4162_v14 = vor.u32 %v4161_v44, %v4143_v24  ;;  %v4167_v7 = vrot.slane %v4165_v25, 5  ;;  %v4052_v26 = vld [vmem:[#allocation3 + $0x2c] sm:$0xf]  ;;  %v4171_v19 = vrot.slane %v4169_v29, 4  ;;  %v4175_v63 = vshll.u32 %v16002_v28, 16 }
 0x4bb   :  { %v16018_v33 = vcombine.low %v4048_v8, %v15986_v62  ;;  %v4144_v45 = vsel %vm14494_vm1, %v4139_v37, %v4143_v24  ;;  %v4194_v21 = vshrl.u32 %v4052_v26, 16  ;;  %v4197_v9 = vshll.u32 %v4052_v26, 16  ;;  %v13348_v32 = vld [vmem:[%s18366_s5 + $0x460] ss:$16 sps:$4 sm:$0xff]   ;;  %v5508_v44 = vld [vmem:[#allocation3] sm:$0xee] }
 0x4bc   :  { %v4163_v38 = vrot.slane %v4162_v14, 4  ;;  %v16036_v61 = vld [vmem:[#allocation3 + $0x38] sm:$0xf]  ;;  %v4172_v56 = vor.u32 %v4171_v19, %v16008_v5  ;;  %v4187_v57 = vrot.slane %v4186_v47, 4  ;;  %v16044_v40 = vrot.slane %v4152_v17, 4 }
 0x4bd   :  { %v16014_v59 = vld [vmem:[#allocation3 + $0x30] sm:$0xff]  ;;  %v16046_v34 = vrot.slane %v4175_v63, 5  ;;  %v16051_v15 = vrot.slane %v4194_v21, 4  ;;  %v4203_v60 = vshll.u32 %v16036_v61, 16  ;;  %v4217_v20 = vshrl.u32 %v16036_v61, 16 }
 0x4be   :  { %v4168_v50 = vsel %vm14494_vm1, %v4163_v38, %v4167_v7  ;;  %v4189_v49 = vshll.u32 %v16014_v59, 16  ;;  %v4207_v42 = vshrl.u32 %v16014_v59, 16  ;;  %v16057_v30 = vcombine.high %v15977_v0, %v16014_v59  ;;  %v5510_v25 = vld [vmem:[#allocation3 + $0x24] sm:$0xee] }
 0x4bf   :  { %v16029_v53 = vcombine.low %v4144_v45, %v4168_v50  ;;  %v16031_v58 = vcombine.high %v4144_v45, %v4168_v50  ;;  %v4129_v54 = vld [vmem:[#allocation3 + $0x3c] sm:$0x11]  ;;  %v16061_v31 = vcombine.low %v15977_v0, %v16014_v59  ;;  %v16064_v24 = vcombine.low %v4052_v26, %v16036_v61  ;;  %v4130_v26 = vld [vmem:[#allocation3 + $0x44] sm:$0x1] }
 0x4c0   :  { %v4191_v8 = vrot.slane %v4189_v49, 5  ;;  %v4209_v41 = vrot.slane %v4207_v42, 4  ;;  %v4213_v55 = vshll.u32 %v4129_v54, 16  ;;  %v4173_v51 = vrot.slane %v4172_v56, 4  ;;  %v5511_v42 = vld [vmem:[#allocation3 + $0x2c] sm:$0xe] }
 0x4c1   :  { %4720 = vmatprep.mubr.bf16.mxu1 %v16031_v58  ;;  %v4199_v48 = vrot.slane %v4197_v9, 5  ;;  %v5522_v29 = vrot.slane %v15982_v43, 5  ;;  %v5529_v37 = vrot.slane %v15997_v11, 5  ;;  %v5536_v0 = vrot.slane %v16014_v59, 5 }
 0x4c2   :  { %4721 = vmatmul.mubr.bf16.vlgmr.msra.gmra.mrb[16].mxu1 %v16029_v53  ;;  %v4210_v36 = vor.u32 %v4209_v41, %v4191_v8  ;;  %v4215_v2 = vrot.slane %v4213_v55, 5  ;;  %v4192_v1 = vsel %vm14494_vm1, %v4187_v57, %v4191_v8  ;;  %v5543_v17 = vrot.slane %v4129_v54, 5 }
 0x4c3   :  { %4742 = vmatpush1.bf16.msra.mxu1 %v13345_v22  ;;  %v11534_v47 = vrot.slane %v5508_v44, 9  ;;  %v11536_v19 = vrot.slane %v5510_v25, 9  ;;  %v4205_v63 = vrot.slane %v4203_v60, 5  ;;  %v4219_v45 = vrot.slane %v4217_v20, 4  ;;  %v5509_v22 = vld [vmem:[#allocation3 + $0x8] sm:$0xe] }
 0x4c4   :  { %v4211_v46 = vrot.slane %v4210_v36, 4  ;;  %4743 = vmatprep.subr.bf16.mxu1 %v13350_v4  ;;  %v5528_v43 = vrot.slane %v5522_v29, 4  ;;  %v5542_v50 = vrot.slane %v5536_v0, 4  ;;  %v5526_v49 = vrot.slane %v15986_v62, 5 }
 0x4c5   :  { %v5523_v11 = vsel %vm14483_vm14, %v11534_v47, %v5522_v29  ;;  %v5537_v59 = vsel %vm14483_vm14, %v11536_v19, %v5536_v0  ;;  %v5540_v54 = vrot.slane %v16036_v61, 5  ;;  %v5532_v8 = vrot.slane %v16002_v28, 5  ;;  %v13356_v29 = vld [vmem:[%s18366_s5 + $0x26c] ss:$16 sps:$4 sm:$0xff]  }
 0x4c6   :  { %v4216_v14 = vsel %vm14494_vm1, %v4211_v46, %v4215_v2  ;;  %v5530_v4 = vsel %vm14483_vm14, %v5528_v43, %v5529_v37  ;;  %v5544_v21 = vsel %vm14483_vm14, %v5542_v50, %v5543_v17  ;;  %v5546_v41 = vrot.slane %v4130_v26, 5  ;;  %v13359_v0 = vld [vmem:[%s18366_s5 + $0x28c] ss:$16 sps:$4 sm:$0xff]   ;;  %v13360_v43 = vld [vmem:[%s18366_s5 + $0x2a8] ss:$16 sps:$4 sm:$0xff]  }
 0x4c7   :  { %v16073_v38 = vcombine.high %v4192_v1, %v4216_v14  ;;  %v16075_v7 = vcombine.low %v4192_v1, %v4216_v14  ;;  %4744 = vmatpush1.bf16.msra.mxu1 %v13348_v32  ;;  %v16091_v55 = vcombine.low %v5523_v11, %v5530_v4  ;;  %v16093_v56 = vcombine.high %v5523_v11, %v5530_v4  ;;  %v13363_v50 = vld [vmem:[%s18366_s5 + $0x2c8] ss:$16 sps:$4 sm:$0xff]   ;;  %v13368_v11 = vld [vmem:[%s18366_s5 + $0x2ec] ss:$16 sps:$4 sm:$0xff]  }
 0x4c8   :  { %4794 = vmatprep.subr.bf16.mxu1 %v13353_v18  ;;  %v16095_v62 = vcombine.high %v5537_v59, %v5544_v21  ;;  %v16097_v61 = vcombine.low %v5537_v59, %v5544_v21  ;;  %v11535_v9 = vrot.slane %v5509_v22, 9  ;;  %v5531_v57 = vrot.slane %v5526_v49, 4  ;;  %v13371_v59 = vld [vmem:[%s18366_s5 + $0x30c] ss:$16 sps:$4 sm:$0xff]   ;;  %v13369_v22 = vld [vmem:[%s18366_s5 + $0x308] ss:$16 sps:$4 sm:$0xff]  }
 0x4c9   :  { %4730 = vmatprep.mubr.bf16.mxu1 %v16073_v38  ;;  %v11537_v36 = vrot.slane %v5511_v42, 9  ;;  %v5545_v32 = vrot.slane %v5540_v54, 4  ;;  %v4158_v28 = vsel %vm14494_vm1, %v16044_v40, %v16008_v5  ;;  %v4178_v18 = vsel %vm14494_vm1, %v4173_v51, %v16046_v34  ;;  %v13351_v5 = vld [vmem:[%s18366_s5 + $0x248] ss:$16 sps:$4 sm:$0xff]   ;;  %v13380_v21 = vld [vmem:[%s18366_s5 + $0x36c] ss:$16 sps:$4 sm:$0xff]  }
 0x4ca   :  { %4731 = vmatmul.mubr.bf16.gmra.mrb[20].mxu1 %v16075_v7  ;;  %v4220_v60 = vor.u32 %v4219_v45, %v4205_v63  ;;  %v5527_v20 = vsel %vm14483_vm14, %v11535_v9, %v5526_v49  ;;  %v5533_v46 = vsel %vm14483_vm14, %v5531_v57, %v5532_v8  ;;  %v4200_v40 = vor.u32 %v4199_v48, %v16051_v15  ;;  %v13354_v15 = vld [vmem:[%s18366_s5 + $0x268] ss:$16 sps:$4 sm:$0xff]   ;;  %v13362_v45 = vld [vmem:[%s18366_s5 + $0x2ac] ss:$16 sps:$4 sm:$0xff]  }
 0x4cb   :  { %4773 = vmatprep.mubr.bf16.mxu1 %v15414_v52  ;;  %v5541_v2 = vsel %vm14483_vm14, %v11537_v36, %v5540_v54  ;;  %v5547_v44 = vsel %vm14483_vm14, %v5545_v32, %v5546_v41  ;;  %v4223_v34 = vshll.u32 %v4130_v26, 16  ;;  %v16118_v25 = vcombine.low %v5527_v20, %v5533_v46  ;;  %v13357_v26 = vld [vmem:[%s18366_s5 + $0x288] ss:$16 sps:$4 sm:$0xff]   ;;  %v13374_v49 = vld [vmem:[%s18366_s5 + $0x32c] ss:$16 sps:$4 sm:$0xff]  }
 0x4cc   :  { %v16120_v1 = vcombine.low %v5541_v2, %v5547_v44  ;;  %v16122_v51 = vcombine.low %v4158_v28, %v4178_v18  ;;  %v4221_v14 = vrot.slane %v4220_v60, 4  ;;  %v4201_v48 = vrot.slane %v4200_v40, 4  ;;  %v13372_v42 = vld [vmem:[%s18366_s5 + $0x328] ss:$16 sps:$4 sm:$0xff]   ;;  %v13377_v54 = vld [vmem:[%s18366_s5 + $0x34c] ss:$16 sps:$4 sm:$0xff]  }
 0x4cd   :  { %v4225_v37 = vrot.slane %v4223_v34, 5  ;;  %v13375_v4 = vld [vmem:[%s18366_s5 + $0x348] ss:$16 sps:$4 sm:$0xff]   ;;  %v13383_v41 = vld [vmem:[%s18366_s5 + $0x38c] ss:$16 sps:$4 sm:$0xff]   ;;  %vm79_vm4 = vcmask 519168  }
 0x4ce   :  { %v4206_v47 = vsel %vm14494_vm1, %v4201_v48, %v4205_v63  ;;  %v13365_v63 = vld [vmem:[%s18366_s5 + $0x2cc] ss:$16 sps:$4 sm:$0xff]   ;;  %v13378_v8 = vld [vmem:[%s18366_s5 + $0x368] ss:$16 sps:$4 sm:$0xff]   ;;  %v13411_v48 = vld [vmem:[%s18366_s5 + $0x40] ss:$16 sps:$4 sm:$0xff]  }
 0x4cf   :  { %v4226_v17 = vsel %vm14494_vm1, %v4221_v14, %v4225_v37  ;;  %v13381_v9 = vld [vmem:[%s18366_s5 + $0x388] ss:$16 sps:$4 sm:$0xff]   ;;  %v13386_v57 = vld [vmem:[%s18366_s5 + $0x3ac] ss:$16 sps:$4 sm:$0xff]   ;;  %v13407_v14 = vld [vmem:[%s18366_s5 + $0x4] ss:$16 sps:$4 sm:$0xff]  }
 0x4d0   :  { %v16143_v19 = vcombine.low %v4206_v47, %v4226_v17  ;;  %v13384_v36 = vld [vmem:[%s18366_s5 + $0x3a8] ss:$16 sps:$4 sm:$0xff]   ;;  %v13389_v32 = vld [vmem:[%s18366_s5 + $0x3cc] ss:$16 sps:$4 sm:$0xff]   ;;  %v13414_v37 = vld [vmem:[%s18366_s5 + $0x60] ss:$16 sps:$4 sm:$0xff]  }
 0x4d1   :  { %v13387_v28 = vld [vmem:[%s18366_s5 + $0x3c8] ss:$16 sps:$4 sm:$0xff]   ;;  %v13392_v18 = vld [vmem:[%s18366_s5 + $0x3ec] ss:$16 sps:$4 sm:$0xff]   ;;  %v13417_v17 = vld [vmem:[%s18366_s5 + $0x80] ss:$16 sps:$4 sm:$0xff]  }
 0x4d2   :  { %11448 = vmatmul.mubr.msk.bf16.vlgmr.msra.gmra.mrb[16].mxu1 %vm3068_vm11, %v16122_v51  ;;  %v13390_v60 = vld [vmem:[%s18366_s5 + $0x3e8] ss:$16 sps:$4 sm:$0xff]   ;;  %v13395_v20 = vld [vmem:[%s18366_s5 + $0x40c] ss:$16 sps:$4 sm:$0xff]   ;;  %v13420_v47 = vld [vmem:[%s18366_s5 + $0xa0] ss:$16 sps:$4 sm:$0xff]  }
 0x4d3   :  { %4795 = vmatpush1.bf16.msra.mxu1 %v13351_v5  ;;  %4783 = vmatprep.mubr.bf16.mxu1 %v15414_v52  ;;  %v13393_v46 = vld [vmem:[%s18366_s5 + $0x408] ss:$16 sps:$4 sm:$0xff]   ;;  %v13398_v2 = vld [vmem:[%s18366_s5 + $0x42c] ss:$16 sps:$4 sm:$0xff]   ;;  %80 = vst.msk [vmem:[#allocation4 + $0x8] sm:$0xf] %vm79_vm4, %v15414_v52 }
 0x4d4   :  { %4796 = vmatprep.subr.bf16.mxu1 %v13356_v29  ;;  %v13396_v44 = vld [vmem:[%s18366_s5 + $0x428] ss:$16 sps:$4 sm:$0xff]   ;;  %v13401_v5 = vld [vmem:[%s18366_s5 + $0x44c] ss:$16 sps:$4 sm:$0xff]   ;;  %85 = vst.msk [vmem:[#allocation4 + $0x20] sm:$0xf] %vm79_vm4, %v15414_v52 }
 0x4d5   :  { %v13399_v40 = vld [vmem:[%s18366_s5 + $0x448] ss:$16 sps:$4 sm:$0xff]   ;;  %v13404_v34 = vld [vmem:[%s18366_s5 + $0x46c] ss:$16 sps:$4 sm:$0xff]   ;;  %vm18458_vm9 = vcmask 1043459   ;;  %vm18459_vm12 = vcmask 1044484  }
 0x4d6   :  { %v13402_v29 = vld [vmem:[%s18366_s5 + $0x468] ss:$16 sps:$4 sm:$0xff]   ;;  %vm18460_vm3 = vcmask 1045509   ;;  %vm18463_vm15 = vmmov %vm18458_vm9 }
 0x4d7   :  { %4797 = vmatpush1.bf16.msra.mxu1 %v13354_v15  ;;  %v13408_v15 = vld [vmem:[%s18366_s5 + $0x20] ss:$16 sps:$4 sm:$0xff]   ;;  %vm18465_vm4 = vmmov %vm18459_vm12 }
 0x4d8   :  { %4798 = vmatprep.subr.bf16.mxu1 %v13359_v0  ;;  %v13419_v0 = vld [vmem:[%s18366_s5 + $0x84] ss:$16 sps:$4 sm:$0xff]  }
 0x4da   :  { %11449 = vmatmul.mubr.msk.bf16.gmra.mrb[20].mxu1 %vm3068_vm11, %v16143_v19 }
 0x4db   :  { %4799 = vmatpush1.bf16.msra.mxu1 %v13357_v26  ;;  %4826 = vmatprep.mubr.bf16.mxu1 %v16031_v58  ;;  %v13366_v58 = vld [vmem:[%s18366_s5 + $0x2e8] ss:$16 sps:$4 sm:$0xff]   ;;  %v13422_v26 = vld [vmem:[%s18366_s5 + $0xa4] ss:$16 sps:$4 sm:$0xff]  }
 0x4dc   :  { %4800 = vmatprep.subr.bf16.mxu1 %v13362_v45  ;;  %v13423_v45 = vld [vmem:[%s18366_s5 + $0xc0] ss:$16 sps:$4 sm:$0xff]  }
 0x4df   :  { %4801 = vmatpush1.bf16.msra.mxu1 %v13360_v43  ;;  %v13428_v43 = vld [vmem:[%s18366_s5 + $0xe4] ss:$16 sps:$4 sm:$0xff]  }
 0x4e0   :  { %4802 = vmatprep.subr.bf16.mxu1 %v13365_v63  ;;  %v13426_v63 = vld [vmem:[%s18366_s5 + $0xe0] ss:$16 sps:$4 sm:$0xff]  }
 0x4e3   :  { %4803 = vmatpush1.bf16.msra.mxu1 %v13363_v50  ;;  %v13431_v50 = vld [vmem:[%s18366_s5 + $0x104] ss:$16 sps:$4 sm:$0xff]  }
 0x4e4   :  { %4804 = vmatprep.subr.bf16.mxu1 %v13368_v11  ;;  %v13429_v11 = vld [vmem:[%s18366_s5 + $0x100] ss:$16 sps:$4 sm:$0xff]  }
 0x4e7   :  { %4805 = vmatpush1.bf16.msra.mxu1 %v13366_v58  ;;  %v13434_v58 = vld [vmem:[%s18366_s5 + $0x124] ss:$16 sps:$4 sm:$0xff]  }
 0x4e8   :  { %4806 = vmatprep.subr.bf16.mxu1 %v13371_v59  ;;  %v13432_v59 = vld [vmem:[%s18366_s5 + $0x120] ss:$16 sps:$4 sm:$0xff]  }
 0x4eb   :  { %4807 = vmatpush1.bf16.msra.mxu1 %v13369_v22  ;;  %v13437_v22 = vld [vmem:[%s18366_s5 + $0x144] ss:$16 sps:$4 sm:$0xff]  }
 0x4ec   :  { %4808 = vmatprep.subr.bf16.mxu1 %v13374_v49  ;;  %v13435_v49 = vld [vmem:[%s18366_s5 + $0x140] ss:$16 sps:$4 sm:$0xff]  }
 0x4ef   :  { %4809 = vmatpush1.bf16.msra.mxu1 %v13372_v42  ;;  %v13440_v42 = vld [vmem:[%s18366_s5 + $0x164] ss:$16 sps:$4 sm:$0xff]  }
 0x4f0   :  { %4810 = vmatprep.subr.bf16.mxu1 %v13377_v54  ;;  %v13438_v54 = vld [vmem:[%s18366_s5 + $0x160] ss:$16 sps:$4 sm:$0xff]  }
 0x4f3   :  { %4811 = vmatpush1.bf16.msra.mxu1 %v13375_v4  ;;  %v13443_v4 = vld [vmem:[%s18366_s5 + $0x184] ss:$16 sps:$4 sm:$0xff]  }
 0x4f4   :  { %4812 = vmatprep.subr.bf16.mxu1 %v13380_v21  ;;  %v13441_v21 = vld [vmem:[%s18366_s5 + $0x180] ss:$16 sps:$4 sm:$0xff]  }
 0x4f7   :  { %4813 = vmatpush1.bf16.msra.mxu1 %v13378_v8  ;;  %v13446_v8 = vld [vmem:[%s18366_s5 + $0x1a4] ss:$16 sps:$4 sm:$0xff]  }
 0x4f8   :  { %4814 = vmatprep.subr.bf16.mxu1 %v13383_v41  ;;  %v13444_v41 = vld [vmem:[%s18366_s5 + $0x1a0] ss:$16 sps:$4 sm:$0xff]  }
 0x4fb   :  { %4815 = vmatpush1.bf16.msra.mxu1 %v13381_v9  ;;  %v13449_v9 = vld [vmem:[%s18366_s5 + $0x1c4] ss:$16 sps:$4 sm:$0xff]  }
 0x4fc   :  { %4816 = vmatprep.subr.bf16.mxu1 %v13386_v57  ;;  %v13447_v57 = vld [vmem:[%s18366_s5 + $0x1c0] ss:$16 sps:$4 sm:$0xff]  }
 0x4ff   :  { %4817 = vmatpush1.bf16.msra.mxu1 %v13384_v36  ;;  %v13452_v36 = vld [vmem:[%s18366_s5 + $0x1e4] ss:$16 sps:$4 sm:$0xff]  }
 0x500   :  { %4818 = vmatprep.subr.bf16.mxu1 %v13389_v32  ;;  %v13450_v32 = vld [vmem:[%s18366_s5 + $0x1e0] ss:$16 sps:$4 sm:$0xff]  }
 0x503   :  { %4819 = vmatpush1.bf16.msra.mxu1 %v13387_v28  ;;  %v13455_v28 = vld [vmem:[%s18366_s5 + $0x204] ss:$16 sps:$4 sm:$0xff]  }
 0x504   :  { %4820 = vmatprep.subr.bf16.mxu1 %v13392_v18  ;;  %v13453_v18 = vld [vmem:[%s18366_s5 + $0x200] ss:$16 sps:$4 sm:$0xff]  }
 0x507   :  { %4821 = vmatpush1.bf16.msra.mxu1 %v13390_v60  ;;  %v13458_v60 = vld [vmem:[%s18366_s5 + $0x224] ss:$16 sps:$4 sm:$0xff]  }
 0x508   :  { %4822 = vmatprep.subr.bf16.mxu1 %v13395_v20  ;;  %v13456_v20 = vld [vmem:[%s18366_s5 + $0x220] ss:$16 sps:$4 sm:$0xff]  }
 0x50b   :  { %4823 = vmatpush1.bf16.msra.mxu1 %v13393_v46  ;;  %v13461_v46 = vld [vmem:[%s18366_s5 + $0xc] ss:$16 sps:$4 sm:$0xff]  }
 0x50c   :  { %4824 = vmatprep.subr.bf16.mxu1 %v13398_v2  ;;  %v13459_v2 = vld [vmem:[%s18366_s5 + $0x8] ss:$16 sps:$4 sm:$0xff]  }
 0x50f   :  { %4825 = vmatpush1.bf16.msra.mxu1 %v13396_v44  ;;  %v13465_v44 = vld [vmem:[%s18366_s5 + $0x2c] ss:$16 sps:$4 sm:$0xff]  }
 0x510   :  { %4847 = vmatprep.subr.bf16.mxu1 %v13401_v5  ;;  %v13463_v5 = vld [vmem:[%s18366_s5 + $0x28] ss:$16 sps:$4 sm:$0xff]  }
 0x512   :  { %4827 = vmatmul.mubr.bf16.vlgmr.msra.gmra.mrb[24].mxu1 %v16029_v53  ;;  %v13405_v53 = vld [vmem:[%s18366_s5] ss:$16 sps:$4 sm:$0xff]  }
 0x513   :  { %4836 = vmatprep.mubr.bf16.mxu1 %v16073_v38  ;;  %4848 = vmatpush1.bf16.msra.mxu1 %v13399_v40  ;;  %v13410_v38 = vld [vmem:[%s18366_s5 + $0x24] ss:$16 sps:$4 sm:$0xff]   ;;  %v13468_v40 = vld [vmem:[%s18366_s5 + $0x4c] ss:$16 sps:$4 sm:$0xff]  }
 0x514   :  { %4849 = vmatprep.subr.bf16.mxu1 %v13404_v34  ;;  %v13466_v34 = vld [vmem:[%s18366_s5 + $0x48] ss:$16 sps:$4 sm:$0xff]  }
 0x517   :  { %4850 = vmatpush1.bf16.msra.mxu1 %v13402_v29  ;;  %v13472_v29 = vld [vmem:[%s18366_s5 + $0x6c] ss:$16 sps:$4 sm:$0xff]  }
 0x518   :  { %5296 = vmatprep.subr.bf16.mxu1 %v13407_v14  ;;  %v13470_v14 = vld [vmem:[%s18366_s5 + $0x68] ss:$16 sps:$4 sm:$0xff]  }
 0x51a   :  { %4837 = vmatmul.mubr.bf16.gmra.mrb[28].mxu1 %v16075_v7  ;;  %v13413_v7 = vld [vmem:[%s18366_s5 + $0x44] ss:$16 sps:$4 sm:$0xff]  }
 0x51b   :  { %4879 = vmatprep.mubr.bf16.mxu1 %v15414_v52 }
 0x522   :  { %11450 = vmatmul.mubr.msk.bf16.vlgmr.msra.gmra.mrb[24].mxu1 %vm3068_vm11, %v16122_v51  ;;  %v13416_v51 = vld [vmem:[%s18366_s5 + $0x64] ss:$16 sps:$4 sm:$0xff]  }
 0x523   :  { %5297 = vmatpush1.bf16.msra.mxu1 %v13405_v53  ;;  %4889 = vmatprep.mubr.bf16.mxu1 %v15414_v52  ;;  %v13475_v53 = vld [vmem:[%s18366_s5 + $0x8c] ss:$16 sps:$4 sm:$0xff]  }
 0x524   :  { %5298 = vmatprep.subr.bf16.mxu1 %v13410_v38  ;;  %v13473_v38 = vld [vmem:[%s18366_s5 + $0x88] ss:$16 sps:$4 sm:$0xff]  }
 0x527   :  { %5299 = vmatpush1.bf16.msra.mxu1 %v13408_v15  ;;  %v13478_v15 = vld [vmem:[%s18366_s5 + $0xac] ss:$16 sps:$4 sm:$0xff]  }
 0x528   :  { %5300 = vmatprep.subr.bf16.mxu1 %v13413_v7  ;;  %v13481_v7 = vld [vmem:[%s18366_s5 + $0xcc] ss:$16 sps:$4 sm:$0xff]  }
 0x52a   :  { %11451 = vmatmul.mubr.msk.bf16.gmra.mrb[28].mxu1 %vm3068_vm11, %v16143_v19  ;;  %v13425_v19 = vld [vmem:[%s18366_s5 + $0xc4] ss:$16 sps:$4 sm:$0xff]  }
 0x52b   :  { %5301 = vmatpush1.bf16.msra.mxu1 %v13411_v48  ;;  %5328 = vmatprep.mubr.bf16.mxu1 %v16006_v3  ;;  %v13479_v48 = vld [vmem:[%s18366_s5 + $0xc8] ss:$16 sps:$4 sm:$0xff]  }
 0x52c   :  { %5302 = vmatprep.subr.bf16.mxu1 %v13416_v51  ;;  %v13484_v51 = vld [vmem:[%s18366_s5 + $0xec] ss:$16 sps:$4 sm:$0xff]  }
 0x52f   :  { %5303 = vmatpush1.bf16.msra.mxu1 %v13414_v37  ;;  %v13482_v37 = vld [vmem:[%s18366_s5 + $0xe8] ss:$16 sps:$4 sm:$0xff]  }
 0x530   :  { %5304 = vmatprep.subr.bf16.mxu1 %v13419_v0  ;;  %v13487_v0 = vld [vmem:[%s18366_s5 + $0x10c] ss:$16 sps:$4 sm:$0xff]  }
 0x533   :  { %5305 = vmatpush1.bf16.msra.mxu1 %v13417_v17  ;;  %v13485_v17 = vld [vmem:[%s18366_s5 + $0x108] ss:$16 sps:$4 sm:$0xff]  }
 0x534   :  { %5306 = vmatprep.subr.bf16.mxu1 %v13422_v26  ;;  %v13490_v26 = vld [vmem:[%s18366_s5 + $0x12c] ss:$16 sps:$4 sm:$0xff]  }
 0x537   :  { %5307 = vmatpush1.bf16.msra.mxu1 %v13420_v47  ;;  %v13488_v47 = vld [vmem:[%s18366_s5 + $0x128] ss:$16 sps:$4 sm:$0xff]  }
 0x538   :  { %5308 = vmatprep.subr.bf16.mxu1 %v13425_v19  ;;  %v13493_v19 = vld [vmem:[%s18366_s5 + $0x14c] ss:$16 sps:$4 sm:$0xff]  }
 0x53b   :  { %5309 = vmatpush1.bf16.msra.mxu1 %v13423_v45  ;;  %v13491_v45 = vld [vmem:[%s18366_s5 + $0x148] ss:$16 sps:$4 sm:$0xff]  }
 0x53c   :  { %5310 = vmatprep.subr.bf16.mxu1 %v13428_v43  ;;  %v13496_v43 = vld [vmem:[%s18366_s5 + $0x16c] ss:$16 sps:$4 sm:$0xff]  }
 0x53f   :  { %5311 = vmatpush1.bf16.msra.mxu1 %v13426_v63  ;;  %v13494_v63 = vld [vmem:[%s18366_s5 + $0x168] ss:$16 sps:$4 sm:$0xff]  }
 0x540   :  { %5312 = vmatprep.subr.bf16.mxu1 %v13431_v50  ;;  %v13499_v50 = vld [vmem:[%s18366_s5 + $0x18c] ss:$16 sps:$4 sm:$0xff]  }
 0x543   :  { %5313 = vmatpush1.bf16.msra.mxu1 %v13429_v11  ;;  %v13497_v11 = vld [vmem:[%s18366_s5 + $0x188] ss:$16 sps:$4 sm:$0xff]  }
 0x544   :  { %5314 = vmatprep.subr.bf16.mxu1 %v13434_v58  ;;  %v13502_v58 = vld [vmem:[%s18366_s5 + $0x1ac] ss:$16 sps:$4 sm:$0xff]  }
 0x547   :  { %5315 = vmatpush1.bf16.msra.mxu1 %v13432_v59  ;;  %v13500_v59 = vld [vmem:[%s18366_s5 + $0x1a8] ss:$16 sps:$4 sm:$0xff]  }
 0x548   :  { %5316 = vmatprep.subr.bf16.mxu1 %v13437_v22  ;;  %v13505_v22 = vld [vmem:[%s18366_s5 + $0x1cc] ss:$16 sps:$4 sm:$0xff]  }
 0x54b   :  { %5317 = vmatpush1.bf16.msra.mxu1 %v13435_v49  ;;  %v13503_v49 = vld [vmem:[%s18366_s5 + $0x1c8] ss:$16 sps:$4 sm:$0xff]  }
 0x54c   :  { %5318 = vmatprep.subr.bf16.mxu1 %v13440_v42  ;;  %v13508_v42 = vld [vmem:[%s18366_s5 + $0x1ec] ss:$16 sps:$4 sm:$0xff]  }
 0x54f   :  { %5319 = vmatpush1.bf16.msra.mxu1 %v13438_v54  ;;  %v13506_v54 = vld [vmem:[%s18366_s5 + $0x1e8] ss:$16 sps:$4 sm:$0xff]  }
 0x550   :  { %5320 = vmatprep.subr.bf16.mxu1 %v13443_v4  ;;  %v13511_v4 = vld [vmem:[%s18366_s5 + $0x20c] ss:$16 sps:$4 sm:$0xff]  }
 0x553   :  { %5321 = vmatpush1.bf16.msra.mxu1 %v13441_v21  ;;  %v13509_v21 = vld [vmem:[%s18366_s5 + $0x208] ss:$16 sps:$4 sm:$0xff]  }
 0x554   :  { %5322 = vmatprep.subr.bf16.mxu1 %v13446_v8  ;;  %v13514_v8 = vld [vmem:[%s18366_s5 + $0x22c] ss:$16 sps:$4 sm:$0xff]  }
 0x557   :  { %5323 = vmatpush1.bf16.msra.mxu1 %v13444_v41  ;;  %v13512_v41 = vld [vmem:[%s18366_s5 + $0x228] ss:$16 sps:$4 sm:$0xff]  }
 0x558   :  { %5324 = vmatprep.subr.bf16.mxu1 %v13449_v9  ;;  %v13517_v9 = vld [vmem:[%s18366_s5 + $0x484] ss:$16 sps:$4 sm:$0xff]  }
 0x55b   :  { %5325 = vmatpush1.bf16.msra.mxu1 %v13447_v57  ;;  %v13518_v57 = vld [vmem:[%s18366_s5 + $0x4a0] ss:$16 sps:$4 sm:$0xff]  }
 0x55c   :  { %5326 = vmatprep.subr.bf16.mxu1 %v13452_v36  ;;  %v13521_v36 = vld [vmem:[%s18366_s5 + $0x4c0] ss:$16 sps:$4 sm:$0xff]  }
 0x55f   :  { %5327 = vmatpush1.bf16.msra.mxu1 %v13450_v32  ;;  %v13524_v32 = vld [vmem:[%s18366_s5 + $0x4e0] ss:$16 sps:$4 sm:$0xff]  }
 0x560   :  { %5349 = vmatprep.subr.bf16.mxu1 %v13455_v28  ;;  %v13529_v28 = vld [vmem:[%s18366_s5 + $0x504] ss:$16 sps:$4 sm:$0xff]  }
 0x562   :  { %5329 = vmatmul.mubr.bf16.vlgmr.msra.gmra.mrb[16].mxu1 %v16012_v16 }
 0x563   :  { %5338 = vmatprep.mubr.bf16.mxu1 %v16057_v30  ;;  %5350 = vmatpush1.bf16.msra.mxu1 %v13453_v18  ;;  %v13527_v18 = vld [vmem:[%s18366_s5 + $0x500] ss:$16 sps:$4 sm:$0xff]  }
 0x564   :  { %5351 = vmatprep.subr.bf16.mxu1 %v13458_v60  ;;  %v13530_v60 = vld [vmem:[%s18366_s5 + $0x520] ss:$16 sps:$4 sm:$0xff]  }
 0x567   :  { %5352 = vmatpush1.bf16.msra.mxu1 %v13456_v20  ;;  %v13535_v20 = vld [vmem:[%s18366_s5 + $0x544] ss:$16 sps:$4 sm:$0xff]  }
 0x568   :  { %5402 = vmatprep.subr.bf16.mxu1 %v13461_v46  ;;  %v13533_v46 = vld [vmem:[%s18366_s5 + $0x540] ss:$16 sps:$4 sm:$0xff]  }
 0x56a   :  { %5339 = vmatmul.mubr.bf16.gmra.mrb[20].mxu1 %v16061_v31 }
 0x56b   :  { %5381 = vmatprep.mubr.bf16.mxu1 %v15414_v52 }
 0x572   :  { %11530 = vmatmul.mubr.msk.bf16.vlgmr.msra.gmra.mrb[16].mxu1 %vm3068_vm11, %v16018_v33 }
 0x573   :  { %5403 = vmatpush1.bf16.msra.mxu1 %v13459_v2  ;;  %5391 = vmatprep.mubr.bf16.mxu1 %v15414_v52  ;;  %v13538_v2 = vld [vmem:[%s18366_s5 + $0x564] ss:$16 sps:$4 sm:$0xff]  }
 0x574   :  { %5404 = vmatprep.subr.bf16.mxu1 %v13465_v44  ;;  %v13536_v44 = vld [vmem:[%s18366_s5 + $0x560] ss:$16 sps:$4 sm:$0xff]  }
 0x577   :  { %5405 = vmatpush1.bf16.msra.mxu1 %v13463_v5  ;;  %v13541_v5 = vld [vmem:[%s18366_s5 + $0x584] ss:$16 sps:$4 sm:$0xff]  }
 0x578   :  { %5406 = vmatprep.subr.bf16.mxu1 %v13468_v40  ;;  %v13539_v40 = vld [vmem:[%s18366_s5 + $0x580] ss:$16 sps:$4 sm:$0xff]  }
 0x57a   :  { %11531 = vmatmul.mubr.msk.bf16.gmra.mrb[20].mxu1 %vm3068_vm11, %v16064_v24 }
 0x57b   :  { %5407 = vmatpush1.bf16.msra.mxu1 %v13466_v34  ;;  %5434 = vmatprep.mubr.bf16.mxu1 %v16006_v3  ;;  %v13476_v3 = vld [vmem:[%s18366_s5 + $0xa8] ss:$16 sps:$4 sm:$0xff]   ;;  %v13544_v34 = vld [vmem:[%s18366_s5 + $0x5a4] ss:$16 sps:$4 sm:$0xff]  }
 0x57c   :  { %5408 = vmatprep.subr.bf16.mxu1 %v13472_v29  ;;  %v13542_v29 = vld [vmem:[%s18366_s5 + $0x5a0] ss:$16 sps:$4 sm:$0xff]  }
 0x57f   :  { %5409 = vmatpush1.bf16.msra.mxu1 %v13470_v14  ;;  %v13547_v14 = vld [vmem:[%s18366_s5 + $0x5c4] ss:$16 sps:$4 sm:$0xff]  }
 0x580   :  { %5410 = vmatprep.subr.bf16.mxu1 %v13475_v53  ;;  %v13545_v53 = vld [vmem:[%s18366_s5 + $0x5c0] ss:$16 sps:$4 sm:$0xff]  }
 0x583   :  { %5411 = vmatpush1.bf16.msra.mxu1 %v13473_v38  ;;  %v13550_v38 = vld [vmem:[%s18366_s5 + $0x5e4] ss:$16 sps:$4 sm:$0xff]  }
 0x584   :  { %5412 = vmatprep.subr.bf16.mxu1 %v13478_v15  ;;  %v13548_v15 = vld [vmem:[%s18366_s5 + $0x5e0] ss:$16 sps:$4 sm:$0xff]  }
 0x587   :  { %5413 = vmatpush1.bf16.msra.mxu1 %v13476_v3  ;;  %v13553_v3 = vld [vmem:[%s18366_s5 + $0x604] ss:$16 sps:$4 sm:$0xff]  }
 0x588   :  { %5414 = vmatprep.subr.bf16.mxu1 %v13481_v7  ;;  %v13551_v7 = vld [vmem:[%s18366_s5 + $0x600] ss:$16 sps:$4 sm:$0xff]  }
 0x58b   :  { %5415 = vmatpush1.bf16.msra.mxu1 %v13479_v48  ;;  %v13556_v48 = vld [vmem:[%s18366_s5 + $0x624] ss:$16 sps:$4 sm:$0xff]  }
 0x58c   :  { %5416 = vmatprep.subr.bf16.mxu1 %v13484_v51  ;;  %v13554_v51 = vld [vmem:[%s18366_s5 + $0x620] ss:$16 sps:$4 sm:$0xff]  }
 0x58f   :  { %5417 = vmatpush1.bf16.msra.mxu1 %v13482_v37  ;;  %v13559_v37 = vld [vmem:[%s18366_s5 + $0x644] ss:$16 sps:$4 sm:$0xff]  }
 0x590   :  { %5418 = vmatprep.subr.bf16.mxu1 %v13487_v0  ;;  %v13557_v0 = vld [vmem:[%s18366_s5 + $0x640] ss:$16 sps:$4 sm:$0xff]  }
 0x593   :  { %5419 = vmatpush1.bf16.msra.mxu1 %v13485_v17  ;;  %v13562_v17 = vld [vmem:[%s18366_s5 + $0x664] ss:$16 sps:$4 sm:$0xff]  }
 0x594   :  { %5420 = vmatprep.subr.bf16.mxu1 %v13490_v26  ;;  %v13560_v26 = vld [vmem:[%s18366_s5 + $0x660] ss:$16 sps:$4 sm:$0xff]  }
 0x597   :  { %5421 = vmatpush1.bf16.msra.mxu1 %v13488_v47  ;;  %v13565_v47 = vld [vmem:[%s18366_s5 + $0x684] ss:$16 sps:$4 sm:$0xff]  }
 0x598   :  { %5422 = vmatprep.subr.bf16.mxu1 %v13493_v19  ;;  %v13563_v19 = vld [vmem:[%s18366_s5 + $0x680] ss:$16 sps:$4 sm:$0xff]  }
 0x59b   :  { %5423 = vmatpush1.bf16.msra.mxu1 %v13491_v45  ;;  %v13568_v45 = vld [vmem:[%s18366_s5 + $0x6a4] ss:$16 sps:$4 sm:$0xff]  }
 0x59c   :  { %5424 = vmatprep.subr.bf16.mxu1 %v13496_v43  ;;  %v13566_v43 = vld [vmem:[%s18366_s5 + $0x6a0] ss:$16 sps:$4 sm:$0xff]  }
 0x59f   :  { %5425 = vmatpush1.bf16.msra.mxu1 %v13494_v63  ;;  %v13571_v63 = vld [vmem:[%s18366_s5 + $0x48c] ss:$16 sps:$4 sm:$0xff]  }
 0x5a0   :  { %5426 = vmatprep.subr.bf16.mxu1 %v13499_v50  ;;  %v13569_v50 = vld [vmem:[%s18366_s5 + $0x488] ss:$16 sps:$4 sm:$0xff]  }
 0x5a3   :  { %5427 = vmatpush1.bf16.msra.mxu1 %v13497_v11  ;;  %v13574_v11 = vld [vmem:[%s18366_s5 + $0x4ac] ss:$16 sps:$4 sm:$0xff]  }
 0x5a4   :  { %5428 = vmatprep.subr.bf16.mxu1 %v13502_v58  ;;  %v13572_v58 = vld [vmem:[%s18366_s5 + $0x4a8] ss:$16 sps:$4 sm:$0xff]  }
 0x5a7   :  { %5429 = vmatpush1.bf16.msra.mxu1 %v13500_v59  ;;  %v13577_v59 = vld [vmem:[%s18366_s5 + $0x4cc] ss:$16 sps:$4 sm:$0xff]  }
 0x5a8   :  { %5430 = vmatprep.subr.bf16.mxu1 %v13505_v22  ;;  %v13575_v22 = vld [vmem:[%s18366_s5 + $0x4c8] ss:$16 sps:$4 sm:$0xff]  }
 0x5ab   :  { %5431 = vmatpush1.bf16.msra.mxu1 %v13503_v49  ;;  %v13580_v49 = vld [vmem:[%s18366_s5 + $0x4ec] ss:$16 sps:$4 sm:$0xff]  }
 0x5ac   :  { %5432 = vmatprep.subr.bf16.mxu1 %v13508_v42  ;;  %v13578_v42 = vld [vmem:[%s18366_s5 + $0x4e8] ss:$16 sps:$4 sm:$0xff]  }
 0x5af   :  { %5433 = vmatpush1.bf16.msra.mxu1 %v13506_v54  ;;  %v13583_v54 = vld [vmem:[%s18366_s5 + $0x50c] ss:$16 sps:$4 sm:$0xff]  }
 0x5b0   :  { %5455 = vmatprep.subr.bf16.mxu1 %v13511_v4  ;;  %v13581_v4 = vld [vmem:[%s18366_s5 + $0x508] ss:$16 sps:$4 sm:$0xff]  }
 0x5b2   :  { %5435 = vmatmul.mubr.bf16.vlgmr.msra.gmra.mrb[24].mxu1 %v16012_v16  ;;  %v13515_v16 = vld [vmem:[%s18366_s5 + $0x480] ss:$16 sps:$4 sm:$0xff]  }
 0x5b3   :  { %5444 = vmatprep.mubr.bf16.mxu1 %v16057_v30  ;;  %5456 = vmatpush1.bf16.msra.mxu1 %v13509_v21  ;;  %v13520_v30 = vld [vmem:[%s18366_s5 + $0x4a4] ss:$16 sps:$4 sm:$0xff]   ;;  %v13586_v21 = vld [vmem:[%s18366_s5 + $0x52c] ss:$16 sps:$4 sm:$0xff]  }
 0x5b4   :  { %5457 = vmatprep.subr.bf16.mxu1 %v13514_v8  ;;  %v13589_v8 = vld [vmem:[%s18366_s5 + $0x54c] ss:$16 sps:$4 sm:$0xff]  }
 0x5b7   :  { %5458 = vmatpush1.bf16.msra.mxu1 %v13512_v41  ;;  %v13587_v41 = vld [vmem:[%s18366_s5 + $0x548] ss:$16 sps:$4 sm:$0xff]  }
 0x5b8   :  { %6009 = vmatprep.subr.bf16.mxu1 %v13517_v9  ;;  %v13592_v9 = vld [vmem:[%s18366_s5 + $0x56c] ss:$16 sps:$4 sm:$0xff]  }
 0x5ba   :  { %5445 = vmatmul.mubr.bf16.gmra.mrb[28].mxu1 %v16061_v31  ;;  %v13523_v31 = vld [vmem:[%s18366_s5 + $0x4c4] ss:$16 sps:$4 sm:$0xff]  }
 0x5bb   :  { %5487 = vmatprep.mubr.bf16.mxu1 %v15414_v52 }
 0x5c2   :  { %11532 = vmatmul.mubr.msk.bf16.vlgmr.msra.gmra.mrb[24].mxu1 %vm3068_vm11, %v16018_v33  ;;  %v13526_v33 = vld [vmem:[%s18366_s5 + $0x4e4] ss:$16 sps:$4 sm:$0xff]  }
 0x5c3   :  { %6010 = vmatpush1.bf16.msra.mxu1 %v13515_v16  ;;  %5497 = vmatprep.mubr.bf16.mxu1 %v15414_v52  ;;  %v13590_v16 = vld [vmem:[%s18366_s5 + $0x568] ss:$16 sps:$4 sm:$0xff]  }
 0x5c4   :  { %6011 = vmatprep.subr.bf16.mxu1 %v13520_v30  ;;  %v13595_v30 = vld [vmem:[%s18366_s5 + $0x58c] ss:$16 sps:$4 sm:$0xff]  }
 0x5c7   :  { %6012 = vmatpush1.bf16.msra.mxu1 %v13518_v57  ;;  %v13593_v57 = vld [vmem:[%s18366_s5 + $0x588] ss:$16 sps:$4 sm:$0xff]  }
 0x5c8   :  { %6013 = vmatprep.subr.bf16.mxu1 %v13523_v31  ;;  %v13598_v31 = vld [vmem:[%s18366_s5 + $0x5ac] ss:$16 sps:$4 sm:$0xff]  }
 0x5ca   :  { %11533 = vmatmul.mubr.msk.bf16.gmra.mrb[28].mxu1 %vm3068_vm11, %v16064_v24  ;;  %v13532_v24 = vld [vmem:[%s18366_s5 + $0x524] ss:$16 sps:$4 sm:$0xff]  }
 0x5cb   :  { %6014 = vmatpush1.bf16.msra.mxu1 %v13521_v36  ;;  %6041 = vmatprep.mubr.bf16.mxu1 %v16093_v56  ;;  %v13596_v36 = vld [vmem:[%s18366_s5 + $0x5a8] ss:$16 sps:$4 sm:$0xff]  }
 0x5cc   :  { %6015 = vmatprep.subr.bf16.mxu1 %v13526_v33  ;;  %v13601_v33 = vld [vmem:[%s18366_s5 + $0x5cc] ss:$16 sps:$4 sm:$0xff]  }
 0x5cf   :  { %6016 = vmatpush1.bf16.msra.mxu1 %v13524_v32  ;;  %v13599_v32 = vld [vmem:[%s18366_s5 + $0x5c8] ss:$16 sps:$4 sm:$0xff]  }
 0x5d0   :  { %6017 = vmatprep.subr.bf16.mxu1 %v13529_v28  ;;  %v13604_v28 = vld [vmem:[%s18366_s5 + $0x5ec] ss:$16 sps:$4 sm:$0xff]  }
 0x5d3   :  { %6018 = vmatpush1.bf16.msra.mxu1 %v13527_v18  ;;  %v13602_v18 = vld [vmem:[%s18366_s5 + $0x5e8] ss:$16 sps:$4 sm:$0xff]  }
 0x5d4   :  { %6019 = vmatprep.subr.bf16.mxu1 %v13532_v24  ;;  %v13607_v24 = vld [vmem:[%s18366_s5 + $0x60c] ss:$16 sps:$4 sm:$0xff]  }
 0x5d7   :  { %6020 = vmatpush1.bf16.msra.mxu1 %v13530_v60  ;;  %v13605_v60 = vld [vmem:[%s18366_s5 + $0x608] ss:$16 sps:$4 sm:$0xff]  }
 0x5d8   :  { %6021 = vmatprep.subr.bf16.mxu1 %v13535_v20  ;;  %v13610_v20 = vld [vmem:[%s18366_s5 + $0x62c] ss:$16 sps:$4 sm:$0xff]  }
 0x5db   :  { %6022 = vmatpush1.bf16.msra.mxu1 %v13533_v46  ;;  %v13608_v46 = vld [vmem:[%s18366_s5 + $0x628] ss:$16 sps:$4 sm:$0xff]  }
 0x5dc   :  { %6023 = vmatprep.subr.bf16.mxu1 %v13538_v2  ;;  %v13613_v2 = vld [vmem:[%s18366_s5 + $0x64c] ss:$16 sps:$4 sm:$0xff]  }
 0x5df   :  { %6024 = vmatpush1.bf16.msra.mxu1 %v13536_v44  ;;  %v13611_v44 = vld [vmem:[%s18366_s5 + $0x648] ss:$16 sps:$4 sm:$0xff]  }
 0x5e0   :  { %6025 = vmatprep.subr.bf16.mxu1 %v13541_v5  ;;  %v13616_v5 = vld [vmem:[%s18366_s5 + $0x66c] ss:$16 sps:$4 sm:$0xff]  }
 0x5e3   :  { %6026 = vmatpush1.bf16.msra.mxu1 %v13539_v40  ;;  %v13614_v40 = vld [vmem:[%s18366_s5 + $0x668] ss:$16 sps:$4 sm:$0xff]  }
 0x5e4   :  { %6027 = vmatprep.subr.bf16.mxu1 %v13544_v34  ;;  %v13619_v34 = vld [vmem:[%s18366_s5 + $0x68c] ss:$16 sps:$4 sm:$0xff]  }
 0x5e7   :  { %6028 = vmatpush1.bf16.msra.mxu1 %v13542_v29  ;;  %v13617_v29 = vld [vmem:[%s18366_s5 + $0x688] ss:$16 sps:$4 sm:$0xff]  }
 0x5e8   :  { %6029 = vmatprep.subr.bf16.mxu1 %v13547_v14  ;;  %v13622_v14 = vld [vmem:[%s18366_s5 + $0x6ac] ss:$16 sps:$4 sm:$0xff]  }
 0x5eb   :  { %6030 = vmatpush1.bf16.msra.mxu1 %v13545_v53  ;;  %v13620_v53 = vld [vmem:[%s18366_s5 + $0x6a8] ss:$16 sps:$4 sm:$0xff]  }
 0x5ec   :  { %6031 = vmatprep.subr.bf16.mxu1 %v13550_v38 }
 0x5ef   :  { %6032 = vmatpush1.bf16.msra.mxu1 %v13548_v15 }
 0x5f0   :  { %6033 = vmatprep.subr.bf16.mxu1 %v13553_v3 }
 0x5f3   :  { %6034 = vmatpush1.bf16.msra.mxu1 %v13551_v7 }
 0x5f4   :  { %6035 = vmatprep.subr.bf16.mxu1 %v13556_v48 }
 0x5f7   :  { %6036 = vmatpush1.bf16.msra.mxu1 %v13554_v51  ;;  %v13628_v51 = vld [vmem:[%s18368_s7 + $0x154] ss:$8 sps:$4 sm:$0xff]  }
 0x5f8   :  { %6037 = vmatprep.subr.bf16.mxu1 %v13559_v37  ;;  %v13626_v37 = vld [vmem:[%s18368_s7 + $0x150] ss:$8 sps:$4 sm:$0xff]  }
 0x5fb   :  { %6038 = vmatpush1.bf16.msra.mxu1 %v13557_v0  ;;  %v13631_v0 = vld [vmem:[%s18368_s7 + $0x164] ss:$8 sps:$4 sm:$0xff]  }
 0x5fc   :  { %6039 = vmatprep.subr.bf16.mxu1 %v13562_v17  ;;  %v13629_v17 = vld [vmem:[%s18368_s7 + $0x160] ss:$8 sps:$4 sm:$0xff]  }
 0x5ff   :  { %6040 = vmatpush1.bf16.msra.mxu1 %v13560_v26  ;;  %v13634_v26 = vld [vmem:[%s18368_s7 + $0x174] ss:$8 sps:$4 sm:$0xff]  }
 0x600   :  { %6062 = vmatprep.subr.bf16.mxu1 %v13565_v47  ;;  %v13632_v47 = vld [vmem:[%s18368_s7 + $0x170] ss:$8 sps:$4 sm:$0xff]  }
 0x602   :  { %6042 = vmatmul.mubr.bf16.vlgmr.msra.gmra.mrb[16].mxu1 %v16091_v55 }
 0x603   :  { %6051 = vmatprep.mubr.bf16.mxu1 %v16095_v62  ;;  %6063 = vmatpush1.bf16.msra.mxu1 %v13563_v19  ;;  %v13637_v19 = vld [vmem:[%s18368_s7 + $0x184] ss:$8 sps:$4 sm:$0xff]  }
 0x604   :  { %6064 = vmatprep.subr.bf16.mxu1 %v13568_v45  ;;  %v13635_v45 = vld [vmem:[%s18368_s7 + $0x180] ss:$8 sps:$4 sm:$0xff]  }
 0x607   :  { %6065 = vmatpush1.bf16.msra.mxu1 %v13566_v43  ;;  %v13640_v43 = vld [vmem:[%s18368_s7 + $0x194] ss:$8 sps:$4 sm:$0xff]  }
 0x608   :  { %6115 = vmatprep.subr.bf16.mxu1 %v13571_v63  ;;  %v13638_v63 = vld [vmem:[%s18368_s7 + $0x190] ss:$8 sps:$4 sm:$0xff]  }
 0x60a   :  { %6052 = vmatmul.mubr.bf16.gmra.mrb[20].mxu1 %v16097_v61 }
 0x60b   :  { %6094 = vmatprep.mubr.bf16.mxu1 %v15414_v52 }
 0x612   :  { %11688 = vmatmul.mubr.msk.bf16.vlgmr.msra.gmra.mrb[16].mxu1 %vm3068_vm11, %v16118_v25 }
 0x613   :  { %6116 = vmatpush1.bf16.msra.mxu1 %v13569_v50  ;;  %6104 = vmatprep.mubr.bf16.mxu1 %v15414_v52  ;;  %v13643_v50 = vld [vmem:[%s18368_s7 + $0x1a4] ss:$8 sps:$4 sm:$0xff]  }
 0x614   :  { %6117 = vmatprep.subr.bf16.mxu1 %v13574_v11  ;;  %v13641_v11 = vld [vmem:[%s18368_s7 + $0x1a0] ss:$8 sps:$4 sm:$0xff]  }
 0x617   :  { %6118 = vmatpush1.bf16.msra.mxu1 %v13572_v58  ;;  %v13646_v58 = vld [vmem:[%s18368_s7 + $0x1b4] ss:$8 sps:$4 sm:$0xff]  }
 0x618   :  { %6119 = vmatprep.subr.bf16.mxu1 %v13577_v59  ;;  %v13644_v59 = vld [vmem:[%s18368_s7 + $0x1b0] ss:$8 sps:$4 sm:$0xff]  }
 0x61a   :  { %11689 = vmatmul.mubr.msk.bf16.gmra.mrb[20].mxu1 %vm3068_vm11, %v16120_v1 }
 0x61b   :  { %6120 = vmatpush1.bf16.msra.mxu1 %v13575_v22  ;;  %6147 = vmatprep.mubr.bf16.mxu1 %v16093_v56  ;;  %v13584_v56 = vld [vmem:[%s18366_s5 + $0x528] ss:$16 sps:$4 sm:$0xff]   ;;  %v13649_v22 = vld [vmem:[%s18368_s7 + $0x1c4] ss:$8 sps:$4 sm:$0xff]  }
 0x61c   :  { %6121 = vmatprep.subr.bf16.mxu1 %v13580_v49  ;;  %v13647_v49 = vld [vmem:[%s18368_s7 + $0x1c0] ss:$8 sps:$4 sm:$0xff]  }
 0x61f   :  { %6122 = vmatpush1.bf16.msra.mxu1 %v13578_v42  ;;  %v6237_v42 = vld [vmem:[%s18367_s6] sm:$0xf] }
 0x620   :  { %6123 = vmatprep.subr.bf16.mxu1 %v13583_v54  ;;  %v6242_v54 = vrot.slane %v6237_v42, %v14808_v6 }
 0x623   :  { %6124 = vmatpush1.bf16.msra.mxu1 %v13581_v4  ;;  %v6246_v4 = vrot.slane %v6237_v42, %v18452_v10 }
 0x624   :  { %6125 = vmatprep.subr.bf16.mxu1 %v13586_v21  ;;  %v16789_v21 = vrot.slane %v6237_v42, %v14811_v39 }
 0x627   :  { %6126 = vmatpush1.bf16.msra.mxu1 %v13584_v56  ;;  %v18455_v56 = vld [vmem:[#allocation11_spill] sm:$0xff] }
 0x628   :  { %6127 = vmatprep.subr.bf16.mxu1 %v13589_v8  ;;  %v18456_v8 = vsub.s32 3, %v18455_v56 }
 0x62b   :  { %6128 = vmatpush1.bf16.msra.mxu1 %v13587_v41  ;;  %v16793_v41 = vrot.slane %v6237_v42, %v18456_v8 }
 0x62c   :  { %6129 = vmatprep.subr.bf16.mxu1 %v13592_v9 }
 0x62f   :  { %6130 = vmatpush1.bf16.msra.mxu1 %v13590_v16 }
 0x630   :  { %6131 = vmatprep.subr.bf16.mxu1 %v13595_v30 }
 0x633   :  { %6132 = vmatpush1.bf16.msra.mxu1 %v13593_v57 }
 0x634   :  { %6133 = vmatprep.subr.bf16.mxu1 %v13598_v31 }
 0x637   :  { %6134 = vmatpush1.bf16.msra.mxu1 %v13596_v36 }
 0x638   :  { %6135 = vmatprep.subr.bf16.mxu1 %v13601_v33 }
 0x63b   :  { %6136 = vmatpush1.bf16.msra.mxu1 %v13599_v32 }
 0x63c   :  { %6137 = vmatprep.subr.bf16.mxu1 %v13604_v28 }
 0x63f   :  { %6138 = vmatpush1.bf16.msra.mxu1 %v13602_v18 }
 0x640   :  { %6139 = vmatprep.subr.bf16.mxu1 %v13607_v24 }
 0x643   :  { %6140 = vmatpush1.bf16.msra.mxu1 %v13605_v60 }
 0x644   :  { %6141 = vmatprep.subr.bf16.mxu1 %v13610_v20 }
 0x647   :  { %6142 = vmatpush1.bf16.msra.mxu1 %v13608_v46 }
 0x648   :  { %6143 = vmatprep.subr.bf16.mxu1 %v13613_v2 }
 0x64b   :  { %6144 = vmatpush1.bf16.msra.mxu1 %v13611_v44 }
 0x64c   :  { %6145 = vmatprep.subr.bf16.mxu1 %v13616_v5 }
 0x64f   :  { %6146 = vmatpush1.bf16.msra.mxu1 %v13614_v40 }
 0x650   :  { %6168 = vmatprep.subr.bf16.mxu1 %v13619_v34 }
 0x652   :  { %6148 = vmatmul.mubr.bf16.vlgmr.msra.gmra.mrb[24].mxu1 %v16091_v55 }
 0x653   :  { %6157 = vmatprep.mubr.bf16.mxu1 %v16095_v62  ;;  %6169 = vmatpush1.bf16.msra.mxu1 %v13617_v29 }
 0x654   :  { %6170 = vmatprep.subr.bf16.mxu1 %v13622_v14 }
 0x657   :  { %6171 = vmatpush1.bf16.msra.mxu1 %v13620_v53 }
 0x65a   :  { %6158 = vmatmul.mubr.bf16.gmra.mrb[28].mxu1 %v16097_v61 }
 0x65b   :  { %6200 = vmatprep.mubr.bf16.mxu1 %v15414_v52 }
 0x662   :  { %11690 = vmatmul.mubr.msk.bf16.vlgmr.msra.gmra.mrb[24].mxu1 %vm3068_vm11, %v16118_v25  ;;  %v13623_v25 = vld [vmem:[%s18368_s7 + $0x140] ss:$8 sps:$4 sm:$0xff]  }
 0x663   :  { %6210 = vmatprep.mubr.bf16.mxu1 %v15414_v52 }
 0x66a   :  { %11691 = vmatmul.mubr.msk.bf16.gmra.mrb[28].mxu1 %vm3068_vm11, %v16120_v1  ;;  %v13625_v1 = vld [vmem:[%s18368_s7 + $0x144] ss:$8 sps:$4 sm:$0xff]  }
 0x66b   :  { %7254 = vmatprep.subr.bf16.mxu0 %v13625_v1 }
 0x66c   :  { %7255 = vmatpush1.bf16.msra.mxu0 %v13623_v25 }
 0x66d   :  { %7256 = vmatprep.subr.bf16.mxu0 %v13628_v51 }
 0x670   :  { %7257 = vmatpush1.bf16.msra.mxu0 %v13626_v37 }
 0x671   :  { %7258 = vmatprep.subr.bf16.mxu0 %v13631_v0 }
 0x674   :  { %7259 = vmatpush1.bf16.msra.mxu0 %v13629_v17 }
 0x675   :  { %7260 = vmatprep.subr.bf16.mxu0 %v13634_v26 }
 0x678   :  { %7261 = vmatpush1.bf16.msra.mxu0 %v13632_v47 }
 0x679   :  { %7262 = vmatprep.subr.bf16.mxu0 %v13637_v19 }
 0x67c   :  { %7263 = vmatpush1.bf16.msra.mxu0 %v13635_v45 }
 0x67d   :  { %7264 = vmatprep.subr.bf16.mxu0 %v13640_v43 }
 0x680   :  { %7265 = vmatpush1.bf16.msra.mxu0 %v13638_v63 }
 0x681   :  { %7266 = vmatprep.subr.bf16.mxu0 %v13643_v50 }
 0x684   :  { %7267 = vmatpush1.bf16.msra.mxu0 %v13641_v11 }
 0x685   :  { %7268 = vmatprep.subr.bf16.mxu0 %v13646_v58 }
 0x688   :  { %7269 = vmatpush1.bf16.msra.mxu0 %v13644_v59 }
 0x689   :  { %7270 = vmatprep.subr.bf16.mxu0 %v13649_v22 }
 0x68c   :  { %7271 = vmatpush1.bf16.msra.mxu0 %v13647_v49 }
 0x6e5   :  { %v6096_v55 = vpop.f32.mrb[16].mxu1 }
 0x6e6   :  { %v6098_v62 = vpop.f32.mrb[17].mxu1  ;;  %v6259_v9 = vadd.f32 %v6242_v54, %v6096_v55 }
 0x6e7   :  { %v6100_v38 = vpop.f32.mrb[18].mxu1  ;;  %v6260_v16 = vadd.f32 %v6246_v4, %v6098_v62 }
 0x6e8   :  { %v6102_v15 = vpop.f32.mrb[19].mxu1  ;;  %v6263_v30 = vadd.f32 %v6242_v54, %v6100_v38  ;;  %v6275_v18 = vmax.f32 %v6259_v9, 0.0 }
 0x6e9   :  { %v6264_v33 = vadd.f32 %v6246_v4, %v6102_v15  ;;  %v6276_v46 = vmax.f32 %v6260_v16, 0.0 }
 0x6ea   :  { %v6279_v2 = vmax.f32 %v6263_v30, 0.0 }
 0x6eb   :  { %v6280_v53 = vmax.f32 %v6264_v33, 0.0 }
 0x6ed   :  { %v16719_v3 = vpop.f32.mrb[20].mxu1 }
 0x6ee   :  { %v16721_v7 = vpop.f32.mrb[21].mxu1  ;;  %v6267_v40 = vadd.f32 %v6242_v54, %v16719_v3 }
 0x6ef   :  { %v16723_v48 = vpop.f32.mrb[22].mxu1  ;;  %v6268_v34 = vadd.f32 %v6246_v4, %v16721_v7 }
 0x6f0   :  { %v16725_v61 = vpop.f32.mrb[23].mxu1  ;;  %v16802_v38 = vadd.f32 %v6242_v54, %v16723_v48  ;;  %v6283_v17 = vmax.f32 %v6267_v40, 0.0 }
 0x6f1   :  { %v16805_v15 = vadd.f32 %v6246_v4, %v16725_v61  ;;  %v6284_v3 = vmax.f32 %v6268_v34, 0.0 }
 0x6f2   :  { %v6287_v61 = vmax.f32 %v16802_v38, 0.0 }
 0x6f3   :  { %v6288_v63 = vmax.f32 %v16805_v15, 0.0 }
 0x735   :  { %v6202_v57 = vpop.f32.mrb[24].mxu1 }
 0x736   :  { %v6261_v31 = vadd.f32 %v16789_v21, %v6202_v57  ;;  %v6204_v36 = vpop.f32.mrb[25].mxu1 }
 0x737   :  { %v6262_v32 = vadd.f32 %v16793_v41, %v6204_v36  ;;  %v6206_v28 = vpop.f32.mrb[26].mxu1 }
 0x738   :  { %v6277_v24 = vmax.f32 %v6261_v31, 0.0  ;;  %v6265_v60 = vadd.f32 %v16789_v21, %v6206_v28  ;;  %v6208_v20 = vpop.f32.mrb[27].mxu1 }
 0x739   :  { %v6278_v44 = vmax.f32 %v6262_v32, 0.0  ;;  %v6266_v5 = vadd.f32 %v16793_v41, %v6208_v20 }
 0x73a   :  { %v6291_v29 = vmax.f32 %v6275_v18, %v6277_v24  ;;  %v6281_v14 = vmax.f32 %v6265_v60, 0.0 }
 0x73b   :  { %v6292_v55 = vmax.f32 %v6276_v46, %v6278_v44  ;;  %v6282_v62 = vmax.f32 %v6266_v5, 0.0 }
 0x73c   :  { %v6293_v25 = vmax.f32 %v6279_v2, %v6281_v14 }
 0x73d   :  { %v6307_v1 = vcombine.low %v6291_v29, %v6292_v55  ;;  %v6308_v51 = vcombine.high %v6291_v29, %v6292_v55  ;;  %v6294_v37 = vmax.f32 %v6280_v53, %v6282_v62  ;;  %v6212_v0 = vpop.f32.mrb[28].mxu1 }
 0x73e   :  { %v6269_v7 = vadd.f32 %v16789_v21, %v6212_v0  ;;  %v6214_v26 = vpop.f32.mrb[29].mxu1 }
 0x73f   :  { %v6315_v47 = vrot.slane %v6307_v1, %v14867_v13  ;;  %v6322_v19 = vrot.slane %v6308_v51, %v14867_v13  ;;  %v6325_v45 = vcombine.low %v6293_v25, %v6294_v37  ;;  %v6326_v48 = vcombine.high %v6293_v25, %v6294_v37  ;;  %v6216_v43 = vpop.f32.mrb[30].mxu1 }
 0x740   :  { %v6285_v50 = vmax.f32 %v6269_v7, 0.0  ;;  %v6270_v11 = vadd.f32 %v16793_v41, %v6214_v26  ;;  %v6218_v58 = vpop.f32.mrb[31].mxu1  ;;  %v6273_v29 = vadd.f32 %v16789_v21, %v6216_v43 }
 0x741   :  { %v6323_v59 = vcombine.high %v6315_v47, %v6315_v47  ;;  %v6324_v22 = vcombine.high %v6322_v19, %v6322_v19  ;;  %v11692_v49 = vrot.slane %v6315_v47, 9  ;;  %v11694_v42 = vrot.slane %v6322_v19, 9 }
 0x742   :  { %v6333_v54 = vrot.slane %v6325_v45, %v14867_v13  ;;  %v16815_v4 = vrot.slane %v6326_v48, %v14867_v13  ;;  %v6295_v56 = vmax.f32 %v6283_v17, %v6285_v50  ;;  %v6286_v8 = vmax.f32 %v6270_v11, 0.0 }
 0x743   :  { %v11693_v9 = vrot.slane %v6323_v59, 9  ;;  %v11695_v16 = vrot.slane %v6324_v22, 9  ;;  %v6443_v30 = vmax.f32 %v6315_v47, %v11692_v49  ;;  %v6445_v57 = vmax.f32 %v6322_v19, %v11694_v42 }
 0x744   :  { %v6341_v31 = vcombine.high %v6333_v54, %v6333_v54  ;;  %v11696_v36 = vrot.slane %v6333_v54, 9  ;;  %v11698_v33 = vrot.slane %v16815_v4, 9  ;;  %v6296_v32 = vmax.f32 %v6284_v3, %v6286_v8 }
 0x745   :  { %v6444_v28 = vmax.f32 %v6323_v59, %v11693_v9  ;;  %v6446_v18 = vmax.f32 %v6324_v22, %v11695_v16  ;;  %v6478_v24 = vrot.slane %v6443_v30, %v14808_v6  ;;  %v6482_v60 = vrot.slane %v6443_v30, %v14811_v39 }
 0x746   :  { %v6494_v20 = vrot.slane %v6445_v57, %v14808_v6  ;;  %v6498_v46 = vrot.slane %v6445_v57, %v14811_v39  ;;  %v11697_v2 = vrot.slane %v6341_v31, 9  ;;  %v6447_v44 = vmax.f32 %v6333_v54, %v11696_v36 }
 0x747   :  { %v6486_v5 = vrot.slane %v6444_v28, %v14808_v6  ;;  %v6490_v40 = vrot.slane %v6444_v28, %v14811_v39  ;;  %v6502_v34 = vrot.slane %v6446_v18, %v14808_v6  ;;  %v6506_v14 = vrot.slane %v6446_v18, %v14811_v39 }
 0x748   :  { %v12560_v53 = vpack.c.bf16 %v6482_v60, %v6478_v24  ;;  %v12562_v55 = vpack.c.bf16 %v6498_v46, %v6494_v20  ;;  %v6448_v62 = vmax.f32 %v6341_v31, %v11697_v2  ;;  %v6449_v1 = vmax.f32 %v16815_v4, %v11698_v33 }
 0x749   :  { %v12561_v25 = vpack.c.bf16 %v6490_v40, %v6486_v5  ;;  %v6510_v51 = vrot.slane %v6447_v44, %v14808_v6  ;;  %v6514_v37 = vrot.slane %v6447_v44, %v14811_v39  ;;  %v16832_v45 = vpack.c.bf16 %v6506_v14, %v6502_v34 }
 0x74a   :  { %v6747_v0 = vunpack.c.l.b16 %v12560_v53  ;;  %v6748_v17 = vunpack.c.h.b16 %v12560_v53  ;;  %v6751_v3 = vunpack.c.l.b16 %v12562_v55  ;;  %v6752_v7 = vunpack.c.h.b16 %v12562_v55 }
 0x74b   :  { %v6749_v26 = vunpack.c.l.b16 %v12561_v25  ;;  %v6750_v47 = vunpack.c.h.b16 %v12561_v25  ;;  %v6518_v21 = vrot.slane %v6448_v62, %v14808_v6  ;;  %v6522_v19 = vrot.slane %v6448_v62, %v14811_v39 }
 0x74c   :  { %v6779_v48 = vrot.slane %v6747_v0, 7  ;;  %v6782_v43 = vrot.slane %v6751_v3, 5  ;;  %v16834_v50 = vrot.slane %v6748_v17, 7  ;;  %v16836_v59 = vrot.slane %v6752_v7, 5 }
 0x74d   :  { %v6780_v11 = vrot.slane %v6749_v26, 6  ;;  %v6526_v22 = vrot.slane %v6449_v1, %v14808_v6  ;;  %v6530_v49 = vrot.slane %v6449_v1, %v14811_v39  ;;  %v16840_v42 = vpack.c.bf16 %v6514_v37, %v6510_v51 }
 0x74e   :  { %v6343_v54 = vcombine.low %v6295_v56, %v6296_v32  ;;  %v6344_v8 = vcombine.high %v6295_v56, %v6296_v32  ;;  %v6289_v9 = vmax.f32 %v6273_v29, 0.0  ;;  %v16842_v16 = vrot.slane %v6750_v47, 6 }
 0x74f   :  { %v6274_v30 = vadd.f32 %v16793_v41, %v6218_v58  ;;  %v16845_v57 = vpack.c.bf16 %v6522_v19, %v6518_v21  ;;  %v16847_v31 = vpack.c.bf16 %v6530_v49, %v6526_v22  ;;  %v6753_v18 = vunpack.c.l.b16 %v16832_v45 }
 0x750   :  { %v6351_v36 = vrot.slane %v6343_v54, %v14867_v13  ;;  %v6358_v33 = vrot.slane %v6344_v8, %v14867_v13  ;;  %v6297_v28 = vmax.f32 %v6287_v61, %v6289_v9  ;;  %v6754_v56 = vunpack.c.h.b16 %v16832_v45 }
 0x751   :  { %v6290_v24 = vmax.f32 %v6274_v30, 0.0  ;;  %v6755_v32 = vunpack.c.l.b16 %v16840_v42  ;;  %v6756_v41 = vunpack.c.h.b16 %v16840_v42  ;;  %v6757_v44 = vunpack.c.l.b16 %v16845_v57 }
 0x752   :  { %v6359_v58 = vcombine.high %v6351_v36, %v6351_v36  ;;  %v6360_v60 = vcombine.high %v6358_v33, %v6358_v33  ;;  %v11700_v20 = vrot.slane %v6351_v36, 9  ;;  %v11702_v46 = vrot.slane %v6358_v33, 9 }
 0x753   :  { %v6298_v2 = vmax.f32 %v6288_v63, %v6290_v24  ;;  %v6758_v38 = vunpack.c.h.b16 %v16845_v57  ;;  %v6759_v61 = vunpack.c.l.b16 %v16847_v31  ;;  %v6760_v55 = vunpack.c.h.b16 %v16847_v31 }
 0x754   :  { %v11701_v5 = vrot.slane %v6359_v58, 9  ;;  %v11703_v40 = vrot.slane %v6360_v60, 9  ;;  %v6451_v34 = vmax.f32 %v6351_v36, %v11700_v20  ;;  %v6453_v29 = vmax.f32 %v6358_v33, %v11702_v46 }
 0x755   :  { %v6361_v14 = vcombine.low %v6297_v28, %v6298_v2  ;;  %v6362_v53 = vcombine.high %v6297_v28, %v6298_v2  ;;  %v6781_v62 = vsel %vm18457_vm6, %v6780_v11, %v6779_v48  ;;  %v6784_v8 = vrot.slane %v6753_v18, 4  ;;  %vm18466_vm6 = vmmov %vm18460_vm3 }
 0x756   :  { %v6452_v25 = vmax.f32 %v6359_v58, %v11701_v5  ;;  %v6454_v1 = vmax.f32 %v6360_v60, %v11703_v40  ;;  %v6542_v15 = vrot.slane %v6451_v34, %v14808_v6  ;;  %v6546_v63 = vrot.slane %v6451_v34, %v14811_v39 }
 0x757   :  { %v6558_v51 = vrot.slane %v6453_v29, %v14808_v6  ;;  %v6562_v37 = vrot.slane %v6453_v29, %v14811_v39  ;;  %v6369_v0 = vrot.slane %v6361_v14, %v14867_v13  ;;  %v16870_v17 = vrot.slane %v6362_v53, %v14867_v13 }
 0x758   :  { %v6550_v3 = vrot.slane %v6452_v25, %v14808_v6  ;;  %v6554_v7 = vrot.slane %v6452_v25, %v14811_v39  ;;  %v6566_v26 = vrot.slane %v6454_v1, %v14808_v6  ;;  %v6570_v47 = vrot.slane %v6454_v1, %v14811_v39 }
 0x759   :  { %v12568_v21 = vpack.c.bf16 %v6546_v63, %v6542_v15  ;;  %v12570_v19 = vpack.c.bf16 %v6562_v37, %v6558_v51  ;;  %v6377_v48 = vcombine.high %v6369_v0, %v6369_v0  ;;  %v11704_v11 = vrot.slane %v6369_v0, 9 }
 0x75a   :  { %v12569_v22 = vpack.c.bf16 %v6554_v7, %v6550_v3  ;;  %v11706_v49 = vrot.slane %v16870_v17, 9  ;;  %v6783_v54 = vsel %vm18458_vm9, %v6782_v43, %v6781_v62  ;;  %v16878_v33 = vpack.c.bf16 %v6570_v47, %v6566_v26  ;;  %v13650_v3 = vld [vmem:[%s18368_s7 + $0x1d0] ss:$8 sps:$4 sm:$0xff]   ;;  %vm18467_vm9 = vmmov %vm18462_vm13 }
 0x75b   :  { %v6763_v13 = vunpack.c.l.b16 %v12568_v21  ;;  %v6764_v9 = vunpack.c.h.b16 %v12568_v21  ;;  %v6767_v30 = vunpack.c.l.b16 %v12570_v19  ;;  %v6768_v36 = vunpack.c.h.b16 %v12570_v19 }
 0x75c   :  { %v6765_v28 = vunpack.c.l.b16 %v12569_v22  ;;  %v11705_v24 = vrot.slane %v6377_v48, 9  ;;  %v6455_v58 = vmax.f32 %v6369_v0, %v11704_v11  ;;  %v6766_v60 = vunpack.c.h.b16 %v12569_v22 }
 0x75d   :  { %v6805_v20 = vrot.slane %v6763_v13, 7  ;;  %v6808_v46 = vrot.slane %v6767_v30, 5  ;;  %v16880_v2 = vrot.slane %v6764_v9, 7  ;;  %v16882_v40 = vrot.slane %v6768_v36, 5 }
 0x75e   :  { %v6806_v5 = vrot.slane %v6765_v28, 6  ;;  %v6456_v34 = vmax.f32 %v6377_v48, %v11705_v24  ;;  %v6457_v43 = vmax.f32 %v16870_v17, %v11706_v49  ;;  %v6574_v18 = vrot.slane %v6455_v58, %v14808_v6 }
 0x75f   :  { %v6578_v29 = vrot.slane %v6455_v58, %v14811_v39  ;;  %v6785_v14 = vsel %vm18459_vm12, %v6784_v8, %v6783_v54  ;;  %v6786_v53 = vrot.slane %v6755_v32, 3  ;;  %v6819_v63 = vrot.slane %v6766_v60, 6  ;;  %v13652_v32 = vld [vmem:[%s18368_s7 + $0x1d4] ss:$8 sps:$4 sm:$0xff]   ;;  %vm18468_vm12 = vmmov %vm18464_vm10 }
 0x760   :  { %v6582_v62 = vrot.slane %v6456_v34, %v14808_v6  ;;  %v6586_v25 = vrot.slane %v6456_v34, %v14811_v39  ;;  %v6590_v1 = vrot.slane %v6457_v43, %v14808_v6  ;;  %v6594_v15 = vrot.slane %v6457_v43, %v14811_v39  ;;  %7272 = vmatprep.subr.bf16.mxu0 %v13652_v32  ;;  %v13661_v32 = vld [vmem:[%s18368_s7 + $0x204] ss:$8 sps:$4 sm:$0xff]  }
 0x761   :  { %v12572_v51 = vpack.c.bf16 %v6578_v29, %v6574_v18  ;;  %v6787_v37 = vsel %vm18460_vm3, %v6786_v53, %v6785_v14  ;;  %v6788_v0 = vrot.slane %v6757_v44, 2  ;;  %v6790_v7 = vrot.slane %v6759_v61, 1  ;;  %7273 = vmatpush1.bf16.msra.mxu0 %v13650_v3  ;;  %vm18469_vm3 = vmmov %vm18461_vm5  ;;  %v13659_v3 = vld [vmem:[%s18368_s7 + $0x200] ss:$8 sps:$4 sm:$0xff]  }
 0x762   :  { %v6794_v26 = vsel %vm18461_vm5, %v16842_v16, %v16834_v50  ;;  %v6797_v47 = vrot.slane %v6754_v56, 4  ;;  %v6799_v21 = vrot.slane %v6756_v41, 3  ;;  %v6801_v48 = vrot.slane %v6758_v38, 2  ;;  %v13655_v38 = vld [vmem:[%s18368_s7 + $0x1e4] ss:$8 sps:$4 sm:$0xff]   ;;  %vm18470_vm5 = vmmov %vm18463_vm15 }
 0x763   :  { %v6789_v44 = vsel %vm18462_vm13, %v6788_v0, %v6787_v37  ;;  %v6796_v19 = vsel %vm18463_vm15, %v16836_v59, %v6794_v26  ;;  %v6342_v61 = vcombine.high %v16815_v4, %v16815_v4  ;;  %v12573_v16 = vpack.c.bf16 %v6586_v25, %v6582_v62  ;;  %v13653_v4 = vld [vmem:[%s18368_s7 + $0x1e0] ss:$8 sps:$4 sm:$0xff]   ;;  %7274 = vmatprep.subr.bf16.mxu0 %v13655_v38  ;;  %vm18471_vm13 = vmmov %vm18465_vm4  ;;  %v13664_v26 = vld [vmem:[%s18368_s7 + $0x214] ss:$8 sps:$4 sm:$0xff]  }
 0x764   :  { %v6791_v50 = vsel %vm18464_vm10, %v6790_v7, %v6789_v44  ;;  %v6798_v45 = vsel %vm18465_vm4, %v6797_v47, %v6796_v19  ;;  %v12574_v56 = vpack.c.bf16 %v6594_v15, %v6590_v1  ;;  %v6803_v41 = vrot.slane %v6760_v55, 1  ;;  %vm18472_vm15 = vmmov %vm18469_vm3  ;;  %v13662_v19 = vld [vmem:[%s18368_s7 + $0x210] ss:$8 sps:$4 sm:$0xff]  }
 0x765   :  { %v6800_v42 = vsel %vm18466_vm6, %v6799_v21, %v6798_v45  ;;  %v11699_v59 = vrot.slane %v6342_v61, 9  ;;  %v6769_v57 = vunpack.c.l.b16 %v16878_v33  ;;  %v6770_v22 = vunpack.c.h.b16 %v16878_v33  ;;  %7275 = vmatpush1.bf16.msra.mxu0 %v13653_v4  ;;  %vm18473_vm10 = vmmov %vm18466_vm6 }
 0x766   :  { %v6802_v11 = vsel %vm18467_vm9, %v6801_v48, %v6800_v42  ;;  %v6771_v49 = vunpack.c.l.b16 %v12572_v51  ;;  %v6773_v54 = vunpack.c.l.b16 %v12573_v16  ;;  %v6772_v8 = vunpack.c.h.b16 %v12572_v51  ;;  %vm18474_vm4 = vmmov %vm18470_vm5  ;;  %v13667_v48 = vld [vmem:[%s18368_s7 + $0x224] ss:$8 sps:$4 sm:$0xff]   ;;  %v13668_v42 = vld [vmem:[%s18368_s7 + $0x230] ss:$8 sps:$4 sm:$0xff]  }
 0x767   :  { %v6804_v31 = vsel %vm18468_vm12, %v6803_v41, %v6802_v11  ;;  %v6450_v55 = vmax.f32 %v6342_v61, %v11699_v59  ;;  %v6775_v13 = vunpack.c.l.b16 %v12574_v56  ;;  %v6774_v30 = vunpack.c.h.b16 %v12573_v16  ;;  %vm18475_vm6 = vmmov %vm18467_vm9  ;;  %v13665_v16 = vld [vmem:[%s18368_s7 + $0x220] ss:$8 sps:$4 sm:$0xff]   ;;  %v6868_v59 = vld [vmem:[#allocation4 + $0x8] sm:$0xf] }
 0x768   :  { %v6831_v9 = vpack.c.b16 %v6804_v31, %v6791_v50  ;;  %v6807_v36 = vsel %vm18469_vm3, %v6806_v5, %v6805_v20  ;;  %v6810_v28 = vrot.slane %v6769_v57, 4  ;;  %v6812_v60 = vrot.slane %v6771_v49, 3  ;;  %v13656_v20 = vld [vmem:[%s18368_s7 + $0x1f0] ss:$8 sps:$4 sm:$0xff]   ;;  %v13658_v5 = vld [vmem:[%s18368_s7 + $0x1f4] ss:$8 sps:$4 sm:$0xff]   ;;  %vm18476_vm9 = vmmov %vm18468_vm12 }
 0x769   :  { %v6534_v24 = vrot.slane %v6450_v55, %v14808_v6  ;;  %v6538_v58 = vrot.slane %v6450_v55, %v14811_v39  ;;  %v6809_v33 = vsel %vm18470_vm5, %v6808_v46, %v6807_v36  ;;  %v6776_v34 = vunpack.c.h.b16 %v12574_v56  ;;  %7276 = vmatprep.subr.bf16.mxu0 %v13658_v5  ;;  %vm18477_vm12 = vmmov %vm18471_vm13  ;;  %v13670_v56 = vld [vmem:[%s18368_s7 + $0x234] ss:$8 sps:$4 sm:$0xff]  }
 0x76a   :  { %6835 = vrot.lane.b32.xlu0 %v6831_v9, %s14152_s29  ;;  %v6811_v43 = vsel %vm18471_vm13, %v6810_v28, %v6809_v33  ;;  %v6814_v18 = vrot.slane %v6773_v54, 2  ;;  %v6820_v29 = vsel %vm18472_vm15, %v6819_v63, %v16880_v2  ;;  %v6816_v14 = vrot.slane %v6775_v13, 1  ;;  %7277 = vmatpush1.bf16.msra.mxu0 %v13656_v20  ;;  %vm18478_vm5 = vmmov %vm18473_vm10  ;;  %v6885_v28 = vld [vmem:[#allocation4 + $0x20] sm:$0xf] }
 0x76b   :  { %v6813_v46 = vsel %vm18473_vm10, %v6812_v60, %v6811_v43  ;;  %v6822_v53 = vsel %vm18474_vm4, %v16882_v40, %v6820_v29  ;;  %v6823_v62 = vrot.slane %v6770_v22, 4  ;;  %v12567_v25 = vpack.c.bf16 %v6538_v58, %v6534_v24  ;;  %vm18479_vm13 = vmmov %vm18475_vm6  ;;  %7278 = vmatprep.subr.bf16.mxu0 %v13661_v32 }
 0x76c   :  { %v6815_v1 = vsel %vm18475_vm6, %v6814_v18, %v6813_v46  ;;  %v6825_v15 = vrot.slane %v6772_v8, 3  ;;  %v6827_v2 = vrot.slane %v6774_v30, 2  ;;  %v6378_v37 = vcombine.high %v16870_v17, %v16870_v17  ;;  %vm18480_vm15 = vmmov %vm18476_vm9  ;;  %v6874_v8 = vld [vmem:[#allocation4 + $0xc] sm:$0x11]  ;;  %v6888_v18 = vld [vmem:[#allocation4 + $0x24] sm:$0x11] }
 0x76d   :  { %v6817_v63 = vsel %vm18476_vm9, %v6816_v14, %v6815_v1  ;;  %v6824_v51 = vsel %vm18477_vm12, %v6823_v62, %v6822_v53  ;;  %vm82_vm3 = vcmask 516096   ;;  %v6829_v0 = vrot.slane %v6776_v34, 1 }
 0x76e   :  { %6837 = vrot.lane.b32.xlu0 %v12567_v25, %s14152_s29  ;;  %v6826_v40 = vsel %vm18478_vm5, %v6825_v15, %v6824_v51  ;;  %83 = vst.msk [vmem:[#allocation4 + $0x14] sm:$0x1] %vm82_vm3, %v15414_v52  ;;  %87 = vst.msk [vmem:[#allocation4 + $0x2c] sm:$0x1] %vm82_vm3, %v15414_v52  ;;  %v11707_v7 = vrot.slane %v6378_v37, 9  ;;  %7279 = vmatpush1.bf16.msra.mxu0 %v13659_v3  ;;  %vm6860_vm10 = vcmask 1043712  }
 0x76f   :  { %v6828_v17 = vsel %vm18479_vm13, %v6827_v2, %v6826_v40  ;;  %7280 = vmatprep.subr.bf16.mxu0 %v13664_v26  ;;  %vm6861_vm4 = vmand %vm6860_vm10, %vm200_vm7  ;;  %vm6871_vm6 = vcmask 1040640   ;;  %vm18481_vm9 = vcmask 257024  }
 0x770   :  { %v6830_v47 = vsel %vm18480_vm15, %v6829_v0, %v6828_v17  ;;  %v6458_v44 = vmax.f32 %v6378_v37, %v11707_v7  ;;  %vm16990_vm12 = vmand %vm18481_vm9, %vm200_vm7  ;;  %vm18486_vm7 = vcmask 253952  }
 0x771   :  { %v6833_v21 = vpack.c.b16 %v6830_v47, %v6817_v63  ;;  %vm16996_vm3 = vmor %vm15426_vm8, %vm6861_vm4 }
 0x772   :  { %v6598_v61 = vrot.slane %v6458_v44, %v14808_v6  ;;  %v6602_v50 = vrot.slane %v6458_v44, %v14811_v39  ;;  %7281 = vmatpush1.bf16.msra.mxu0 %v13662_v19  ;;  %v13673_v39 = vld [vmem:[%s18368_s7 + $0x244] ss:$8 sps:$4 sm:$0xff]   ;;  %vm6872_vm5 = vmand %vm6871_vm6, %vm96_vm0 }
 0x773   :  { %6839 = vrot.lane.b32.xlu1 %v6833_v21, %s14152_s29  ;;  %7282 = vmatprep.subr.bf16.mxu0 %v13667_v48  ;;  %vm17011_vm8 = vmand %vm18486_vm7, %vm96_vm0  ;;  %vm7250_vm0 = vcmask 523264  }
 0x774   :  { %v12575_v45 = vpack.c.bf16 %v6602_v50, %v6598_v61  ;;  %vm17018_vm13 = vmor %vm15444_vm2, %vm6872_vm5  ;;  %vm18491_vm2 = vcmask 1041409  }
 0x775   :  { %v6879_v54 = vld [vmem:[#allocation4 + $0x14] sm:$0x1]  ;;  %v6891_v34 = vld [vmem:[#allocation4 + $0x2c] sm:$0x1] }
 0x776   :  { %7283 = vmatpush1.bf16.msra.mxu0 %v13665_v16 }
 0x777   :  { %6841 = vrot.lane.b32.xlu1 %v12575_v45, %s14152_s29  ;;  %7284 = vmatprep.subr.bf16.mxu0 %v13670_v56  ;;  %v13671_v56 = vld [vmem:[%s18368_s7 + $0x240] ss:$8 sps:$4 sm:$0xff]  }
 0x77a   :  { %7285 = vmatpush1.bf16.msra.mxu0 %v13668_v42 }
 0x77b   :  { %7297 = vmatprep.subr.bf16.mxu0 %v13673_v39 }
 0x7dc   :  { %v6836_v57 = vpop.permute.xlu0 %6835 }
 0x7dd   :  { %v6843_v38 = vrot.slane %v6836_v57, 4 }
 0x7df   :  { %v6848_v11 = vsel %vm3068_vm11, %v6843_v38, %v6836_v57  ;;  %v6869_v22 = vsel %vm16990_vm12, %v6843_v38, %v6868_v59  ;;  %v13676_v59 = vld [vmem:[%s18368_s7 + $0x254] ss:$8 sps:$4 sm:$0xff]  }
 0x7e0   :  { %v17007_v49 = vsel %vm16996_vm3, %v6848_v11, %v15414_v52  ;;  %6870 = vst [vmem:[#allocation4 + $0x8] sm:$0xf] %v6869_v22  ;;  %v6838_v31 = vpop.permute.xlu0 %6837  ;;  %v13674_v22 = vld [vmem:[%s18368_s7 + $0x250] ss:$8 sps:$4 sm:$0xff]  }
 0x7e1   :  { %6865 = vst [vmem:[#allocation4] sm:$0xff] %v17007_v49  ;;  %v6844_v13 = vrot.slane %v6838_v31, 4  ;;  %v6943_v20 = vshrl.u32 %v17007_v49, 16  ;;  %v6946_v5 = vshll.u32 %v17007_v49, 16 }
 0x7e3   :  { %v6849_v9 = vsel %vm3068_vm11, %v6844_v13, %v6838_v31  ;;  %v6880_v30 = vsel %vm17011_vm8, %v6844_v13, %v6879_v54  ;;  %v6945_v15 = vrot.slane %v6943_v20, 4  ;;  %v6948_v2 = vrot.slane %v6946_v5, 5 }
 0x7e4   :  { %v6875_v36 = vsel %vm17018_vm13, %v6849_v9, %v6874_v8  ;;  %6881 = vst [vmem:[#allocation4 + $0x14] sm:$0x1] %v6880_v30  ;;  %v13679_v8 = vld [vmem:[%s18368_s7 + $0x264] ss:$8 sps:$4 sm:$0xff]  }
 0x7e5   :  { %6876 = vst [vmem:[#allocation4 + $0xc] sm:$0x11] %v6875_v36  ;;  %v6840_v24 = vpop.permute.xlu1 %6839  ;;  %v6949_v40 = vor.u32 %v6948_v2, %v6945_v15  ;;  %v13677_v36 = vld [vmem:[%s18368_s7 + $0x260] ss:$8 sps:$4 sm:$0xff]   ;;  %v13691_v15 = vld [vmem:[%s18368_s7 + $0x24] ss:$8 sps:$4 sm:$0xff]  }
 0x7e6   :  { %v6845_v58 = vrot.slane %v6840_v24, 4  ;;  %v13689_v2 = vld [vmem:[%s18368_s7 + $0x20] ss:$8 sps:$4 sm:$0xff]  }
 0x7e7   :  { %v6950_v26 = vrot.slane %v6949_v40, 4  ;;  %v17053_v44 = vld [vmem:[#allocation4 + $0x8] sm:$0xf]  ;;  %v13695_v40 = vld [vmem:[%s18368_s7 + $0x40] ss:$8 sps:$4 sm:$0xff]  }
 0x7e8   :  { %v6850_v35 = vsel %vm3068_vm11, %v6845_v58, %v6840_v24  ;;  %v6886_v33 = vsel %vm16990_vm12, %v6845_v58, %v6885_v28  ;;  %v6957_v42 = vshrl.u32 %v17053_v44, 16  ;;  %v6960_v39 = vshll.u32 %v17053_v44, 16  ;;  %v13682_v58 = vld [vmem:[%s18368_s7 + $0x274] ss:$8 sps:$4 sm:$0xff]  }
 0x7e9   :  { %v17033_v60 = vsel %vm16996_vm3, %v6850_v35, %v15414_v52  ;;  %6887 = vst [vmem:[#allocation4 + $0x20] sm:$0xf] %v6886_v33  ;;  %v6842_v43 = vpop.permute.xlu1 %6841 }
 0x7ea   :  { %6884 = vst [vmem:[#allocation4 + $0x18] sm:$0xff] %v17033_v60  ;;  %v6846_v29 = vrot.slane %v6842_v43, 4  ;;  %v6971_v53 = vshrl.u32 %v17033_v60, 16  ;;  %v6974_v62 = vshll.u32 %v17033_v60, 16  ;;  %v6959_v54 = vrot.slane %v6957_v42, 4 }
 0x7eb   :  { %v6962_v31 = vrot.slane %v6960_v39, 5  ;;  %v17078_v13 = vld [vmem:[#allocation4 + $0x14] sm:$0x1]  ;;  %v13716_v42 = vld [vmem:[%s18368_s7 + $0xb0] ss:$8 sps:$4 sm:$0xff]  }
 0x7ec   :  { %v6851_v46 = vsel %vm3068_vm11, %v6846_v29, %v6842_v43  ;;  %v6892_v14 = vsel %vm17011_vm8, %v6846_v29, %v6891_v34  ;;  %v17045_v1 = vld [vmem:[#allocation4 + $0xc] sm:$0x11]  ;;  %v6973_v63 = vrot.slane %v6971_v53, 4  ;;  %v6976_v51 = vrot.slane %v6974_v62, 5  ;;  %v13680_v34 = vld [vmem:[%s18368_s7 + $0x270] ss:$8 sps:$4 sm:$0xff]  }
 0x7ed   :  { %v6889_v25 = vsel %vm17018_vm13, %v6851_v46, %v6888_v18  ;;  %6893 = vst [vmem:[#allocation4 + $0x2c] sm:$0x1] %v6892_v14  ;;  %v6952_v37 = vshll.u32 %v17045_v1, 16  ;;  %v6963_v28 = vor.u32 %v6962_v31, %v6959_v54  ;;  %v6966_v24 = vshll.u32 %v17078_v13, 16  ;;  %v13685_v29 = vld [vmem:[%s18368_s7 + $0x4] ss:$8 sps:$4 sm:$0xff]  }
 0x7ee   :  { %6890 = vst [vmem:[#allocation4 + $0x24] sm:$0x11] %v6889_v25  ;;  %v6977_v0 = vor.u32 %v6976_v51, %v6973_v63  ;;  %v13683_v46 = vld [vmem:[%s18368_s7] ss:$8 sps:$4 sm:$0xff]   ;;  %v13688_v53 = vld [vmem:[%s18368_s7 + $0x14] ss:$8 sps:$4 sm:$0xff]   ;;  %v11809_v62 = vcombine.high %v17007_v49, %v17033_v60 }
 0x7ef   :  { %v6954_v32 = vrot.slane %v6952_v37, 5  ;;  %v6964_v43 = vrot.slane %v6963_v28, 4  ;;  %v6968_v18 = vrot.slane %v6966_v24, 5  ;;  %v13686_v25 = vld [vmem:[%s18368_s7 + $0x10] ss:$8 sps:$4 sm:$0xff]  }
 0x7f0   :  { %v17051_v7 = vld [vmem:[#allocation4 + $0x20] sm:$0xf]  ;;  %v6978_v47 = vrot.slane %v6977_v0, 4  ;;  %v13694_v63 = vld [vmem:[%s18368_s7 + $0x34] ss:$8 sps:$4 sm:$0xff]  }
 0x7f1   :  { %v6985_v19 = vshrl.u32 %v17051_v7, 16  ;;  %v6988_v48 = vshll.u32 %v17051_v7, 16  ;;  %v6955_v61 = vsel %vm14494_vm1, %v6950_v26, %v6954_v32  ;;  %v6969_v5 = vsel %vm14494_vm1, %v6964_v43, %v6968_v18  ;;  %v13692_v51 = vld [vmem:[%s18368_s7 + $0x30] ss:$8 sps:$4 sm:$0xff]   ;;  %v13697_v37 = vld [vmem:[%s18368_s7 + $0x44] ss:$8 sps:$4 sm:$0xff]  }
 0x7f2   :  { %v13700_v0 = vld [vmem:[%s18368_s7 + $0x54] ss:$8 sps:$4 sm:$0xff]   ;;  %v13698_v32 = vld [vmem:[%s18368_s7 + $0x50] ss:$8 sps:$4 sm:$0xff]   ;;  %v13701_v26 = vld [vmem:[%s18368_s7 + $0x60] ss:$8 sps:$4 sm:$0xff]  }
 0x7f3   :  { %v6987_v57 = vrot.slane %v6985_v19, 4  ;;  %v6990_v38 = vrot.slane %v6988_v48, 5  ;;  %v13709_v19 = vld [vmem:[%s18368_s7 + $0x84] ss:$8 sps:$4 sm:$0xff]   ;;  %v13707_v48 = vld [vmem:[%s18368_s7 + $0x80] ss:$8 sps:$4 sm:$0xff]  }
 0x7f4   :  { %v17069_v11 = vld [vmem:[#allocation4 + $0x2c] sm:$0x1]  ;;  %v13721_v39 = vld [vmem:[%s18368_s7 + $0xc4] ss:$8 sps:$4 sm:$0xff]   ;;  %v13725_v54 = vld [vmem:[%s18368_s7 + $0xe0] ss:$8 sps:$4 sm:$0xff]  }
 0x7f5   :  { %v17048_v3 = vld [vmem:[#allocation4 + $0x24] sm:$0x11]  ;;  %v6991_v9 = vor.u32 %v6990_v38, %v6987_v57  ;;  %v6994_v30 = vshll.u32 %v17069_v11, 16 }
 0x7f6   :  { %v6980_v17 = vshll.u32 %v17048_v3, 16  ;;  %v13724_v57 = vld [vmem:[%s18368_s7 + $0xd4] ss:$8 sps:$4 sm:$0xff]   ;;  %v13722_v38 = vld [vmem:[%s18368_s7 + $0xd0] ss:$8 sps:$4 sm:$0xff]   ;;  %v7666_v43 = vrot.slane %v17048_v3, 5 }
 0x7f7   :  { %v6992_v35 = vrot.slane %v6991_v9, 4  ;;  %v6996_v33 = vrot.slane %v6994_v30, 5  ;;  %v13730_v31 = vld [vmem:[%s18368_s7 + $0xf4] ss:$8 sps:$4 sm:$0xff]   ;;  %v13733_v9 = vld [vmem:[%s18368_s7 + $0x104] ss:$8 sps:$4 sm:$0xff]  }
 0x7f8   :  { %v6982_v21 = vrot.slane %v6980_v17, 5  ;;  %v13703_v17 = vld [vmem:[%s18368_s7 + $0x64] ss:$8 sps:$4 sm:$0xff]   ;;  %v13731_v30 = vld [vmem:[%s18368_s7 + $0x100] ss:$8 sps:$4 sm:$0xff]  }
 0x7f9   :  { %v6997_v20 = vsel %vm14494_vm1, %v6992_v35, %v6996_v33  ;;  %v13736_v28 = vld [vmem:[%s18368_s7 + $0x114] ss:$8 sps:$4 sm:$0xff]   ;;  %v13734_v24 = vld [vmem:[%s18368_s7 + $0x110] ss:$8 sps:$4 sm:$0xff]   ;;  %v13737_v35 = vld [vmem:[%s18368_s7 + $0x120] ss:$8 sps:$4 sm:$0xff]  }
 0x7fa   :  { %v6983_v50 = vsel %vm14494_vm1, %v6978_v47, %v6982_v21  ;;  %v11766_v14 = vcombine.low %v6969_v5, %v6997_v20  ;;  %v13706_v47 = vld [vmem:[%s18368_s7 + $0x74] ss:$8 sps:$4 sm:$0xff]   ;;  %v13704_v21 = vld [vmem:[%s18368_s7 + $0x70] ss:$8 sps:$4 sm:$0xff]   ;;  %v13746_v20 = vld [vmem:[%s18368_s7 + $0x284] ss:$8 sps:$4 sm:$0xff]  }
 0x7fb   :  { %v11764_v45 = vcombine.low %v6955_v61, %v6983_v50  ;;  %v11765_v16 = vcombine.high %v6955_v61, %v6983_v50  ;;  %v13712_v61 = vld [vmem:[%s18368_s7 + $0x94] ss:$8 sps:$4 sm:$0xff]   ;;  %v13710_v50 = vld [vmem:[%s18368_s7 + $0x90] ss:$8 sps:$4 sm:$0xff]   ;;  %v7658_v5 = vrot.slane %v17045_v1, 5 }
 0x7fc   :  { %v13742_v33 = vld [vmem:[%s18368_s7 + $0x134] ss:$8 sps:$4 sm:$0xff]   ;;  %v13740_v18 = vld [vmem:[%s18368_s7 + $0x130] ss:$8 sps:$4 sm:$0xff]   ;;  %v13744_v3 = vld [vmem:[%s18368_s7 + $0x280] ss:$8 sps:$4 sm:$0xff]  }
 0x7fd   :  { %7286 = vmatprep.mubr.bf16.mxu0 %v11765_v16  ;;  %v13713_v16 = vld [vmem:[%s18368_s7 + $0xa0] ss:$8 sps:$4 sm:$0xff]   ;;  %v13749_v1 = vld [vmem:[%s18368_s7 + $0x294] ss:$8 sps:$4 sm:$0xff]  }
 0x7fe   :  { %7287 = vmatmul.mubr.bf16.vlgmr.msra.gmra.mrb[24].mxu0 %v11764_v45  ;;  %v13715_v45 = vld [vmem:[%s18368_s7 + $0xa4] ss:$8 sps:$4 sm:$0xff]  }
 0x7ff   :  { %7298 = vmatpush1.bf16.msra.mxu0 %v13671_v56  ;;  %7329 = vmatprep.mubr.bf16.mxu0 %v15414_v52  ;;  %v13718_v56 = vld [vmem:[%s18368_s7 + $0xb4] ss:$8 sps:$4 sm:$0xff]  }
 0x800   :  { %7299 = vmatprep.subr.bf16.mxu0 %v13676_v59  ;;  %v13719_v59 = vld [vmem:[%s18368_s7 + $0xc0] ss:$8 sps:$4 sm:$0xff]  }
 0x803   :  { %7300 = vmatpush1.bf16.msra.mxu0 %v13674_v22  ;;  %v13727_v22 = vld [vmem:[%s18368_s7 + $0xe4] ss:$8 sps:$4 sm:$0xff]  }
 0x804   :  { %7301 = vmatprep.subr.bf16.mxu0 %v13679_v8  ;;  %v13728_v8 = vld [vmem:[%s18368_s7 + $0xf0] ss:$8 sps:$4 sm:$0xff]  }
 0x807   :  { %7302 = vmatpush1.bf16.msra.mxu0 %v13677_v36  ;;  %v11808_v36 = vcombine.low %v17007_v49, %v17033_v60 }
 0x808   :  { %7303 = vmatprep.subr.bf16.mxu0 %v13682_v58  ;;  %v13739_v58 = vld [vmem:[%s18368_s7 + $0x124] ss:$8 sps:$4 sm:$0xff]  }
 0x80b   :  { %7304 = vmatpush1.bf16.msra.mxu0 %v13680_v34  ;;  %v7646_v34 = vld [vmem:[#allocation4 + $0x18] sm:$0xee] }
 0x80c   :  { %7558 = vmatprep.subr.bf16.mxu0 %v13685_v29  ;;  %v7644_v29 = vld [vmem:[#allocation4] sm:$0xee] }
 0x80e   :  { %11807 = vmatmul.mubr.msk.bf16.vlgmr.msra.gmra.mrb[24].mxu0 %vm7250_vm0, %v11766_v14  ;;  %v11852_v14 = vrot.slane %v7644_v29, 9  ;;  %v13801_v29 = vld [vmem:[%s18368_s7 + $0x3b0] ss:$8 sps:$4 sm:$0xff]  }
 0x80f   :  { %7559 = vmatpush1.bf16.msra.mxu0 %v13683_v46  ;;  %7590 = vmatprep.mubr.bf16.mxu0 %v11809_v62  ;;  %v11854_v46 = vrot.slane %v7646_v34, 9  ;;  %v11810_v62 = vcombine.low %v17053_v44, %v17051_v7  ;;  %v13747_v7 = vld [vmem:[%s18368_s7 + $0x290] ss:$8 sps:$4 sm:$0xff]   ;;  %v13752_v44 = vld [vmem:[%s18368_s7 + $0x2a4] ss:$8 sps:$4 sm:$0xff]  }
 0x810   :  { %7560 = vmatprep.subr.bf16.mxu0 %v13688_v53  ;;  %v7647_v34 = vld [vmem:[#allocation4 + $0x20] sm:$0xe] }
 0x811   :  { %v17228_v53 = vsel %vm14483_vm14, %v11854_v46, %v7666_v43  ;;  %v7670_v43 = vrot.slane %v17069_v11, 5  ;;  %v13804_v11 = vld [vmem:[%s18370_s9 + $0x140] ss:$8 sps:$4 sm:$0xff]  }
 0x813   :  { %7561 = vmatpush1.bf16.msra.mxu0 %v13686_v25  ;;  %v17237_v25 = vsel %vm14483_vm14, %v11852_v14, %v7658_v5  ;;  %v11855_v5 = vrot.slane %v7647_v34, 9 }
 0x814   :  { %7562 = vmatprep.subr.bf16.mxu0 %v13691_v15  ;;  %v11897_v15 = vcombine.high %v17237_v25, %v17228_v53 }
 0x815   :  { %v7671_v14 = vsel %vm14483_vm14, %v11855_v5, %v7670_v43 }
 0x817   :  { %7563 = vmatpush1.bf16.msra.mxu0 %v13689_v2  ;;  %v13750_v2 = vld [vmem:[%s18368_s7 + $0x2a0] ss:$8 sps:$4 sm:$0xff]  }
 0x818   :  { %7564 = vmatprep.subr.bf16.mxu0 %v13694_v63  ;;  %v13755_v63 = vld [vmem:[%s18368_s7 + $0x2b4] ss:$8 sps:$4 sm:$0xff]  }
 0x81b   :  { %7565 = vmatpush1.bf16.msra.mxu0 %v13692_v51  ;;  %v13753_v51 = vld [vmem:[%s18368_s7 + $0x2b0] ss:$8 sps:$4 sm:$0xff]  }
 0x81c   :  { %7566 = vmatprep.subr.bf16.mxu0 %v13697_v37  ;;  %v13758_v37 = vld [vmem:[%s18368_s7 + $0x2c4] ss:$8 sps:$4 sm:$0xff]  }
 0x81f   :  { %7567 = vmatpush1.bf16.msra.mxu0 %v13695_v40  ;;  %v13756_v40 = vld [vmem:[%s18368_s7 + $0x2c0] ss:$8 sps:$4 sm:$0xff]  }
 0x820   :  { %7568 = vmatprep.subr.bf16.mxu0 %v13700_v0  ;;  %v13761_v0 = vld [vmem:[%s18368_s7 + $0x2d4] ss:$8 sps:$4 sm:$0xff]  }
 0x823   :  { %7569 = vmatpush1.bf16.msra.mxu0 %v13698_v32  ;;  %v13759_v32 = vld [vmem:[%s18368_s7 + $0x2d0] ss:$8 sps:$4 sm:$0xff]  }
 0x824   :  { %7570 = vmatprep.subr.bf16.mxu0 %v13703_v17  ;;  %v13764_v17 = vld [vmem:[%s18368_s7 + $0x2e4] ss:$8 sps:$4 sm:$0xff]  }
 0x827   :  { %7571 = vmatpush1.bf16.msra.mxu0 %v13701_v26  ;;  %v13762_v26 = vld [vmem:[%s18368_s7 + $0x2e0] ss:$8 sps:$4 sm:$0xff]  }
 0x828   :  { %7572 = vmatprep.subr.bf16.mxu0 %v13706_v47  ;;  %v13767_v47 = vld [vmem:[%s18368_s7 + $0x2f4] ss:$8 sps:$4 sm:$0xff]  }
 0x82b   :  { %7573 = vmatpush1.bf16.msra.mxu0 %v13704_v21  ;;  %v13765_v21 = vld [vmem:[%s18368_s7 + $0x2f0] ss:$8 sps:$4 sm:$0xff]  }
 0x82c   :  { %7574 = vmatprep.subr.bf16.mxu0 %v13709_v19  ;;  %v13770_v19 = vld [vmem:[%s18368_s7 + $0x304] ss:$8 sps:$4 sm:$0xff]  }
 0x82f   :  { %7575 = vmatpush1.bf16.msra.mxu0 %v13707_v48  ;;  %v13768_v48 = vld [vmem:[%s18368_s7 + $0x300] ss:$8 sps:$4 sm:$0xff]  }
 0x830   :  { %7576 = vmatprep.subr.bf16.mxu0 %v13712_v61  ;;  %v13773_v61 = vld [vmem:[%s18368_s7 + $0x314] ss:$8 sps:$4 sm:$0xff]  }
 0x833   :  { %7577 = vmatpush1.bf16.msra.mxu0 %v13710_v50  ;;  %v13771_v50 = vld [vmem:[%s18368_s7 + $0x310] ss:$8 sps:$4 sm:$0xff]  }
 0x834   :  { %7578 = vmatprep.subr.bf16.mxu0 %v13715_v45  ;;  %v13776_v45 = vld [vmem:[%s18368_s7 + $0x324] ss:$8 sps:$4 sm:$0xff]  }
 0x837   :  { %7579 = vmatpush1.bf16.msra.mxu0 %v13713_v16  ;;  %v13774_v16 = vld [vmem:[%s18368_s7 + $0x320] ss:$8 sps:$4 sm:$0xff]  }
 0x838   :  { %7580 = vmatprep.subr.bf16.mxu0 %v13718_v56  ;;  %v13779_v56 = vld [vmem:[%s18368_s7 + $0x334] ss:$8 sps:$4 sm:$0xff]  }
 0x83b   :  { %7581 = vmatpush1.bf16.msra.mxu0 %v13716_v42  ;;  %v13777_v42 = vld [vmem:[%s18368_s7 + $0x330] ss:$8 sps:$4 sm:$0xff]  }
 0x83c   :  { %7582 = vmatprep.subr.bf16.mxu0 %v13721_v39  ;;  %v13782_v39 = vld [vmem:[%s18368_s7 + $0x344] ss:$8 sps:$4 sm:$0xff]  }
 0x83f   :  { %7583 = vmatpush1.bf16.msra.mxu0 %v13719_v59  ;;  %v13780_v59 = vld [vmem:[%s18368_s7 + $0x340] ss:$8 sps:$4 sm:$0xff]  }
 0x840   :  { %7584 = vmatprep.subr.bf16.mxu0 %v13724_v57  ;;  %v13785_v57 = vld [vmem:[%s18368_s7 + $0x354] ss:$8 sps:$4 sm:$0xff]  }
 0x843   :  { %7585 = vmatpush1.bf16.msra.mxu0 %v13722_v38  ;;  %v13783_v38 = vld [vmem:[%s18368_s7 + $0x350] ss:$8 sps:$4 sm:$0xff]  }
 0x844   :  { %7586 = vmatprep.subr.bf16.mxu0 %v13727_v22  ;;  %v13788_v22 = vld [vmem:[%s18368_s7 + $0x364] ss:$8 sps:$4 sm:$0xff]  }
 0x847   :  { %7587 = vmatpush1.bf16.msra.mxu0 %v13725_v54  ;;  %v13786_v54 = vld [vmem:[%s18368_s7 + $0x360] ss:$8 sps:$4 sm:$0xff]  }
 0x848   :  { %7588 = vmatprep.subr.bf16.mxu0 %v13730_v31  ;;  %v13791_v31 = vld [vmem:[%s18368_s7 + $0x374] ss:$8 sps:$4 sm:$0xff]  }
 0x84b   :  { %7589 = vmatpush1.bf16.msra.mxu0 %v13728_v8  ;;  %v13789_v8 = vld [vmem:[%s18368_s7 + $0x370] ss:$8 sps:$4 sm:$0xff]  }
 0x84c   :  { %7601 = vmatprep.subr.bf16.mxu0 %v13733_v9  ;;  %v13794_v9 = vld [vmem:[%s18368_s7 + $0x384] ss:$8 sps:$4 sm:$0xff]  }
 0x84e   :  { %7591 = vmatmul.mubr.bf16.vlgmr.msra.gmra.mrb[24].mxu0 %v11808_v36  ;;  %v11896_v36 = vcombine.low %v17237_v25, %v17228_v53  ;;  %v13807_v25 = vld [vmem:[%s18370_s9 + $0x150] ss:$8 sps:$4 sm:$0xff]  }
 0x84f   :  { %7602 = vmatpush1.bf16.msra.mxu0 %v13731_v30  ;;  %7633 = vmatprep.mubr.bf16.mxu0 %v15414_v52  ;;  %v13792_v30 = vld [vmem:[%s18368_s7 + $0x380] ss:$8 sps:$4 sm:$0xff]  }
 0x850   :  { %7603 = vmatprep.subr.bf16.mxu0 %v13736_v28  ;;  %v13797_v28 = vld [vmem:[%s18368_s7 + $0x394] ss:$8 sps:$4 sm:$0xff]  }
 0x853   :  { %7604 = vmatpush1.bf16.msra.mxu0 %v13734_v24  ;;  %v13795_v24 = vld [vmem:[%s18368_s7 + $0x390] ss:$8 sps:$4 sm:$0xff]  }
 0x854   :  { %7605 = vmatprep.subr.bf16.mxu0 %v13739_v58  ;;  %v13800_v58 = vld [vmem:[%s18368_s7 + $0x3a4] ss:$8 sps:$4 sm:$0xff]  }
 0x857   :  { %7606 = vmatpush1.bf16.msra.mxu0 %v13737_v35  ;;  %v13798_v35 = vld [vmem:[%s18368_s7 + $0x3a0] ss:$8 sps:$4 sm:$0xff]  }
 0x858   :  { %7607 = vmatprep.subr.bf16.mxu0 %v13742_v33  ;;  %v13803_v33 = vld [vmem:[%s18368_s7 + $0x3b4] ss:$8 sps:$4 sm:$0xff]  }
 0x85b   :  { %7608 = vmatpush1.bf16.msra.mxu0 %v13740_v18  ;;  %v7645_v18 = vld [vmem:[#allocation4 + $0x8] sm:$0xe] }
 0x85c   :  { %7927 = vmatprep.subr.bf16.mxu0 %v13746_v20  ;;  %v7662_v20 = vrot.slane %v17078_v13, 5  ;;  %v11853_v46 = vrot.slane %v7645_v18, 9  ;;  %v13806_v13 = vld [vmem:[%s18370_s9 + $0x144] ss:$8 sps:$4 sm:$0xff]  }
 0x85d   :  { %v13842_v18 = vld [vmem:[%s18370_s9 + $0x204] ss:$8 sps:$4 sm:$0xff]  }
 0x85e   :  { %11851 = vmatmul.mubr.msk.bf16.vlgmr.msra.gmra.mrb[24].mxu0 %vm7250_vm0, %v11810_v62  ;;  %v7663_v53 = vsel %vm14483_vm14, %v11853_v46, %v7662_v20  ;;  %v13809_v62 = vld [vmem:[%s18370_s9 + $0x154] ss:$8 sps:$4 sm:$0xff]   ;;  %v13840_v46 = vld [vmem:[%s18370_s9 + $0x200] ss:$8 sps:$4 sm:$0xff]  }
 0x85f   :  { %7928 = vmatpush1.bf16.msra.mxu0 %v13744_v3  ;;  %7959 = vmatprep.mubr.bf16.mxu0 %v11897_v15  ;;  %v11898_v3 = vcombine.low %v7663_v53, %v7671_v14  ;;  %v13810_v15 = vld [vmem:[%s18370_s9 + $0x160] ss:$8 sps:$4 sm:$0xff]   ;;  %v13845_v14 = vld [vmem:[%s18370_s9 + $0x214] ss:$8 sps:$4 sm:$0xff]  }
 0x860   :  { %7929 = vmatprep.subr.bf16.mxu0 %v13749_v1  ;;  %v13812_v1 = vld [vmem:[%s18370_s9 + $0x164] ss:$8 sps:$4 sm:$0xff]  }
 0x863   :  { %7930 = vmatpush1.bf16.msra.mxu0 %v13747_v7  ;;  %v13815_v7 = vld [vmem:[%s18370_s9 + $0x174] ss:$8 sps:$4 sm:$0xff]  }
 0x864   :  { %7931 = vmatprep.subr.bf16.mxu0 %v13752_v44  ;;  %v13813_v44 = vld [vmem:[%s18370_s9 + $0x170] ss:$8 sps:$4 sm:$0xff]  }
 0x867   :  { %7932 = vmatpush1.bf16.msra.mxu0 %v13750_v2  ;;  %v13818_v2 = vld [vmem:[%s18370_s9 + $0x184] ss:$8 sps:$4 sm:$0xff]  }
 0x868   :  { %7933 = vmatprep.subr.bf16.mxu0 %v13755_v63  ;;  %v13816_v63 = vld [vmem:[%s18370_s9 + $0x180] ss:$8 sps:$4 sm:$0xff]  }
 0x86b   :  { %7934 = vmatpush1.bf16.msra.mxu0 %v13753_v51  ;;  %v13821_v51 = vld [vmem:[%s18370_s9 + $0x194] ss:$8 sps:$4 sm:$0xff]  }
 0x86c   :  { %7935 = vmatprep.subr.bf16.mxu0 %v13758_v37  ;;  %v13819_v37 = vld [vmem:[%s18370_s9 + $0x190] ss:$8 sps:$4 sm:$0xff]  }
 0x86f   :  { %7936 = vmatpush1.bf16.msra.mxu0 %v13756_v40  ;;  %v13824_v40 = vld [vmem:[%s18370_s9 + $0x1a4] ss:$8 sps:$4 sm:$0xff]  }
 0x870   :  { %7937 = vmatprep.subr.bf16.mxu0 %v13761_v0  ;;  %v13822_v0 = vld [vmem:[%s18370_s9 + $0x1a0] ss:$8 sps:$4 sm:$0xff]  }
 0x873   :  { %7938 = vmatpush1.bf16.msra.mxu0 %v13759_v32  ;;  %v13827_v32 = vld [vmem:[%s18370_s9 + $0x1b4] ss:$8 sps:$4 sm:$0xff]  }
 0x874   :  { %7939 = vmatprep.subr.bf16.mxu0 %v13764_v17  ;;  %v13825_v17 = vld [vmem:[%s18370_s9 + $0x1b0] ss:$8 sps:$4 sm:$0xff]  }
 0x877   :  { %7940 = vmatpush1.bf16.msra.mxu0 %v13762_v26  ;;  %v13830_v26 = vld [vmem:[%s18370_s9 + $0x1c4] ss:$8 sps:$4 sm:$0xff]  }
 0x878   :  { %7941 = vmatprep.subr.bf16.mxu0 %v13767_v47  ;;  %v13828_v47 = vld [vmem:[%s18370_s9 + $0x1c0] ss:$8 sps:$4 sm:$0xff]  }
 0x87b   :  { %7942 = vmatpush1.bf16.msra.mxu0 %v13765_v21  ;;  %v13833_v21 = vld [vmem:[%s18370_s9 + $0x1d4] ss:$8 sps:$4 sm:$0xff]  }
 0x87c   :  { %7943 = vmatprep.subr.bf16.mxu0 %v13770_v19  ;;  %v13831_v19 = vld [vmem:[%s18370_s9 + $0x1d0] ss:$8 sps:$4 sm:$0xff]  }
 0x87f   :  { %7944 = vmatpush1.bf16.msra.mxu0 %v13768_v48  ;;  %v8017_v48 = vld [vmem:[%s18369_s8] sm:$0x3]  ;;  %s10834_s8 = sshll.u32 %s14155_s4, 4  ;;  %s10835_s8 = int_to_ptr.vmem [resolvable:$true] %s10834_s8 }
 0x880   :  { %7945 = vmatprep.subr.bf16.mxu0 %v13773_v61  ;;  %v8022_v61 = vrot.slane %v8017_v48, %v14808_v6  ;;  %p14129_p1 = scmp.lt.s32.totalorder %s10835_s8, %s10835_s8 }
 0x883   :  { %7946 = vmatpush1.bf16.msra.mxu0 %v13771_v50  ;;  %v8026_v50 = vrot.slane %v8017_v48, %v18452_v10 }
 0x884   :  { %7947 = vmatprep.subr.bf16.mxu0 %v13776_v45 }
 0x887   :  { %7948 = vmatpush1.bf16.msra.mxu0 %v13774_v16 }
 0x888   :  { %7949 = vmatprep.subr.bf16.mxu0 %v13779_v56 }
 0x88b   :  { %7950 = vmatpush1.bf16.msra.mxu0 %v13777_v42 }
 0x88c   :  { %7951 = vmatprep.subr.bf16.mxu0 %v13782_v39 }
 0x88f   :  { %7952 = vmatpush1.bf16.msra.mxu0 %v13780_v59 }
 0x890   :  { %7953 = vmatprep.subr.bf16.mxu0 %v13785_v57 }
 0x893   :  { %7954 = vmatpush1.bf16.msra.mxu0 %v13783_v38 }
 0x894   :  { %7955 = vmatprep.subr.bf16.mxu0 %v13788_v22 }
 0x897   :  { %7956 = vmatpush1.bf16.msra.mxu0 %v13786_v54 }
 0x898   :  { %7957 = vmatprep.subr.bf16.mxu0 %v13791_v31 }
 0x89b   :  { %7958 = vmatpush1.bf16.msra.mxu0 %v13789_v8  ;;  %v13834_v8 = vld [vmem:[%s18370_s9 + $0x1e0] ss:$8 sps:$4 sm:$0xff]  }
 0x89c   :  { %7970 = vmatprep.subr.bf16.mxu0 %v13794_v9  ;;  %v13836_v9 = vld [vmem:[%s18370_s9 + $0x1e4] ss:$8 sps:$4 sm:$0xff]  }
 0x89e   :  { %7960 = vmatmul.mubr.bf16.vlgmr.msra.gmra.mrb[24].mxu0 %v11896_v36 }
 0x89f   :  { %7971 = vmatpush1.bf16.msra.mxu0 %v13792_v30  ;;  %8002 = vmatprep.mubr.bf16.mxu0 %v15414_v52 }
 0x8a0   :  { %7972 = vmatprep.subr.bf16.mxu0 %v13797_v28 }
 0x8a3   :  { %7973 = vmatpush1.bf16.msra.mxu0 %v13795_v24 }
 0x8a4   :  { %7974 = vmatprep.subr.bf16.mxu0 %v13800_v58  ;;  %v13837_v58 = vld [vmem:[%s18370_s9 + $0x1f0] ss:$8 sps:$4 sm:$0xff]  }
 0x8a7   :  { %7975 = vmatpush1.bf16.msra.mxu0 %v13798_v35  ;;  %v13839_v35 = vld [vmem:[%s18370_s9 + $0x1f4] ss:$8 sps:$4 sm:$0xff]  }
 0x8a8   :  { %7976 = vmatprep.subr.bf16.mxu0 %v13803_v33 }
 0x8ab   :  { %7977 = vmatpush1.bf16.msra.mxu0 %v13801_v29 }
 0x8ac   :  { %8473 = vmatprep.subr.bf16.mxu0 %v13806_v13  ;;  %v13848_v13 = vld [vmem:[%s18370_s9 + $0x224] ss:$8 sps:$4 sm:$0xff]  }
 0x8ae   :  { %11939 = vmatmul.mubr.msk.bf16.vlgmr.msra.gmra.mrb[24].mxu0 %vm7250_vm0, %v11898_v3 }
 0x8af   :  { %8474 = vmatpush1.bf16.msra.mxu0 %v13804_v11  ;;  %v13843_v11 = vld [vmem:[%s18370_s9 + $0x210] ss:$8 sps:$4 sm:$0xff]  }
 0x8b0   :  { %8475 = vmatprep.subr.bf16.mxu0 %v13809_v62 }
 0x8b3   :  { %8476 = vmatpush1.bf16.msra.mxu0 %v13807_v25  ;;  %v13846_v25 = vld [vmem:[%s18370_s9 + $0x220] ss:$8 sps:$4 sm:$0xff]  }
 0x8b4   :  { %8477 = vmatprep.subr.bf16.mxu0 %v13812_v1  ;;  %v13851_v1 = vld [vmem:[%s18370_s9 + $0x234] ss:$8 sps:$4 sm:$0xff]  }
 0x8b7   :  { %8478 = vmatpush1.bf16.msra.mxu0 %v13810_v15  ;;  %v13849_v15 = vld [vmem:[%s18370_s9 + $0x230] ss:$8 sps:$4 sm:$0xff]  }
 0x8b8   :  { %8479 = vmatprep.subr.bf16.mxu0 %v13815_v7  ;;  %v13854_v7 = vld [vmem:[%s18370_s9 + $0x244] ss:$8 sps:$4 sm:$0xff]  }
 0x8bb   :  { %8480 = vmatpush1.bf16.msra.mxu0 %v13813_v44 }
 0x8bc   :  { %8481 = vmatprep.subr.bf16.mxu0 %v13818_v2 }
 0x8bf   :  { %8482 = vmatpush1.bf16.msra.mxu0 %v13816_v63  ;;  %v8093_v63 = vld [vmem:[#allocation4 + $0x8] sm:$0xf] }
 0x8c0   :  { %8483 = vmatprep.subr.bf16.mxu0 %v13821_v51 }
 0x8c3   :  { %8484 = vmatpush1.bf16.msra.mxu0 %v13819_v37 }
 0x8c4   :  { %8485 = vmatprep.subr.bf16.mxu0 %v13824_v40 }
 0x8c7   :  { %8486 = vmatpush1.bf16.msra.mxu0 %v13822_v0 }
 0x8c8   :  { %8487 = vmatprep.subr.bf16.mxu0 %v13827_v32 }
 0x8cb   :  { %8488 = vmatpush1.bf16.msra.mxu0 %v13825_v17  ;;  %v8105_v17 = vld [vmem:[#allocation4 + $0x20] sm:$0xf] }
 0x8cc   :  { %8489 = vmatprep.subr.bf16.mxu0 %v13830_v26 }
 0x8cf   :  { %8490 = vmatpush1.bf16.msra.mxu0 %v13828_v47 }
 0x8d0   :  { %8491 = vmatprep.subr.bf16.mxu0 %v13833_v21 }
 0x8d3   :  { %8492 = vmatpush1.bf16.msra.mxu0 %v13831_v19 }
 0x8d4   :  { %8493 = vmatprep.subr.bf16.mxu0 %v13836_v9 }
 0x8d7   :  { %8494 = vmatpush1.bf16.msra.mxu0 %v13834_v8 }
 0x8d8   :  { %8495 = vmatprep.subr.bf16.mxu0 %v13839_v35 }
 0x8db   :  { %8496 = vmatpush1.bf16.msra.mxu0 %v13837_v58 }
 0x8dc   :  { %8497 = vmatprep.subr.bf16.mxu0 %v13842_v18 }
 0x8df   :  { %8498 = vmatpush1.bf16.msra.mxu0 %v13840_v46 }
 0x8e0   :  { %8499 = vmatprep.subr.bf16.mxu0 %v13845_v14 }
 0x8e3   :  { %8500 = vmatpush1.bf16.msra.mxu0 %v13843_v11 }
 0x8e4   :  { %8501 = vmatprep.subr.bf16.mxu0 %v13848_v13 }
 0x8e7   :  { %8502 = vmatpush1.bf16.msra.mxu0 %v13846_v25 }
 0x8e8   :  { %8503 = vmatprep.subr.bf16.mxu0 %v13851_v1 }
 0x8eb   :  { %8504 = vmatpush1.bf16.msra.mxu0 %v13849_v15 }
 0x8ec   :  { %8516 = vmatprep.subr.bf16.mxu0 %v13854_v7 }
 0x981   :  { %v8004_v45 = vpop.f32.mrb[24].mxu0 }
 0x982   :  { %v8029_v16 = vadd.f32 %v8022_v61, %v8004_v45  ;;  %v8006_v56 = vpop.f32.mrb[25].mxu0 }
 0x983   :  { %v8030_v42 = vadd.f32 %v8026_v50, %v8006_v56  ;;  %v8008_v39 = vpop.f32.mrb[26].mxu0 }
 0x984   :  { %v8033_v59 = vmax.f32 %v8029_v16, 0.0  ;;  %v8031_v57 = vadd.f32 %v8022_v61, %v8008_v39  ;;  %v8010_v38 = vpop.f32.mrb[27].mxu0  ;;  %v8099_v61 = vld [vmem:[#allocation4 + $0x14] sm:$0x1]  ;;  %v8096_v16 = vld [vmem:[#allocation4 + $0xc] sm:$0x11] }
 0x985   :  { %v8034_v22 = vmax.f32 %v8030_v42, 0.0  ;;  %v8032_v54 = vadd.f32 %v8026_v50, %v8010_v38 }
 0x986   :  { %v8035_v31 = vmax.f32 %v8031_v57, 0.0 }
 0x987   :  { %v12576_v30 = vpack.c.bf16 %v8034_v22, %v8033_v59  ;;  %v8036_v36 = vmax.f32 %v8032_v54, 0.0  ;;  %v8108_v59 = vld [vmem:[#allocation4 + $0x24] sm:$0x11] }
 0x989   :  { %v8052_v28 = vshrl.u32 %v12576_v30, 16  ;;  %v12577_v24 = vpack.c.bf16 %v8036_v36, %v8035_v31  ;;  %v8055_v34 = vshll.u32 %v12576_v30, 16 }
 0x98b   :  { %v8054_v33 = vrot.slane %v8052_v28, 7  ;;  %v8060_v43 = vshrl.u32 %v12577_v24, 16  ;;  %v8063_v20 = vshll.u32 %v12577_v24, 16 }
 0x98d   :  { %v8062_v29 = vrot.slane %v8060_v43, 7  ;;  %v8057_v5 = vor.u32 %v8055_v34, %v8054_v33  ;;  %v8058_v3 = vrot.slane %v8054_v33, 4 }
 0x98f   :  { %8067 = vrot.lane.b32.xlu0 %v8057_v5, %s14152_s29  ;;  %v8065_v53 = vor.u32 %v8063_v20, %v8062_v29  ;;  %v8066_v62 = vrot.slane %v8062_v29, 4 }
 0x991   :  { %8071 = vrot.lane.b32.xlu1 %v8065_v53, %s14152_s29 }
 0x993   :  { %8069 = vrot.lane.b32.xlu0 %v8058_v3, %s14152_s29 }
 0x995   :  { %8073 = vrot.lane.b32.xlu1 %v8066_v62, %s14152_s29 }
 0xa01   :  { %v8068_v44 = vpop.permute.xlu0 %8067 }
 0xa02   :  { %v8075_v2 = vrot.slane %v8068_v44, 4 }
 0xa03   :  { %v8072_v51 = vpop.permute.xlu1 %8071 }
 0xa04   :  { %v8079_v37 = vsel %vm3068_vm11, %v8075_v2, %v8068_v44  ;;  %v8094_v40 = vsel %vm16990_vm12, %v8075_v2, %v8093_v63  ;;  %v8077_v0 = vrot.slane %v8072_v51, 4 }
 0xa05   :  { %v17480_v32 = vsel %vm16996_vm3, %v8079_v37, %v17007_v49  ;;  %8095 = vst [vmem:[#allocation4 + $0x8] sm:$0xf] %v8094_v40  ;;  %v8070_v26 = vpop.permute.xlu0 %8069 }
 0xa06   :  { %8092 = vst [vmem:[#allocation4] sm:$0xff] %v17480_v32  ;;  %v8081_v47 = vsel %vm3068_vm11, %v8077_v0, %v8072_v51  ;;  %v8106_v21 = vsel %vm16990_vm12, %v8077_v0, %v8105_v17  ;;  %v8076_v19 = vrot.slane %v8070_v26, 4  ;;  %v8163_v50 = vshrl.u32 %v17480_v32, 16 }
 0xa07   :  { %v17489_v48 = vsel %vm16996_vm3, %v8081_v47, %v17033_v60  ;;  %8107 = vst [vmem:[#allocation4 + $0x20] sm:$0xf] %v8106_v21  ;;  %v8074_v49 = vpop.permute.xlu1 %8073  ;;  %v8166_v45 = vshll.u32 %v17480_v32, 16  ;;  %v8111_v60 = vld [vmem:[#allocation4 + $0x2c] sm:$0x1] }
 0xa08   :  { %8104 = vst [vmem:[#allocation4 + $0x18] sm:$0xff] %v17489_v48  ;;  %v8080_v56 = vsel %vm3068_vm11, %v8076_v19, %v8070_v26  ;;  %v8100_v41 = vsel %vm17011_vm8, %v8076_v19, %v8099_v61  ;;  %v8078_v42 = vrot.slane %v8074_v49, 4  ;;  %v8191_v39 = vshrl.u32 %v17489_v48, 16 }
 0xa09   :  { %v8097_v4 = vsel %vm17018_vm13, %v8080_v56, %v8096_v16  ;;  %8101 = vst [vmem:[#allocation4 + $0x14] sm:$0x1] %v8100_v41  ;;  %v8194_v22 = vshll.u32 %v17489_v48, 16  ;;  %v12026_v54 = vcombine.low %v17480_v32, %v17489_v48  ;;  %v8165_v8 = vrot.slane %v8163_v50, 4  ;;  %v13857_v41 = vld [vmem:[%s18370_s9 + $0x254] ss:$8 sps:$4 sm:$0xff]  }
 0xa0a   :  { %8098 = vst [vmem:[#allocation4 + $0xc] sm:$0x11] %v8097_v4  ;;  %v8082_v57 = vsel %vm3068_vm11, %v8078_v42, %v8074_v49  ;;  %v8112_v38 = vsel %vm17011_vm8, %v8078_v42, %v8111_v60  ;;  %v8168_v9 = vrot.slane %v8166_v45, 5  ;;  %v8193_v30 = vrot.slane %v8191_v39, 4  ;;  %v13852_v45 = vld [vmem:[%s18370_s9 + $0x240] ss:$8 sps:$4 sm:$0xff]  }
 0xa0b   :  { %v8109_v31 = vsel %vm17018_vm13, %v8082_v57, %v8108_v59  ;;  %8113 = vst [vmem:[#allocation4 + $0x2c] sm:$0x1] %v8112_v38  ;;  %v8196_v36 = vrot.slane %v8194_v22, 5  ;;  %v13855_v39 = vld [vmem:[%s18370_s9 + $0x250] ss:$8 sps:$4 sm:$0xff]  }
 0xa0c   :  { %8110 = vst [vmem:[#allocation4 + $0x24] sm:$0x11] %v8109_v31  ;;  %v8169_v24 = vor.u32 %v8168_v9, %v8165_v8  ;;  %v17510_v58 = vld [vmem:[#allocation4 + $0x8] sm:$0xf]  ;;  %v13860_v57 = vld [vmem:[%s18370_s9 + $0x264] ss:$8 sps:$4 sm:$0xff]  }
 0xa0d   :  { %v8863_v33 = vld [vmem:[#allocation4] sm:$0xee]  ;;  %v8864_v43 = vld [vmem:[#allocation4 + $0x8] sm:$0xe]  ;;  %v8197_v18 = vor.u32 %v8196_v36, %v8193_v30  ;;  %v8177_v14 = vshrl.u32 %v17510_v58, 16  ;;  %v8180_v13 = vshll.u32 %v17510_v58, 16 }
 0xa0e   :  { %v17508_v28 = vld [vmem:[#allocation4 + $0x20] sm:$0xf]  ;;  %v8170_v46 = vrot.slane %v8169_v24, 4  ;;  %v12070_v62 = vrot.slane %v8863_v33, 9  ;;  %v12071_v37 = vrot.slane %v8864_v43, 9 }
 0xa0f   :  { %v12028_v12 = vcombine.low %v17510_v58, %v17508_v28  ;;  %v8865_v34 = vld [vmem:[#allocation4 + $0x18] sm:$0xee]  ;;  %v8866_v25 = vld [vmem:[#allocation4 + $0x20] sm:$0xe]  ;;  %v8198_v2 = vrot.slane %v8197_v18, 4  ;;  %v8205_v51 = vshrl.u32 %v17508_v28, 16 }
 0xa10   :  { %v8159_v29 = vld [vmem:[#allocation4 + $0x14] sm:$0x1]  ;;  %v12072_v1 = vrot.slane %v8865_v34, 9  ;;  %v8208_v40 = vshll.u32 %v17508_v28, 16  ;;  %v12073_v26 = vrot.slane %v8866_v25, 9  ;;  %v8179_v27 = vrot.slane %v8177_v14, 4 }
 0xa11   :  { %v8158_v35 = vld [vmem:[#allocation4 + $0xc] sm:$0x11]  ;;  %v8881_v7 = vrot.slane %v8159_v29, 5  ;;  %v8207_v4 = vrot.slane %v8205_v51, 4  ;;  %v8182_v59 = vrot.slane %v8180_v13, 5  ;;  %v8186_v9 = vshll.u32 %v8159_v29, 16 }
 0xa12   :  { %v8172_v55 = vshll.u32 %v8158_v35, 16  ;;  %v8161_v20 = vld [vmem:[#allocation4 + $0x2c] sm:$0x1]  ;;  %v8877_v53 = vrot.slane %v8158_v35, 5  ;;  %v8210_v60 = vrot.slane %v8208_v40, 5  ;;  %v13985_v40 = vld [vmem:[%s18372_s11 + $0xc0] sm:$0xff]  }
 0xa13   :  { %v8160_v5 = vld [vmem:[#allocation4 + $0x24] sm:$0x11]  ;;  %v8889_v44 = vrot.slane %v8161_v20, 5  ;;  %v17539_v16 = vsel %vm14483_vm14, %v12071_v37, %v8881_v7  ;;  %v8214_v22 = vshll.u32 %v8161_v20, 16  ;;  %v13858_v31 = vld [vmem:[%s18370_s9 + $0x260] ss:$8 sps:$4 sm:$0xff]   ;;  %v8183_v8 = vor.u32 %v8182_v59, %v8179_v27  ;;  %12582 = vmatprep.subr.bf16.mxu1 %v13985_v40 }
 0xa14   :  { %v8174_v3 = vrot.slane %v8172_v55, 5  ;;  %v8200_v11 = vshll.u32 %v8160_v5, 16  ;;  %v8885_v15 = vrot.slane %v8160_v5, 5  ;;  %v17520_v0 = vsel %vm14483_vm14, %v12070_v62, %v8877_v53  ;;  %v13863_v30 = vld [vmem:[%s18370_s9 + $0x274] ss:$8 sps:$4 sm:$0xff]  }
 0xa15   :  { %v17543_v56 = vsel %vm14483_vm14, %v12073_v26, %v8889_v44  ;;  %v8211_v38 = vor.u32 %v8210_v60, %v8207_v4  ;;  %v8216_v24 = vrot.slane %v8214_v22, 5  ;;  %v13861_v35 = vld [vmem:[%s18370_s9 + $0x270] ss:$8 sps:$4 sm:$0xff]   ;;  %v8184_v33 = vrot.slane %v8183_v8, 4  ;;  %v13866_v43 = vld [vmem:[%s18370_s9 + $0x4] ss:$8 sps:$4 sm:$0xff]  }
 0xa16   :  { %v8202_v63 = vrot.slane %v8200_v11, 5  ;;  %v17524_v17 = vsel %vm14483_vm14, %v12072_v1, %v8885_v15  ;;  %v8175_v47 = vsel %vm14494_vm1, %v8170_v46, %v8174_v3  ;;  %v12116_v42 = vcombine.low %v17539_v16, %v17543_v56  ;;  %v13864_v29 = vld [vmem:[%s18370_s9] ss:$8 sps:$4 sm:$0xff]   ;;  %v13869_v5 = vld [vmem:[%s18370_s9 + $0x14] ss:$8 sps:$4 sm:$0xff]   ;;  %vm18492_vm14 = vmmov %vm18491_vm2 }
 0xa17   :  { %v12114_v19 = vcombine.low %v17520_v0, %v17524_v17  ;;  %v12115_v61 = vcombine.high %v17520_v0, %v17524_v17  ;;  %v8212_v36 = vrot.slane %v8211_v38, 4  ;;  %v8188_v34 = vrot.slane %v8186_v9, 5  ;;  %v13872_v14 = vld [vmem:[%s18370_s9 + $0x24] ss:$8 sps:$4 sm:$0xff]   ;;  %v13870_v53 = vld [vmem:[%s18370_s9 + $0x20] ss:$8 sps:$4 sm:$0xff]  }
 0xa18   :  { %v8203_v21 = vsel %vm14494_vm1, %v8198_v2, %v8202_v63  ;;  %v12027_v46 = vcombine.high %v17480_v32, %v17489_v48  ;;  %v13875_v3 = vld [vmem:[%s18370_s9 + $0x34] ss:$8 sps:$4 sm:$0xff]   ;;  %v13873_v11 = vld [vmem:[%s18370_s9 + $0x30] ss:$8 sps:$4 sm:$0xff]   ;;  %v13878_v13 = vld [vmem:[%s18370_s9 + $0x44] ss:$8 sps:$4 sm:$0xff]  }
 0xa19   :  { %v11982_v49 = vcombine.low %v8175_v47, %v8203_v21  ;;  %v11983_v50 = vcombine.high %v8175_v47, %v8203_v21  ;;  %v8217_v55 = vsel %vm14494_vm1, %v8212_v36, %v8216_v24  ;;  %v8189_v18 = vsel %vm14494_vm1, %v8184_v33, %v8188_v34  ;;  %v13876_v62 = vld [vmem:[%s18370_s9 + $0x40] ss:$8 sps:$4 sm:$0xff]   ;;  %v13881_v25 = vld [vmem:[%s18370_s9 + $0x54] ss:$8 sps:$4 sm:$0xff]   ;;  %v13879_v1 = vld [vmem:[%s18370_s9 + $0x50] ss:$8 sps:$4 sm:$0xff]  }
 0xa1a   :  { %v11984_v20 = vcombine.low %v8189_v18, %v8217_v55  ;;  %v13884_v15 = vld [vmem:[%s18370_s9 + $0x64] ss:$8 sps:$4 sm:$0xff]   ;;  %v13882_v7 = vld [vmem:[%s18370_s9 + $0x60] ss:$8 sps:$4 sm:$0xff]   ;;  %v13887_v44 = vld [vmem:[%s18370_s9 + $0x74] ss:$8 sps:$4 sm:$0xff]  }
 0xa1b   :  { %8505 = vmatprep.mubr.bf16.mxu0 %v11983_v50  ;;  %v13885_v2 = vld [vmem:[%s18370_s9 + $0x70] ss:$8 sps:$4 sm:$0xff]   ;;  %v13890_v63 = vld [vmem:[%s18370_s9 + $0x84] ss:$8 sps:$4 sm:$0xff]   ;;  %v13888_v51 = vld [vmem:[%s18370_s9 + $0x80] ss:$8 sps:$4 sm:$0xff]  }
 0xa1c   :  { %8506 = vmatmul.mubr.bf16.vlgmr.msra.gmra.mrb[28].mxu0 %v11982_v49  ;;  %v13893_v37 = vld [vmem:[%s18370_s9 + $0x94] ss:$8 sps:$4 sm:$0xff]   ;;  %v13986_v26 = vld [vmem:[%s18372_s11 + $0x80] sm:$0xff]   ;;  %v13987_v47 = vld [vmem:[%s18372_s11 + $0xc8] sm:$0xff]  }
 0xa1d   :  { %8517 = vmatpush1.bf16.msra.mxu0 %v13852_v45  ;;  %8548 = vmatprep.mubr.bf16.mxu0 %v15414_v52  ;;  %v13891_v21 = vld [vmem:[%s18370_s9 + $0x90] ss:$8 sps:$4 sm:$0xff]   ;;  %v13896_v49 = vld [vmem:[%s18370_s9 + $0xa4] ss:$8 sps:$4 sm:$0xff]   ;;  %v13899_v4 = vld [vmem:[%s18370_s9 + $0xb4] ss:$8 sps:$4 sm:$0xff]  }
 0xa1e   :  { %8518 = vmatprep.subr.bf16.mxu0 %v13857_v41  ;;  %12583 = vmatpush3.bf16.msra.mxu1 %v13986_v26  ;;  %v13988_v50 = vld [vmem:[%s18372_s11 + $0x88] sm:$0xff]   ;;  %v13989_v45 = vld [vmem:[%s18372_s11 + $0xd0] sm:$0xff]   ;;  %v13993_v38 = vld [vmem:[%s18372_s11 + $0xe0] sm:$0xff]  }
 0xa1f   :  { %12584 = vmatprep.subr.bf16.mxu1 %v13987_v47  ;;  %v13894_v41 = vld [vmem:[%s18370_s9 + $0xa0] ss:$8 sps:$4 sm:$0xff]   ;;  %v13990_v60 = vld [vmem:[%s18372_s11 + $0x90] sm:$0xff]   ;;  %v13902_v59 = vld [vmem:[%s18370_s9 + $0xc4] ss:$8 sps:$4 sm:$0xff]  }
 0xa20   :  { %v13897_v27 = vld [vmem:[%s18370_s9 + $0xb0] ss:$8 sps:$4 sm:$0xff]   ;;  %v13900_v22 = vld [vmem:[%s18370_s9 + $0xc0] ss:$8 sps:$4 sm:$0xff]   ;;  %v13908_v9 = vld [vmem:[%s18370_s9 + $0xe4] ss:$8 sps:$4 sm:$0xff]  }
 0xa21   :  { %8519 = vmatpush1.bf16.msra.mxu0 %v13855_v39  ;;  %v13991_v39 = vld [vmem:[%s18372_s11 + $0xd8] sm:$0xff]   ;;  %v13912_v33 = vld [vmem:[%s18370_s9 + $0x100] ss:$8 sps:$4 sm:$0xff]   ;;  %v13920_v55 = vld [vmem:[%s18370_s9 + $0x124] ss:$8 sps:$4 sm:$0xff]  }
 0xa22   :  { %8520 = vmatprep.subr.bf16.mxu0 %v13860_v57  ;;  %12585 = vmatpush3.bf16.msra.mxu1 %v13988_v50  ;;  %v13992_v57 = vld [vmem:[%s18372_s11 + $0x98] sm:$0xff]   ;;  %v13918_v18 = vld [vmem:[%s18370_s9 + $0x120] ss:$8 sps:$4 sm:$0xff]   ;;  %v13998_v16 = vld [vmem:[%s18372_s11 + $0xb0] sm:$0xff]  }
 0xa23   :  { %12586 = vmatprep.subr.bf16.mxu1 %v13989_v45  ;;  %v13903_v8 = vld [vmem:[%s18370_s9 + $0xd0] ss:$8 sps:$4 sm:$0xff]   ;;  %v13911_v36 = vld [vmem:[%s18370_s9 + $0xf4] ss:$8 sps:$4 sm:$0xff]   ;;  %v13931_v28 = vld [vmem:[%s18370_s9 + $0x2a0] ss:$8 sps:$4 sm:$0xff]  }
 0xa24   :  { %v13909_v24 = vld [vmem:[%s18370_s9 + $0xf0] ss:$8 sps:$4 sm:$0xff]   ;;  %v13917_v34 = vld [vmem:[%s18370_s9 + $0x114] ss:$8 sps:$4 sm:$0xff]   ;;  %v13961_v40 = vld [vmem:[%s18370_s9 + $0x340] ss:$8 sps:$4 sm:$0xff]  }
 0xa25   :  { %8521 = vmatpush1.bf16.msra.mxu0 %v13858_v31  ;;  %v13905_v31 = vld [vmem:[%s18370_s9 + $0xd4] ss:$8 sps:$4 sm:$0xff]   ;;  %v13921_v48 = vld [vmem:[%s18370_s9 + $0x130] ss:$8 sps:$4 sm:$0xff]   ;;  %v13994_v17 = vld [vmem:[%s18372_s11 + $0xa0] sm:$0xff]  }
 0xa26   :  { %8522 = vmatprep.subr.bf16.mxu0 %v13863_v30  ;;  %12587 = vmatpush3.bf16.msra.mxu1 %v13990_v60  ;;  %v13906_v30 = vld [vmem:[%s18370_s9 + $0xe0] ss:$8 sps:$4 sm:$0xff]   ;;  %v13923_v32 = vld [vmem:[%s18370_s9 + $0x134] ss:$8 sps:$4 sm:$0xff]   ;;  %v13964_v47 = vld [vmem:[%s18370_s9 + $0x350] ss:$8 sps:$4 sm:$0xff]  }
 0xa27   :  { %12588 = vmatprep.subr.bf16.mxu1 %v13991_v39  ;;  %v13936_v58 = vld [vmem:[%s18370_s9 + $0x2b4] ss:$8 sps:$4 sm:$0xff]   ;;  %v13970_v45 = vld [vmem:[%s18370_s9 + $0x370] ss:$8 sps:$4 sm:$0xff]   ;;  %vm18493_vm1 = vmmov %vm18491_vm2 }
 0xa28   :  { %v13966_v26 = vld [vmem:[%s18370_s9 + $0x354] ss:$8 sps:$4 sm:$0xff]   ;;  %v13976_v39 = vld [vmem:[%s18370_s9 + $0x390] ss:$8 sps:$4 sm:$0xff]   ;;  %vm18494_vm11 = vmmov %vm18493_vm1 }
 0xa29   :  { %8523 = vmatpush1.bf16.msra.mxu0 %v13861_v35  ;;  %v13914_v35 = vld [vmem:[%s18370_s9 + $0x104] ss:$8 sps:$4 sm:$0xff]   ;;  %v13972_v50 = vld [vmem:[%s18370_s9 + $0x374] ss:$8 sps:$4 sm:$0xff]   ;;  %vm18495_vm15 = vmmov %vm18493_vm1 }
 0xa2a   :  { %8777 = vmatprep.subr.bf16.mxu0 %v13866_v43  ;;  %12589 = vmatpush3.bf16.msra.mxu1 %v13992_v57  ;;  %v13915_v43 = vld [vmem:[%s18370_s9 + $0x110] ss:$8 sps:$4 sm:$0xff]   ;;  %v13978_v60 = vld [vmem:[%s18370_s9 + $0x394] ss:$8 sps:$4 sm:$0xff]   ;;  %v13996_v57 = vld [vmem:[%s18372_s11 + $0xa8] sm:$0xff]  }
 0xa2b   :  { %12590 = vmatprep.subr.bf16.mxu1 %v13993_v38  ;;  %v13984_v0 = vld [vmem:[%s18370_s9 + $0x3b4] ss:$8 sps:$4 sm:$0xff]   ;;  %vm18496_vm10 = vmmov %vm18493_vm1 }
 0xa2c   :  { %12025 = vmatmul.mubr.msk.bf16.vlgmr.msra.gmra.mrb[28].mxu0 %vm7250_vm0, %v11984_v20  ;;  %v13930_v20 = vld [vmem:[%s18370_s9 + $0x294] ss:$8 sps:$4 sm:$0xff]   ;;  %vm18497_vm4 = vmmov %vm18493_vm1 }
 0xa2d   :  { %8778 = vmatpush1.bf16.msra.mxu0 %v13864_v29  ;;  %8809 = vmatprep.mubr.bf16.mxu0 %v12027_v46  ;;  %v13925_v29 = vld [vmem:[%s18370_s9 + $0x280] ss:$8 sps:$4 sm:$0xff]   ;;  %v13933_v46 = vld [vmem:[%s18370_s9 + $0x2a4] ss:$8 sps:$4 sm:$0xff]   ;;  %v13997_v38 = vld [vmem:[%s18372_s11 + $0xf0] sm:$0xff]  }
 0xa2e   :  { %8779 = vmatprep.subr.bf16.mxu0 %v13869_v5  ;;  %v13928_v5 = vld [vmem:[%s18370_s9 + $0x290] ss:$8 sps:$4 sm:$0xff]   ;;  %12591 = vmatpush3.bf16.msra.mxu1 %v13994_v17  ;;  %vm18498_vm6 = vmmov %vm18493_vm1 }
 0xa2f   :  { %v13999_v56 = vld [vmem:[%s18372_s11 + $0xf8] sm:$0xff]   ;;  %vm18499_vm9 = vmmov %vm18493_vm1 }
 0xa30   :  { %vm18500_vm12 = vmmov %vm18493_vm1 }
 0xa31   :  { %8780 = vmatpush1.bf16.msra.mxu0 %v13867_v23  ;;  %v13937_v23 = vld [vmem:[%s18370_s9 + $0x2c0] ss:$8 sps:$4 sm:$0xff]   ;;  %vm18501_vm3 = vmmov %vm18493_vm1 }
 0xa32   :  { %8781 = vmatprep.subr.bf16.mxu0 %v13872_v14  ;;  %v13942_v14 = vld [vmem:[%s18370_s9 + $0x2d4] ss:$8 sps:$4 sm:$0xff]   ;;  %vm18502_vm5 = vmmov %vm18493_vm1 }
 0xa33   :  { %vm18503_vm7 = vmmov %vm18493_vm1 }
 0xa34   :  { %vm18504_vm8 = vmmov %vm18493_vm1 }
 0xa35   :  { %8782 = vmatpush1.bf16.msra.mxu0 %v13870_v53  ;;  %v13940_v53 = vld [vmem:[%s18370_s9 + $0x2d0] ss:$8 sps:$4 sm:$0xff]   ;;  %vm18505_vm13 = vmmov %vm18493_vm1 }
 0xa36   :  { %8783 = vmatprep.subr.bf16.mxu0 %v13875_v3  ;;  %v13945_v3 = vld [vmem:[%s18370_s9 + $0x2e4] ss:$8 sps:$4 sm:$0xff]  }
 0xa39   :  { %8784 = vmatpush1.bf16.msra.mxu0 %v13873_v11  ;;  %v13943_v11 = vld [vmem:[%s18370_s9 + $0x2e0] ss:$8 sps:$4 sm:$0xff]  }
 0xa3a   :  { %8785 = vmatprep.subr.bf16.mxu0 %v13878_v13  ;;  %v13948_v13 = vld [vmem:[%s18370_s9 + $0x2f4] ss:$8 sps:$4 sm:$0xff]  }
 0xa3d   :  { %8786 = vmatpush1.bf16.msra.mxu0 %v13876_v62  ;;  %v13946_v62 = vld [vmem:[%s18370_s9 + $0x2f0] ss:$8 sps:$4 sm:$0xff]  }
 0xa3e   :  { %8787 = vmatprep.subr.bf16.mxu0 %v13881_v25  ;;  %v13951_v25 = vld [vmem:[%s18370_s9 + $0x304] ss:$8 sps:$4 sm:$0xff]  }
 0xa41   :  { %8788 = vmatpush1.bf16.msra.mxu0 %v13879_v1  ;;  %v13949_v1 = vld [vmem:[%s18370_s9 + $0x300] ss:$8 sps:$4 sm:$0xff]  }
 0xa42   :  { %8789 = vmatprep.subr.bf16.mxu0 %v13884_v15  ;;  %v13954_v15 = vld [vmem:[%s18370_s9 + $0x314] ss:$8 sps:$4 sm:$0xff]  }
 0xa45   :  { %8790 = vmatpush1.bf16.msra.mxu0 %v13882_v7  ;;  %v13952_v7 = vld [vmem:[%s18370_s9 + $0x310] ss:$8 sps:$4 sm:$0xff]  }
 0xa46   :  { %8791 = vmatprep.subr.bf16.mxu0 %v13887_v44  ;;  %v13957_v44 = vld [vmem:[%s18370_s9 + $0x324] ss:$8 sps:$4 sm:$0xff]  }
 0xa49   :  { %8792 = vmatpush1.bf16.msra.mxu0 %v13885_v2  ;;  %v13955_v2 = vld [vmem:[%s18370_s9 + $0x320] ss:$8 sps:$4 sm:$0xff]  }
 0xa4a   :  { %8793 = vmatprep.subr.bf16.mxu0 %v13890_v63  ;;  %v13960_v63 = vld [vmem:[%s18370_s9 + $0x334] ss:$8 sps:$4 sm:$0xff]  }
 0xa4d   :  { %8794 = vmatpush1.bf16.msra.mxu0 %v13888_v51  ;;  %v13958_v51 = vld [vmem:[%s18370_s9 + $0x330] ss:$8 sps:$4 sm:$0xff]  }
 0xa4e   :  { %8795 = vmatprep.subr.bf16.mxu0 %v13893_v37  ;;  %v13963_v37 = vld [vmem:[%s18370_s9 + $0x344] ss:$8 sps:$4 sm:$0xff]  }
 0xa51   :  { %8796 = vmatpush1.bf16.msra.mxu0 %v13891_v21  ;;  %v13969_v21 = vld [vmem:[%s18370_s9 + $0x364] ss:$8 sps:$4 sm:$0xff]  }
 0xa52   :  { %8797 = vmatprep.subr.bf16.mxu0 %v13896_v49  ;;  %v13967_v49 = vld [vmem:[%s18370_s9 + $0x360] ss:$8 sps:$4 sm:$0xff]  }
 0xa55   :  { %8798 = vmatpush1.bf16.msra.mxu0 %v13894_v41  ;;  %v13975_v41 = vld [vmem:[%s18370_s9 + $0x384] ss:$8 sps:$4 sm:$0xff]  }
 0xa56   :  { %8799 = vmatprep.subr.bf16.mxu0 %v13899_v4  ;;  %v13973_v4 = vld [vmem:[%s18370_s9 + $0x380] ss:$8 sps:$4 sm:$0xff]  }
 0xa59   :  { %8800 = vmatpush1.bf16.msra.mxu0 %v13897_v27  ;;  %v13981_v27 = vld [vmem:[%s18370_s9 + $0x3a4] ss:$8 sps:$4 sm:$0xff]  }
 0xa5a   :  { %8801 = vmatprep.subr.bf16.mxu0 %v13902_v59  ;;  %v13979_v59 = vld [vmem:[%s18370_s9 + $0x3a0] ss:$8 sps:$4 sm:$0xff]  }
 0xa5d   :  { %8802 = vmatpush1.bf16.msra.mxu0 %v13900_v22  ;;  %v14001_v22 = vld [vmem:[%s18372_s11 + $0x40] sm:$0xff]  }
 0xa5e   :  { %8803 = vmatprep.subr.bf16.mxu0 %v13905_v31  ;;  %v9236_v31 = vld [vmem:[%s18371_s10] sm:$0x3] }
 0xa61   :  { %8804 = vmatpush1.bf16.msra.mxu0 %v13903_v8  ;;  %v9241_v8 = vrot.slane %v9236_v31, %v14808_v6 }
 0xa62   :  { %8805 = vmatprep.subr.bf16.mxu0 %v13908_v9  ;;  %v9245_v9 = vrot.slane %v9236_v31, %v18452_v10  ;;  %v14006_v31 = vld [vmem:[%s18372_s11 + $0x10] sm:$0xff]  }
 0xa65   :  { %8806 = vmatpush1.bf16.msra.mxu0 %v13906_v30 }
 0xa66   :  { %8807 = vmatprep.subr.bf16.mxu0 %v13911_v36 }
 0xa69   :  { %8808 = vmatpush1.bf16.msra.mxu0 %v13909_v24 }
 0xa6a   :  { %8820 = vmatprep.subr.bf16.mxu0 %v13914_v35 }
 0xa6c   :  { %8810 = vmatmul.mubr.bf16.vlgmr.msra.gmra.mrb[28].mxu0 %v12026_v54  ;;  %v13927_v54 = vld [vmem:[%s18370_s9 + $0x284] ss:$8 sps:$4 sm:$0xff]  }
 0xa6d   :  { %8821 = vmatpush1.bf16.msra.mxu0 %v13912_v33  ;;  %8852 = vmatprep.mubr.bf16.mxu0 %v15414_v52 }
 0xa6e   :  { %8822 = vmatprep.subr.bf16.mxu0 %v13917_v34 }
 0xa71   :  { %8823 = vmatpush1.bf16.msra.mxu0 %v13915_v43 }
 0xa72   :  { %8824 = vmatprep.subr.bf16.mxu0 %v13920_v55 }
 0xa75   :  { %8825 = vmatpush1.bf16.msra.mxu0 %v13918_v18 }
 0xa76   :  { %8826 = vmatprep.subr.bf16.mxu0 %v13923_v32 }
 0xa79   :  { %8827 = vmatpush1.bf16.msra.mxu0 %v13921_v48 }
 0xa7a   :  { %9146 = vmatprep.subr.bf16.mxu0 %v13927_v54 }
 0xa7c   :  { %12069 = vmatmul.mubr.msk.bf16.vlgmr.msra.gmra.mrb[28].mxu0 %vm7250_vm0, %v12028_v12  ;;  %v13934_v12 = vld [vmem:[%s18370_s9 + $0x2b0] ss:$8 sps:$4 sm:$0xff]  }
 0xa7d   :  { %9147 = vmatpush1.bf16.msra.mxu0 %v13925_v29  ;;  %9178 = vmatprep.mubr.bf16.mxu0 %v12115_v61  ;;  %v13939_v61 = vld [vmem:[%s18370_s9 + $0x2c4] ss:$8 sps:$4 sm:$0xff]  }
 0xa7e   :  { %9148 = vmatprep.subr.bf16.mxu0 %v13930_v20 }
 0xa81   :  { %9149 = vmatpush1.bf16.msra.mxu0 %v13928_v5 }
 0xa82   :  { %9150 = vmatprep.subr.bf16.mxu0 %v13933_v46 }
 0xa85   :  { %9151 = vmatpush1.bf16.msra.mxu0 %v13931_v28 }
 0xa86   :  { %9152 = vmatprep.subr.bf16.mxu0 %v13936_v58 }
 0xa89   :  { %9153 = vmatpush1.bf16.msra.mxu0 %v13934_v12 }
 0xa8a   :  { %9154 = vmatprep.subr.bf16.mxu0 %v13939_v61 }
 0xa8d   :  { %9155 = vmatpush1.bf16.msra.mxu0 %v13937_v23 }
 0xa8e   :  { %9156 = vmatprep.subr.bf16.mxu0 %v13942_v14 }
 0xa91   :  { %9157 = vmatpush1.bf16.msra.mxu0 %v13940_v53 }
 0xa92   :  { %9158 = vmatprep.subr.bf16.mxu0 %v13945_v3 }
 0xa95   :  { %9159 = vmatpush1.bf16.msra.mxu0 %v13943_v11 }
 0xa96   :  { %9160 = vmatprep.subr.bf16.mxu0 %v13948_v13 }
 0xa99   :  { %9161 = vmatpush1.bf16.msra.mxu0 %v13946_v62 }
 0xa9a   :  { %9162 = vmatprep.subr.bf16.mxu0 %v13951_v25 }
 0xa9d   :  { %9163 = vmatpush1.bf16.msra.mxu0 %v13949_v1 }
 0xa9e   :  { %9164 = vmatprep.subr.bf16.mxu0 %v13954_v15 }
 0xaa1   :  { %9165 = vmatpush1.bf16.msra.mxu0 %v13952_v7 }
 0xaa2   :  { %9166 = vmatprep.subr.bf16.mxu0 %v13957_v44 }
 0xaa5   :  { %9167 = vmatpush1.bf16.msra.mxu0 %v13955_v2  ;;  %v14002_v2 = vld [vmem:[%s18372_s11] sm:$0xff]  }
 0xaa6   :  { %9168 = vmatprep.subr.bf16.mxu0 %v13960_v63 }
 0xaa9   :  { %9169 = vmatpush1.bf16.msra.mxu0 %v13958_v51 }
 0xaaa   :  { %9170 = vmatprep.subr.bf16.mxu0 %v13963_v37 }
 0xaad   :  { %9171 = vmatpush1.bf16.msra.mxu0 %v13961_v40 }
 0xaae   :  { %9172 = vmatprep.subr.bf16.mxu0 %v13966_v26 }
 0xab1   :  { %9173 = vmatpush1.bf16.msra.mxu0 %v13964_v47  ;;  %v14003_v47 = vld [vmem:[%s18372_s11 + $0x48] sm:$0xff]  }
 0xab2   :  { %9174 = vmatprep.subr.bf16.mxu0 %v13969_v21 }
 0xab5   :  { %9175 = vmatpush1.bf16.msra.mxu0 %v13967_v49 }
 0xab6   :  { %9176 = vmatprep.subr.bf16.mxu0 %v13972_v50 }
 0xab9   :  { %9177 = vmatpush1.bf16.msra.mxu0 %v13970_v45 }
 0xaba   :  { %9189 = vmatprep.subr.bf16.mxu0 %v13975_v41 }
 0xabc   :  { %9179 = vmatmul.mubr.bf16.vlgmr.msra.gmra.mrb[28].mxu0 %v12114_v19  ;;  %v13995_v19 = vld [vmem:[%s18372_s11 + $0xe8] sm:$0xff]  }
 0xabd   :  { %9190 = vmatpush1.bf16.msra.mxu0 %v13973_v4  ;;  %9221 = vmatprep.mubr.bf16.mxu0 %v15414_v52  ;;  %v13982_v52 = vld [vmem:[%s18370_s9 + $0x3b0] ss:$8 sps:$4 sm:$0xff]  }
 0xabe   :  { %9191 = vmatprep.subr.bf16.mxu0 %v13978_v60  ;;  %12592 = vmatprep.subr.bf16.mxu1 %v13995_v19  ;;  %v14004_v60 = vld [vmem:[%s18372_s11 + $0x8] sm:$0xff]  }
 0xabf   :  { %12593 = vmatpush3.bf16.msra.mxu1 %v13996_v57 }
 0xac0   :  { %12594 = vmatprep.subr.bf16.mxu1 %v13997_v38 }
 0xac1   :  { %9192 = vmatpush1.bf16.msra.mxu0 %v13976_v39 }
 0xac2   :  { %9193 = vmatprep.subr.bf16.mxu0 %v13981_v27 }
 0xac3   :  { %12595 = vmatpush3.bf16.msra.mxu1 %v13998_v16 }
 0xac4   :  { %12596 = vmatprep.subr.bf16.mxu1 %v13999_v56 }
 0xac5   :  { %9194 = vmatpush1.bf16.msra.mxu0 %v13979_v59 }
 0xac6   :  { %9195 = vmatprep.subr.bf16.mxu0 %v13984_v0 }
 0xac9   :  { %9196 = vmatpush1.bf16.msra.mxu0 %v13982_v52  ;;  %v14005_v52 = vld [vmem:[%s18372_s11 + $0x50] sm:$0xff]  }
 0xacc   :  { %12157 = vmatmul.mubr.msk.bf16.vlgmr.msra.gmra.mrb[28].mxu0 %vm7250_vm0, %v12116_v42  ;;  %v14000_v42 = vld [vmem:[%s18372_s11 + $0xb8] sm:$0xff]   ;;  %vm18506_vm0 = vmmov %vm18493_vm1 }
 0xacd   :  { %12597 = vmatpush3.bf16.msra.mxu1 %v14000_v42 }
 0xace   :  { %12604 = vmatprep.subr.bf16.mxu1 %v14001_v22 }
 0xb9f   :  { %v9223_v30 = vpop.f32.mrb[28].mxu0 }
 0xba0   :  { %v9248_v36 = vadd.f32 %v9241_v8, %v9223_v30  ;;  %v9225_v24 = vpop.f32.mrb[29].mxu0 }
 0xba1   :  { %v9249_v35 = vadd.f32 %v9245_v9, %v9225_v24  ;;  %v9227_v33 = vpop.f32.mrb[30].mxu0 }
 0xba2   :  { %v9252_v34 = vmax.f32 %v9248_v36, 0.0  ;;  %v9250_v43 = vadd.f32 %v9241_v8, %v9227_v33  ;;  %v9229_v55 = vpop.f32.mrb[31].mxu0  ;;  %v14007_v36 = vld [vmem:[%s18372_s11 + $0x58] sm:$0xff]  }
 0xba3   :  { %v9253_v18 = vmax.f32 %v9249_v35, 0.0  ;;  %v9251_v32 = vadd.f32 %v9245_v9, %v9229_v55 }
 0xba4   :  { %v12578_v48 = vpack.c.bf16 %v9252_v34, %v9252_v34  ;;  %v9254_v54 = vmax.f32 %v9250_v43, 0.0 }
 0xba5   :  { %v12579_v29 = vpack.c.bf16 %v9253_v18, %v9253_v18  ;;  %v9255_v20 = vmax.f32 %v9251_v32, 0.0  ;;  %v14008_v32 = vld [vmem:[%s18372_s11 + $0x18] sm:$0xff]  }
 0xba6   :  { %v17888_v5 = vunpack.c.l.b16 %v12578_v48  ;;  %v12580_v46 = vpack.c.bf16 %v9254_v54, %v9254_v54  ;;  %v14009_v48 = vld [vmem:[%s18372_s11 + $0x60] sm:$0xff]  }
 0xba7   :  { %v17890_v6 = vunpack.c.l.b16 %v12579_v29  ;;  %v12581_v10 = vpack.c.bf16 %v9255_v20, %v9255_v20  ;;  %v14010_v54 = vld [vmem:[%s18372_s11 + $0x20] sm:$0xff]   ;;  %v14011_v29 = vld [vmem:[%s18372_s11 + $0x68] sm:$0xff]  }
 0xba8   :  { %v17892_v28 = vunpack.c.l.b16 %v12580_v46  ;;  %v9337_v58 = vrot.slane %v17888_v5, 1  ;;  %v9658_v12 = vrot.slane %v17888_v5, 2  ;;  %v9838_v53 = vrot.slane %v17888_v5, 3  ;;  %v14012_v20 = vld [vmem:[%s18372_s11 + $0x28] sm:$0xff]   ;;  %v14014_v46 = vld [vmem:[%s18372_s11 + $0x30] sm:$0xff]  }
 0xba9   :  { %v9336_v61 = vunpack.c.l.b16 %v12581_v10  ;;  %v9339_v23 = vrot.slane %v17890_v6, 1  ;;  %v9661_v14 = vrot.slane %v17890_v6, 2  ;;  %v9841_v7 = vrot.slane %v17890_v6, 3  ;;  %v14016_v10 = vld [vmem:[%s18372_s11 + $0x38] sm:$0xff]  }
 0xbaa   :  { %v9338_v3 = vsel %vm18491_vm2, %v17892_v28, %v9337_v58  ;;  %v9481_v11 = vrot.slane %v17892_v28, 7  ;;  %v9659_v13 = vrot.slane %v17892_v28, 1  ;;  %v9839_v62 = vrot.slane %v17892_v28, 2  ;;  %v14018_v58 = vld [vmem:[%s18372_s11 + $0x100] sm:$0xff]  }
 0xbab   :  { %v9340_v25 = vsel %vm18492_vm14, %v9336_v61, %v9339_v23  ;;  %v9483_v1 = vrot.slane %v9336_v61, 7  ;;  %v9662_v15 = vrot.slane %v9336_v61, 1  ;;  %v9842_v37 = vrot.slane %v9336_v61, 2 }
 0xbac   :  { %v9342_v44 = vpack.c.b16 %v9340_v25, %v9340_v25  ;;  %v17911_v63 = vsel %vm18493_vm1, %v9481_v11, %v17888_v5  ;;  %v17914_v51 = vsel %vm18494_vm11, %v9659_v13, %v9658_v12  ;;  %v9341_v40 = vpack.c.b16 %v9338_v3, %v9338_v3  ;;  %v14022_v3 = vld [vmem:[%s18372_s11 + $0x110] sm:$0xff]   ;;  %v14023_v11 = vld [vmem:[%s18372_s11 + $0x158] sm:$0xff]   ;;  %v14026_v25 = vld [vmem:[%s18372_s11 + $0x120] sm:$0xff]  }
 0xbad   :  { %v9484_v26 = vsel %vm18495_vm15, %v9483_v1, %v17890_v6  ;;  %v17922_v21 = vsel %vm18496_vm10, %v9662_v15, %v9661_v14  ;;  %v17925_v50 = vsel %vm18497_vm4, %v9842_v37, %v9841_v7  ;;  %v17928_v45 = vsel %vm18498_vm6, %v9839_v62, %v9838_v53  ;;  %v14020_v14 = vld [vmem:[%s18372_s11 + $0x108] sm:$0xff]   ;;  %v14021_v53 = vld [vmem:[%s18372_s11 + $0x150] sm:$0xff]   ;;  %v14024_v13 = vld [vmem:[%s18372_s11 + $0x118] sm:$0xff]  }
 0xbae   :  { %9473 = vmatprep.mubr.bf16.mxu1 %v9342_v44  ;;  %v9486_v49 = vpack.c.b16 %v9484_v26, %v9484_v26  ;;  %v10021_v41 = vrot.slane %v17890_v6, 4  ;;  %v10022_v4 = vrot.slane %v9336_v61, 3  ;;  %v10018_v39 = vrot.slane %v17888_v5, 4  ;;  %v14025_v62 = vld [vmem:[%s18372_s11 + $0x160] sm:$0xff]   ;;  %v14027_v1 = vld [vmem:[%s18372_s11 + $0x168] sm:$0xff]   ;;  %v14029_v7 = vld [vmem:[%s18372_s11 + $0x170] sm:$0xff]  }
 0xbaf   :  { %9474 = vmatmul.mubr.bf16.vlgmr.msra.gmra.mrb[32].mxu1 %v9341_v40  ;;  %v10019_v27 = vrot.slane %v17892_v28, 3  ;;  %v10201_v59 = vrot.slane %v17890_v6, 5  ;;  %v10202_v0 = vrot.slane %v9336_v61, 4  ;;  %v10198_v19 = vrot.slane %v17888_v5, 5  ;;  %v14028_v15 = vld [vmem:[%s18372_s11 + $0x128] sm:$0xff]   ;;  %v14030_v44 = vld [vmem:[%s18372_s11 + $0x130] sm:$0xff]  }
 0xbb0   :  { %12605 = vmatpush3.bf16.msra.mxu1 %v14002_v2  ;;  %9617 = vmatprep.mubr.bf16.mxu1 %v9486_v49  ;;  %v17941_v17 = vsel %vm18499_vm9, %v10022_v4, %v10021_v41  ;;  %v10199_v57 = vrot.slane %v17892_v28, 4  ;;  %v10381_v56 = vrot.slane %v17890_v6, 6  ;;  %v10382_v42 = vrot.slane %v9336_v61, 5  ;;  %v14031_v2 = vld [vmem:[%s18372_s11 + $0x178] sm:$0xff]   ;;  %v14033_v37 = vld [vmem:[%s18372_s11 + $0x1c0] sm:$0xff]   ;;  %v14036_v49 = vld [vmem:[%s18372_s11 + $0x188] sm:$0xff]  }
 0xbb1   :  { %12606 = vmatprep.subr.bf16.mxu1 %v14003_v47  ;;  %v17946_v38 = vsel %vm18500_vm12, %v10019_v27, %v10018_v39  ;;  %v17949_v16 = vsel %vm18501_vm3, %v10202_v0, %v10201_v59  ;;  %v10378_v9 = vrot.slane %v17888_v5, 6  ;;  %v10379_v30 = vrot.slane %v17892_v28, 5  ;;  %v14034_v40 = vld [vmem:[%s18372_s11 + $0x180] sm:$0xff]   ;;  %v14035_v47 = vld [vmem:[%s18372_s11 + $0x1c8] sm:$0xff]   ;;  %v14038_v41 = vld [vmem:[%s18372_s11 + $0x190] sm:$0xff]  }
 0xbb2   :  { %v17953_v22 = vsel %vm18502_vm5, %v10199_v57, %v10198_v19  ;;  %v17959_v8 = vsel %vm18503_vm7, %v10382_v42, %v10381_v56  ;;  %v10561_v24 = vrot.slane %v17890_v6, 7  ;;  %v10562_v35 = vrot.slane %v9336_v61, 6  ;;  %v14015_v6 = vld [vmem:[%s18372_s11 + $0x78] sm:$0xff]   ;;  %v14019_v61 = vld [vmem:[%s18372_s11 + $0x148] sm:$0xff]   ;;  %v14042_v39 = vld [vmem:[%s18372_s11 + $0x1a0] sm:$0xff]  }
 0xbb3   :  { %v10558_v33 = vrot.slane %v17888_v5, 7  ;;  %v10559_v34 = vrot.slane %v17892_v28, 6  ;;  %v17970_v43 = vsel %vm18504_vm8, %v10379_v30, %v10378_v9  ;;  %v14013_v5 = vld [vmem:[%s18372_s11 + $0x70] sm:$0xff]   ;;  %v14017_v28 = vld [vmem:[%s18372_s11 + $0x140] sm:$0xff]   ;;  %v9485_v12 = vpack.c.b16 %v17911_v63, %v17911_v63  ;;  %v14032_v63 = vld [vmem:[%s18372_s11 + $0x138] sm:$0xff]  }
 0xbb4   :  { %12607 = vmatpush3.bf16.msra.mxu1 %v14004_v60  ;;  %v17973_v55 = vsel %vm18505_vm13, %v10562_v35, %v10561_v24  ;;  %v9665_v23 = vpack.c.b16 %v17922_v21, %v17922_v21  ;;  %v9664_v26 = vpack.c.b16 %v17914_v51, %v17914_v51  ;;  %v9845_v21 = vpack.c.b16 %v17925_v50, %v17925_v50  ;;  %v14037_v51 = vld [vmem:[%s18372_s11 + $0x1d0] sm:$0xff]   ;;  %v14039_v50 = vld [vmem:[%s18372_s11 + $0x1d8] sm:$0xff]   ;;  %v14041_v60 = vld [vmem:[%s18372_s11 + $0x1e0] sm:$0xff]  }
 0xbb5   :  { %12608 = vmatprep.subr.bf16.mxu1 %v14005_v52  ;;  %v17976_v18 = vsel %vm18506_vm0, %v10559_v34, %v10558_v33  ;;  %v14040_v4 = vld [vmem:[%s18372_s11 + $0x198] sm:$0xff]   ;;  %v14043_v27 = vld [vmem:[%s18372_s11 + $0x1e8] sm:$0xff]   ;;  %v14045_v0 = vld [vmem:[%s18372_s11 + $0x1f0] sm:$0xff]   ;;  %v10025_v30 = vpack.c.b16 %v17941_v17, %v17941_v17  ;;  %vm14154_vm2 = vmmov 0   ;;  %vm10826_vm14 = vcmask 74752  }
 0xbb6   :  { %v14044_v59 = vld [vmem:[%s18372_s11 + $0x1a8] sm:$0xff]   ;;  %v14046_v52 = vld [vmem:[%s18372_s11 + $0x1b0] sm:$0xff]   ;;  %v14047_v19 = vld [vmem:[%s18372_s11 + $0x1f8] sm:$0xff]  }
 0xbb7   :  { %v14048_v57 = vld [vmem:[%s18372_s11 + $0x1b8] sm:$0xff]   ;;  %v14049_v56 = vld [vmem:[%s18372_s11 + $0x240] sm:$0xff]   ;;  %v14051_v9 = vld [vmem:[%s18372_s11 + $0x248] sm:$0xff]  }
 0xbb8   :  { %12609 = vmatpush3.bf16.msra.mxu1 %v14006_v31  ;;  %v14050_v42 = vld [vmem:[%s18372_s11 + $0x200] sm:$0xff]   ;;  %v9844_v31 = vpack.c.b16 %v17928_v45, %v17928_v45  ;;  %v14053_v45 = vld [vmem:[%s18372_s11 + $0x250] sm:$0xff]   ;;  %v14055_v17 = vld [vmem:[%s18372_s11 + $0x258] sm:$0xff]  }
 0xbb9   :  { %12610 = vmatprep.subr.bf16.mxu1 %v14007_v36  ;;  %v14052_v36 = vld [vmem:[%s18372_s11 + $0x208] sm:$0xff]   ;;  %v14054_v24 = vld [vmem:[%s18372_s11 + $0x210] sm:$0xff]   ;;  %v14056_v35 = vld [vmem:[%s18372_s11 + $0x218] sm:$0xff]  }
 0xbba   :  { %v14057_v33 = vld [vmem:[%s18372_s11 + $0x260] sm:$0xff]  }
 0xbbb   :  { %v14058_v34 = vld [vmem:[%s18372_s11 + $0x220] sm:$0xff]  }
 0xbbc   :  { %12611 = vmatpush3.bf16.msra.mxu1 %v14008_v32  ;;  %v14059_v32 = vld [vmem:[%s18372_s11 + $0x268] sm:$0xff]  }
 0xbbd   :  { %12612 = vmatprep.subr.bf16.mxu1 %v14009_v48  ;;  %v14060_v48 = vld [vmem:[%s18372_s11 + $0x228] sm:$0xff]  }
 0xbc0   :  { %12613 = vmatpush3.bf16.msra.mxu1 %v14010_v54  ;;  %v14061_v54 = vld [vmem:[%s18372_s11 + $0x270] sm:$0xff]  }
 0xbc1   :  { %12614 = vmatprep.subr.bf16.mxu1 %v14011_v29  ;;  %v14062_v29 = vld [vmem:[%s18372_s11 + $0x230] sm:$0xff]  }
 0xbc4   :  { %12615 = vmatpush3.bf16.msra.mxu1 %v14012_v20  ;;  %v14063_v20 = vld [vmem:[%s18372_s11 + $0x278] sm:$0xff]  }
 0xbc5   :  { %12616 = vmatprep.subr.bf16.mxu1 %v14013_v5  ;;  %v14064_v5 = vld [vmem:[%s18372_s11 + $0x238] sm:$0xff]  }
 0xbc8   :  { %12617 = vmatpush3.bf16.msra.mxu1 %v14014_v46  ;;  %v14065_v46 = vld [vmem:[%s18372_s11 + $0x2c0] sm:$0xff]  }
 0xbc9   :  { %12618 = vmatprep.subr.bf16.mxu1 %v14015_v6  ;;  %v14066_v6 = vld [vmem:[%s18372_s11 + $0x280] sm:$0xff]  }
 0xbcc   :  { %12619 = vmatpush3.bf16.msra.mxu1 %v14016_v10  ;;  %v10024_v10 = vpack.c.b16 %v17946_v38, %v17946_v38  ;;  %v14069_v38 = vld [vmem:[%s18372_s11 + $0x2d0] sm:$0xff]  }
 0xbcd   :  { %12626 = vmatprep.subr.bf16.mxu1 %v14017_v28  ;;  %v14067_v28 = vld [vmem:[%s18372_s11 + $0x2c8] sm:$0xff]  }
 0xbcf   :  { %9618 = vmatmul.mubr.bf16.vlgmr.msra.gmra.mrb[36].mxu1 %v9485_v12  ;;  %v14068_v12 = vld [vmem:[%s18372_s11 + $0x288] sm:$0xff]  }
 0xbd0   :  { %12627 = vmatpush3.bf16.msra.mxu1 %v14018_v58  ;;  %9796 = vmatprep.mubr.bf16.mxu1 %v9665_v23  ;;  %v10205_v58 = vpack.c.b16 %v17949_v16, %v17949_v16  ;;  %v14071_v16 = vld [vmem:[%s18372_s11 + $0x2d8] sm:$0xff]  }
 0xbd1   :  { %12628 = vmatprep.subr.bf16.mxu1 %v14019_v61  ;;  %v14070_v61 = vld [vmem:[%s18372_s11 + $0x290] sm:$0xff]   ;;  %v14072_v23 = vld [vmem:[%s18372_s11 + $0x298] sm:$0xff]  }
 0xbd4   :  { %12629 = vmatpush3.bf16.msra.mxu1 %v14020_v14  ;;  %v14073_v14 = vld [vmem:[%s18372_s11 + $0x2e0] sm:$0xff]  }
 0xbd5   :  { %12630 = vmatprep.subr.bf16.mxu1 %v14021_v53  ;;  %v14074_v53 = vld [vmem:[%s18372_s11 + $0x2a0] sm:$0xff]  }
 0xbd8   :  { %12631 = vmatpush3.bf16.msra.mxu1 %v14022_v3  ;;  %v14075_v3 = vld [vmem:[%s18372_s11 + $0x2e8] sm:$0xff]  }
 0xbd9   :  { %12632 = vmatprep.subr.bf16.mxu1 %v14023_v11  ;;  %v14076_v11 = vld [vmem:[%s18372_s11 + $0x2a8] sm:$0xff]  }
 0xbdc   :  { %12633 = vmatpush3.bf16.msra.mxu1 %v14024_v13  ;;  %v14077_v13 = vld [vmem:[%s18372_s11 + $0x2f0] sm:$0xff]  }
 0xbdd   :  { %12634 = vmatprep.subr.bf16.mxu1 %v14025_v62  ;;  %v14078_v62 = vld [vmem:[%s18372_s11 + $0x2b0] sm:$0xff]  }
 0xbe0   :  { %12635 = vmatpush3.bf16.msra.mxu1 %v14026_v25  ;;  %v14079_v25 = vld [vmem:[%s18372_s11 + $0x2f8] sm:$0xff]  }
 0xbe1   :  { %12636 = vmatprep.subr.bf16.mxu1 %v14027_v1  ;;  %v14080_v1 = vld [vmem:[%s18372_s11 + $0x2b8] sm:$0xff]  }
 0xbe4   :  { %12637 = vmatpush3.bf16.msra.mxu1 %v14028_v15  ;;  %v14081_v15 = vld [vmem:[%s18372_s11 + $0x340] sm:$0xff]  }
 0xbe5   :  { %12638 = vmatprep.subr.bf16.mxu1 %v14029_v7  ;;  %v14082_v7 = vld [vmem:[%s18372_s11 + $0x300] sm:$0xff]  }
 0xbe8   :  { %12639 = vmatpush3.bf16.msra.mxu1 %v14030_v44  ;;  %v10204_v44 = vpack.c.b16 %v17953_v22, %v17953_v22  ;;  %v14085_v22 = vld [vmem:[%s18372_s11 + $0x350] sm:$0xff]  }
 0xbe9   :  { %12640 = vmatprep.subr.bf16.mxu1 %v14031_v2  ;;  %v14083_v2 = vld [vmem:[%s18372_s11 + $0x348] sm:$0xff]  }
 0xbec   :  { %12641 = vmatpush3.bf16.msra.mxu1 %v14032_v63  ;;  %v10385_v63 = vpack.c.b16 %v17959_v8, %v17959_v8  ;;  %v14087_v8 = vld [vmem:[%s18372_s11 + $0x358] sm:$0xff]  }
 0xbed   :  { %12648 = vmatprep.subr.bf16.mxu1 %v14033_v37  ;;  %v14084_v37 = vld [vmem:[%s18372_s11 + $0x308] sm:$0xff]  }
 0xbef   :  { %9797 = vmatmul.mubr.bf16.vlgmr.msra.gmra.mrb[40].mxu1 %v9664_v26  ;;  %v14088_v26 = vld [vmem:[%s18372_s11 + $0x318] sm:$0xff]  }
 0xbf0   :  { %12649 = vmatpush3.bf16.msra.mxu1 %v14034_v40  ;;  %9976 = vmatprep.mubr.bf16.mxu1 %v9845_v21  ;;  %v14086_v40 = vld [vmem:[%s18372_s11 + $0x310] sm:$0xff]   ;;  %v14090_v21 = vld [vmem:[%s18372_s11 + $0x320] sm:$0xff]  }
 0xbf1   :  { %12650 = vmatprep.subr.bf16.mxu1 %v14035_v47  ;;  %v14089_v47 = vld [vmem:[%s18372_s11 + $0x360] sm:$0xff]  }
 0xbf4   :  { %12651 = vmatpush3.bf16.msra.mxu1 %v14036_v49  ;;  %v14091_v49 = vld [vmem:[%s18372_s11 + $0x368] sm:$0xff]  }
 0xbf5   :  { %12652 = vmatprep.subr.bf16.mxu1 %v14037_v51  ;;  %v14092_v51 = vld [vmem:[%s18372_s11 + $0x328] sm:$0xff]  }
 0xbf8   :  { %12653 = vmatpush3.bf16.msra.mxu1 %v14038_v41  ;;  %v14093_v41 = vld [vmem:[%s18372_s11 + $0x370] sm:$0xff]  }
 0xbf9   :  { %12654 = vmatprep.subr.bf16.mxu1 %v14039_v50  ;;  %v14094_v50 = vld [vmem:[%s18372_s11 + $0x330] sm:$0xff]  }
 0xbfc   :  { %12655 = vmatpush3.bf16.msra.mxu1 %v14040_v4  ;;  %v14095_v4 = vld [vmem:[%s18372_s11 + $0x378] sm:$0xff]  }
 0xbfd   :  { %12656 = vmatprep.subr.bf16.mxu1 %v14041_v60  ;;  %v14096_v60 = vld [vmem:[%s18372_s11 + $0x338] sm:$0xff]  }
 0xc00   :  { %12657 = vmatpush3.bf16.msra.mxu1 %v14042_v39  ;;  %v14097_v39 = vld [vmem:[%s18372_s11 + $0x3c0] sm:$0xff]  }
 0xc01   :  { %12658 = vmatprep.subr.bf16.mxu1 %v14043_v27  ;;  %v14098_v27 = vld [vmem:[%s18372_s11 + $0x380] sm:$0xff]  }
 0xc04   :  { %12659 = vmatpush3.bf16.msra.mxu1 %v14044_v59  ;;  %v10384_v59 = vpack.c.b16 %v17970_v43, %v17970_v43  ;;  %v14101_v43 = vld [vmem:[%s18372_s11 + $0x3d0] sm:$0xff]  }
 0xc05   :  { %12660 = vmatprep.subr.bf16.mxu1 %v14045_v0  ;;  %v14099_v0 = vld [vmem:[%s18372_s11 + $0x3c8] sm:$0xff]  }
 0xc08   :  { %12661 = vmatpush3.bf16.msra.mxu1 %v14046_v52  ;;  %v10565_v52 = vpack.c.b16 %v17973_v55, %v17973_v55  ;;  %v14103_v55 = vld [vmem:[%s18372_s11 + $0x3d8] sm:$0xff]  }
 0xc09   :  { %12662 = vmatprep.subr.bf16.mxu1 %v14047_v19  ;;  %v14100_v19 = vld [vmem:[%s18372_s11 + $0x388] sm:$0xff]  }
 0xc0c   :  { %12663 = vmatpush3.bf16.msra.mxu1 %v14048_v57  ;;  %v14102_v57 = vld [vmem:[%s18372_s11 + $0x390] sm:$0xff]  }
 0xc0d   :  { %12670 = vmatprep.subr.bf16.mxu1 %v14049_v56  ;;  %v14104_v56 = vld [vmem:[%s18372_s11 + $0x398] sm:$0xff]  }
 0xc0f   :  { %9977 = vmatmul.mubr.bf16.vlgmr.msra.gmra.mrb[44].mxu1 %v9844_v31  ;;  %v14106_v31 = vld [vmem:[%s18372_s11 + $0x3a0] sm:$0xff]  }
 0xc10   :  { %12671 = vmatpush3.bf16.msra.mxu1 %v14050_v42  ;;  %10156 = vmatprep.mubr.bf16.mxu1 %v10025_v30  ;;  %v14105_v42 = vld [vmem:[%s18372_s11 + $0x3e0] sm:$0xff]   ;;  %v14108_v30 = vld [vmem:[%s18372_s11 + $0x3a8] sm:$0xff]  }
 0xc11   :  { %12672 = vmatprep.subr.bf16.mxu1 %v14051_v9  ;;  %v14107_v9 = vld [vmem:[%s18372_s11 + $0x3e8] sm:$0xff]  }
 0xc14   :  { %12673 = vmatpush3.bf16.msra.mxu1 %v14052_v36  ;;  %v14109_v36 = vld [vmem:[%s18372_s11 + $0x3f0] sm:$0xff]  }
 0xc15   :  { %12674 = vmatprep.subr.bf16.mxu1 %v14053_v45 }
 0xc18   :  { %12675 = vmatpush3.bf16.msra.mxu1 %v14054_v24 }
 0xc19   :  { %12676 = vmatprep.subr.bf16.mxu1 %v14055_v17 }
 0xc1c   :  { %12677 = vmatpush3.bf16.msra.mxu1 %v14056_v35 }
 0xc1d   :  { %12678 = vmatprep.subr.bf16.mxu1 %v14057_v33  ;;  %v14110_v33 = vld [vmem:[%s18372_s11 + $0x3b0] sm:$0xff]  }
 0xc20   :  { %12679 = vmatpush3.bf16.msra.mxu1 %v14058_v34 }
 0xc21   :  { %12680 = vmatprep.subr.bf16.mxu1 %v14059_v32  ;;  %v14111_v32 = vld [vmem:[%s18372_s11 + $0x3f8] sm:$0xff]  }
 0xc24   :  { %12681 = vmatpush3.bf16.msra.mxu1 %v14060_v48  ;;  %v14112_v48 = vld [vmem:[%s18372_s11 + $0x3b8] sm:$0xff]  }
 0xc25   :  { %12682 = vmatprep.subr.bf16.mxu1 %v14061_v54  ;;  %v10564_v54 = vpack.c.b16 %v17976_v18, %v17976_v18  ;;  %v14114_v18 = vld [vmem:[%s18374_s13 + $0x8] sm:$0xff]  }
 0xc28   :  { %12683 = vmatpush3.bf16.msra.mxu1 %v14062_v29 }
 0xc29   :  { %12684 = vmatprep.subr.bf16.mxu1 %v14063_v20 }
 0xc2c   :  { %12685 = vmatpush3.bf16.msra.mxu1 %v14064_v5 }
 0xc2d   :  { %12692 = vmatprep.subr.bf16.mxu1 %v14065_v46 }
 0xc2f   :  { %10157 = vmatmul.mubr.bf16.vlgmr.msra.gmra.mrb[48].mxu1 %v10024_v10 }
 0xc30   :  { %12693 = vmatpush3.bf16.msra.mxu1 %v14066_v6  ;;  %10336 = vmatprep.mubr.bf16.mxu1 %v10205_v58 }
 0xc31   :  { %12694 = vmatprep.subr.bf16.mxu1 %v14067_v28 }
 0xc34   :  { %12695 = vmatpush3.bf16.msra.mxu1 %v14068_v12 }
 0xc35   :  { %12696 = vmatprep.subr.bf16.mxu1 %v14069_v38 }
 0xc38   :  { %12697 = vmatpush3.bf16.msra.mxu1 %v14070_v61 }
 0xc39   :  { %12698 = vmatprep.subr.bf16.mxu1 %v14071_v16 }
 0xc3c   :  { %12699 = vmatpush3.bf16.msra.mxu1 %v14072_v23  ;;  %v14113_v23 = vld [vmem:[%s18374_s13] sm:$0xff]  }
 0xc3d   :  { %12700 = vmatprep.subr.bf16.mxu1 %v14073_v14  ;;  %v14153_v14 = vmov 0.0  }
 0xc3e   :  { %12767 = vmatprep.subr.bf16.mxu0 %v14153_v14  ;;  %12783 = vmatprep.mubr.msk.bf16.mxu0 %vm14154_vm2, %v14153_v14 }
 0xc3f   :  { %12768 = vmatpush3.bf16.msra.mxu0 %v14113_v23 }
 0xc40   :  { %12701 = vmatpush3.bf16.msra.mxu1 %v14074_v53  ;;  %12769 = vmatprep.subr.bf16.mxu0 %v14153_v14  ;;  %v14115_v53 = vld [vmem:[%s18374_s13 + $0x10] sm:$0xff]  }
 0xc41   :  { %12702 = vmatprep.subr.bf16.mxu1 %v14075_v3  ;;  %v14116_v3 = vld [vmem:[%s18374_s13 + $0x18] sm:$0xff]  }
 0xc43   :  { %12770 = vmatpush3.bf16.msra.mxu0 %v14114_v18 }
 0xc44   :  { %12703 = vmatpush3.bf16.msra.mxu1 %v14076_v11  ;;  %12771 = vmatprep.subr.bf16.mxu0 %v14153_v14  ;;  %v14117_v11 = vld [vmem:[%s18374_s13 + $0x20] sm:$0xff]  }
 0xc45   :  { %12704 = vmatprep.subr.bf16.mxu1 %v14077_v13 }
 0xc47   :  { %12772 = vmatpush3.bf16.msra.mxu0 %v14115_v53 }
 0xc48   :  { %12705 = vmatpush3.bf16.msra.mxu1 %v14078_v62  ;;  %12773 = vmatprep.subr.bf16.mxu0 %v14153_v14 }
 0xc49   :  { %12706 = vmatprep.subr.bf16.mxu1 %v14079_v25 }
 0xc4b   :  { %12774 = vmatpush3.bf16.msra.mxu0 %v14116_v3 }
 0xc4c   :  { %12707 = vmatpush3.bf16.msra.mxu1 %v14080_v1  ;;  %12775 = vmatprep.subr.bf16.mxu0 %v14153_v14 }
 0xc4d   :  { %12714 = vmatprep.subr.bf16.mxu1 %v14081_v15 }
 0xc4f   :  { %10337 = vmatmul.mubr.bf16.vlgmr.msra.gmra.mrb[52].mxu1 %v10204_v44  ;;  %12776 = vmatpush3.bf16.msra.mxu0 %v14117_v11  ;;  %v14118_v44 = vld [vmem:[%s18374_s13 + $0x28] sm:$0xff]  }
 0xc50   :  { %12715 = vmatpush3.bf16.msra.mxu1 %v14082_v7  ;;  %10516 = vmatprep.mubr.bf16.mxu1 %v10385_v63  ;;  %v14120_v63 = vld [vmem:[%s18374_s13 + $0x38] sm:$0xff]  }
 0xc51   :  { %12716 = vmatprep.subr.bf16.mxu1 %v14083_v2  ;;  %12777 = vmatprep.subr.bf16.mxu0 %v14153_v14  ;;  %v14119_v2 = vld [vmem:[%s18374_s13 + $0x30] sm:$0xff]  }
 0xc53   :  { %12778 = vmatpush3.bf16.msra.mxu0 %v14118_v44 }
 0xc54   :  { %12717 = vmatpush3.bf16.msra.mxu1 %v14084_v37  ;;  %12779 = vmatprep.subr.bf16.mxu0 %v14153_v14 }
 0xc55   :  { %12718 = vmatprep.subr.bf16.mxu1 %v14085_v22 }
 0xc57   :  { %12780 = vmatpush3.bf16.msra.mxu0 %v14119_v2 }
 0xc58   :  { %12719 = vmatpush3.bf16.msra.mxu1 %v14086_v40  ;;  %12781 = vmatprep.subr.bf16.mxu0 %v14153_v14 }
 0xc59   :  { %12720 = vmatprep.subr.bf16.mxu1 %v14087_v8 }
 0xc5b   :  { %12782 = vmatpush3.bf16.msra.mxu0 %v14120_v63 }
 0xc5c   :  { %12721 = vmatpush3.bf16.msra.mxu1 %v14088_v26 }
 0xc5d   :  { %12722 = vmatprep.subr.bf16.mxu1 %v14089_v47 }
 0xc60   :  { %12723 = vmatpush3.bf16.msra.mxu1 %v14090_v21 }
 0xc61   :  { %12724 = vmatprep.subr.bf16.mxu1 %v14091_v49 }
 0xc64   :  { %12725 = vmatpush3.bf16.msra.mxu1 %v14092_v51 }
 0xc65   :  { %12726 = vmatprep.subr.bf16.mxu1 %v14093_v41 }
 0xc68   :  { %12727 = vmatpush3.bf16.msra.mxu1 %v14094_v50 }
 0xc69   :  { %12728 = vmatprep.subr.bf16.mxu1 %v14095_v4 }
 0xc6c   :  { %12729 = vmatpush3.bf16.msra.mxu1 %v14096_v60 }
 0xc6d   :  { %12736 = vmatprep.subr.bf16.mxu1 %v14097_v39 }
 0xc6f   :  { %10517 = vmatmul.mubr.bf16.vlgmr.msra.gmra.mrb[56].mxu1 %v10384_v59 }
 0xc70   :  { %12737 = vmatpush3.bf16.msra.mxu1 %v14098_v27  ;;  %10696 = vmatprep.mubr.bf16.mxu1 %v10565_v52 }
 0xc71   :  { %12738 = vmatprep.subr.bf16.mxu1 %v14099_v0 }
 0xc74   :  { %12739 = vmatpush3.bf16.msra.mxu1 %v14100_v19 }
 0xc75   :  { %12740 = vmatprep.subr.bf16.mxu1 %v14101_v43 }
 0xc78   :  { %12741 = vmatpush3.bf16.msra.mxu1 %v14102_v57 }
 0xc79   :  { %12742 = vmatprep.subr.bf16.mxu1 %v14103_v55 }
 0xc7c   :  { %12743 = vmatpush3.bf16.msra.mxu1 %v14104_v56  ;;  %v12514_v56 = vld [vmem:[%s18373_s12] ss:$0 sm:$0xff]  ;;  %s14124_s12 = scalar_lea.vmem %s10835_s8, 32 }
 0xc7d   :  { %12744 = vmatprep.subr.bf16.mxu1 %v14105_v42  ;;  %p14125_p0 = scmp.ne.s32.totalorder %s10835_s8, %s14124_s12  ;;  %p14130_p2 = scmp.lt.s32.totalorder %s14124_s12, %s14124_s12 }
 0xc7f   :  { %p14131_p3 = por %p14130_p2, %p14129_p1 }
 0xc80   :  { %12745 = vmatpush3.bf16.msra.mxu1 %v14106_v31 }
 0xc81   :  { %12746 = vmatprep.subr.bf16.mxu1 %v14107_v9  ;;  %p14132_p4 = pnand %p14131_p3, %p14125_p0 }
 0xc82   :  { %v12598_v45 = vpop.f32.mrb[32].mxu1 }
 0xc83   :  { %v12599_v24 = vpop.f32.mrb[33].mxu1 }
 0xc84   :  { %v12600_v17 = vadd.f32 %v12599_v24, %v12598_v45  ;;  %12747 = vmatpush3.bf16.msra.mxu1 %v14108_v30  ;;  %v12601_v35 = vpop.f32.mrb[34].mxu1  ;;  %v12515_v45 = vld [vmem:[%s18375_s14] ss:$0 sm:$0xff] }
 0xc85   :  { %v12602_v34 = vpop.f32.mrb[35].mxu1  ;;  %12748 = vmatprep.subr.bf16.mxu1 %v14109_v36 }
 0xc88   :  { %12749 = vmatpush3.bf16.msra.mxu1 %v14110_v33 }
 0xc89   :  { %12750 = vmatprep.subr.bf16.mxu1 %v14111_v32 }
 0xc8c   :  { %12751 = vmatpush3.bf16.msra.mxu1 %v14112_v48 }
 0xc8f   :  { %10697 = vmatmul.mubr.bf16.vlgmr.msra.gmra.mrb[60].mxu1 %v10564_v54 }
 0xca2   :  { %v12620_v29 = vpop.f32.mrb[36].mxu1 }
 0xca3   :  { %v12621_v20 = vpop.f32.mrb[37].mxu1 }
 0xca4   :  { %v12622_v5 = vadd.f32 %v12621_v20, %v12620_v29  ;;  %v12623_v46 = vpop.f32.mrb[38].mxu1 }
 0xca5   :  { %v12624_v6 = vpop.f32.mrb[39].mxu1 }
 0xca6   :  { %v9620_v10 = vadd.f32 %v12622_v5, %v12600_v17 }
 0xcc2   :  { %v12642_v28 = vpop.f32.mrb[40].mxu1 }
 0xcc3   :  { %v12643_v58 = vpop.f32.mrb[41].mxu1 }
 0xcc4   :  { %v12644_v12 = vadd.f32 %v12643_v58, %v12642_v28  ;;  %v12645_v38 = vpop.f32.mrb[42].mxu1 }
 0xcc5   :  { %v12646_v61 = vpop.f32.mrb[43].mxu1 }
 0xcc6   :  { %v9804_v16 = vadd.f32 %v12644_v12, %v9620_v10 }
 0xce2   :  { %v12664_v13 = vpop.f32.mrb[44].mxu1 }
 0xce3   :  { %v12665_v62 = vpop.f32.mrb[45].mxu1 }
 0xce4   :  { %v12666_v25 = vadd.f32 %v12665_v62, %v12664_v13  ;;  %v12667_v1 = vpop.f32.mrb[46].mxu1 }
 0xce5   :  { %v12668_v15 = vpop.f32.mrb[47].mxu1 }
 0xce6   :  { %v9984_v7 = vadd.f32 %v12666_v25, %v9804_v16 }
 0xd02   :  { %v12686_v37 = vpop.f32.mrb[48].mxu1 }
 0xd03   :  { %v12687_v22 = vpop.f32.mrb[49].mxu1 }
 0xd04   :  { %v12688_v40 = vadd.f32 %v12687_v22, %v12686_v37  ;;  %v12689_v8 = vpop.f32.mrb[50].mxu1 }
 0xd05   :  { %v12690_v26 = vpop.f32.mrb[51].mxu1 }
 0xd06   :  { %v10164_v47 = vadd.f32 %v12688_v40, %v9984_v7 }
 0xd22   :  { %v12708_v21 = vpop.f32.mrb[52].mxu1 }
 0xd23   :  { %v12709_v49 = vpop.f32.mrb[53].mxu1 }
 0xd24   :  { %v12710_v51 = vadd.f32 %v12709_v49, %v12708_v21  ;;  %v12711_v41 = vpop.f32.mrb[54].mxu1 }
 0xd25   :  { %v12712_v50 = vpop.f32.mrb[55].mxu1 }
 0xd26   :  { %v10344_v4 = vadd.f32 %v12710_v51, %v10164_v47 }
 0xd42   :  { %v12730_v60 = vpop.f32.mrb[56].mxu1 }
 0xd43   :  { %v12731_v39 = vpop.f32.mrb[57].mxu1 }
 0xd44   :  { %v12732_v27 = vadd.f32 %v12731_v39, %v12730_v60  ;;  %v12733_v59 = vpop.f32.mrb[58].mxu1 }
 0xd45   :  { %v12734_v0 = vpop.f32.mrb[59].mxu1 }
 0xd46   :  { %v10524_v52 = vadd.f32 %v12732_v27, %v10344_v4 }
 0xd62   :  { %v12752_v19 = vpop.f32.mrb[60].mxu1 }
 0xd63   :  { %v12753_v43 = vpop.f32.mrb[61].mxu1 }
 0xd64   :  { %v12754_v57 = vadd.f32 %v12753_v43, %v12752_v19  ;;  %v12755_v55 = vpop.f32.mrb[62].mxu1 }
 0xd65   :  { %v12756_v42 = vpop.f32.mrb[63].mxu1 }
 0xd66   :  { %v10704_v31 = vadd.f32 %v12754_v57, %v10524_v52 }
 0xd68   :  { %v10712_v9 = vadd.f32 %v12514_v56, %v10704_v31 }
 0xd6a   :  { %v10713_v30 = vmax.f32 %v10712_v9, 0.0 }
 0xd6c   :  { %v10714_v36 = vpack.c.bf16 %v10713_v30, %v10713_v30 }
 0xd6e   :  { %12784 = vmatmul.mubr.bf16.vlgmr.msra.gmra.mrb[32].mxu0 %v10714_v36 }
 0xe41   :  { %v10820_v24 = vpop.f32.mrb[32].mxu0 }
 0xe42   :  { %v10821_v17 = vadd.f32 %v12515_v45, %v10820_v24  ;;  %v12785_v35 = vpop.f32.mrb[33].mxu0 }
 0xe43   :  { %v10823_v33 = vpop.f32.mrb[34].mxu0 }
 0xe44   :  { %v12786_v34 = vpop.f32.mrb[35].mxu0  ;;  %10827 = vst.msk [vmem:[#allocation5] sm:$0x3] %vm10826_vm14, %v10821_v17 }
 0xe45   :  { %14135 = shalt.err (!%p14132_p4)
}
 0xe46   :  { %s14136_s14 = scalar_lea.hbm %s18376_s15, 32 }
 0xe47   :  { %p14137_p5 = scmp.ne.s32.totalorder %s18376_s15, %s14136_s14  ;;  %p14140_p6 = scmp.lt.u32.totalorder %s14136_s14, %s18376_s15 }
 0xe49   :  { %p14142_p7 = pnand %p14140_p6, %p14137_p5 }
 0xe4b   :  { %14145 = shalt.err (!%p14142_p7)
}
 0xe4c   :  { %10837 = dma.vmem_to_hbm [thread:$0]  %s10835_s8, 32, %s18376_s15, [#allocation6]  }
 0xe4d   :  { %14146 = dma.done.wait [#allocation6], 32  }
 0xe4e   :  { %14147 = vsyncadd [#allocation6], 4294967264 }
 0xe4f   :  { %10841 = vsyncpa [#allocation6], 1 }

</bundles_post_ra>
